<compile_context>
chip_gen: v7x
topology: tpu7x:2x2x1
jax: 0.10.0
libtpu: 0.0.40
codegen_flags: <defaults>
</compile_context>

<pallas_src>
import jax
import jax.numpy as jnp
from jax.experimental import pallas as pl
from jax.experimental.pallas import tpu as pltpu

f32 = jnp.float32
bf16 = jnp.bfloat16


# ------------------------------ kernel body ------------------------------------
def _make_kernel(N, H, C, HC):
    def kernel(x_ref, adj_ref,
               w1_ref, att1_ref, b1_ref,
               wb_ref, bb_ref, wfc_ref, bfc_ref, wfcs_ref, bfcs_ref,
               w2_ref, att2_ref, b2_ref,
               logp_ref, temp2_ref):
        adj_m = adj_ref[...]                                     # [N, N]  (target, source)

        def gat(xin, w_ref, att_ref):
            """GAT layer; returns a list of H per-head [N, C] aggregations."""
            # One lane-dense projection for all heads (bf16 weights, f32 accumulate).
            xp = jnp.dot(xin.astype(bf16), w_ref[...],
                         preferred_element_type=f32)             # [N, HC]
            # dst+src attention scores for all heads in one natural A@B MXU matmul.
            scores = jnp.dot(xp, att_ref[...],
                             preferred_element_type=f32)         # [N, 2H]
            src_t = jnp.transpose(scores)[H:, :]                 # [H, N]  (tiny transpose)
            outs = []
            for h in range(H):
                a_dst = scores[:, h:h + 1]                       # [N, 1]  target scores
                a_src = src_t[h:h + 1, :]                        # [1, N]  source scores
                logits = a_dst + a_src                           # [N, N]
                logits = jnp.where(logits > 0, logits, 0.2 * logits)       # leaky_relu(0.2)
                m = jnp.max(jnp.where(adj_m > 0, logits, -1e30), axis=1, keepdims=True)
                # Multiplicative masking; the clamp keeps exp finite for non-neighbours
                # whose raw logit may exceed the masked row max.
                e = jnp.exp(jnp.minimum(logits - m, 0.0)) * adj_m
                attn = e / jnp.sum(e, axis=1, keepdims=True)     # softmax over sources
                # Aggregate only this head's C columns: [N,N] x [N,C].
                outs.append(jnp.dot(attn, xp[:, h * C:(h + 1) * C],
                                    preferred_element_type=f32))
            return outs

        # ---- GAT1 (concat=True) + bias + ELU, consumed per head by the SE entry ------
        h1_heads = gat(x_ref[...], w1_ref, att1_ref)
        hb = bb_ref[...]                                         # [1, 4*HC] (broadcasts)
        for h in range(H):
            h1_h = h1_heads[h] + b1_ref[h]                       # [N, C]
            h1_h = jnp.where(h1_h > 0, h1_h,
                             jnp.exp(jnp.minimum(h1_h, 0.0)) - 1.0)        # ELU
            # SE entry matmul decomposed per head: h1 @ wb == sum_h h1_h @ wb[h].
            hb = hb + jnp.dot(h1_h.astype(bf16), wb_ref[h],
                              preferred_element_type=f32)        # [N, 4*HC]
        hb = jnp.maximum(hb, 0.0)                                # per-branch ReLU

        # ---- SE block (Local_stage2): 4 branches / 4 fcs fused into wide matmuls -----
        hs = [hb[:, k * HC:(k + 1) * HC] for k in range(4)]      # 512-aligned slices
        u = hs[0] + hs[1] + hs[2] + hs[3]
        z = jnp.dot(u, wfc_ref[...], preferred_element_type=f32) + bfc_ref[...]    # [N, d]
        wv = jnp.dot(z.astype(bf16), wfcs_ref[...],
                     preferred_element_type=f32) + bfcs_ref[...]                   # [N, 4*HC]
        ws = [wv[:, k * HC:(k + 1) * HC] for k in range(4)]
        mw = jnp.maximum(jnp.maximum(ws[0], ws[1]), jnp.maximum(ws[2], ws[3]))
        es = [jnp.exp(w - mw) for w in ws]                       # softmax over branches
        inv = 1.0 / (es[0] + es[1] + es[2] + es[3])
        x_se = (es[0] * hs[0] + es[1] * hs[1] + es[2] * hs[2] + es[3] * hs[3]) * inv
        temp2_ref[...] = x_se                                    # lane-dense [N, HC] store

        # ---- GAT2 (concat=False: head mean) + bias + log_softmax ---------------------
        h2_heads = gat(x_se, w2_ref, att2_ref)
        acc2 = h2_heads[0]
        for h in range(1, H):
            acc2 = acc2 + h2_heads[h]
        h2 = acc2 * (1.0 / H) + b2_ref[...]                      # [N, C]
        mm = jnp.max(h2, axis=1, keepdims=True)
        zz = h2 - mm
        logp_ref[...] = zz - jnp.log(jnp.sum(jnp.exp(zz), axis=1, keepdims=True))

    return kernel


# ------------------------------ batched forward --------------------------------
def global_forward_batched(params, x_b, adj_b):
    """x_b: [B, N, Fin], adj_b: [B, N, N] (adj[target, source], self loops included)."""
    B, N, Fin = x_b.shape
    g1, g2, se = params["gat1"], params["gat2"], params["se"]
    H, _, C = g1["W"].shape
    HC = H * C
    d = se["w_fc"].shape[1]

    # TODO(synk): dropout (p=0.6 features, p=0.4 attention) is identity in eval mode;
    # this implements the training=False forward pass (BN also uses running stats).
    # TODO(synk): for large N (esp. v7x, 64 MiB VMEM) the dense [N, N] adjacency should
    # be streamed in source tiles with an online softmax; at these sizes it trivially fits.

    # ---------------- one-time weight packing (plain XLA, outside the kernel) ---------
    # Heads fused into a single lane-dense projection; big operands cast to bf16 once.
    w1 = jnp.transpose(g1["W"], (1, 0, 2)).reshape(Fin, HC).astype(bf16)
    w2 = jnp.transpose(g2["W"], (1, 0, 2)).reshape(HC, HC).astype(bf16)

    def att_pack(g):
        # [HC, 2H]: column h carries att_dst[h] on rows h*C:(h+1)*C, column H+h att_src[h].
        eye = jnp.eye(H, dtype=f32)

        def blockcols(v):                                        # [H, C] -> [HC, H]
            return (eye[:, None, :] * v[:, :, None]).reshape(HC, H)

        return jnp.concatenate([blockcols(g["att_dst"].reshape(H, C)),
                                blockcols(g["att_src"].reshape(H, C))], axis=1)

    att1, att2 = att_pack(g1), att_pack(g2)
    b1 = g1["bias"].reshape(H, 1, C)
    b2 = g2["bias"].reshape(1, C)

    # SE: fold eval-mode BN into the center-tap conv weights; concat the 4 branch convs
    # (and 4 fcs) into single wide matmuls. wb is laid out per head ([H, C, 4*HC]) so the
    # SE entry matmul can consume GAT1's per-head outputs without a concat layout.
    eps = 1e-5
    scale = se["bn_gamma"] / jnp.sqrt(se["bn_var"] + eps)        # [4, HC]
    wb = (jnp.transpose(se["w_conv"] * scale[:, :, None], (2, 0, 1))
          .reshape(H, C, 4 * HC).astype(bf16))
    bb = ((se["b_conv"] - se["bn_mean"]) * scale + se["bn_beta"]).reshape(1, 4 * HC)
    wfc, bfc = se["w_fc"], se["b_fc"]
    wfcs = jnp.transpose(se["w_fcs"], (1, 0, 2)).reshape(d, 4 * HC).astype(bf16)
    bfcs = se["b_fcs"].reshape(1, 4 * HC)

    def const_spec(a):
        zero = (0,) * a.ndim
        return pl.BlockSpec(a.shape, lambda b: zero)             # weights stay VMEM-resident

    def graph_spec(*dims):
        return pl.BlockSpec((None,) + dims, lambda b: (b, 0, 0))  # per-graph pipelined block

    weights = (w1, att1, b1, wb, bb, wfc, bfc, wfcs, bfcs, w2, att2, b2)

    logp, temp2 = pl.pallas_call(
        _make_kernel(N, H, C, HC),
        out_shape=(jax.ShapeDtypeStruct((B, N, C), f32),
                   jax.ShapeDtypeStruct((B, N, HC), f32)),
        grid=(B,),
        in_specs=[graph_spec(N, Fin), graph_spec(N, N)] + [const_spec(w) for w in weights],
        out_specs=(graph_spec(N, C), graph_spec(N, HC)),
        compiler_params=pltpu.CompilerParams(dimension_semantics=("parallel",)),
    )(x_b, adj_b, *weights)
    return logp, temp2


# ------------------------------ single-graph API -------------------------------
def build_adj(edge_index, N):
    """Dense adjacency adj[target, source] with self loops (GATConv add_self_loops)."""
    adj = jnp.zeros((N, N), f32)
    adj = adj.at[edge_index[1], edge_index[0]].set(1.0)
    adj = adj.at[jnp.arange(N), jnp.arange(N)].set(1.0)
    return adj


def global_forward(params, x, edge_index):
    """Single-graph forward matching Global.forward(data) in eval mode."""
    N = x.shape[0]
    adj = build_adj(edge_index, N)
    logp, temp2 = global_forward_batched(params, x[None], adj[None])
    return logp[0], temp2[0]


# ------------------------------ parameters -------------------------------------
def init_params(key, in_channels, out_channels, heads):
    H, C = heads, out_channels
    se_ch = H * C                      # must equal 512 (Local_stage2(512) hard-code)
    d = 32                             # max(L=32, 512 // (512/4)) = 32
    ks = jax.random.split(key, 14)

    def nrm(k, shape, scale):
        return jax.random.normal(k, shape, jnp.float32) * scale

    return {
        "gat1": {  # GATConv(in_channels, C, heads=H, concat=True)
            "W": nrm(ks[0], (H, in_channels, C), 1.0 / jnp.sqrt(in_channels)),
            "att_src": nrm(ks[1], (H, 1, C), 0.1),
            "att_dst": nrm(ks[2], (H, 1, C), 0.1),
            "bias": nrm(ks[3], (H * C,), 0.02),
        },
        "gat2": {  # GATConv(H*C, C, heads=H, concat=False)
            "W": nrm(ks[4], (H, se_ch, C), 1.0 / jnp.sqrt(se_ch)),
            "att_src": nrm(ks[5], (H, 1, C), 0.1),
            "att_dst": nrm(ks[6], (H, 1, C), 0.1),
            "bias": nrm(ks[7], (C,), 0.02),
        },
        "se": {    # Local_stage1(channel=512): only the center conv taps matter on 1x1 input
            "w_conv": nrm(ks[8], (4, se_ch, se_ch), 1.0 / jnp.sqrt(se_ch)),  # [branch, out, in]
            "b_conv": nrm(ks[9], (4, se_ch), 0.02),
            "bn_gamma": jnp.ones((4, se_ch), jnp.float32),
            "bn_beta": jnp.zeros((4, se_ch), jnp.float32),
            "bn_mean": jnp.zeros((4, se_ch), jnp.float32),
            "bn_var": jnp.ones((4, se_ch), jnp.float32),
            "w_fc": nrm(ks[10], (se_ch, d), 1.0 / jnp.sqrt(se_ch)),
            "b_fc": nrm(ks[11], (1, d), 0.02),
            "w_fcs": nrm(ks[12], (4, d, se_ch), 1.0 / jnp.sqrt(d)),
            "b_fcs": nrm(ks[13], (4, se_ch), 0.02),
        },
    }


if __name__ == "__main__":
    key = jax.random.PRNGKey(0)
    k_x, k_p = jax.random.split(key)

    # heads * out_channels must equal 512 because Local_stage2(512) is hard-coded.
    B, N, in_channels, out_channels, heads = 2, 16, 32, 64, 8
    x_b = jax.random.normal(k_x, (B, N, in_channels), jnp.float32)

    src = jnp.arange(N, dtype=jnp.int32)
    ring = jnp.stack([jnp.concatenate([src, src]),
                      jnp.concatenate([(src + 1) % N, (src - 1) % N])], axis=0)
    skip = jnp.stack([jnp.concatenate([src, src]),
                      jnp.concatenate([(src + 2) % N, (src - 2) % N])], axis=0)
    adj_b = jnp.stack([build_adj(ring, N), build_adj(skip, N)], axis=0)

    params = init_params(k_p, in_channels, out_channels, heads)
    logp, temp2 = global_forward_batched(params, x_b, adj_b)
    jax.block_until_ready((logp, temp2))

    assert logp.shape == (B, N, out_channels)
    assert temp2.shape == (B, N, heads * out_channels)
    assert bool(jnp.isfinite(logp).all()) and bool(jnp.isfinite(temp2).all())
    # log_softmax self-consistency: rows must sum to 1 in probability space.
    assert bool(jnp.allclose(jnp.exp(logp).sum(-1), 1.0, atol=1e-3))
    print("KERNEL_OK")
</pallas_src>

<mosaic_0001>
module attributes {stable_mosaic.version = 11 : i64} {
  func.func @kernel(%arg0: i32, %arg1: memref<1x16x32xf32, #tpu.memory_space<vmem>>, %arg2: memref<1x16x16xf32, #tpu.memory_space<vmem>>, %arg3: memref<32x512xbf16, #tpu.memory_space<vmem>>, %arg4: memref<512x16xf32, #tpu.memory_space<vmem>>, %arg5: memref<8x1x64xf32, #tpu.memory_space<vmem>>, %arg6: memref<8x64x2048xbf16, #tpu.memory_space<vmem>>, %arg7: memref<1x2048xf32, #tpu.memory_space<vmem>>, %arg8: memref<512x32xf32, #tpu.memory_space<vmem>>, %arg9: memref<1x32xf32, #tpu.memory_space<vmem>>, %arg10: memref<32x2048xbf16, #tpu.memory_space<vmem>>, %arg11: memref<1x2048xf32, #tpu.memory_space<vmem>>, %arg12: memref<512x512xbf16, #tpu.memory_space<vmem>>, %arg13: memref<512x16xf32, #tpu.memory_space<vmem>>, %arg14: memref<1x64xf32, #tpu.memory_space<vmem>>, %arg15: memref<1x16x64xf32, #tpu.memory_space<vmem>>, %arg16: memref<1x16x512xf32, #tpu.memory_space<vmem>>) attributes {dimension_semantics = [#tpu.dimension_semantics<parallel>], iteration_bounds = array<i64: 2>, scalar_prefetch = 0 : i64, scratch_operands = 0 : i64, tpu.core_type = #tpu.core_type<tc>, window_params = [{transform_indices = @transform_0, window_bounds = array<i64: 1, 16, 32>}, {transform_indices = @transform_1, window_bounds = array<i64: 1, 16, 16>}, {pipeline_mode = #tpu.pipeline_mode<synchronous>, transform_indices = @transform_2, window_bounds = array<i64: 32, 512>}, {pipeline_mode = #tpu.pipeline_mode<synchronous>, transform_indices = @transform_3, window_bounds = array<i64: 512, 16>}, {pipeline_mode = #tpu.pipeline_mode<synchronous>, transform_indices = @transform_4, window_bounds = array<i64: 8, 1, 64>}, {pipeline_mode = #tpu.pipeline_mode<synchronous>, transform_indices = @transform_5, window_bounds = array<i64: 8, 64, 2048>}, {pipeline_mode = #tpu.pipeline_mode<synchronous>, transform_indices = @transform_6, window_bounds = array<i64: 1, 2048>}, {pipeline_mode = #tpu.pipeline_mode<synchronous>, transform_indices = @transform_7, window_bounds = array<i64: 512, 32>}, {pipeline_mode = #tpu.pipeline_mode<synchronous>, transform_indices = @transform_8, window_bounds = array<i64: 1, 32>}, {pipeline_mode = #tpu.pipeline_mode<synchronous>, transform_indices = @transform_9, window_bounds = array<i64: 32, 2048>}, {pipeline_mode = #tpu.pipeline_mode<synchronous>, transform_indices = @transform_10, window_bounds = array<i64: 1, 2048>}, {pipeline_mode = #tpu.pipeline_mode<synchronous>, transform_indices = @transform_11, window_bounds = array<i64: 512, 512>}, {pipeline_mode = #tpu.pipeline_mode<synchronous>, transform_indices = @transform_12, window_bounds = array<i64: 512, 16>}, {pipeline_mode = #tpu.pipeline_mode<synchronous>, transform_indices = @transform_13, window_bounds = array<i64: 1, 64>}, {transform_indices = @transform_14, window_bounds = array<i64: 1, 16, 64>}, {transform_indices = @transform_15, window_bounds = array<i64: 1, 16, 512>}]} {
    %c0 = arith.constant 0 : index
    %c0_0 = arith.constant 0 : index
    %c0_1 = arith.constant 0 : index
    %0 = vector.load %arg2[%c0, %c0_0, %c0_1] : memref<1x16x16xf32, #tpu.memory_space<vmem>>, vector<1x16x16xf32>
    %1 = vector.shape_cast %0 : vector<1x16x16xf32> to vector<16x16xf32>
    %c0_2 = arith.constant 0 : index
    %c0_3 = arith.constant 0 : index
    %c0_4 = arith.constant 0 : index
    %2 = vector.load %arg1[%c0_2, %c0_3, %c0_4] : memref<1x16x32xf32, #tpu.memory_space<vmem>>, vector<1x16x32xf32>
    %3 = vector.shape_cast %2 : vector<1x16x32xf32> to vector<16x32xf32>
    %4 = arith.truncf %3 : vector<16x32xf32> to vector<16x32xbf16>
    %c0_5 = arith.constant 0 : index
    %c0_6 = arith.constant 0 : index
    %5 = vector.load %arg3[%c0_5, %c0_6] : memref<32x512xbf16, #tpu.memory_space<vmem>>, vector<32x512xbf16>
    %cst = arith.constant dense<0.000000e+00> : vector<16x512xf32>
    %6 = tpu.matmul %4, %5, %cst {dimension_numbers = #tpu.dot_dimension_numbers<[1], [0], [0], [1], [0, 0, 1, 1], [], []>} : vector<16x32xbf16>, vector<32x512xbf16>, vector<16x512xf32> -> vector<16x512xf32>
    %c0_7 = arith.constant 0 : index
    %c0_8 = arith.constant 0 : index
    %7 = vector.load %arg4[%c0_7, %c0_8] : memref<512x16xf32, #tpu.memory_space<vmem>>, vector<512x16xf32>
    %cst_9 = arith.constant dense<0.000000e+00> : vector<16x16xf32>
    %8 = tpu.matmul %6, %7, %cst_9 {dimension_numbers = #tpu.dot_dimension_numbers<[1], [0], [0], [1], [0, 0, 1, 1], [], []>} : vector<16x512xf32>, vector<512x16xf32>, vector<16x16xf32> -> vector<16x16xf32>
    %9 = tpu.transpose %8, [1, 0] : vector<16x16xf32> -> vector<16x16xf32>
    %10 = vector.extract_strided_slice %9 {offsets = [8, 0], sizes = [8, 16], strides = [1, 1]} : vector<16x16xf32> to vector<8x16xf32>
    %11 = vector.extract_strided_slice %8 {offsets = [0, 0], sizes = [16, 1], strides = [1, 1]} : vector<16x16xf32> to vector<16x1xf32>
    %12 = vector.extract_strided_slice %10 {offsets = [0, 0], sizes = [1, 16], strides = [1, 1]} : vector<8x16xf32> to vector<1x16xf32>
    %13 = vector.broadcast %11 : vector<16x1xf32> to vector<16x16xf32>
    %14 = vector.broadcast %12 : vector<1x16xf32> to vector<16x16xf32>
    %15 = arith.addf %13, %14 : vector<16x16xf32>
    %cst_10 = arith.constant 0.000000e+00 : f32
    %16 = vector.broadcast %cst_10 : f32 to vector<16x16xf32>
    %17 = arith.cmpf ogt, %15, %16 : vector<16x16xf32>
    %cst_11 = arith.constant 2.000000e-01 : f32
    %18 = vector.broadcast %cst_11 : f32 to vector<16x16xf32>
    %19 = arith.mulf %18, %15 : vector<16x16xf32>
    %20 = arith.select %17, %15, %19 : vector<16x16xi1>, vector<16x16xf32>
    %cst_12 = arith.constant 0.000000e+00 : f32
    %21 = vector.broadcast %cst_12 : f32 to vector<16x16xf32>
    %22 = arith.cmpf ogt, %1, %21 : vector<16x16xf32>
    %cst_13 = arith.constant -1.000000e+30 : f32
    %23 = vector.broadcast %cst_13 : f32 to vector<16x16xf32>
    %24 = arith.select %22, %20, %23 : vector<16x16xi1>, vector<16x16xf32>
    %cst_14 = arith.constant dense<0xFF800000> : vector<16xf32>
    %25 = vector.multi_reduction <maximumf>, %24, %cst_14 [1] : vector<16x16xf32> to vector<16xf32>
    %26 = vector.shape_cast %25 : vector<16xf32> to vector<16x1xf32>
    %27 = vector.broadcast %26 : vector<16x1xf32> to vector<16x16xf32>
    %28 = arith.subf %20, %27 : vector<16x16xf32>
    %cst_15 = arith.constant 0.000000e+00 : f32
    %29 = vector.broadcast %cst_15 : f32 to vector<16x16xf32>
    %30 = arith.minimumf %28, %29 : vector<16x16xf32>
    %31 = math.exp %30 : vector<16x16xf32>
    %32 = arith.mulf %31, %1 : vector<16x16xf32>
    %cst_16 = arith.constant dense<0.000000e+00> : vector<16xf32>
    %33 = vector.multi_reduction <add>, %32, %cst_16 [1] : vector<16x16xf32> to vector<16xf32>
    %34 = vector.shape_cast %33 : vector<16xf32> to vector<16x1xf32>
    %35 = vector.broadcast %34 : vector<16x1xf32> to vector<16x16xf32>
    %36 = arith.divf %32, %35 : vector<16x16xf32>
    %37 = vector.extract_strided_slice %6 {offsets = [0, 0], sizes = [16, 64], strides = [1, 1]} : vector<16x512xf32> to vector<16x64xf32>
    %cst_17 = arith.constant dense<0.000000e+00> : vector<16x64xf32>
    %38 = tpu.matmul %36, %37, %cst_17 {dimension_numbers = #tpu.dot_dimension_numbers<[1], [0], [0], [1], [0, 0, 1, 1], [], []>} : vector<16x16xf32>, vector<16x64xf32>, vector<16x64xf32> -> vector<16x64xf32>
    %39 = vector.extract_strided_slice %8 {offsets = [0, 1], sizes = [16, 1], strides = [1, 1]} : vector<16x16xf32> to vector<16x1xf32>
    %40 = vector.extract_strided_slice %10 {offsets = [1, 0], sizes = [1, 16], strides = [1, 1]} : vector<8x16xf32> to vector<1x16xf32>
    %41 = vector.broadcast %39 : vector<16x1xf32> to vector<16x16xf32>
    %42 = vector.broadcast %40 : vector<1x16xf32> to vector<16x16xf32>
    %43 = arith.addf %41, %42 : vector<16x16xf32>
    %cst_18 = arith.constant 0.000000e+00 : f32
    %44 = vector.broadcast %cst_18 : f32 to vector<16x16xf32>
    %45 = arith.cmpf ogt, %43, %44 : vector<16x16xf32>
    %cst_19 = arith.constant 2.000000e-01 : f32
    %46 = vector.broadcast %cst_19 : f32 to vector<16x16xf32>
    %47 = arith.mulf %46, %43 : vector<16x16xf32>
    %48 = arith.select %45, %43, %47 : vector<16x16xi1>, vector<16x16xf32>
    %cst_20 = arith.constant 0.000000e+00 : f32
    %49 = vector.broadcast %cst_20 : f32 to vector<16x16xf32>
    %50 = arith.cmpf ogt, %1, %49 : vector<16x16xf32>
    %cst_21 = arith.constant -1.000000e+30 : f32
    %51 = vector.broadcast %cst_21 : f32 to vector<16x16xf32>
    %52 = arith.select %50, %48, %51 : vector<16x16xi1>, vector<16x16xf32>
    %cst_22 = arith.constant dense<0xFF800000> : vector<16xf32>
    %53 = vector.multi_reduction <maximumf>, %52, %cst_22 [1] : vector<16x16xf32> to vector<16xf32>
    %54 = vector.shape_cast %53 : vector<16xf32> to vector<16x1xf32>
    %55 = vector.broadcast %54 : vector<16x1xf32> to vector<16x16xf32>
    %56 = arith.subf %48, %55 : vector<16x16xf32>
    %cst_23 = arith.constant 0.000000e+00 : f32
    %57 = vector.broadcast %cst_23 : f32 to vector<16x16xf32>
    %58 = arith.minimumf %56, %57 : vector<16x16xf32>
    %59 = math.exp %58 : vector<16x16xf32>
    %60 = arith.mulf %59, %1 : vector<16x16xf32>
    %cst_24 = arith.constant dense<0.000000e+00> : vector<16xf32>
    %61 = vector.multi_reduction <add>, %60, %cst_24 [1] : vector<16x16xf32> to vector<16xf32>
    %62 = vector.shape_cast %61 : vector<16xf32> to vector<16x1xf32>
    %63 = vector.broadcast %62 : vector<16x1xf32> to vector<16x16xf32>
    %64 = arith.divf %60, %63 : vector<16x16xf32>
    %65 = vector.extract_strided_slice %6 {offsets = [0, 64], sizes = [16, 64], strides = [1, 1]} : vector<16x512xf32> to vector<16x64xf32>
    %cst_25 = arith.constant dense<0.000000e+00> : vector<16x64xf32>
    %66 = tpu.matmul %64, %65, %cst_25 {dimension_numbers = #tpu.dot_dimension_numbers<[1], [0], [0], [1], [0, 0, 1, 1], [], []>} : vector<16x16xf32>, vector<16x64xf32>, vector<16x64xf32> -> vector<16x64xf32>
    %67 = vector.extract_strided_slice %8 {offsets = [0, 2], sizes = [16, 1], strides = [1, 1]} : vector<16x16xf32> to vector<16x1xf32>
    %68 = vector.extract_strided_slice %10 {offsets = [2, 0], sizes = [1, 16], strides = [1, 1]} : vector<8x16xf32> to vector<1x16xf32>
    %69 = vector.broadcast %67 : vector<16x1xf32> to vector<16x16xf32>
    %70 = vector.broadcast %68 : vector<1x16xf32> to vector<16x16xf32>
    %71 = arith.addf %69, %70 : vector<16x16xf32>
    %cst_26 = arith.constant 0.000000e+00 : f32
    %72 = vector.broadcast %cst_26 : f32 to vector<16x16xf32>
    %73 = arith.cmpf ogt, %71, %72 : vector<16x16xf32>
    %cst_27 = arith.constant 2.000000e-01 : f32
    %74 = vector.broadcast %cst_27 : f32 to vector<16x16xf32>
    %75 = arith.mulf %74, %71 : vector<16x16xf32>
    %76 = arith.select %73, %71, %75 : vector<16x16xi1>, vector<16x16xf32>
    %cst_28 = arith.constant 0.000000e+00 : f32
    %77 = vector.broadcast %cst_28 : f32 to vector<16x16xf32>
    %78 = arith.cmpf ogt, %1, %77 : vector<16x16xf32>
    %cst_29 = arith.constant -1.000000e+30 : f32
    %79 = vector.broadcast %cst_29 : f32 to vector<16x16xf32>
    %80 = arith.select %78, %76, %79 : vector<16x16xi1>, vector<16x16xf32>
    %cst_30 = arith.constant dense<0xFF800000> : vector<16xf32>
    %81 = vector.multi_reduction <maximumf>, %80, %cst_30 [1] : vector<16x16xf32> to vector<16xf32>
    %82 = vector.shape_cast %81 : vector<16xf32> to vector<16x1xf32>
    %83 = vector.broadcast %82 : vector<16x1xf32> to vector<16x16xf32>
    %84 = arith.subf %76, %83 : vector<16x16xf32>
    %cst_31 = arith.constant 0.000000e+00 : f32
    %85 = vector.broadcast %cst_31 : f32 to vector<16x16xf32>
    %86 = arith.minimumf %84, %85 : vector<16x16xf32>
    %87 = math.exp %86 : vector<16x16xf32>
    %88 = arith.mulf %87, %1 : vector<16x16xf32>
    %cst_32 = arith.constant dense<0.000000e+00> : vector<16xf32>
    %89 = vector.multi_reduction <add>, %88, %cst_32 [1] : vector<16x16xf32> to vector<16xf32>
    %90 = vector.shape_cast %89 : vector<16xf32> to vector<16x1xf32>
    %91 = vector.broadcast %90 : vector<16x1xf32> to vector<16x16xf32>
    %92 = arith.divf %88, %91 : vector<16x16xf32>
    %93 = vector.extract_strided_slice %6 {offsets = [0, 128], sizes = [16, 64], strides = [1, 1]} : vector<16x512xf32> to vector<16x64xf32>
    %cst_33 = arith.constant dense<0.000000e+00> : vector<16x64xf32>
    %94 = tpu.matmul %92, %93, %cst_33 {dimension_numbers = #tpu.dot_dimension_numbers<[1], [0], [0], [1], [0, 0, 1, 1], [], []>} : vector<16x16xf32>, vector<16x64xf32>, vector<16x64xf32> -> vector<16x64xf32>
    %95 = vector.extract_strided_slice %8 {offsets = [0, 3], sizes = [16, 1], strides = [1, 1]} : vector<16x16xf32> to vector<16x1xf32>
    %96 = vector.extract_strided_slice %10 {offsets = [3, 0], sizes = [1, 16], strides = [1, 1]} : vector<8x16xf32> to vector<1x16xf32>
    %97 = vector.broadcast %95 : vector<16x1xf32> to vector<16x16xf32>
    %98 = vector.broadcast %96 : vector<1x16xf32> to vector<16x16xf32>
    %99 = arith.addf %97, %98 : vector<16x16xf32>
    %cst_34 = arith.constant 0.000000e+00 : f32
    %100 = vector.broadcast %cst_34 : f32 to vector<16x16xf32>
    %101 = arith.cmpf ogt, %99, %100 : vector<16x16xf32>
    %cst_35 = arith.constant 2.000000e-01 : f32
    %102 = vector.broadcast %cst_35 : f32 to vector<16x16xf32>
    %103 = arith.mulf %102, %99 : vector<16x16xf32>
    %104 = arith.select %101, %99, %103 : vector<16x16xi1>, vector<16x16xf32>
    %cst_36 = arith.constant 0.000000e+00 : f32
    %105 = vector.broadcast %cst_36 : f32 to vector<16x16xf32>
    %106 = arith.cmpf ogt, %1, %105 : vector<16x16xf32>
    %cst_37 = arith.constant -1.000000e+30 : f32
    %107 = vector.broadcast %cst_37 : f32 to vector<16x16xf32>
    %108 = arith.select %106, %104, %107 : vector<16x16xi1>, vector<16x16xf32>
    %cst_38 = arith.constant dense<0xFF800000> : vector<16xf32>
    %109 = vector.multi_reduction <maximumf>, %108, %cst_38 [1] : vector<16x16xf32> to vector<16xf32>
    %110 = vector.shape_cast %109 : vector<16xf32> to vector<16x1xf32>
    %111 = vector.broadcast %110 : vector<16x1xf32> to vector<16x16xf32>
    %112 = arith.subf %104, %111 : vector<16x16xf32>
    %cst_39 = arith.constant 0.000000e+00 : f32
    %113 = vector.broadcast %cst_39 : f32 to vector<16x16xf32>
    %114 = arith.minimumf %112, %113 : vector<16x16xf32>
    %115 = math.exp %114 : vector<16x16xf32>
    %116 = arith.mulf %115, %1 : vector<16x16xf32>
    %cst_40 = arith.constant dense<0.000000e+00> : vector<16xf32>
    %117 = vector.multi_reduction <add>, %116, %cst_40 [1] : vector<16x16xf32> to vector<16xf32>
    %118 = vector.shape_cast %117 : vector<16xf32> to vector<16x1xf32>
    %119 = vector.broadcast %118 : vector<16x1xf32> to vector<16x16xf32>
    %120 = arith.divf %116, %119 : vector<16x16xf32>
    %121 = vector.extract_strided_slice %6 {offsets = [0, 192], sizes = [16, 64], strides = [1, 1]} : vector<16x512xf32> to vector<16x64xf32>
    %cst_41 = arith.constant dense<0.000000e+00> : vector<16x64xf32>
    %122 = tpu.matmul %120, %121, %cst_41 {dimension_numbers = #tpu.dot_dimension_numbers<[1], [0], [0], [1], [0, 0, 1, 1], [], []>} : vector<16x16xf32>, vector<16x64xf32>, vector<16x64xf32> -> vector<16x64xf32>
    %123 = vector.extract_strided_slice %8 {offsets = [0, 4], sizes = [16, 1], strides = [1, 1]} : vector<16x16xf32> to vector<16x1xf32>
    %124 = vector.extract_strided_slice %10 {offsets = [4, 0], sizes = [1, 16], strides = [1, 1]} : vector<8x16xf32> to vector<1x16xf32>
    %125 = vector.broadcast %123 : vector<16x1xf32> to vector<16x16xf32>
    %126 = vector.broadcast %124 : vector<1x16xf32> to vector<16x16xf32>
    %127 = arith.addf %125, %126 : vector<16x16xf32>
    %cst_42 = arith.constant 0.000000e+00 : f32
    %128 = vector.broadcast %cst_42 : f32 to vector<16x16xf32>
    %129 = arith.cmpf ogt, %127, %128 : vector<16x16xf32>
    %cst_43 = arith.constant 2.000000e-01 : f32
    %130 = vector.broadcast %cst_43 : f32 to vector<16x16xf32>
    %131 = arith.mulf %130, %127 : vector<16x16xf32>
    %132 = arith.select %129, %127, %131 : vector<16x16xi1>, vector<16x16xf32>
    %cst_44 = arith.constant 0.000000e+00 : f32
    %133 = vector.broadcast %cst_44 : f32 to vector<16x16xf32>
    %134 = arith.cmpf ogt, %1, %133 : vector<16x16xf32>
    %cst_45 = arith.constant -1.000000e+30 : f32
    %135 = vector.broadcast %cst_45 : f32 to vector<16x16xf32>
    %136 = arith.select %134, %132, %135 : vector<16x16xi1>, vector<16x16xf32>
    %cst_46 = arith.constant dense<0xFF800000> : vector<16xf32>
    %137 = vector.multi_reduction <maximumf>, %136, %cst_46 [1] : vector<16x16xf32> to vector<16xf32>
    %138 = vector.shape_cast %137 : vector<16xf32> to vector<16x1xf32>
    %139 = vector.broadcast %138 : vector<16x1xf32> to vector<16x16xf32>
    %140 = arith.subf %132, %139 : vector<16x16xf32>
    %cst_47 = arith.constant 0.000000e+00 : f32
    %141 = vector.broadcast %cst_47 : f32 to vector<16x16xf32>
    %142 = arith.minimumf %140, %141 : vector<16x16xf32>
    %143 = math.exp %142 : vector<16x16xf32>
    %144 = arith.mulf %143, %1 : vector<16x16xf32>
    %cst_48 = arith.constant dense<0.000000e+00> : vector<16xf32>
    %145 = vector.multi_reduction <add>, %144, %cst_48 [1] : vector<16x16xf32> to vector<16xf32>
    %146 = vector.shape_cast %145 : vector<16xf32> to vector<16x1xf32>
    %147 = vector.broadcast %146 : vector<16x1xf32> to vector<16x16xf32>
    %148 = arith.divf %144, %147 : vector<16x16xf32>
    %149 = vector.extract_strided_slice %6 {offsets = [0, 256], sizes = [16, 64], strides = [1, 1]} : vector<16x512xf32> to vector<16x64xf32>
    %cst_49 = arith.constant dense<0.000000e+00> : vector<16x64xf32>
    %150 = tpu.matmul %148, %149, %cst_49 {dimension_numbers = #tpu.dot_dimension_numbers<[1], [0], [0], [1], [0, 0, 1, 1], [], []>} : vector<16x16xf32>, vector<16x64xf32>, vector<16x64xf32> -> vector<16x64xf32>
    %151 = vector.extract_strided_slice %8 {offsets = [0, 5], sizes = [16, 1], strides = [1, 1]} : vector<16x16xf32> to vector<16x1xf32>
    %152 = vector.extract_strided_slice %10 {offsets = [5, 0], sizes = [1, 16], strides = [1, 1]} : vector<8x16xf32> to vector<1x16xf32>
    %153 = vector.broadcast %151 : vector<16x1xf32> to vector<16x16xf32>
    %154 = vector.broadcast %152 : vector<1x16xf32> to vector<16x16xf32>
    %155 = arith.addf %153, %154 : vector<16x16xf32>
    %cst_50 = arith.constant 0.000000e+00 : f32
    %156 = vector.broadcast %cst_50 : f32 to vector<16x16xf32>
    %157 = arith.cmpf ogt, %155, %156 : vector<16x16xf32>
    %cst_51 = arith.constant 2.000000e-01 : f32
    %158 = vector.broadcast %cst_51 : f32 to vector<16x16xf32>
    %159 = arith.mulf %158, %155 : vector<16x16xf32>
    %160 = arith.select %157, %155, %159 : vector<16x16xi1>, vector<16x16xf32>
    %cst_52 = arith.constant 0.000000e+00 : f32
    %161 = vector.broadcast %cst_52 : f32 to vector<16x16xf32>
    %162 = arith.cmpf ogt, %1, %161 : vector<16x16xf32>
    %cst_53 = arith.constant -1.000000e+30 : f32
    %163 = vector.broadcast %cst_53 : f32 to vector<16x16xf32>
    %164 = arith.select %162, %160, %163 : vector<16x16xi1>, vector<16x16xf32>
    %cst_54 = arith.constant dense<0xFF800000> : vector<16xf32>
    %165 = vector.multi_reduction <maximumf>, %164, %cst_54 [1] : vector<16x16xf32> to vector<16xf32>
    %166 = vector.shape_cast %165 : vector<16xf32> to vector<16x1xf32>
    %167 = vector.broadcast %166 : vector<16x1xf32> to vector<16x16xf32>
    %168 = arith.subf %160, %167 : vector<16x16xf32>
    %cst_55 = arith.constant 0.000000e+00 : f32
    %169 = vector.broadcast %cst_55 : f32 to vector<16x16xf32>
    %170 = arith.minimumf %168, %169 : vector<16x16xf32>
    %171 = math.exp %170 : vector<16x16xf32>
    %172 = arith.mulf %171, %1 : vector<16x16xf32>
    %cst_56 = arith.constant dense<0.000000e+00> : vector<16xf32>
    %173 = vector.multi_reduction <add>, %172, %cst_56 [1] : vector<16x16xf32> to vector<16xf32>
    %174 = vector.shape_cast %173 : vector<16xf32> to vector<16x1xf32>
    %175 = vector.broadcast %174 : vector<16x1xf32> to vector<16x16xf32>
    %176 = arith.divf %172, %175 : vector<16x16xf32>
    %177 = vector.extract_strided_slice %6 {offsets = [0, 320], sizes = [16, 64], strides = [1, 1]} : vector<16x512xf32> to vector<16x64xf32>
    %cst_57 = arith.constant dense<0.000000e+00> : vector<16x64xf32>
    %178 = tpu.matmul %176, %177, %cst_57 {dimension_numbers = #tpu.dot_dimension_numbers<[1], [0], [0], [1], [0, 0, 1, 1], [], []>} : vector<16x16xf32>, vector<16x64xf32>, vector<16x64xf32> -> vector<16x64xf32>
    %179 = vector.extract_strided_slice %8 {offsets = [0, 6], sizes = [16, 1], strides = [1, 1]} : vector<16x16xf32> to vector<16x1xf32>
    %180 = vector.extract_strided_slice %10 {offsets = [6, 0], sizes = [1, 16], strides = [1, 1]} : vector<8x16xf32> to vector<1x16xf32>
    %181 = vector.broadcast %179 : vector<16x1xf32> to vector<16x16xf32>
    %182 = vector.broadcast %180 : vector<1x16xf32> to vector<16x16xf32>
    %183 = arith.addf %181, %182 : vector<16x16xf32>
    %cst_58 = arith.constant 0.000000e+00 : f32
    %184 = vector.broadcast %cst_58 : f32 to vector<16x16xf32>
    %185 = arith.cmpf ogt, %183, %184 : vector<16x16xf32>
    %cst_59 = arith.constant 2.000000e-01 : f32
    %186 = vector.broadcast %cst_59 : f32 to vector<16x16xf32>
    %187 = arith.mulf %186, %183 : vector<16x16xf32>
    %188 = arith.select %185, %183, %187 : vector<16x16xi1>, vector<16x16xf32>
    %cst_60 = arith.constant 0.000000e+00 : f32
    %189 = vector.broadcast %cst_60 : f32 to vector<16x16xf32>
    %190 = arith.cmpf ogt, %1, %189 : vector<16x16xf32>
    %cst_61 = arith.constant -1.000000e+30 : f32
    %191 = vector.broadcast %cst_61 : f32 to vector<16x16xf32>
    %192 = arith.select %190, %188, %191 : vector<16x16xi1>, vector<16x16xf32>
    %cst_62 = arith.constant dense<0xFF800000> : vector<16xf32>
    %193 = vector.multi_reduction <maximumf>, %192, %cst_62 [1] : vector<16x16xf32> to vector<16xf32>
    %194 = vector.shape_cast %193 : vector<16xf32> to vector<16x1xf32>
    %195 = vector.broadcast %194 : vector<16x1xf32> to vector<16x16xf32>
    %196 = arith.subf %188, %195 : vector<16x16xf32>
    %cst_63 = arith.constant 0.000000e+00 : f32
    %197 = vector.broadcast %cst_63 : f32 to vector<16x16xf32>
    %198 = arith.minimumf %196, %197 : vector<16x16xf32>
    %199 = math.exp %198 : vector<16x16xf32>
    %200 = arith.mulf %199, %1 : vector<16x16xf32>
    %cst_64 = arith.constant dense<0.000000e+00> : vector<16xf32>
    %201 = vector.multi_reduction <add>, %200, %cst_64 [1] : vector<16x16xf32> to vector<16xf32>
    %202 = vector.shape_cast %201 : vector<16xf32> to vector<16x1xf32>
    %203 = vector.broadcast %202 : vector<16x1xf32> to vector<16x16xf32>
    %204 = arith.divf %200, %203 : vector<16x16xf32>
    %205 = vector.extract_strided_slice %6 {offsets = [0, 384], sizes = [16, 64], strides = [1, 1]} : vector<16x512xf32> to vector<16x64xf32>
    %cst_65 = arith.constant dense<0.000000e+00> : vector<16x64xf32>
    %206 = tpu.matmul %204, %205, %cst_65 {dimension_numbers = #tpu.dot_dimension_numbers<[1], [0], [0], [1], [0, 0, 1, 1], [], []>} : vector<16x16xf32>, vector<16x64xf32>, vector<16x64xf32> -> vector<16x64xf32>
    %207 = vector.extract_strided_slice %8 {offsets = [0, 7], sizes = [16, 1], strides = [1, 1]} : vector<16x16xf32> to vector<16x1xf32>
    %208 = vector.extract_strided_slice %10 {offsets = [7, 0], sizes = [1, 16], strides = [1, 1]} : vector<8x16xf32> to vector<1x16xf32>
    %209 = vector.broadcast %207 : vector<16x1xf32> to vector<16x16xf32>
    %210 = vector.broadcast %208 : vector<1x16xf32> to vector<16x16xf32>
    %211 = arith.addf %209, %210 : vector<16x16xf32>
    %cst_66 = arith.constant 0.000000e+00 : f32
    %212 = vector.broadcast %cst_66 : f32 to vector<16x16xf32>
    %213 = arith.cmpf ogt, %211, %212 : vector<16x16xf32>
    %cst_67 = arith.constant 2.000000e-01 : f32
    %214 = vector.broadcast %cst_67 : f32 to vector<16x16xf32>
    %215 = arith.mulf %214, %211 : vector<16x16xf32>
    %216 = arith.select %213, %211, %215 : vector<16x16xi1>, vector<16x16xf32>
    %cst_68 = arith.constant 0.000000e+00 : f32
    %217 = vector.broadcast %cst_68 : f32 to vector<16x16xf32>
    %218 = arith.cmpf ogt, %1, %217 : vector<16x16xf32>
    %cst_69 = arith.constant -1.000000e+30 : f32
    %219 = vector.broadcast %cst_69 : f32 to vector<16x16xf32>
    %220 = arith.select %218, %216, %219 : vector<16x16xi1>, vector<16x16xf32>
    %cst_70 = arith.constant dense<0xFF800000> : vector<16xf32>
    %221 = vector.multi_reduction <maximumf>, %220, %cst_70 [1] : vector<16x16xf32> to vector<16xf32>
    %222 = vector.shape_cast %221 : vector<16xf32> to vector<16x1xf32>
    %223 = vector.broadcast %222 : vector<16x1xf32> to vector<16x16xf32>
    %224 = arith.subf %216, %223 : vector<16x16xf32>
    %cst_71 = arith.constant 0.000000e+00 : f32
    %225 = vector.broadcast %cst_71 : f32 to vector<16x16xf32>
    %226 = arith.minimumf %224, %225 : vector<16x16xf32>
    %227 = math.exp %226 : vector<16x16xf32>
    %228 = arith.mulf %227, %1 : vector<16x16xf32>
    %cst_72 = arith.constant dense<0.000000e+00> : vector<16xf32>
    %229 = vector.multi_reduction <add>, %228, %cst_72 [1] : vector<16x16xf32> to vector<16xf32>
    %230 = vector.shape_cast %229 : vector<16xf32> to vector<16x1xf32>
    %231 = vector.broadcast %230 : vector<16x1xf32> to vector<16x16xf32>
    %232 = arith.divf %228, %231 : vector<16x16xf32>
    %233 = vector.extract_strided_slice %6 {offsets = [0, 448], sizes = [16, 64], strides = [1, 1]} : vector<16x512xf32> to vector<16x64xf32>
    %cst_73 = arith.constant dense<0.000000e+00> : vector<16x64xf32>
    %234 = tpu.matmul %232, %233, %cst_73 {dimension_numbers = #tpu.dot_dimension_numbers<[1], [0], [0], [1], [0, 0, 1, 1], [], []>} : vector<16x16xf32>, vector<16x64xf32>, vector<16x64xf32> -> vector<16x64xf32>
    %c0_74 = arith.constant 0 : index
    %c0_75 = arith.constant 0 : index
    %235 = vector.load %arg7[%c0_74, %c0_75] : memref<1x2048xf32, #tpu.memory_space<vmem>>, vector<1x2048xf32>
    %c0_76 = arith.constant 0 : index
    %c0_77 = arith.constant 0 : index
    %c0_78 = arith.constant 0 : index
    %236 = vector.load %arg5[%c0_76, %c0_77, %c0_78] : memref<8x1x64xf32, #tpu.memory_space<vmem>>, vector<1x1x64xf32>
    %237 = vector.shape_cast %236 : vector<1x1x64xf32> to vector<1x64xf32>
    %238 = vector.broadcast %237 : vector<1x64xf32> to vector<16x64xf32>
    %239 = arith.addf %38, %238 : vector<16x64xf32>
    %cst_79 = arith.constant 0.000000e+00 : f32
    %240 = vector.broadcast %cst_79 : f32 to vector<16x64xf32>
    %241 = arith.cmpf ogt, %239, %240 : vector<16x64xf32>
    %cst_80 = arith.constant 0.000000e+00 : f32
    %242 = vector.broadcast %cst_80 : f32 to vector<16x64xf32>
    %243 = arith.minimumf %239, %242 : vector<16x64xf32>
    %244 = math.exp %243 : vector<16x64xf32>
    %cst_81 = arith.constant 1.000000e+00 : f32
    %245 = vector.broadcast %cst_81 : f32 to vector<16x64xf32>
    %246 = arith.subf %244, %245 : vector<16x64xf32>
    %247 = arith.select %241, %239, %246 : vector<16x64xi1>, vector<16x64xf32>
    %248 = arith.truncf %247 : vector<16x64xf32> to vector<16x64xbf16>
    %c0_82 = arith.constant 0 : index
    %c0_83 = arith.constant 0 : index
    %c0_84 = arith.constant 0 : index
    %249 = vector.load %arg6[%c0_82, %c0_83, %c0_84] : memref<8x64x2048xbf16, #tpu.memory_space<vmem>>, vector<1x64x2048xbf16>
    %250 = vector.shape_cast %249 : vector<1x64x2048xbf16> to vector<64x2048xbf16>
    %cst_85 = arith.constant dense<0.000000e+00> : vector<16x2048xf32>
    %251 = tpu.matmul %248, %250, %cst_85 {dimension_numbers = #tpu.dot_dimension_numbers<[1], [0], [0], [1], [0, 0, 1, 1], [], []>} : vector<16x64xbf16>, vector<64x2048xbf16>, vector<16x2048xf32> -> vector<16x2048xf32>
    %252 = vector.broadcast %235 : vector<1x2048xf32> to vector<16x2048xf32>
    %253 = arith.addf %252, %251 : vector<16x2048xf32>
    %c1 = arith.constant 1 : index
    %c0_86 = arith.constant 0 : index
    %c0_87 = arith.constant 0 : index
    %254 = vector.load %arg5[%c1, %c0_86, %c0_87] : memref<8x1x64xf32, #tpu.memory_space<vmem>>, vector<1x1x64xf32>
    %255 = vector.shape_cast %254 : vector<1x1x64xf32> to vector<1x64xf32>
    %256 = vector.broadcast %255 : vector<1x64xf32> to vector<16x64xf32>
    %257 = arith.addf %66, %256 : vector<16x64xf32>
    %cst_88 = arith.constant 0.000000e+00 : f32
    %258 = vector.broadcast %cst_88 : f32 to vector<16x64xf32>
    %259 = arith.cmpf ogt, %257, %258 : vector<16x64xf32>
    %cst_89 = arith.constant 0.000000e+00 : f32
    %260 = vector.broadcast %cst_89 : f32 to vector<16x64xf32>
    %261 = arith.minimumf %257, %260 : vector<16x64xf32>
    %262 = math.exp %261 : vector<16x64xf32>
    %cst_90 = arith.constant 1.000000e+00 : f32
    %263 = vector.broadcast %cst_90 : f32 to vector<16x64xf32>
    %264 = arith.subf %262, %263 : vector<16x64xf32>
    %265 = arith.select %259, %257, %264 : vector<16x64xi1>, vector<16x64xf32>
    %266 = arith.truncf %265 : vector<16x64xf32> to vector<16x64xbf16>
    %c1_91 = arith.constant 1 : index
    %c0_92 = arith.constant 0 : index
    %c0_93 = arith.constant 0 : index
    %267 = vector.load %arg6[%c1_91, %c0_92, %c0_93] : memref<8x64x2048xbf16, #tpu.memory_space<vmem>>, vector<1x64x2048xbf16>
    %268 = vector.shape_cast %267 : vector<1x64x2048xbf16> to vector<64x2048xbf16>
    %cst_94 = arith.constant dense<0.000000e+00> : vector<16x2048xf32>
    %269 = tpu.matmul %266, %268, %cst_94 {dimension_numbers = #tpu.dot_dimension_numbers<[1], [0], [0], [1], [0, 0, 1, 1], [], []>} : vector<16x64xbf16>, vector<64x2048xbf16>, vector<16x2048xf32> -> vector<16x2048xf32>
    %270 = arith.addf %253, %269 : vector<16x2048xf32>
    %c2 = arith.constant 2 : index
    %c0_95 = arith.constant 0 : index
    %c0_96 = arith.constant 0 : index
    %271 = vector.load %arg5[%c2, %c0_95, %c0_96] : memref<8x1x64xf32, #tpu.memory_space<vmem>>, vector<1x1x64xf32>
    %272 = vector.shape_cast %271 : vector<1x1x64xf32> to vector<1x64xf32>
    %273 = vector.broadcast %272 : vector<1x64xf32> to vector<16x64xf32>
    %274 = arith.addf %94, %273 : vector<16x64xf32>
    %cst_97 = arith.constant 0.000000e+00 : f32
    %275 = vector.broadcast %cst_97 : f32 to vector<16x64xf32>
    %276 = arith.cmpf ogt, %274, %275 : vector<16x64xf32>
    %cst_98 = arith.constant 0.000000e+00 : f32
    %277 = vector.broadcast %cst_98 : f32 to vector<16x64xf32>
    %278 = arith.minimumf %274, %277 : vector<16x64xf32>
    %279 = math.exp %278 : vector<16x64xf32>
    %cst_99 = arith.constant 1.000000e+00 : f32
    %280 = vector.broadcast %cst_99 : f32 to vector<16x64xf32>
    %281 = arith.subf %279, %280 : vector<16x64xf32>
    %282 = arith.select %276, %274, %281 : vector<16x64xi1>, vector<16x64xf32>
    %283 = arith.truncf %282 : vector<16x64xf32> to vector<16x64xbf16>
    %c2_100 = arith.constant 2 : index
    %c0_101 = arith.constant 0 : index
    %c0_102 = arith.constant 0 : index
    %284 = vector.load %arg6[%c2_100, %c0_101, %c0_102] : memref<8x64x2048xbf16, #tpu.memory_space<vmem>>, vector<1x64x2048xbf16>
    %285 = vector.shape_cast %284 : vector<1x64x2048xbf16> to vector<64x2048xbf16>
    %cst_103 = arith.constant dense<0.000000e+00> : vector<16x2048xf32>
    %286 = tpu.matmul %283, %285, %cst_103 {dimension_numbers = #tpu.dot_dimension_numbers<[1], [0], [0], [1], [0, 0, 1, 1], [], []>} : vector<16x64xbf16>, vector<64x2048xbf16>, vector<16x2048xf32> -> vector<16x2048xf32>
    %287 = arith.addf %270, %286 : vector<16x2048xf32>
    %c3 = arith.constant 3 : index
    %c0_104 = arith.constant 0 : index
    %c0_105 = arith.constant 0 : index
    %288 = vector.load %arg5[%c3, %c0_104, %c0_105] : memref<8x1x64xf32, #tpu.memory_space<vmem>>, vector<1x1x64xf32>
    %289 = vector.shape_cast %288 : vector<1x1x64xf32> to vector<1x64xf32>
    %290 = vector.broadcast %289 : vector<1x64xf32> to vector<16x64xf32>
    %291 = arith.addf %122, %290 : vector<16x64xf32>
    %cst_106 = arith.constant 0.000000e+00 : f32
    %292 = vector.broadcast %cst_106 : f32 to vector<16x64xf32>
    %293 = arith.cmpf ogt, %291, %292 : vector<16x64xf32>
    %cst_107 = arith.constant 0.000000e+00 : f32
    %294 = vector.broadcast %cst_107 : f32 to vector<16x64xf32>
    %295 = arith.minimumf %291, %294 : vector<16x64xf32>
    %296 = math.exp %295 : vector<16x64xf32>
    %cst_108 = arith.constant 1.000000e+00 : f32
    %297 = vector.broadcast %cst_108 : f32 to vector<16x64xf32>
    %298 = arith.subf %296, %297 : vector<16x64xf32>
    %299 = arith.select %293, %291, %298 : vector<16x64xi1>, vector<16x64xf32>
    %300 = arith.truncf %299 : vector<16x64xf32> to vector<16x64xbf16>
    %c3_109 = arith.constant 3 : index
    %c0_110 = arith.constant 0 : index
    %c0_111 = arith.constant 0 : index
    %301 = vector.load %arg6[%c3_109, %c0_110, %c0_111] : memref<8x64x2048xbf16, #tpu.memory_space<vmem>>, vector<1x64x2048xbf16>
    %302 = vector.shape_cast %301 : vector<1x64x2048xbf16> to vector<64x2048xbf16>
    %cst_112 = arith.constant dense<0.000000e+00> : vector<16x2048xf32>
    %303 = tpu.matmul %300, %302, %cst_112 {dimension_numbers = #tpu.dot_dimension_numbers<[1], [0], [0], [1], [0, 0, 1, 1], [], []>} : vector<16x64xbf16>, vector<64x2048xbf16>, vector<16x2048xf32> -> vector<16x2048xf32>
    %304 = arith.addf %287, %303 : vector<16x2048xf32>
    %c4 = arith.constant 4 : index
    %c0_113 = arith.constant 0 : index
    %c0_114 = arith.constant 0 : index
    %305 = vector.load %arg5[%c4, %c0_113, %c0_114] : memref<8x1x64xf32, #tpu.memory_space<vmem>>, vector<1x1x64xf32>
    %306 = vector.shape_cast %305 : vector<1x1x64xf32> to vector<1x64xf32>
    %307 = vector.broadcast %306 : vector<1x64xf32> to vector<16x64xf32>
    %308 = arith.addf %150, %307 : vector<16x64xf32>
    %cst_115 = arith.constant 0.000000e+00 : f32
    %309 = vector.broadcast %cst_115 : f32 to vector<16x64xf32>
    %310 = arith.cmpf ogt, %308, %309 : vector<16x64xf32>
    %cst_116 = arith.constant 0.000000e+00 : f32
    %311 = vector.broadcast %cst_116 : f32 to vector<16x64xf32>
    %312 = arith.minimumf %308, %311 : vector<16x64xf32>
    %313 = math.exp %312 : vector<16x64xf32>
    %cst_117 = arith.constant 1.000000e+00 : f32
    %314 = vector.broadcast %cst_117 : f32 to vector<16x64xf32>
    %315 = arith.subf %313, %314 : vector<16x64xf32>
    %316 = arith.select %310, %308, %315 : vector<16x64xi1>, vector<16x64xf32>
    %317 = arith.truncf %316 : vector<16x64xf32> to vector<16x64xbf16>
    %c4_118 = arith.constant 4 : index
    %c0_119 = arith.constant 0 : index
    %c0_120 = arith.constant 0 : index
    %318 = vector.load %arg6[%c4_118, %c0_119, %c0_120] : memref<8x64x2048xbf16, #tpu.memory_space<vmem>>, vector<1x64x2048xbf16>
    %319 = vector.shape_cast %318 : vector<1x64x2048xbf16> to vector<64x2048xbf16>
    %cst_121 = arith.constant dense<0.000000e+00> : vector<16x2048xf32>
    %320 = tpu.matmul %317, %319, %cst_121 {dimension_numbers = #tpu.dot_dimension_numbers<[1], [0], [0], [1], [0, 0, 1, 1], [], []>} : vector<16x64xbf16>, vector<64x2048xbf16>, vector<16x2048xf32> -> vector<16x2048xf32>
    %321 = arith.addf %304, %320 : vector<16x2048xf32>
    %c5 = arith.constant 5 : index
    %c0_122 = arith.constant 0 : index
    %c0_123 = arith.constant 0 : index
    %322 = vector.load %arg5[%c5, %c0_122, %c0_123] : memref<8x1x64xf32, #tpu.memory_space<vmem>>, vector<1x1x64xf32>
    %323 = vector.shape_cast %322 : vector<1x1x64xf32> to vector<1x64xf32>
    %324 = vector.broadcast %323 : vector<1x64xf32> to vector<16x64xf32>
    %325 = arith.addf %178, %324 : vector<16x64xf32>
    %cst_124 = arith.constant 0.000000e+00 : f32
    %326 = vector.broadcast %cst_124 : f32 to vector<16x64xf32>
    %327 = arith.cmpf ogt, %325, %326 : vector<16x64xf32>
    %cst_125 = arith.constant 0.000000e+00 : f32
    %328 = vector.broadcast %cst_125 : f32 to vector<16x64xf32>
    %329 = arith.minimumf %325, %328 : vector<16x64xf32>
    %330 = math.exp %329 : vector<16x64xf32>
    %cst_126 = arith.constant 1.000000e+00 : f32
    %331 = vector.broadcast %cst_126 : f32 to vector<16x64xf32>
    %332 = arith.subf %330, %331 : vector<16x64xf32>
    %333 = arith.select %327, %325, %332 : vector<16x64xi1>, vector<16x64xf32>
    %334 = arith.truncf %333 : vector<16x64xf32> to vector<16x64xbf16>
    %c5_127 = arith.constant 5 : index
    %c0_128 = arith.constant 0 : index
    %c0_129 = arith.constant 0 : index
    %335 = vector.load %arg6[%c5_127, %c0_128, %c0_129] : memref<8x64x2048xbf16, #tpu.memory_space<vmem>>, vector<1x64x2048xbf16>
    %336 = vector.shape_cast %335 : vector<1x64x2048xbf16> to vector<64x2048xbf16>
    %cst_130 = arith.constant dense<0.000000e+00> : vector<16x2048xf32>
    %337 = tpu.matmul %334, %336, %cst_130 {dimension_numbers = #tpu.dot_dimension_numbers<[1], [0], [0], [1], [0, 0, 1, 1], [], []>} : vector<16x64xbf16>, vector<64x2048xbf16>, vector<16x2048xf32> -> vector<16x2048xf32>
    %338 = arith.addf %321, %337 : vector<16x2048xf32>
    %c6 = arith.constant 6 : index
    %c0_131 = arith.constant 0 : index
    %c0_132 = arith.constant 0 : index
    %339 = vector.load %arg5[%c6, %c0_131, %c0_132] : memref<8x1x64xf32, #tpu.memory_space<vmem>>, vector<1x1x64xf32>
    %340 = vector.shape_cast %339 : vector<1x1x64xf32> to vector<1x64xf32>
    %341 = vector.broadcast %340 : vector<1x64xf32> to vector<16x64xf32>
    %342 = arith.addf %206, %341 : vector<16x64xf32>
    %cst_133 = arith.constant 0.000000e+00 : f32
    %343 = vector.broadcast %cst_133 : f32 to vector<16x64xf32>
    %344 = arith.cmpf ogt, %342, %343 : vector<16x64xf32>
    %cst_134 = arith.constant 0.000000e+00 : f32
    %345 = vector.broadcast %cst_134 : f32 to vector<16x64xf32>
    %346 = arith.minimumf %342, %345 : vector<16x64xf32>
    %347 = math.exp %346 : vector<16x64xf32>
    %cst_135 = arith.constant 1.000000e+00 : f32
    %348 = vector.broadcast %cst_135 : f32 to vector<16x64xf32>
    %349 = arith.subf %347, %348 : vector<16x64xf32>
    %350 = arith.select %344, %342, %349 : vector<16x64xi1>, vector<16x64xf32>
    %351 = arith.truncf %350 : vector<16x64xf32> to vector<16x64xbf16>
    %c6_136 = arith.constant 6 : index
    %c0_137 = arith.constant 0 : index
    %c0_138 = arith.constant 0 : index
    %352 = vector.load %arg6[%c6_136, %c0_137, %c0_138] : memref<8x64x2048xbf16, #tpu.memory_space<vmem>>, vector<1x64x2048xbf16>
    %353 = vector.shape_cast %352 : vector<1x64x2048xbf16> to vector<64x2048xbf16>
    %cst_139 = arith.constant dense<0.000000e+00> : vector<16x2048xf32>
    %354 = tpu.matmul %351, %353, %cst_139 {dimension_numbers = #tpu.dot_dimension_numbers<[1], [0], [0], [1], [0, 0, 1, 1], [], []>} : vector<16x64xbf16>, vector<64x2048xbf16>, vector<16x2048xf32> -> vector<16x2048xf32>
    %355 = arith.addf %338, %354 : vector<16x2048xf32>
    %c7 = arith.constant 7 : index
    %c0_140 = arith.constant 0 : index
    %c0_141 = arith.constant 0 : index
    %356 = vector.load %arg5[%c7, %c0_140, %c0_141] : memref<8x1x64xf32, #tpu.memory_space<vmem>>, vector<1x1x64xf32>
    %357 = vector.shape_cast %356 : vector<1x1x64xf32> to vector<1x64xf32>
    %358 = vector.broadcast %357 : vector<1x64xf32> to vector<16x64xf32>
    %359 = arith.addf %234, %358 : vector<16x64xf32>
    %cst_142 = arith.constant 0.000000e+00 : f32
    %360 = vector.broadcast %cst_142 : f32 to vector<16x64xf32>
    %361 = arith.cmpf ogt, %359, %360 : vector<16x64xf32>
    %cst_143 = arith.constant 0.000000e+00 : f32
    %362 = vector.broadcast %cst_143 : f32 to vector<16x64xf32>
    %363 = arith.minimumf %359, %362 : vector<16x64xf32>
    %364 = math.exp %363 : vector<16x64xf32>
    %cst_144 = arith.constant 1.000000e+00 : f32
    %365 = vector.broadcast %cst_144 : f32 to vector<16x64xf32>
    %366 = arith.subf %364, %365 : vector<16x64xf32>
    %367 = arith.select %361, %359, %366 : vector<16x64xi1>, vector<16x64xf32>
    %368 = arith.truncf %367 : vector<16x64xf32> to vector<16x64xbf16>
    %c7_145 = arith.constant 7 : index
    %c0_146 = arith.constant 0 : index
    %c0_147 = arith.constant 0 : index
    %369 = vector.load %arg6[%c7_145, %c0_146, %c0_147] : memref<8x64x2048xbf16, #tpu.memory_space<vmem>>, vector<1x64x2048xbf16>
    %370 = vector.shape_cast %369 : vector<1x64x2048xbf16> to vector<64x2048xbf16>
    %cst_148 = arith.constant dense<0.000000e+00> : vector<16x2048xf32>
    %371 = tpu.matmul %368, %370, %cst_148 {dimension_numbers = #tpu.dot_dimension_numbers<[1], [0], [0], [1], [0, 0, 1, 1], [], []>} : vector<16x64xbf16>, vector<64x2048xbf16>, vector<16x2048xf32> -> vector<16x2048xf32>
    %372 = arith.addf %355, %371 : vector<16x2048xf32>
    %cst_149 = arith.constant 0.000000e+00 : f32
    %373 = vector.broadcast %cst_149 : f32 to vector<16x2048xf32>
    %374 = arith.maximumf %372, %373 : vector<16x2048xf32>
    %375 = vector.extract_strided_slice %374 {offsets = [0, 0], sizes = [16, 512], strides = [1, 1]} : vector<16x2048xf32> to vector<16x512xf32>
    %376 = vector.extract_strided_slice %374 {offsets = [0, 512], sizes = [16, 512], strides = [1, 1]} : vector<16x2048xf32> to vector<16x512xf32>
    %377 = vector.extract_strided_slice %374 {offsets = [0, 1024], sizes = [16, 512], strides = [1, 1]} : vector<16x2048xf32> to vector<16x512xf32>
    %378 = vector.extract_strided_slice %374 {offsets = [0, 1536], sizes = [16, 512], strides = [1, 1]} : vector<16x2048xf32> to vector<16x512xf32>
    %379 = arith.addf %375, %376 : vector<16x512xf32>
    %380 = arith.addf %379, %377 : vector<16x512xf32>
    %381 = arith.addf %380, %378 : vector<16x512xf32>
    %c0_150 = arith.constant 0 : index
    %c0_151 = arith.constant 0 : index
    %382 = vector.load %arg8[%c0_150, %c0_151] : memref<512x32xf32, #tpu.memory_space<vmem>>, vector<512x32xf32>
    %cst_152 = arith.constant dense<0.000000e+00> : vector<16x32xf32>
    %383 = tpu.matmul %381, %382, %cst_152 {dimension_numbers = #tpu.dot_dimension_numbers<[1], [0], [0], [1], [0, 0, 1, 1], [], []>} : vector<16x512xf32>, vector<512x32xf32>, vector<16x32xf32> -> vector<16x32xf32>
    %c0_153 = arith.constant 0 : index
    %c0_154 = arith.constant 0 : index
    %384 = vector.load %arg9[%c0_153, %c0_154] : memref<1x32xf32, #tpu.memory_space<vmem>>, vector<1x32xf32>
    %385 = vector.broadcast %384 : vector<1x32xf32> to vector<16x32xf32>
    %386 = arith.addf %383, %385 : vector<16x32xf32>
    %387 = arith.truncf %386 : vector<16x32xf32> to vector<16x32xbf16>
    %c0_155 = arith.constant 0 : index
    %c0_156 = arith.constant 0 : index
    %388 = vector.load %arg10[%c0_155, %c0_156] : memref<32x2048xbf16, #tpu.memory_space<vmem>>, vector<32x2048xbf16>
    %cst_157 = arith.constant dense<0.000000e+00> : vector<16x2048xf32>
    %389 = tpu.matmul %387, %388, %cst_157 {dimension_numbers = #tpu.dot_dimension_numbers<[1], [0], [0], [1], [0, 0, 1, 1], [], []>} : vector<16x32xbf16>, vector<32x2048xbf16>, vector<16x2048xf32> -> vector<16x2048xf32>
    %c0_158 = arith.constant 0 : index
    %c0_159 = arith.constant 0 : index
    %390 = vector.load %arg11[%c0_158, %c0_159] : memref<1x2048xf32, #tpu.memory_space<vmem>>, vector<1x2048xf32>
    %391 = vector.broadcast %390 : vector<1x2048xf32> to vector<16x2048xf32>
    %392 = arith.addf %389, %391 : vector<16x2048xf32>
    %393 = vector.extract_strided_slice %392 {offsets = [0, 0], sizes = [16, 512], strides = [1, 1]} : vector<16x2048xf32> to vector<16x512xf32>
    %394 = vector.extract_strided_slice %392 {offsets = [0, 512], sizes = [16, 512], strides = [1, 1]} : vector<16x2048xf32> to vector<16x512xf32>
    %395 = vector.extract_strided_slice %392 {offsets = [0, 1024], sizes = [16, 512], strides = [1, 1]} : vector<16x2048xf32> to vector<16x512xf32>
    %396 = vector.extract_strided_slice %392 {offsets = [0, 1536], sizes = [16, 512], strides = [1, 1]} : vector<16x2048xf32> to vector<16x512xf32>
    %397 = arith.maximumf %393, %394 : vector<16x512xf32>
    %398 = arith.maximumf %395, %396 : vector<16x512xf32>
    %399 = arith.maximumf %397, %398 : vector<16x512xf32>
    %400 = arith.subf %393, %399 : vector<16x512xf32>
    %401 = math.exp %400 : vector<16x512xf32>
    %402 = arith.subf %394, %399 : vector<16x512xf32>
    %403 = math.exp %402 : vector<16x512xf32>
    %404 = arith.subf %395, %399 : vector<16x512xf32>
    %405 = math.exp %404 : vector<16x512xf32>
    %406 = arith.subf %396, %399 : vector<16x512xf32>
    %407 = math.exp %406 : vector<16x512xf32>
    %408 = arith.addf %401, %403 : vector<16x512xf32>
    %409 = arith.addf %408, %405 : vector<16x512xf32>
    %410 = arith.addf %409, %407 : vector<16x512xf32>
    %cst_160 = arith.constant 1.000000e+00 : f32
    %411 = vector.broadcast %cst_160 : f32 to vector<16x512xf32>
    %412 = arith.divf %411, %410 : vector<16x512xf32>
    %413 = arith.mulf %401, %375 : vector<16x512xf32>
    %414 = arith.mulf %403, %376 : vector<16x512xf32>
    %415 = arith.addf %413, %414 : vector<16x512xf32>
    %416 = arith.mulf %405, %377 : vector<16x512xf32>
    %417 = arith.addf %415, %416 : vector<16x512xf32>
    %418 = arith.mulf %407, %378 : vector<16x512xf32>
    %419 = arith.addf %417, %418 : vector<16x512xf32>
    %420 = arith.mulf %419, %412 : vector<16x512xf32>
    %c0_161 = arith.constant 0 : index
    %c0_162 = arith.constant 0 : index
    %c0_163 = arith.constant 0 : index
    %421 = vector.load %arg16[%c0_161, %c0_162, %c0_163] : memref<1x16x512xf32, #tpu.memory_space<vmem>>, vector<1x16x512xf32>
    %422 = vector.shape_cast %421 : vector<1x16x512xf32> to vector<16x512xf32>
    %423 = vector.shape_cast %420 : vector<16x512xf32> to vector<1x16x512xf32>
    tpu.vector_store %arg16[%c0_161, %c0_162, %c0_163], %423 {strides = array<i32>} : memref<1x16x512xf32, #tpu.memory_space<vmem>>, vector<1x16x512xf32>,
    %424 = arith.truncf %420 : vector<16x512xf32> to vector<16x512xbf16>
    %c0_164 = arith.constant 0 : index
    %c0_165 = arith.constant 0 : index
    %425 = vector.load %arg12[%c0_164, %c0_165] : memref<512x512xbf16, #tpu.memory_space<vmem>>, vector<512x512xbf16>
    %cst_166 = arith.constant dense<0.000000e+00> : vector<16x512xf32>
    %426 = tpu.matmul %424, %425, %cst_166 {dimension_numbers = #tpu.dot_dimension_numbers<[1], [0], [0], [1], [0, 0, 1, 1], [], []>} : vector<16x512xbf16>, vector<512x512xbf16>, vector<16x512xf32> -> vector<16x512xf32>
    %c0_167 = arith.constant 0 : index
    %c0_168 = arith.constant 0 : index
    %427 = vector.load %arg13[%c0_167, %c0_168] : memref<512x16xf32, #tpu.memory_space<vmem>>, vector<512x16xf32>
    %cst_169 = arith.constant dense<0.000000e+00> : vector<16x16xf32>
    %428 = tpu.matmul %426, %427, %cst_169 {dimension_numbers = #tpu.dot_dimension_numbers<[1], [0], [0], [1], [0, 0, 1, 1], [], []>} : vector<16x512xf32>, vector<512x16xf32>, vector<16x16xf32> -> vector<16x16xf32>
    %429 = tpu.transpose %428, [1, 0] : vector<16x16xf32> -> vector<16x16xf32>
    %430 = vector.extract_strided_slice %429 {offsets = [8, 0], sizes = [8, 16], strides = [1, 1]} : vector<16x16xf32> to vector<8x16xf32>
    %431 = vector.extract_strided_slice %428 {offsets = [0, 0], sizes = [16, 1], strides = [1, 1]} : vector<16x16xf32> to vector<16x1xf32>
    %432 = vector.extract_strided_slice %430 {offsets = [0, 0], sizes = [1, 16], strides = [1, 1]} : vector<8x16xf32> to vector<1x16xf32>
    %433 = vector.broadcast %431 : vector<16x1xf32> to vector<16x16xf32>
    %434 = vector.broadcast %432 : vector<1x16xf32> to vector<16x16xf32>
    %435 = arith.addf %433, %434 : vector<16x16xf32>
    %cst_170 = arith.constant 0.000000e+00 : f32
    %436 = vector.broadcast %cst_170 : f32 to vector<16x16xf32>
    %437 = arith.cmpf ogt, %435, %436 : vector<16x16xf32>
    %cst_171 = arith.constant 2.000000e-01 : f32
    %438 = vector.broadcast %cst_171 : f32 to vector<16x16xf32>
    %439 = arith.mulf %438, %435 : vector<16x16xf32>
    %440 = arith.select %437, %435, %439 : vector<16x16xi1>, vector<16x16xf32>
    %cst_172 = arith.constant 0.000000e+00 : f32
    %441 = vector.broadcast %cst_172 : f32 to vector<16x16xf32>
    %442 = arith.cmpf ogt, %1, %441 : vector<16x16xf32>
    %cst_173 = arith.constant -1.000000e+30 : f32
    %443 = vector.broadcast %cst_173 : f32 to vector<16x16xf32>
    %444 = arith.select %442, %440, %443 : vector<16x16xi1>, vector<16x16xf32>
    %cst_174 = arith.constant dense<0xFF800000> : vector<16xf32>
    %445 = vector.multi_reduction <maximumf>, %444, %cst_174 [1] : vector<16x16xf32> to vector<16xf32>
    %446 = vector.shape_cast %445 : vector<16xf32> to vector<16x1xf32>
    %447 = vector.broadcast %446 : vector<16x1xf32> to vector<16x16xf32>
    %448 = arith.subf %440, %447 : vector<16x16xf32>
    %cst_175 = arith.constant 0.000000e+00 : f32
    %449 = vector.broadcast %cst_175 : f32 to vector<16x16xf32>
    %450 = arith.minimumf %448, %449 : vector<16x16xf32>
    %451 = math.exp %450 : vector<16x16xf32>
    %452 = arith.mulf %451, %1 : vector<16x16xf32>
    %cst_176 = arith.constant dense<0.000000e+00> : vector<16xf32>
    %453 = vector.multi_reduction <add>, %452, %cst_176 [1] : vector<16x16xf32> to vector<16xf32>
    %454 = vector.shape_cast %453 : vector<16xf32> to vector<16x1xf32>
    %455 = vector.broadcast %454 : vector<16x1xf32> to vector<16x16xf32>
    %456 = arith.divf %452, %455 : vector<16x16xf32>
    %457 = vector.extract_strided_slice %426 {offsets = [0, 0], sizes = [16, 64], strides = [1, 1]} : vector<16x512xf32> to vector<16x64xf32>
    %cst_177 = arith.constant dense<0.000000e+00> : vector<16x64xf32>
    %458 = tpu.matmul %456, %457, %cst_177 {dimension_numbers = #tpu.dot_dimension_numbers<[1], [0], [0], [1], [0, 0, 1, 1], [], []>} : vector<16x16xf32>, vector<16x64xf32>, vector<16x64xf32> -> vector<16x64xf32>
    %459 = vector.extract_strided_slice %428 {offsets = [0, 1], sizes = [16, 1], strides = [1, 1]} : vector<16x16xf32> to vector<16x1xf32>
    %460 = vector.extract_strided_slice %430 {offsets = [1, 0], sizes = [1, 16], strides = [1, 1]} : vector<8x16xf32> to vector<1x16xf32>
    %461 = vector.broadcast %459 : vector<16x1xf32> to vector<16x16xf32>
    %462 = vector.broadcast %460 : vector<1x16xf32> to vector<16x16xf32>
    %463 = arith.addf %461, %462 : vector<16x16xf32>
    %cst_178 = arith.constant 0.000000e+00 : f32
    %464 = vector.broadcast %cst_178 : f32 to vector<16x16xf32>
    %465 = arith.cmpf ogt, %463, %464 : vector<16x16xf32>
    %cst_179 = arith.constant 2.000000e-01 : f32
    %466 = vector.broadcast %cst_179 : f32 to vector<16x16xf32>
    %467 = arith.mulf %466, %463 : vector<16x16xf32>
    %468 = arith.select %465, %463, %467 : vector<16x16xi1>, vector<16x16xf32>
    %cst_180 = arith.constant 0.000000e+00 : f32
    %469 = vector.broadcast %cst_180 : f32 to vector<16x16xf32>
    %470 = arith.cmpf ogt, %1, %469 : vector<16x16xf32>
    %cst_181 = arith.constant -1.000000e+30 : f32
    %471 = vector.broadcast %cst_181 : f32 to vector<16x16xf32>
    %472 = arith.select %470, %468, %471 : vector<16x16xi1>, vector<16x16xf32>
    %cst_182 = arith.constant dense<0xFF800000> : vector<16xf32>
    %473 = vector.multi_reduction <maximumf>, %472, %cst_182 [1] : vector<16x16xf32> to vector<16xf32>
    %474 = vector.shape_cast %473 : vector<16xf32> to vector<16x1xf32>
    %475 = vector.broadcast %474 : vector<16x1xf32> to vector<16x16xf32>
    %476 = arith.subf %468, %475 : vector<16x16xf32>
    %cst_183 = arith.constant 0.000000e+00 : f32
    %477 = vector.broadcast %cst_183 : f32 to vector<16x16xf32>
    %478 = arith.minimumf %476, %477 : vector<16x16xf32>
    %479 = math.exp %478 : vector<16x16xf32>
    %480 = arith.mulf %479, %1 : vector<16x16xf32>
    %cst_184 = arith.constant dense<0.000000e+00> : vector<16xf32>
    %481 = vector.multi_reduction <add>, %480, %cst_184 [1] : vector<16x16xf32> to vector<16xf32>
    %482 = vector.shape_cast %481 : vector<16xf32> to vector<16x1xf32>
    %483 = vector.broadcast %482 : vector<16x1xf32> to vector<16x16xf32>
    %484 = arith.divf %480, %483 : vector<16x16xf32>
    %485 = vector.extract_strided_slice %426 {offsets = [0, 64], sizes = [16, 64], strides = [1, 1]} : vector<16x512xf32> to vector<16x64xf32>
    %cst_185 = arith.constant dense<0.000000e+00> : vector<16x64xf32>
    %486 = tpu.matmul %484, %485, %cst_185 {dimension_numbers = #tpu.dot_dimension_numbers<[1], [0], [0], [1], [0, 0, 1, 1], [], []>} : vector<16x16xf32>, vector<16x64xf32>, vector<16x64xf32> -> vector<16x64xf32>
    %487 = vector.extract_strided_slice %428 {offsets = [0, 2], sizes = [16, 1], strides = [1, 1]} : vector<16x16xf32> to vector<16x1xf32>
    %488 = vector.extract_strided_slice %430 {offsets = [2, 0], sizes = [1, 16], strides = [1, 1]} : vector<8x16xf32> to vector<1x16xf32>
    %489 = vector.broadcast %487 : vector<16x1xf32> to vector<16x16xf32>
    %490 = vector.broadcast %488 : vector<1x16xf32> to vector<16x16xf32>
    %491 = arith.addf %489, %490 : vector<16x16xf32>
    %cst_186 = arith.constant 0.000000e+00 : f32
    %492 = vector.broadcast %cst_186 : f32 to vector<16x16xf32>
    %493 = arith.cmpf ogt, %491, %492 : vector<16x16xf32>
    %cst_187 = arith.constant 2.000000e-01 : f32
    %494 = vector.broadcast %cst_187 : f32 to vector<16x16xf32>
    %495 = arith.mulf %494, %491 : vector<16x16xf32>
    %496 = arith.select %493, %491, %495 : vector<16x16xi1>, vector<16x16xf32>
    %cst_188 = arith.constant 0.000000e+00 : f32
    %497 = vector.broadcast %cst_188 : f32 to vector<16x16xf32>
    %498 = arith.cmpf ogt, %1, %497 : vector<16x16xf32>
    %cst_189 = arith.constant -1.000000e+30 : f32
    %499 = vector.broadcast %cst_189 : f32 to vector<16x16xf32>
    %500 = arith.select %498, %496, %499 : vector<16x16xi1>, vector<16x16xf32>
    %cst_190 = arith.constant dense<0xFF800000> : vector<16xf32>
    %501 = vector.multi_reduction <maximumf>, %500, %cst_190 [1] : vector<16x16xf32> to vector<16xf32>
    %502 = vector.shape_cast %501 : vector<16xf32> to vector<16x1xf32>
    %503 = vector.broadcast %502 : vector<16x1xf32> to vector<16x16xf32>
    %504 = arith.subf %496, %503 : vector<16x16xf32>
    %cst_191 = arith.constant 0.000000e+00 : f32
    %505 = vector.broadcast %cst_191 : f32 to vector<16x16xf32>
    %506 = arith.minimumf %504, %505 : vector<16x16xf32>
    %507 = math.exp %506 : vector<16x16xf32>
    %508 = arith.mulf %507, %1 : vector<16x16xf32>
    %cst_192 = arith.constant dense<0.000000e+00> : vector<16xf32>
    %509 = vector.multi_reduction <add>, %508, %cst_192 [1] : vector<16x16xf32> to vector<16xf32>
    %510 = vector.shape_cast %509 : vector<16xf32> to vector<16x1xf32>
    %511 = vector.broadcast %510 : vector<16x1xf32> to vector<16x16xf32>
    %512 = arith.divf %508, %511 : vector<16x16xf32>
    %513 = vector.extract_strided_slice %426 {offsets = [0, 128], sizes = [16, 64], strides = [1, 1]} : vector<16x512xf32> to vector<16x64xf32>
    %cst_193 = arith.constant dense<0.000000e+00> : vector<16x64xf32>
    %514 = tpu.matmul %512, %513, %cst_193 {dimension_numbers = #tpu.dot_dimension_numbers<[1], [0], [0], [1], [0, 0, 1, 1], [], []>} : vector<16x16xf32>, vector<16x64xf32>, vector<16x64xf32> -> vector<16x64xf32>
    %515 = vector.extract_strided_slice %428 {offsets = [0, 3], sizes = [16, 1], strides = [1, 1]} : vector<16x16xf32> to vector<16x1xf32>
    %516 = vector.extract_strided_slice %430 {offsets = [3, 0], sizes = [1, 16], strides = [1, 1]} : vector<8x16xf32> to vector<1x16xf32>
    %517 = vector.broadcast %515 : vector<16x1xf32> to vector<16x16xf32>
    %518 = vector.broadcast %516 : vector<1x16xf32> to vector<16x16xf32>
    %519 = arith.addf %517, %518 : vector<16x16xf32>
    %cst_194 = arith.constant 0.000000e+00 : f32
    %520 = vector.broadcast %cst_194 : f32 to vector<16x16xf32>
    %521 = arith.cmpf ogt, %519, %520 : vector<16x16xf32>
    %cst_195 = arith.constant 2.000000e-01 : f32
    %522 = vector.broadcast %cst_195 : f32 to vector<16x16xf32>
    %523 = arith.mulf %522, %519 : vector<16x16xf32>
    %524 = arith.select %521, %519, %523 : vector<16x16xi1>, vector<16x16xf32>
    %cst_196 = arith.constant 0.000000e+00 : f32
    %525 = vector.broadcast %cst_196 : f32 to vector<16x16xf32>
    %526 = arith.cmpf ogt, %1, %525 : vector<16x16xf32>
    %cst_197 = arith.constant -1.000000e+30 : f32
    %527 = vector.broadcast %cst_197 : f32 to vector<16x16xf32>
    %528 = arith.select %526, %524, %527 : vector<16x16xi1>, vector<16x16xf32>
    %cst_198 = arith.constant dense<0xFF800000> : vector<16xf32>
    %529 = vector.multi_reduction <maximumf>, %528, %cst_198 [1] : vector<16x16xf32> to vector<16xf32>
    %530 = vector.shape_cast %529 : vector<16xf32> to vector<16x1xf32>
    %531 = vector.broadcast %530 : vector<16x1xf32> to vector<16x16xf32>
    %532 = arith.subf %524, %531 : vector<16x16xf32>
    %cst_199 = arith.constant 0.000000e+00 : f32
    %533 = vector.broadcast %cst_199 : f32 to vector<16x16xf32>
    %534 = arith.minimumf %532, %533 : vector<16x16xf32>
    %535 = math.exp %534 : vector<16x16xf32>
    %536 = arith.mulf %535, %1 : vector<16x16xf32>
    %cst_200 = arith.constant dense<0.000000e+00> : vector<16xf32>
    %537 = vector.multi_reduction <add>, %536, %cst_200 [1] : vector<16x16xf32> to vector<16xf32>
    %538 = vector.shape_cast %537 : vector<16xf32> to vector<16x1xf32>
    %539 = vector.broadcast %538 : vector<16x1xf32> to vector<16x16xf32>
    %540 = arith.divf %536, %539 : vector<16x16xf32>
    %541 = vector.extract_strided_slice %426 {offsets = [0, 192], sizes = [16, 64], strides = [1, 1]} : vector<16x512xf32> to vector<16x64xf32>
    %cst_201 = arith.constant dense<0.000000e+00> : vector<16x64xf32>
    %542 = tpu.matmul %540, %541, %cst_201 {dimension_numbers = #tpu.dot_dimension_numbers<[1], [0], [0], [1], [0, 0, 1, 1], [], []>} : vector<16x16xf32>, vector<16x64xf32>, vector<16x64xf32> -> vector<16x64xf32>
    %543 = vector.extract_strided_slice %428 {offsets = [0, 4], sizes = [16, 1], strides = [1, 1]} : vector<16x16xf32> to vector<16x1xf32>
    %544 = vector.extract_strided_slice %430 {offsets = [4, 0], sizes = [1, 16], strides = [1, 1]} : vector<8x16xf32> to vector<1x16xf32>
    %545 = vector.broadcast %543 : vector<16x1xf32> to vector<16x16xf32>
    %546 = vector.broadcast %544 : vector<1x16xf32> to vector<16x16xf32>
    %547 = arith.addf %545, %546 : vector<16x16xf32>
    %cst_202 = arith.constant 0.000000e+00 : f32
    %548 = vector.broadcast %cst_202 : f32 to vector<16x16xf32>
    %549 = arith.cmpf ogt, %547, %548 : vector<16x16xf32>
    %cst_203 = arith.constant 2.000000e-01 : f32
    %550 = vector.broadcast %cst_203 : f32 to vector<16x16xf32>
    %551 = arith.mulf %550, %547 : vector<16x16xf32>
    %552 = arith.select %549, %547, %551 : vector<16x16xi1>, vector<16x16xf32>
    %cst_204 = arith.constant 0.000000e+00 : f32
    %553 = vector.broadcast %cst_204 : f32 to vector<16x16xf32>
    %554 = arith.cmpf ogt, %1, %553 : vector<16x16xf32>
    %cst_205 = arith.constant -1.000000e+30 : f32
    %555 = vector.broadcast %cst_205 : f32 to vector<16x16xf32>
    %556 = arith.select %554, %552, %555 : vector<16x16xi1>, vector<16x16xf32>
    %cst_206 = arith.constant dense<0xFF800000> : vector<16xf32>
    %557 = vector.multi_reduction <maximumf>, %556, %cst_206 [1] : vector<16x16xf32> to vector<16xf32>
    %558 = vector.shape_cast %557 : vector<16xf32> to vector<16x1xf32>
    %559 = vector.broadcast %558 : vector<16x1xf32> to vector<16x16xf32>
    %560 = arith.subf %552, %559 : vector<16x16xf32>
    %cst_207 = arith.constant 0.000000e+00 : f32
    %561 = vector.broadcast %cst_207 : f32 to vector<16x16xf32>
    %562 = arith.minimumf %560, %561 : vector<16x16xf32>
    %563 = math.exp %562 : vector<16x16xf32>
    %564 = arith.mulf %563, %1 : vector<16x16xf32>
    %cst_208 = arith.constant dense<0.000000e+00> : vector<16xf32>
    %565 = vector.multi_reduction <add>, %564, %cst_208 [1] : vector<16x16xf32> to vector<16xf32>
    %566 = vector.shape_cast %565 : vector<16xf32> to vector<16x1xf32>
    %567 = vector.broadcast %566 : vector<16x1xf32> to vector<16x16xf32>
    %568 = arith.divf %564, %567 : vector<16x16xf32>
    %569 = vector.extract_strided_slice %426 {offsets = [0, 256], sizes = [16, 64], strides = [1, 1]} : vector<16x512xf32> to vector<16x64xf32>
    %cst_209 = arith.constant dense<0.000000e+00> : vector<16x64xf32>
    %570 = tpu.matmul %568, %569, %cst_209 {dimension_numbers = #tpu.dot_dimension_numbers<[1], [0], [0], [1], [0, 0, 1, 1], [], []>} : vector<16x16xf32>, vector<16x64xf32>, vector<16x64xf32> -> vector<16x64xf32>
    %571 = vector.extract_strided_slice %428 {offsets = [0, 5], sizes = [16, 1], strides = [1, 1]} : vector<16x16xf32> to vector<16x1xf32>
    %572 = vector.extract_strided_slice %430 {offsets = [5, 0], sizes = [1, 16], strides = [1, 1]} : vector<8x16xf32> to vector<1x16xf32>
    %573 = vector.broadcast %571 : vector<16x1xf32> to vector<16x16xf32>
    %574 = vector.broadcast %572 : vector<1x16xf32> to vector<16x16xf32>
    %575 = arith.addf %573, %574 : vector<16x16xf32>
    %cst_210 = arith.constant 0.000000e+00 : f32
    %576 = vector.broadcast %cst_210 : f32 to vector<16x16xf32>
    %577 = arith.cmpf ogt, %575, %576 : vector<16x16xf32>
    %cst_211 = arith.constant 2.000000e-01 : f32
    %578 = vector.broadcast %cst_211 : f32 to vector<16x16xf32>
    %579 = arith.mulf %578, %575 : vector<16x16xf32>
    %580 = arith.select %577, %575, %579 : vector<16x16xi1>, vector<16x16xf32>
    %cst_212 = arith.constant 0.000000e+00 : f32
    %581 = vector.broadcast %cst_212 : f32 to vector<16x16xf32>
    %582 = arith.cmpf ogt, %1, %581 : vector<16x16xf32>
    %cst_213 = arith.constant -1.000000e+30 : f32
    %583 = vector.broadcast %cst_213 : f32 to vector<16x16xf32>
    %584 = arith.select %582, %580, %583 : vector<16x16xi1>, vector<16x16xf32>
    %cst_214 = arith.constant dense<0xFF800000> : vector<16xf32>
    %585 = vector.multi_reduction <maximumf>, %584, %cst_214 [1] : vector<16x16xf32> to vector<16xf32>
    %586 = vector.shape_cast %585 : vector<16xf32> to vector<16x1xf32>
    %587 = vector.broadcast %586 : vector<16x1xf32> to vector<16x16xf32>
    %588 = arith.subf %580, %587 : vector<16x16xf32>
    %cst_215 = arith.constant 0.000000e+00 : f32
    %589 = vector.broadcast %cst_215 : f32 to vector<16x16xf32>
    %590 = arith.minimumf %588, %589 : vector<16x16xf32>
    %591 = math.exp %590 : vector<16x16xf32>
    %592 = arith.mulf %591, %1 : vector<16x16xf32>
    %cst_216 = arith.constant dense<0.000000e+00> : vector<16xf32>
    %593 = vector.multi_reduction <add>, %592, %cst_216 [1] : vector<16x16xf32> to vector<16xf32>
    %594 = vector.shape_cast %593 : vector<16xf32> to vector<16x1xf32>
    %595 = vector.broadcast %594 : vector<16x1xf32> to vector<16x16xf32>
    %596 = arith.divf %592, %595 : vector<16x16xf32>
    %597 = vector.extract_strided_slice %426 {offsets = [0, 320], sizes = [16, 64], strides = [1, 1]} : vector<16x512xf32> to vector<16x64xf32>
    %cst_217 = arith.constant dense<0.000000e+00> : vector<16x64xf32>
    %598 = tpu.matmul %596, %597, %cst_217 {dimension_numbers = #tpu.dot_dimension_numbers<[1], [0], [0], [1], [0, 0, 1, 1], [], []>} : vector<16x16xf32>, vector<16x64xf32>, vector<16x64xf32> -> vector<16x64xf32>
    %599 = vector.extract_strided_slice %428 {offsets = [0, 6], sizes = [16, 1], strides = [1, 1]} : vector<16x16xf32> to vector<16x1xf32>
    %600 = vector.extract_strided_slice %430 {offsets = [6, 0], sizes = [1, 16], strides = [1, 1]} : vector<8x16xf32> to vector<1x16xf32>
    %601 = vector.broadcast %599 : vector<16x1xf32> to vector<16x16xf32>
    %602 = vector.broadcast %600 : vector<1x16xf32> to vector<16x16xf32>
    %603 = arith.addf %601, %602 : vector<16x16xf32>
    %cst_218 = arith.constant 0.000000e+00 : f32
    %604 = vector.broadcast %cst_218 : f32 to vector<16x16xf32>
    %605 = arith.cmpf ogt, %603, %604 : vector<16x16xf32>
    %cst_219 = arith.constant 2.000000e-01 : f32
    %606 = vector.broadcast %cst_219 : f32 to vector<16x16xf32>
    %607 = arith.mulf %606, %603 : vector<16x16xf32>
    %608 = arith.select %605, %603, %607 : vector<16x16xi1>, vector<16x16xf32>
    %cst_220 = arith.constant 0.000000e+00 : f32
    %609 = vector.broadcast %cst_220 : f32 to vector<16x16xf32>
    %610 = arith.cmpf ogt, %1, %609 : vector<16x16xf32>
    %cst_221 = arith.constant -1.000000e+30 : f32
    %611 = vector.broadcast %cst_221 : f32 to vector<16x16xf32>
    %612 = arith.select %610, %608, %611 : vector<16x16xi1>, vector<16x16xf32>
    %cst_222 = arith.constant dense<0xFF800000> : vector<16xf32>
    %613 = vector.multi_reduction <maximumf>, %612, %cst_222 [1] : vector<16x16xf32> to vector<16xf32>
    %614 = vector.shape_cast %613 : vector<16xf32> to vector<16x1xf32>
    %615 = vector.broadcast %614 : vector<16x1xf32> to vector<16x16xf32>
    %616 = arith.subf %608, %615 : vector<16x16xf32>
    %cst_223 = arith.constant 0.000000e+00 : f32
    %617 = vector.broadcast %cst_223 : f32 to vector<16x16xf32>
    %618 = arith.minimumf %616, %617 : vector<16x16xf32>
    %619 = math.exp %618 : vector<16x16xf32>
    %620 = arith.mulf %619, %1 : vector<16x16xf32>
    %cst_224 = arith.constant dense<0.000000e+00> : vector<16xf32>
    %621 = vector.multi_reduction <add>, %620, %cst_224 [1] : vector<16x16xf32> to vector<16xf32>
    %622 = vector.shape_cast %621 : vector<16xf32> to vector<16x1xf32>
    %623 = vector.broadcast %622 : vector<16x1xf32> to vector<16x16xf32>
    %624 = arith.divf %620, %623 : vector<16x16xf32>
    %625 = vector.extract_strided_slice %426 {offsets = [0, 384], sizes = [16, 64], strides = [1, 1]} : vector<16x512xf32> to vector<16x64xf32>
    %cst_225 = arith.constant dense<0.000000e+00> : vector<16x64xf32>
    %626 = tpu.matmul %624, %625, %cst_225 {dimension_numbers = #tpu.dot_dimension_numbers<[1], [0], [0], [1], [0, 0, 1, 1], [], []>} : vector<16x16xf32>, vector<16x64xf32>, vector<16x64xf32> -> vector<16x64xf32>
    %627 = vector.extract_strided_slice %428 {offsets = [0, 7], sizes = [16, 1], strides = [1, 1]} : vector<16x16xf32> to vector<16x1xf32>
    %628 = vector.extract_strided_slice %430 {offsets = [7, 0], sizes = [1, 16], strides = [1, 1]} : vector<8x16xf32> to vector<1x16xf32>
    %629 = vector.broadcast %627 : vector<16x1xf32> to vector<16x16xf32>
    %630 = vector.broadcast %628 : vector<1x16xf32> to vector<16x16xf32>
    %631 = arith.addf %629, %630 : vector<16x16xf32>
    %cst_226 = arith.constant 0.000000e+00 : f32
    %632 = vector.broadcast %cst_226 : f32 to vector<16x16xf32>
    %633 = arith.cmpf ogt, %631, %632 : vector<16x16xf32>
    %cst_227 = arith.constant 2.000000e-01 : f32
    %634 = vector.broadcast %cst_227 : f32 to vector<16x16xf32>
    %635 = arith.mulf %634, %631 : vector<16x16xf32>
    %636 = arith.select %633, %631, %635 : vector<16x16xi1>, vector<16x16xf32>
    %cst_228 = arith.constant 0.000000e+00 : f32
    %637 = vector.broadcast %cst_228 : f32 to vector<16x16xf32>
    %638 = arith.cmpf ogt, %1, %637 : vector<16x16xf32>
    %cst_229 = arith.constant -1.000000e+30 : f32
    %639 = vector.broadcast %cst_229 : f32 to vector<16x16xf32>
    %640 = arith.select %638, %636, %639 : vector<16x16xi1>, vector<16x16xf32>
    %cst_230 = arith.constant dense<0xFF800000> : vector<16xf32>
    %641 = vector.multi_reduction <maximumf>, %640, %cst_230 [1] : vector<16x16xf32> to vector<16xf32>
    %642 = vector.shape_cast %641 : vector<16xf32> to vector<16x1xf32>
    %643 = vector.broadcast %642 : vector<16x1xf32> to vector<16x16xf32>
    %644 = arith.subf %636, %643 : vector<16x16xf32>
    %cst_231 = arith.constant 0.000000e+00 : f32
    %645 = vector.broadcast %cst_231 : f32 to vector<16x16xf32>
    %646 = arith.minimumf %644, %645 : vector<16x16xf32>
    %647 = math.exp %646 : vector<16x16xf32>
    %648 = arith.mulf %647, %1 : vector<16x16xf32>
    %cst_232 = arith.constant dense<0.000000e+00> : vector<16xf32>
    %649 = vector.multi_reduction <add>, %648, %cst_232 [1] : vector<16x16xf32> to vector<16xf32>
    %650 = vector.shape_cast %649 : vector<16xf32> to vector<16x1xf32>
    %651 = vector.broadcast %650 : vector<16x1xf32> to vector<16x16xf32>
    %652 = arith.divf %648, %651 : vector<16x16xf32>
    %653 = vector.extract_strided_slice %426 {offsets = [0, 448], sizes = [16, 64], strides = [1, 1]} : vector<16x512xf32> to vector<16x64xf32>
    %cst_233 = arith.constant dense<0.000000e+00> : vector<16x64xf32>
    %654 = tpu.matmul %652, %653, %cst_233 {dimension_numbers = #tpu.dot_dimension_numbers<[1], [0], [0], [1], [0, 0, 1, 1], [], []>} : vector<16x16xf32>, vector<16x64xf32>, vector<16x64xf32> -> vector<16x64xf32>
    %655 = arith.addf %458, %486 : vector<16x64xf32>
    %656 = arith.addf %655, %514 : vector<16x64xf32>
    %657 = arith.addf %656, %542 : vector<16x64xf32>
    %658 = arith.addf %657, %570 : vector<16x64xf32>
    %659 = arith.addf %658, %598 : vector<16x64xf32>
    %660 = arith.addf %659, %626 : vector<16x64xf32>
    %661 = arith.addf %660, %654 : vector<16x64xf32>
    %cst_234 = arith.constant 1.250000e-01 : f32
    %662 = vector.broadcast %cst_234 : f32 to vector<16x64xf32>
    %663 = arith.mulf %661, %662 : vector<16x64xf32>
    %c0_235 = arith.constant 0 : index
    %c0_236 = arith.constant 0 : index
    %664 = vector.load %arg14[%c0_235, %c0_236] : memref<1x64xf32, #tpu.memory_space<vmem>>, vector<1x64xf32>
    %665 = vector.broadcast %664 : vector<1x64xf32> to vector<16x64xf32>
    %666 = arith.addf %663, %665 : vector<16x64xf32>
    %cst_237 = arith.constant dense<0xFF800000> : vector<16xf32>
    %667 = vector.multi_reduction <maximumf>, %666, %cst_237 [1] : vector<16x64xf32> to vector<16xf32>
    %668 = vector.shape_cast %667 : vector<16xf32> to vector<16x1xf32>
    %669 = vector.broadcast %668 : vector<16x1xf32> to vector<16x64xf32>
    %670 = arith.subf %666, %669 : vector<16x64xf32>
    %671 = math.exp %670 : vector<16x64xf32>
    %cst_238 = arith.constant dense<0.000000e+00> : vector<16xf32>
    %672 = vector.multi_reduction <add>, %671, %cst_238 [1] : vector<16x64xf32> to vector<16xf32>
    %673 = vector.shape_cast %672 : vector<16xf32> to vector<16x1xf32>
    %674 = math.log %673 : vector<16x1xf32>
    %675 = vector.broadcast %674 : vector<16x1xf32> to vector<16x64xf32>
    %676 = arith.subf %670, %675 : vector<16x64xf32>
    %c0_239 = arith.constant 0 : index
    %c0_240 = arith.constant 0 : index
    %c0_241 = arith.constant 0 : index
    %677 = vector.load %arg15[%c0_239, %c0_240, %c0_241] : memref<1x16x64xf32, #tpu.memory_space<vmem>>, vector<1x16x64xf32>
    %678 = vector.shape_cast %677 : vector<1x16x64xf32> to vector<16x64xf32>
    %679 = vector.shape_cast %676 : vector<16x64xf32> to vector<1x16x64xf32>
    tpu.vector_store %arg15[%c0_239, %c0_240, %c0_241], %679 {strides = array<i32>} : memref<1x16x64xf32, #tpu.memory_space<vmem>>, vector<1x16x64xf32>,
    return
  }
  func.func @transform_0(%arg0: i32) -> (i32, i32, i32) {
    %c0_i32 = arith.constant 0 : i32
    %c0_i32_0 = arith.constant 0 : i32
    %c0_i32_1 = arith.constant 0 : i32
    return %arg0, %c0_i32, %c0_i32_0 : i32, i32, i32
  }
  func.func @transform_1(%arg0: i32) -> (i32, i32, i32) {
    %c0_i32 = arith.constant 0 : i32
    %c0_i32_0 = arith.constant 0 : i32
    %c0_i32_1 = arith.constant 0 : i32
    return %arg0, %c0_i32, %c0_i32_0 : i32, i32, i32
  }
  func.func @transform_2(%arg0: i32) -> (i32, i32) {
    %c0_i32 = arith.constant 0 : i32
    %c0_i32_0 = arith.constant 0 : i32
    %c0_i32_1 = arith.constant 0 : i32
    return %c0_i32, %c0_i32_0 : i32, i32
  }
  func.func @transform_3(%arg0: i32) -> (i32, i32) {
    %c0_i32 = arith.constant 0 : i32
    %c0_i32_0 = arith.constant 0 : i32
    %c0_i32_1 = arith.constant 0 : i32
    return %c0_i32, %c0_i32_0 : i32, i32
  }
  func.func @transform_4(%arg0: i32) -> (i32, i32, i32) {
    %c0_i32 = arith.constant 0 : i32
    %c0_i32_0 = arith.constant 0 : i32
    %c0_i32_1 = arith.constant 0 : i32
    %c0_i32_2 = arith.constant 0 : i32
    return %c0_i32, %c0_i32_0, %c0_i32_1 : i32, i32, i32
  }
  func.func @transform_5(%arg0: i32) -> (i32, i32, i32) {
    %c0_i32 = arith.constant 0 : i32
    %c0_i32_0 = arith.constant 0 : i32
    %c0_i32_1 = arith.constant 0 : i32
    %c0_i32_2 = arith.constant 0 : i32
    return %c0_i32, %c0_i32_0, %c0_i32_1 : i32, i32, i32
  }
  func.func @transform_6(%arg0: i32) -> (i32, i32) {
    %c0_i32 = arith.constant 0 : i32
    %c0_i32_0 = arith.constant 0 : i32
    %c0_i32_1 = arith.constant 0 : i32
    return %c0_i32, %c0_i32_0 : i32, i32
  }
  func.func @transform_7(%arg0: i32) -> (i32, i32) {
    %c0_i32 = arith.constant 0 : i32
    %c0_i32_0 = arith.constant 0 : i32
    %c0_i32_1 = arith.constant 0 : i32
    return %c0_i32, %c0_i32_0 : i32, i32
  }
  func.func @transform_8(%arg0: i32) -> (i32, i32) {
    %c0_i32 = arith.constant 0 : i32
    %c0_i32_0 = arith.constant 0 : i32
    %c0_i32_1 = arith.constant 0 : i32
    return %c0_i32, %c0_i32_0 : i32, i32
  }
  func.func @transform_9(%arg0: i32) -> (i32, i32) {
    %c0_i32 = arith.constant 0 : i32
    %c0_i32_0 = arith.constant 0 : i32
    %c0_i32_1 = arith.constant 0 : i32
    return %c0_i32, %c0_i32_0 : i32, i32
  }
  func.func @transform_10(%arg0: i32) -> (i32, i32) {
    %c0_i32 = arith.constant 0 : i32
    %c0_i32_0 = arith.constant 0 : i32
    %c0_i32_1 = arith.constant 0 : i32
    return %c0_i32, %c0_i32_0 : i32, i32
  }
  func.func @transform_11(%arg0: i32) -> (i32, i32) {
    %c0_i32 = arith.constant 0 : i32
    %c0_i32_0 = arith.constant 0 : i32
    %c0_i32_1 = arith.constant 0 : i32
    return %c0_i32, %c0_i32_0 : i32, i32
  }
  func.func @transform_12(%arg0: i32) -> (i32, i32) {
    %c0_i32 = arith.constant 0 : i32
    %c0_i32_0 = arith.constant 0 : i32
    %c0_i32_1 = arith.constant 0 : i32
    return %c0_i32, %c0_i32_0 : i32, i32
  }
  func.func @transform_13(%arg0: i32) -> (i32, i32) {
    %c0_i32 = arith.constant 0 : i32
    %c0_i32_0 = arith.constant 0 : i32
    %c0_i32_1 = arith.constant 0 : i32
    return %c0_i32, %c0_i32_0 : i32, i32
  }
  func.func @transform_14(%arg0: i32) -> (i32, i32, i32) {
    %c0_i32 = arith.constant 0 : i32
    %c0_i32_0 = arith.constant 0 : i32
    %c0_i32_1 = arith.constant 0 : i32
    return %arg0, %c0_i32, %c0_i32_0 : i32, i32, i32
  }
  func.func @transform_15(%arg0: i32) -> (i32, i32, i32) {
    %c0_i32 = arith.constant 0 : i32
    %c0_i32_0 = arith.constant 0 : i32
    %c0_i32_1 = arith.constant 0 : i32
    return %arg0, %c0_i32, %c0_i32_0 : i32, i32, i32
  }
}

</mosaic_0001>

<bundles_post_ra>
// kernel: tpu_custom_call.1
= control target key start
LH: loop header
LB: loop body
LE: loop exit
PB: predicated region body
PF: predicated region fallthrough
CT: control target
= control target key end

     0   :  { %s17870_s0 = inlined_call_operand.hbm [shape: f32[2,16,32], index: 0, kind: input, shape index: {}]   ;;  %s17871_s1 = inlined_call_operand.hbm [shape: f32[2,16,16], index: 1, kind: input, shape index: {}]   ;;  %s17872_s2 = inlined_call_operand.hbm [shape: bf16[32,512], index: 2, kind: input, shape index: {}]   ;;  %s17873_s3 = inlined_call_operand.vmem [shape: f32[512,16], index: 3, kind: input, shape index: {}]   ;;  %s17874_s4 = inlined_call_operand.hbm [shape: f32[8,1,64], index: 4, kind: input, shape index: {}]   ;;  %s17875_s5 = inlined_call_operand.hbm [shape: bf16[8,64,2048], index: 5, kind: input, shape index: {}]   ;;  %s17876_s6 = inlined_call_operand.hbm [shape: f32[1,2048], index: 6, kind: input, shape index: {}]   ;;  %s17877_s7 = inlined_call_operand.vmem [shape: f32[512,32], index: 7, kind: input, shape index: {}]   ;;  %s17878_s8 = inlined_call_operand.hbm [shape: f32[1,32], index: 8, kind: input, shape index: {}]   ;;  %s17879_s9 = inlined_call_operand.hbm [shape: bf16[32,2048], index: 9, kind: input, shape index: {}]   ;;  %s17880_s10 = inlined_call_operand.hbm [shape: f32[1,2048], index: 10, kind: input, shape index: {}]   ;;  %s17881_s11 = inlined_call_operand.hbm [shape: bf16[512,512], index: 11, kind: input, shape index: {}]   ;;  %s17882_s12 = inlined_call_operand.vmem [shape: f32[512,16], index: 12, kind: input, shape index: {}]   ;;  %s17883_s13 = inlined_call_operand.hbm [shape: f32[1,64], index: 13, kind: input, shape index: {}]   ;;  %s17884_s14 = inlined_call_operand.hbm [shape: f32[2,16,64], index: 14, kind: output, shape index: {0}]   ;;  %s17885_s15 = inlined_call_operand.hbm [shape: f32[2,16,512], index: 15, kind: output, shape index: {1}]  }
   0x1   :  { %17980 = sst [smem:[#allocation66_spill]] %s17870_s0 }
   0x2   :  { %17981 = sst [smem:[#allocation67_spill]] %s17871_s1 }
   0x3   :  { %17982 = sst [smem:[#allocation68_spill]] %s17872_s2 }
   0x4   :  { %17983 = sst [smem:[#allocation69_spill]] %s17873_s3 }
   0x5   :  { %17984 = sst [smem:[#allocation70_spill]] %s17874_s4 }
   0x6   :  { %17985 = sst [smem:[#allocation71_spill]] %s17875_s5 }
   0x7   :  { %17986 = sst [smem:[#allocation72_spill]] %s17876_s6 }
   0x8   :  { %17987 = sst [smem:[#allocation73_spill]] %s17877_s7 }
   0x9   :  { %17988 = sst [smem:[#allocation74_spill]] %s17878_s8 }
   0xa   :  { %17989 = sst [smem:[#allocation75_spill]] %s17879_s9 }
   0xb   :  { %17990 = sst [smem:[#allocation76_spill]] %s17882_s12 }
   0xc   :  { %17991 = sst [smem:[#allocation77_spill]] %s17884_s14 }
   0xd   :  { %17992 = sst [smem:[#allocation78_spill]] %s17885_s15 }
   0xe   :  { %21 = vsyncpa [#allocation3], 0 }
   0xf   :  { %23 = vsyncpa [#allocation3 + $0x1], 0 }
  0x10   :  { %24 = vsyncpa [#allocation6], 0 }
  0x11   :  { %26 = vsyncpa [#allocation6 + $0x1], 0 }
  0x12   :  { %27 = vsyncpa [#allocation9], 0 }
  0x13   :  { %28 = vsyncpa [#allocation12], 0 }
  0x14   :  { %29 = vsyncpa [#allocation15], 0 }
  0x15   :  { %30 = vsyncpa [#allocation18], 0 }
  0x16   :  { %31 = vsyncpa [#allocation4], 0 }
  0x17   :  { %33 = vsyncpa [#allocation4 + $0x1], 0 }
  0x18   :  { %34 = vsyncpa [#allocation22], 0 }
  0x19   :  { %36 = vsyncpa [#allocation22 + $0x1], 0  ;;  %s15234_s18 = smov 0   ;;  %s15236_s19 = smov 0  }
  0x1a   :  { %s15238_s20 = smov 0   ;;  %s15240_s21 = smov 0  }
  0x1b LB: > { %s15121_s22 = smov [#allocation7]   ;;  %s15255_s24 = sadd.s32 4294967295, %s15119_s21   ;;  %s15119_s21 = sphi %s15240_s21, %s18155_s21   ;;  %s15115_s20 = sphi %s15238_s20, %s18154_s20   ;;  %s15111_s19 = sphi %s15236_s19, %s18153_s19   ;;  %s15107_s18 = sphi %s15234_s18, %s18152_s18  }
  0x1c   : > { %s415_s23 = sshll.u32 %s15121_s22, 4  ;;  %p12195_p0 = scmp.ge.s32.totalorder %s15119_s21, 1  ;;  %s15260_s23 = int_to_ptr.vmem [resolvable:$true] %s415_s23 }
  0x1d   : > { %p17893_p1 = scmp.eq.s32.totalorder %s15255_s24, 0  ;;  %p403_p2 = scmp.lt.s32.totalorder %s15119_s21, 3 }
  0x1e   : > { %s15122_s26 = smov [#allocation8]   ;;  %s15123_s29 = smov [#allocation11]  }
  0x1f   : > { %p15262_p3 = pnand %p12195_p0, %p403_p2  ;;  %s431_s27 = sshll.u32 %s15122_s26, 4  ;;  %s15275_s27 = int_to_ptr.vmem [resolvable:$true] %s431_s27 }
  0x20   : > { %s15277_s30 = sshll.u32 %s15123_s29, 4  ;;  %s17996_s2 = sld [smem:[#allocation68_spill]]  ;;  %s459_s30 = int_to_ptr.vmem [resolvable:$true] %s15277_s30 }
  0x21   : > { %s17993_s25 = scalar_select %p15262_p3, 1, 0 }
  0x22   : > { %p14032_p5 = pneg %p15262_p3 }
  0x23   : > { %17994 = sst [smem:[#allocation32_spill]] %s17993_s25 }
  0x24   : > { %p15271_p6 = pnand %p14032_p5, %p17893_p1 }
  0x26   : > { %s14685_s22 = scalar_lea.hbm %s17996_s2, 1024  ;;  %p15287_p8 = pneg %p15271_p6 }
  0x27   : > { %p14686_p7 = scmp.ne.s32.totalorder %s17996_s2, %s14685_s22  ;;  %p14692_p11 = scmp.lt.u32.totalorder %s14685_s22, %s17996_s2 }
  0x29   : > { %p14688_p9 = pnand %p15287_p8, %p14686_p7 }
  0x2b   : > { %p14689_p10 = pneg %p14688_p9 }
  0x2d   : > { %p14694_p12 = pnand %p14692_p11, %p14689_p10 }
  0x2f   : > { %14697 = shalt.err (!%p14694_p12)
}
  0x30   : > { %s14698_s14 = scalar_lea.vmem %s15260_s23, 1024  ;;  %p14706_p5 = scmp.lt.s32.totalorder %s15260_s23, %s15260_s23 }
  0x31   : > { %p14699_p13 = scmp.ne.s32.totalorder %s15260_s23, %s14698_s14  ;;  %p14707_p4 = scmp.lt.s32.totalorder %s14698_s14, %s14698_s14 }
  0x33   : > { %p14701_p0 = pnand %p14699_p13, %p15287_p8  ;;  %p14708_p7 = por %p14707_p4, %p14706_p5 }
  0x35   : > { %p14702_p2 = pneg %p14701_p0 }
  0x37   : > { %p14709_p9 = pnand %p14708_p7, %p14702_p2 }
  0x39   : > { %14712 = shalt.err (!%p14709_p9)
}
  0x3a   : > { %s17895_s15 = smov 256   ;;  %s15125_s12 = smov 16  }
  0x3b   : > { %14035 = dma.hbm_to_vmem [thread:$0]  (!%p15271_p6), %s17996_s2, 1024, %s15260_s23, [#allocation6], %s17895_s15, %s17895_s15, %s15125_s12  }
  0x3c   : > { %s17998_s4 = sld [smem:[#allocation70_spill]] }
  0x42   : > { %s14713_s14 = scalar_lea.hbm %s17998_s4, 128 }
  0x43   : > { %p14714_p4 = scmp.ne.s32.totalorder %s17998_s4, %s14713_s14  ;;  %p14720_p12 = scmp.lt.u32.totalorder %s14713_s14, %s17998_s4 }
  0x45   : > { %p14716_p10 = pnand %p14714_p4, %p15287_p8 }
  0x47   : > { %p14717_p11 = pneg %p14716_p10 }
  0x49   : > { %p14722_p13 = pnand %p14720_p12, %p14717_p11 }
  0x4b   : > { %14725 = shalt.err (!%p14722_p13)
}
  0x4c   : > { %s14726_s23 = scalar_lea.vmem %s15275_s27, 128  ;;  %p14734_p7 = scmp.lt.s32.totalorder %s15275_s27, %s15275_s27 }
  0x4d   : > { %p14727_p0 = scmp.ne.s32.totalorder %s15275_s27, %s14726_s23  ;;  %p14735_p9 = scmp.lt.s32.totalorder %s14726_s23, %s14726_s23 }
  0x4f   : > { %p14729_p2 = pnand %p14727_p0, %p15287_p8  ;;  %p14736_p4 = por %p14735_p9, %p14734_p7 }
  0x51   : > { %p14730_p5 = pneg %p14729_p2 }
  0x53   : > { %p14737_p10 = pnand %p14736_p4, %p14730_p5 }
  0x55   : > { %14740 = shalt.err (!%p14737_p10)
}
  0x56   : > { %s15126_s3 = smov 1   ;;  %s17999_s6 = sld [smem:[#allocation72_spill]] }
  0x57   : > { %14038 = dma.hbm_to_vmem [thread:$0]  (!%p15271_p6), %s17998_s4, 128, %s15275_s27, [#allocation9], %s15125_s12, %s15125_s12, %s15126_s3  }
  0x5c   : > { %s14741_s17 = scalar_lea.hbm %s17999_s6, 256 }
  0x5d   : > { %p14742_p11 = scmp.ne.s32.totalorder %s17999_s6, %s14741_s17  ;;  %p14748_p0 = scmp.lt.u32.totalorder %s14741_s17, %s17999_s6 }
  0x5f   : > { %p14744_p12 = pnand %p14742_p11, %p15287_p8 }
  0x61   : > { %p14745_p13 = pneg %p14744_p12 }
  0x63   : > { %p14750_p2 = pnand %p14748_p0, %p14745_p13 }
  0x65   : > { %14753 = shalt.err (!%p14750_p2)
}
  0x66   : > { %s14754_s1 = scalar_lea.vmem %s459_s30, 256  ;;  %p14762_p4 = scmp.lt.s32.totalorder %s459_s30, %s459_s30 }
  0x67   : > { %p14755_p5 = scmp.ne.s32.totalorder %s459_s30, %s14754_s1  ;;  %p14763_p10 = scmp.lt.s32.totalorder %s14754_s1, %s14754_s1 }
  0x69   : > { %p14757_p7 = pnand %p14755_p5, %p15287_p8  ;;  %p14764_p1 = por %p14763_p10, %p14762_p4 }
  0x6b   : > { %p14758_p9 = pneg %p14757_p7 }
  0x6d   : > { %p14765_p3 = pnand %p14764_p1, %p14758_p9 }
  0x6f   : > { %14768 = shalt.err (!%p14765_p3)
}
  0x70   : > { %14044 = dma.hbm_to_vmem [thread:$0]  (!%p15271_p6), %s17999_s6, 256, %s459_s30, [#allocation12]  }
  0x71   : > { %s15127_s7 = smov [#allocation14]   ;;  %s15128_s16 = smov [#allocation17]  }
  0x72   : > { %s482_s25 = sshll.u32 %s15127_s7, 4  ;;  %s506_s17 = sshll.u32 %s15128_s16, 4  ;;  %s483_s25 = int_to_ptr.vmem [resolvable:$true] %s482_s25  ;;  %s15355_s17 = int_to_ptr.vmem [resolvable:$true] %s506_s17 }
  0x73   : > { %s18000_s9 = sld [smem:[#allocation75_spill]] }
  0x79   : > { %s14769_s14 = scalar_lea.hbm %s18000_s9, 4096 }
  0x7a   : > { %p14770_p1 = scmp.ne.s32.totalorder %s18000_s9, %s14769_s14  ;;  %p14776_p12 = scmp.lt.u32.totalorder %s14769_s14, %s18000_s9 }
  0x7c   : > { %p14772_p3 = pnand %p14770_p1, %p15287_p8 }
  0x7e   : > { %p14773_p11 = pneg %p14772_p3 }
  0x80   : > { %p14778_p13 = pnand %p14776_p12, %p14773_p11 }
  0x82   : > { %14781 = shalt.err (!%p14778_p13)
}
  0x83   : > { %s14782_s3 = scalar_lea.vmem %s483_s25, 4096  ;;  %p14790_p7 = scmp.lt.s32.totalorder %s483_s25, %s483_s25 }
  0x84   : > { %p14783_p0 = scmp.ne.s32.totalorder %s483_s25, %s14782_s3  ;;  %p14791_p9 = scmp.lt.s32.totalorder %s14782_s3, %s14782_s3 }
  0x86   : > { %p14785_p2 = pnand %p14783_p0, %p15287_p8  ;;  %p14792_p4 = por %p14791_p9, %p14790_p7 }
  0x88   : > { %p14786_p5 = pneg %p14785_p2 }
  0x8a   : > { %p14793_p10 = pnand %p14792_p4, %p14786_p5 }
  0x8c   : > { %14796 = shalt.err (!%p14793_p10)
}
  0x8d   : > { %s17896_s7 = smov 1024   ;;  %s17897_s16 = smov 64  }
  0x8e   : > { %14050 = dma.hbm_to_vmem [thread:$0]  (!%p15271_p6), %s18000_s9, 4096, %s483_s25, [#allocation15], %s17896_s7, %s17896_s7, %s17897_s16  }
  0x8f   : > { %s14797_s1 = scalar_lea.hbm %s17881_s11, 16384 }
  0x90   : > { %p14798_p1 = scmp.ne.s32.totalorder %s17881_s11, %s14797_s1  ;;  %p14804_p12 = scmp.lt.u32.totalorder %s14797_s1, %s17881_s11 }
  0x92   : > { %p14800_p3 = pnand %p14798_p1, %p15287_p8 }
  0x94   : > { %p14801_p11 = pneg %p14800_p3 }
  0x96   : > { %p14806_p13 = pnand %p14804_p12, %p14801_p11 }
  0x98   : > { %14809 = shalt.err (!%p14806_p13)
}
  0x99   : > { %s14810_s25 = scalar_lea.vmem %s15355_s17, 16384  ;;  %p14818_p7 = scmp.lt.s32.totalorder %s15355_s17, %s15355_s17 }
  0x9a   : > { %p14811_p0 = scmp.ne.s32.totalorder %s15355_s17, %s14810_s25  ;;  %p14819_p9 = scmp.lt.s32.totalorder %s14810_s25, %s14810_s25 }
  0x9c   : > { %p14813_p2 = pnand %p14811_p0, %p15287_p8  ;;  %p14820_p4 = por %p14819_p9, %p14818_p7 }
  0x9e   : > { %p14814_p5 = pneg %p14813_p2 }
  0xa0   : > { %p14821_p10 = pnand %p14820_p4, %p14814_p5 }
  0xa2   : > { %14824 = shalt.err (!%p14821_p10)
}
  0xa3   : > { %s18001_s15 = smov 256   ;;  %s15131_s14 = smov [#allocation10]  }
  0xa4   : > { %14056 = dma.hbm_to_vmem [thread:$0]  (!%p15271_p6), %s17881_s11, 16384, %s15355_s17, [#allocation18], %s18001_s15, %s18001_s15, %s15125_s12  }
  0xa5   : > { %s444_s23 = sshll.u32 %s15131_s14, 4  ;;  %s15132_s1 = smov [#allocation13]   ;;  %s445_s23 = int_to_ptr.vmem [resolvable:$true] %s444_s23 }
  0xa6   : > { %s472_s27 = sshll.u32 %s15132_s1, 4  ;;  %s18002_s5 = sld [smem:[#allocation71_spill]]  ;;  %s15404_s27 = int_to_ptr.vmem [resolvable:$true] %s472_s27 }
  0xac   : > { %s14825_s25 = scalar_lea.hbm %s18002_s5, 65536 }
  0xad   : > { %p14826_p1 = scmp.ne.s32.totalorder %s18002_s5, %s14825_s25  ;;  %p14832_p12 = scmp.lt.u32.totalorder %s14825_s25, %s18002_s5 }
  0xaf   : > { %p14828_p3 = pnand %p14826_p1, %p15287_p8 }
  0xb1   : > { %p14829_p11 = pneg %p14828_p3 }
  0xb3   : > { %p14834_p13 = pnand %p14832_p12, %p14829_p11 }
  0xb5   : > { %14837 = shalt.err (!%p14834_p13)
}
  0xb6   : > { %s14838_s17 = scalar_lea.vmem %s445_s23, 65536  ;;  %p14846_p7 = scmp.lt.s32.totalorder %s445_s23, %s445_s23 }
  0xb7   : > { %p14839_p0 = scmp.ne.s32.totalorder %s445_s23, %s14838_s17  ;;  %p14847_p9 = scmp.lt.s32.totalorder %s14838_s17, %s14838_s17 }
  0xb9   : > { %p14841_p2 = pnand %p14839_p0, %p15287_p8  ;;  %p14848_p4 = por %p14847_p9, %p14846_p7 }
  0xbb   : > { %p14842_p5 = pneg %p14841_p2 }
  0xbd   : > { %p14849_p10 = pnand %p14848_p4, %p14842_p5 }
  0xbf   : > { %14852 = shalt.err (!%p14849_p10)
}
  0xc0   : > { %s18003_s7 = smov 64   ;;  %s18004_s16 = smov 1024  }
  0xc1   : > { %14041 = dma.hbm_to_vmem [thread:$0]  (!%p15271_p6), %s18002_s5, 65536, %s445_s23, [#allocation9], %s18004_s16, %s18004_s16, %s18003_s7  }
  0xc2   : > { %s18005_s8 = sld [smem:[#allocation74_spill]] }
  0xc8   : > { %s14853_s30 = scalar_lea.hbm %s18005_s8, 16 }
  0xc9   : > { %p14854_p1 = scmp.ne.s32.totalorder %s18005_s8, %s14853_s30  ;;  %p14860_p12 = scmp.lt.u32.totalorder %s14853_s30, %s18005_s8 }
  0xcb   : > { %p14856_p3 = pnand %p14854_p1, %p15287_p8 }
  0xcd   : > { %p14857_p11 = pneg %p14856_p3 }
  0xcf   : > { %p14862_p13 = pnand %p14860_p12, %p14857_p11 }
  0xd1   : > { %14865 = shalt.err (!%p14862_p13)
}
  0xd2   : > { %s14866_s23 = scalar_lea.vmem %s15404_s27, 16  ;;  %s14873_s17 = scalar_lea.vmem %s15404_s27, 32 }
  0xd3   : > { %p14867_p0 = scmp.ne.s32.totalorder %s15404_s27, %s14866_s23  ;;  %p14874_p7 = scmp.lt.s32.totalorder %s15404_s27, %s15404_s27 }
  0xd4   : > { %p14875_p9 = scmp.lt.s32.totalorder %s14873_s17, %s14866_s23 }
  0xd5   : > { %p14869_p2 = pnand %p14867_p0, %p15287_p8 }
  0xd6   : > { %p14876_p4 = por %p14875_p9, %p14874_p7 }
  0xd7   : > { %p14870_p5 = pneg %p14869_p2 }
  0xd9   : > { %p14877_p10 = pnand %p14876_p4, %p14870_p5 }
  0xdb   : > { %14880 = shalt.err (!%p14877_p10)
}
  0xdc   : > { %14047 = dma.hbm_to_vmem [thread:$0]  (!%p15271_p6), %s18005_s8, 16, %s15404_s27, [#allocation12]  }
  0xdd   : > { %s15133_s15 = smov [#allocation16]   ;;  %s15134_s14 = smov [#allocation19]  }
  0xde   : > { %s496_s29 = sshll.u32 %s15133_s15, 4  ;;  %s523_s1 = sshll.u32 %s15134_s14, 4  ;;  %s497_s29 = int_to_ptr.vmem [resolvable:$true] %s496_s29  ;;  %s15451_s1 = int_to_ptr.vmem [resolvable:$true] %s523_s1 }
  0xdf   : > { %s14881_s25 = scalar_lea.hbm %s17880_s10, 256 }
  0xe0   : > { %p14882_p1 = scmp.ne.s32.totalorder %s17880_s10, %s14881_s25  ;;  %p14888_p12 = scmp.lt.u32.totalorder %s14881_s25, %s17880_s10 }
  0xe2   : > { %p14884_p3 = pnand %p14882_p1, %p15287_p8 }
  0xe4   : > { %p14885_p11 = pneg %p14884_p3 }
  0xe6   : > { %p14890_p13 = pnand %p14888_p12, %p14885_p11 }
  0xe8   : > { %14893 = shalt.err (!%p14890_p13)
}
  0xe9   : > { %s14894_s17 = scalar_lea.vmem %s497_s29, 256  ;;  %p14902_p7 = scmp.lt.s32.totalorder %s497_s29, %s497_s29 }
  0xea   : > { %p14895_p0 = scmp.ne.s32.totalorder %s497_s29, %s14894_s17  ;;  %p14903_p9 = scmp.lt.s32.totalorder %s14894_s17, %s14894_s17 }
  0xec   : > { %p14897_p2 = pnand %p14895_p0, %p15287_p8  ;;  %p14904_p4 = por %p14903_p9, %p14902_p7 }
  0xee   : > { %p14898_p5 = pneg %p14897_p2 }
  0xf0   : > { %p14905_p10 = pnand %p14904_p4, %p14898_p5 }
  0xf2   : > { %14908 = shalt.err (!%p14905_p10)
}
  0xf3   : > { %14053 = dma.hbm_to_vmem [thread:$0]  (!%p15271_p6), %s17880_s10, 256, %s497_s29, [#allocation15]  }
  0xf4   : > { %s14909_s30 = scalar_lea.hbm %s17883_s13, 16 }
  0xf5   : > { %p14910_p1 = scmp.ne.s32.totalorder %s17883_s13, %s14909_s30  ;;  %p14916_p12 = scmp.lt.u32.totalorder %s14909_s30, %s17883_s13 }
  0xf7   : > { %p14912_p3 = pnand %p14910_p1, %p15287_p8 }
  0xf9   : > { %p14913_p11 = pneg %p14912_p3 }
  0xfb   : > { %p14918_p13 = pnand %p14916_p12, %p14913_p11 }
  0xfd   : > { %14921 = shalt.err (!%p14918_p13)
}
  0xfe   : > { %s14922_s29 = scalar_lea.vmem %s15451_s1, 16  ;;  %s14929_s23 = scalar_lea.vmem %s15451_s1, 32 }
  0xff   : > { %p14923_p0 = scmp.ne.s32.totalorder %s15451_s1, %s14922_s29  ;;  %p14930_p7 = scmp.lt.s32.totalorder %s15451_s1, %s15451_s1 }
 0x100   : > { %p14931_p9 = scmp.lt.s32.totalorder %s14929_s23, %s14922_s29 }
 0x101   : > { %p14925_p2 = pnand %p14923_p0, %p15287_p8 }
 0x102   : > { %p14932_p4 = por %p14931_p9, %p14930_p7 }
 0x103   : > { %p14926_p5 = pneg %p14925_p2 }
 0x105   : > { %p14933_p10 = pnand %p14932_p4, %p14926_p5 }
 0x107   : > { %14936 = shalt.err (!%p14933_p10)
}
 0x108   : > { %14059 = dma.hbm_to_vmem [thread:$0]  (!%p15271_p6), %s17883_s13, 16, %s15451_s1, [#allocation18]  }
 0x109   : > { %s12194_s28 = sadd.s32 4294967294, %s15119_s21   ;;  %s15497_s26 = sadd.s32 1, %s15119_s21  }
 0x10a   : > { %s46_s7 = ssub.s32 %s15119_s21, %s15497_s26  ;;  %s49_s16 = sadd.s32 1, %s15115_s20 }
 0x10b   : > { %p47_p8 = scmp.eq.s32.totalorder %s46_s7, 0  ;;  %p56_p1 = scmp.ne.s32.totalorder %s15115_s20, %s15111_s19 }
 0x10c   : > { %p57_p3 = scmp.eq.s32.totalorder %s15119_s21, 0  ;;  %p62_p11 = scmp.ne.s32.totalorder %s15111_s19, %s15107_s18 }
 0x10d   : > { %s15508_s15 = scalar_select %p47_p8, %s15115_s20, %s49_s16  }
 0x10e   : > { %p15510_p12 = por %p57_p3, %p56_p1  ;;  %p18007_p13 = scmp.eq.s32.totalorder %s15255_s24, 0 }
 0x10f   : > { %p364_p0 = scmp.eq.s32.totalorder %s15255_s24, 1  ;;  %p370_p2 = scmp.eq.s32.totalorder %s12194_s28, 1 }
 0x110   : > { %p15516_p6 = por %p18007_p13, %p62_p11  ;;  %p14083_p5 = scmp.lt.s32.totalorder %s15119_s21, 2 }
 0x111   : > { %s534_s30 = sand.u32 1, %s15115_s20   ;;  %p15523_p7 = por %p364_p0, %p56_p1 }
 0x112   : > { %p15527_p9 = por %p370_p2, %p62_p11  ;;  %s15531_s22 = sshll.u32 %s534_s30, 4 }
 0x113   : > { %s18009_s3 = scalar_select %p15523_p7, 1, 0 }
 0x114   : > { %s18010_s25 = scalar_select %p15527_p9, 1, 0 }
 0x115   : > { %s17898_s12 = sshll.u32 %s15119_s21, 8  ;;  %s18011_s0 = sld [smem:[#allocation66_spill]] }
 0x116   : > { %s538_s17 = scalar_lea.vmem [#allocation2], %s15531_s22  ;;  %p15546_p4 = pnand %p14083_p5, %p15510_p12 }
 0x117   : > { %s545_s28 = sshll.u32 %s538_s17, 4  ;;  %s15550_s16 = scalar_lea.sflag [#allocation3], %s534_s30  ;;  %s15542_s28 = int_to_ptr.vmem [resolvable:$true] %s545_s28 }
 0x118   : > { %p14939_p8 = pneg %p15546_p4 }
 0x11b   : > { %s15539_s27 = scalar_lea.hbm %s18011_s0, %s17898_s12  ;;  %s14942_s14 = scalar_lea.hbm %s18011_s0, 512 }
 0x11c   : > { %s14937_s29 = scalar_lea.hbm %s15539_s27, 256  ;;  %p14943_p11 = scmp.lt.u32.totalorder %s15539_s27, %s18011_s0 }
 0x11d   : > { %p14938_p10 = scmp.ne.s32.totalorder %s15539_s27, %s14937_s29  ;;  %p14944_p12 = scmp.lt.u32.totalorder %s14942_s14, %s14937_s29 }
 0x11e   : > { %p14946_p0 = scmp.lt.u32.totalorder %s14937_s29, %s15539_s27 }
 0x11f   : > { %p14940_p1 = pnand %p14939_p8, %p14938_p10  ;;  %p14945_p13 = por %p14944_p12, %p14943_p11 }
 0x121   : > { %p14941_p3 = pneg %p14940_p1  ;;  %p14947_p2 = por %p14946_p0, %p14945_p13 }
 0x123   : > { %p14948_p5 = pnand %p14947_p2, %p14941_p3 }
 0x125   : > { %14951 = shalt.err (!%p14948_p5)
}
 0x126   : > { %s14952_s30 = scalar_lea.vmem %s15542_s28, 256  ;;  %s15135_s23 = smov [#allocation2]  }
 0x127   : > { %p14953_p10 = scmp.ne.s32.totalorder %s15542_s28, %s14952_s30  ;;  %s14957_s17 = sshll.u32 %s15135_s23, 4  ;;  %s14958_s17 = int_to_ptr.vmem [resolvable:$false] %s14957_s17 }
 0x128   : > { %s14959_s2 = scalar_lea.vmem %s14958_s17, 512  ;;  %p14960_p7 = scmp.lt.s32.totalorder %s15542_s28, %s14958_s17 }
 0x129   : > { %p14955_p1 = pnand %p14953_p10, %p14939_p8  ;;  %p14961_p11 = scmp.lt.s32.totalorder %s14959_s2, %s14952_s30 }
 0x12b   : > { %p14956_p9 = pneg %p14955_p1  ;;  %p14962_p12 = por %p14961_p11, %p14960_p7 }
 0x12d   : > { %p14963_p13 = pnand %p14962_p12, %p14956_p9 }
 0x12f   : > { %14966 = shalt.err (!%p14963_p13)
}
 0x130   : > { %s15136_s12 = smov 128   ;;  %s15137_s29 = smov 8  }
 0x131   : > { %14063 = dma.hbm_to_vmem [thread:$0]  (!%p15546_p4), %s15539_s27, 256, %s15542_s28, %s15550_s16, %s15136_s12, %s15136_s12, %s15137_s29  }
 0x132   : > { %s18013_s14 = sshll.u32 %s15119_s21, 8  ;;  %s18014_s17 = sld [smem:[#allocation67_spill]] }
 0x133   : > { %s559_s0 = scalar_lea.vmem [#allocation5], %s15531_s22  ;;  %s555_s5 = sand.u32 1, %s15119_s21  }
 0x134   : > { %s566_s4 = sshll.u32 %s559_s0, 4  ;;  %s15592_s6 = scalar_lea.sflag [#allocation6], %s555_s5  ;;  %s15589_s4 = int_to_ptr.vmem [resolvable:$true] %s566_s4 }
 0x138   : > { %s15586_s2 = scalar_lea.hbm %s18014_s17, %s18013_s14  ;;  %s14972_s16 = scalar_lea.hbm %s18014_s17, 512 }
 0x139   : > { %s14967_s8 = scalar_lea.hbm %s15586_s2, 256  ;;  %p14973_p0 = scmp.lt.u32.totalorder %s15586_s2, %s18014_s17 }
 0x13a   : > { %p14968_p7 = scmp.ne.s32.totalorder %s15586_s2, %s14967_s8  ;;  %p14974_p2 = scmp.lt.u32.totalorder %s14972_s16, %s14967_s8 }
 0x13b   : > { %p14976_p10 = scmp.lt.u32.totalorder %s14967_s8, %s15586_s2 }
 0x13c   : > { %p14970_p9 = pnand %p14968_p7, %p14939_p8  ;;  %p14975_p5 = por %p14974_p2, %p14973_p0 }
 0x13e   : > { %p14971_p3 = pneg %p14970_p9  ;;  %p14977_p1 = por %p14976_p10, %p14975_p5 }
 0x140   : > { %p14978_p11 = pnand %p14977_p1, %p14971_p3 }
 0x142   : > { %14981 = shalt.err (!%p14978_p11)
}
 0x143   : > { %s14982_s0 = scalar_lea.vmem %s15589_s4, 256  ;;  %s15138_s5 = smov [#allocation5]  }
 0x144   : > { %p14983_p12 = scmp.ne.s32.totalorder %s15589_s4, %s14982_s0  ;;  %s14987_s22 = sshll.u32 %s15138_s5, 4  ;;  %s14988_s22 = int_to_ptr.vmem [resolvable:$false] %s14987_s22 }
 0x145   : > { %s14989_s23 = scalar_lea.vmem %s14988_s22, 512  ;;  %p14990_p9 = scmp.lt.s32.totalorder %s15589_s4, %s14988_s22 }
 0x146   : > { %p14985_p13 = pnand %p14983_p12, %p14939_p8  ;;  %p14991_p0 = scmp.lt.s32.totalorder %s14989_s23, %s14982_s0 }
 0x148   : > { %p14986_p7 = pneg %p14985_p13  ;;  %p14992_p2 = por %p14991_p0, %p14990_p9 }
 0x14a   : > { %p14993_p5 = pnand %p14992_p2, %p14986_p7 }
 0x14c   : > { %14996 = shalt.err (!%p14993_p5)
}
 0x14d   : > { %14066 = dma.hbm_to_vmem [thread:$0]  (!%p15546_p4), %s15586_s2, 256, %s15589_s4, %s15592_s6, %s15136_s12, %s15136_s12, %s15137_s29  }
 0x14e   : > { %s18015_s8 = sld [smem:[#allocation32_spill]] }
 0x154   : > { %p18016_p8 = scmp.ne.s32.totalorder %s18015_s8, 0 }
 0x156   : > { %578 = sbr.rel (%p18016_p8) target bundleno = 6235 (0x185b), region = 76 }
 0x15d   : > { %s15624_s27 = sand.u32 1, %s15111_s19  }
 0x15e   : > { %s15627_s28 = sshll.u32 %s15624_s27, 4  ;;  %s581_s7 = scalar_lea.sflag [#allocation3], %s15624_s27 }
 0x15f   : > { %s584_s16 = scalar_lea.vmem [#allocation2], %s15627_s28 }
 0x160   : > { %15070 = dma.done.wait (%p15516_p6), %s581_s7, 256  }
 0x161   : > { %15072 = vsyncadd (%p15516_p6), %s581_s7, 4294967040  ;;  %s589_s4 = sand.u32 1, %s15255_s24   ;;  %s15637_s12 = scalar_lea.vmem [#allocation5], %s15627_s28 }
 0x162   : > { %s590_s6 = scalar_lea.sflag [#allocation6], %s589_s4 }
 0x163   : > { %15074 = dma.done.wait (%p15516_p6), %s590_s6, 256  }
 0x164   : > { %15076 = vsyncadd (%p15516_p6), %s590_s6, 4294967040  ;;  %p18017_p4 = scmp.eq.s32.totalorder %s15255_s24, 0 }
 0x166   : > { %15078 = dma.done.wait (%p18017_p4), [#allocation6], 1024   ;;  %p18018_p3 = pmov %p18017_p4 }
 0x168   : > { %15080 = vsyncadd (%p18018_p3), [#allocation6], 4294966272  ;;  %p18019_p10 = pmov %p18018_p3 }
 0x169   : > { %p18020_p1 = pmov %p18018_p3 }
 0x16a   : > { %15082 = dma.done.wait (%p18019_p10), [#allocation9], 65664  }
 0x16b   : > { %15084 = vsyncadd (%p18020_p1), [#allocation9], 4294901632  ;;  %p18021_p11 = pmov %p18020_p1 }
 0x16c   : > { %p18022_p12 = pmov %p18020_p1 }
 0x16d   : > { %15086 = dma.done.wait (%p18021_p11), [#allocation12], 272  }
 0x16e   : > { %15088 = vsyncadd (%p18022_p12), [#allocation12], 4294967024  ;;  %p18023_p6 = pmov %p18020_p1 }
 0x16f   : > { %p18024_p13 = pmov %p18020_p1 }
 0x170   : > { %15090 = dma.done.wait (%p18023_p6), [#allocation15], 4352  }
 0x171   : > { %15092 = vsyncadd (%p18024_p13), [#allocation15], 4294962944  ;;  %p18025_p7 = pmov %p18020_p1 }
 0x172   : > { %p18026_p9 = pmov %p18020_p1 }
 0x173   : > { %15094 = dma.done.wait (%p18025_p7), [#allocation18], 16400  }
 0x174   : > { %15096 = vsyncadd (%p18026_p9), [#allocation18], 4294950896  ;;  %v17912_v0 = vmov 0   ;;  %v14225_v1 = vld [vmem:[#allocation7 + $0x4] ss:$16 sps:$4 sm:$0xff]   ;;  %v690_v10 = vld [vmem:[%s584_s16 + $0x8] sm:$0xff] }
 0x175   : > { %776 = vmatprep.mubr.bf16.mxu0 %v17912_v0  ;;  %819 = vmatprep.mubr.bf16.mxu1 %v17912_v0  ;;  %v14227_v2 = vld [vmem:[#allocation7 + $0xc] ss:$16 sps:$4 sm:$0xff]   ;;  %v14229_v3 = vld [vmem:[#allocation7] ss:$16 sps:$4 sm:$0xff]   ;;  %v14230_v4 = vld [vmem:[#allocation7 + $0x8] ss:$16 sps:$4 sm:$0xff]  }
 0x176   : > { %14156 = vset.pattern.permute.xlu0 %v17912_v0  ;;  %744 = vmatprep.subr.bf16.mxu0 %v14225_v1  ;;  %v14231_v5 = vld [vmem:[#allocation7 + $0x24] ss:$16 sps:$4 sm:$0xff]   ;;  %v14233_v6 = vld [vmem:[#allocation7 + $0x2c] ss:$16 sps:$4 sm:$0xff]   ;;  %v14235_v7 = vld [vmem:[#allocation7 + $0x20] ss:$16 sps:$4 sm:$0xff]  }
 0x177   : > { %787 = vmatprep.subr.bf16.mxu1 %v14227_v2  ;;  %745 = vmatpush1.bf16.msra.mxu0 %v14229_v3  ;;  %v14236_v8 = vld [vmem:[#allocation7 + $0x28] ss:$16 sps:$4 sm:$0xff]   ;;  %v689_v9 = vld [vmem:[%s584_s16] sm:$0xff]  ;;  %s18027_s2 = sld [smem:[#allocation69_spill]]  ;;  %vm740_vm0 = vcmask 261120   ;;  %vm1102_vm5 = vcmask 130048  }
 0x178   : > { %788 = vmatpush1.bf16.msra.mxu1 %v14230_v4  ;;  %746 = vmatprep.subr.bf16.mxu0 %v14231_v5  ;;  %v691_v14 = vpack.c.bf16 %v690_v10, %v689_v9  ;;  %s17977_s4 = smov 64   ;;  %vm1952_vm11 = vcmask 523264   ;;  %s18038_s29 = sld [smem:[#allocation73_spill]] }
 0x179   : > { %789 = vmatprep.subr.bf16.mxu1 %v14233_v6  ;;  %s12225_s23 = sshll.u32 %s15624_s27, 6  ;;  %s18127_s6 = sld [smem:[#allocation76_spill]] }
 0x17a   : > { %s17186_s8 = scalar_lea.vmem [#allocation21], %s12225_s23  ;;  %s18147_s1 = sld [smem:[#allocation78_spill]] }
 0x17b   : > { %747 = vmatpush1.bf16.msra.mxu0 %v14235_v7  ;;  %s11981_s23 = sshll.u32 %s17186_s8, 4  ;;  %s11952_s30 = scalar_lea.sflag [#allocation22], %s15624_s27  ;;  %s17790_s23 = int_to_ptr.vmem [resolvable:$true] %s11981_s23 }
 0x17c   : > { %790 = vmatpush1.bf16.msra.mxu1 %v14236_v8  ;;  %s14997_s0 = scalar_lea.vmem %s17790_s23, 1024  ;;  %p18148_p2 = scmp.ne.s32.totalorder %s18009_s3, 0 }
 0x17d   : > { %v846_v11 = vld [vmem:[%s18027_s2 + $0x80] sm:$0xff]  ;;  %v847_v12 = vld [vmem:[%s18027_s2 + $0x88] sm:$0xff]  ;;  %v848_v23 = vld [vmem:[%s18027_s2 + $0x90] sm:$0xff]  ;;  %p14998_p0 = scmp.ne.s32.totalorder %s17790_s23, %s14997_s0  ;;  %s15148_s5 = smov [#allocation21]  }
 0x17e   : > { %v878_v13 = vld [vmem:[%s18027_s2 + $0x180] sm:$0xff]  ;;  %v13454_v15 = vpack.c.bf16 %v847_v12, %v846_v11  ;;  %v879_v16 = vld [vmem:[%s18027_s2 + $0x188] sm:$0xff]  ;;  %v849_v25 = vld [vmem:[%s18027_s2 + $0x98] sm:$0xff]  ;;  %12234 = vmatmul.mubr.msk.bf16.vlgmr.msra.gmra.mrb[0].mxu0 %vm740_vm0, %v691_v14  ;;  %s15001_s22 = sshll.u32 %s15148_s5, 4  ;;  %s15002_s22 = int_to_ptr.vmem [resolvable:$false] %s15001_s22 }
 0x17f   : > { %v830_v17 = vld [vmem:[%s18027_s2] sm:$0xff]  ;;  %v831_v18 = vld [vmem:[%s18027_s2 + $0x8] sm:$0xff]  ;;  %v13486_v19 = vpack.c.bf16 %v879_v16, %v878_v13  ;;  %v880_v26 = vld [vmem:[%s18027_s2 + $0x190] sm:$0xff]  ;;  %v13458_v28 = vpack.c.bf16 %v849_v25, %v848_v23  ;;  %12235 = vmatmul.mubr.msk.bf16.vlgmr.msra.gmra.mrb[0].mxu1 %vm740_vm0, %v691_v14  ;;  %p14999_p5 = pnand %p14998_p0, %p18148_p2  ;;  %p15004_p4 = scmp.lt.s32.totalorder %s17790_s23, %s15002_s22 }
 0x180   : > { %v13456_v20 = vpack.c.bf16 %v831_v18, %v830_v17  ;;  %v862_v21 = vld [vmem:[%s18027_s2 + $0x100] sm:$0xff]  ;;  %v863_v22 = vld [vmem:[%s18027_s2 + $0x108] sm:$0xff]  ;;  %13455 = vmatprep.subr.bf16.mxu0 %v13454_v15  ;;  %v881_v27 = vld [vmem:[%s18027_s2 + $0x198] sm:$0xff] }
 0x181   : > { %v13488_v24 = vpack.c.bf16 %v863_v22, %v862_v21  ;;  %13487 = vmatprep.subr.bf16.mxu1 %v13486_v19  ;;  %v13490_v29 = vpack.c.bf16 %v881_v27, %v880_v26  ;;  %v832_v30 = vld [vmem:[%s18027_s2 + $0x10] sm:$0xff]  ;;  %v833_v31 = vld [vmem:[%s18027_s2 + $0x18] sm:$0xff]  ;;  %v850_v34 = vld [vmem:[%s18027_s2 + $0xa0] sm:$0xff]  ;;  %p15000_p8 = pneg %p14999_p5 }
 0x182   : > { %v864_v32 = vld [vmem:[%s18027_s2 + $0x110] sm:$0xff]  ;;  %v865_v33 = vld [vmem:[%s18027_s2 + $0x118] sm:$0xff]  ;;  %v851_v35 = vld [vmem:[%s18027_s2 + $0xa8] sm:$0xff]  ;;  %13457 = vmatpush3.bf16.msra.mxu0 %v13456_v20  ;;  %v13460_v36 = vpack.c.bf16 %v833_v31, %v832_v30 }
 0x183   : > { %13489 = vmatpush3.bf16.msra.mxu1 %v13488_v24  ;;  %v13492_v37 = vpack.c.bf16 %v865_v33, %v864_v32  ;;  %v882_v38 = vld [vmem:[%s18027_s2 + $0x1a0] sm:$0xff]  ;;  %v883_v39 = vld [vmem:[%s18027_s2 + $0x1a8] sm:$0xff]  ;;  %13459 = vmatprep.subr.bf16.mxu0 %v13458_v28  ;;  %v13462_v41 = vpack.c.bf16 %v851_v35, %v850_v34  ;;  %v852_v46 = vld [vmem:[%s18027_s2 + $0xb0] sm:$0xff] }
 0x184   : > { %v834_v40 = vld [vmem:[%s18027_s2 + $0x20] sm:$0xff]  ;;  %13491 = vmatprep.subr.bf16.mxu1 %v13490_v29  ;;  %v13494_v42 = vpack.c.bf16 %v883_v39, %v882_v38  ;;  %v835_v43 = vld [vmem:[%s18027_s2 + $0x28] sm:$0xff]  ;;  %v853_v47 = vld [vmem:[%s18027_s2 + $0xb8] sm:$0xff] }
 0x185   : > { %v866_v44 = vld [vmem:[%s18027_s2 + $0x120] sm:$0xff]  ;;  %v867_v45 = vld [vmem:[%s18027_s2 + $0x128] sm:$0xff]  ;;  %v884_v48 = vld [vmem:[%s18027_s2 + $0x1b0] sm:$0xff]  ;;  %v13464_v50 = vpack.c.bf16 %v835_v43, %v834_v40  ;;  %v13466_v54 = vpack.c.bf16 %v853_v47, %v852_v46 }
 0x186   : > { %v885_v49 = vld [vmem:[%s18027_s2 + $0x1b8] sm:$0xff]  ;;  %13461 = vmatpush3.bf16.msra.mxu0 %v13460_v36  ;;  %v13496_v51 = vpack.c.bf16 %v867_v45, %v866_v44  ;;  %v836_v52 = vld [vmem:[%s18027_s2 + $0x30] sm:$0xff]  ;;  %v854_v58 = vld [vmem:[%s18027_s2 + $0xc0] sm:$0xff] }
 0x187   : > { %13493 = vmatpush3.bf16.msra.mxu1 %v13492_v37  ;;  %v837_v53 = vld [vmem:[%s18027_s2 + $0x38] sm:$0xff]  ;;  %13463 = vmatprep.subr.bf16.mxu0 %v13462_v41  ;;  %v13498_v55 = vpack.c.bf16 %v885_v49, %v884_v48  ;;  %v868_v56 = vld [vmem:[%s18027_s2 + $0x130] sm:$0xff]  ;;  %v855_v59 = vld [vmem:[%s18027_s2 + $0xc8] sm:$0xff] }
 0x188   : > { %13495 = vmatprep.subr.bf16.mxu1 %v13494_v42  ;;  %v869_v57 = vld [vmem:[%s18027_s2 + $0x138] sm:$0xff]  ;;  %v886_v60 = vld [vmem:[%s18027_s2 + $0x1c0] sm:$0xff]  ;;  %v887_v61 = vld [vmem:[%s18027_s2 + $0x1c8] sm:$0xff]  ;;  %v13468_v62 = vpack.c.bf16 %v837_v53, %v836_v52  ;;  %v13470_v3 = vpack.c.bf16 %v855_v59, %v854_v58 }
 0x189   : > { %v13500_v63 = vpack.c.bf16 %v869_v57, %v868_v56  ;;  %v838_v1 = vld [vmem:[%s18027_s2 + $0x40] sm:$0xff]  ;;  %v839_v2 = vld [vmem:[%s18027_s2 + $0x48] sm:$0xff]  ;;  %v13502_v4 = vpack.c.bf16 %v887_v61, %v886_v60  ;;  %v856_v7 = vld [vmem:[%s18027_s2 + $0xd0] sm:$0xff] }
 0x18a   : > { %13465 = vmatpush3.bf16.msra.mxu0 %v13464_v50  ;;  %v870_v5 = vld [vmem:[%s18027_s2 + $0x140] sm:$0xff]  ;;  %v871_v6 = vld [vmem:[%s18027_s2 + $0x148] sm:$0xff]  ;;  %v857_v8 = vld [vmem:[%s18027_s2 + $0xd8] sm:$0xff]  ;;  %v13472_v13 = vpack.c.bf16 %v839_v2, %v838_v1 }
 0x18b   : > { %13497 = vmatpush3.bf16.msra.mxu1 %v13496_v51  ;;  %13467 = vmatprep.subr.bf16.mxu0 %v13466_v54  ;;  %v888_v9 = vld [vmem:[%s18027_s2 + $0x1d0] sm:$0xff]  ;;  %v889_v10 = vld [vmem:[%s18027_s2 + $0x1d8] sm:$0xff]  ;;  %v13504_v14 = vpack.c.bf16 %v871_v6, %v870_v5  ;;  %v858_v17 = vld [vmem:[%s18027_s2 + $0xe0] sm:$0xff]  ;;  %v13474_v18 = vpack.c.bf16 %v857_v8, %v856_v7 }
 0x18c   : > { %13499 = vmatprep.subr.bf16.mxu1 %v13498_v55  ;;  %v840_v11 = vld [vmem:[%s18027_s2 + $0x50] sm:$0xff]  ;;  %v841_v12 = vld [vmem:[%s18027_s2 + $0x58] sm:$0xff]  ;;  %v13506_v19 = vpack.c.bf16 %v889_v10, %v888_v9  ;;  %v859_v20 = vld [vmem:[%s18027_s2 + $0xe8] sm:$0xff] }
 0x18d   : > { %v872_v15 = vld [vmem:[%s18027_s2 + $0x150] sm:$0xff]  ;;  %v873_v16 = vld [vmem:[%s18027_s2 + $0x158] sm:$0xff]  ;;  %v890_v21 = vld [vmem:[%s18027_s2 + $0x1e0] sm:$0xff]  ;;  %v13476_v27 = vpack.c.bf16 %v841_v12, %v840_v11  ;;  %v13478_v33 = vpack.c.bf16 %v859_v20, %v858_v17  ;;  %v17911_v12 = vmov 1  }
 0x18e   : > { %13469 = vmatpush3.bf16.msra.mxu0 %v13468_v62  ;;  %v891_v22 = vld [vmem:[%s18027_s2 + $0x1e8] sm:$0xff]  ;;  %v842_v23 = vld [vmem:[%s18027_s2 + $0x60] sm:$0xff]  ;;  %v13508_v28 = vpack.c.bf16 %v873_v16, %v872_v15  ;;  %v860_v29 = vld [vmem:[%s18027_s2 + $0xf0] sm:$0xff] }
 0x18f   : > { %13501 = vmatpush3.bf16.msra.mxu1 %v13500_v63  ;;  %13471 = vmatprep.subr.bf16.mxu0 %v13470_v3  ;;  %v843_v24 = vld [vmem:[%s18027_s2 + $0x68] sm:$0xff]  ;;  %v874_v25 = vld [vmem:[%s18027_s2 + $0x160] sm:$0xff]  ;;  %v861_v30 = vld [vmem:[%s18027_s2 + $0xf8] sm:$0xff]  ;;  %v13510_v34 = vpack.c.bf16 %v891_v22, %v890_v21 }
 0x190   : > { %13503 = vmatprep.subr.bf16.mxu1 %v13502_v4  ;;  %v875_v26 = vld [vmem:[%s18027_s2 + $0x168] sm:$0xff]  ;;  %v892_v31 = vld [vmem:[%s18027_s2 + $0x1f0] sm:$0xff]  ;;  %v893_v32 = vld [vmem:[%s18027_s2 + $0x1f8] sm:$0xff]  ;;  %v13480_v35 = vpack.c.bf16 %v843_v24, %v842_v23  ;;  %v13482_v37 = vpack.c.bf16 %v861_v30, %v860_v29 }
 0x191   : > { %v13512_v36 = vpack.c.bf16 %v875_v26, %v874_v25  ;;  %v13514_v38 = vpack.c.bf16 %v893_v32, %v892_v31  ;;  %v844_v39 = vld [vmem:[%s18027_s2 + $0x70] sm:$0xff]  ;;  %v845_v40 = vld [vmem:[%s18027_s2 + $0x78] sm:$0xff] }
 0x192   : > { %13473 = vmatpush3.bf16.msra.mxu0 %v13472_v13  ;;  %v876_v41 = vld [vmem:[%s18027_s2 + $0x170] sm:$0xff]  ;;  %v13484_v42 = vpack.c.bf16 %v845_v40, %v844_v39  ;;  %v877_v43 = vld [vmem:[%s18027_s2 + $0x178] sm:$0xff]  ;;  %v1086_v13 = vlaneseq }
 0x193   : > { %13505 = vmatpush3.bf16.msra.mxu1 %v13504_v14  ;;  %13475 = vmatprep.subr.bf16.mxu0 %v13474_v18  ;;  %v13516_v44 = vpack.c.bf16 %v877_v43, %v876_v41  ;;  %v15934_v21 = vld [vmem:[%s15637_s12] sm:$0xff] }
 0x194   : > { %13507 = vmatprep.subr.bf16.mxu1 %v13506_v19  ;;  %v15921_v14 = vshrl.u32 %v1086_v13, 7  ;;  %v15929_v19 = vld [vmem:[%s15637_s12 + $0x8] sm:$0xff]  ;;  %18030 = vst [vmem:[#allocation35_spill] sm:$0xff] %v15934_v21  ;;  %vm1098_vm2 = vcmp.gt.f32.partialorder %v15934_v21, 0.0 }
 0x195   : > { %18029 = vst [vmem:[#allocation34_spill] sm:$0xff] %v15929_v19  ;;  %vm1099_vm1 = vcmp.gt.f32.partialorder %v15929_v19, 0.0 }
 0x196   : > { %13477 = vmatpush3.bf16.msra.mxu0 %v13476_v27  ;;  %v15924_v17 = vsub.s32 0, %v15921_v14 }
 0x197   : > { %13509 = vmatpush3.bf16.msra.mxu1 %v13508_v28  ;;  %13479 = vmatprep.subr.bf16.mxu0 %v13478_v33  ;;  %v17909_v33 = vmov 2  }
 0x198   : > { %13511 = vmatprep.subr.bf16.mxu1 %v13510_v34  ;;  %18028 = vst [vmem:[#allocation33_spill] sm:$0xff] %v15924_v17 }
 0x19a   : > { %13481 = vmatpush3.bf16.msra.mxu0 %v13480_v35 }
 0x19b   : > { %13513 = vmatpush3.bf16.msra.mxu1 %v13512_v36  ;;  %13483 = vmatprep.subr.bf16.mxu0 %v13482_v37 }
 0x19c   : > { %13515 = vmatprep.subr.bf16.mxu1 %v13514_v38 }
 0x19e   : > { %13485 = vmatpush3.bf16.msra.mxu0 %v13484_v42 }
 0x19f   : > { %13517 = vmatpush3.bf16.msra.mxu1 %v13516_v44 }
 0x251   : > { %v15864_v45 = vpop.f32.mrb[0].mxu0 }
 0x252   : > { %v15866_v46 = vpop.f32.mrb[0].mxu1  ;;  %v15868_v47 = vpop.f32.mrb[1].mxu0 }
 0x253   : > { %v15870_v48 = vpop.f32.mrb[1].mxu1  ;;  %v15872_v49 = vpop.f32.mrb[2].mxu0  ;;  %958 = vmatprep.mubr.f32.mxu0 %v15868_v47 }
 0x254   : > { %v15874_v50 = vpop.f32.mrb[2].mxu1  ;;  %1033 = vmatprep.mubr.f32.mxu1 %v15870_v48  ;;  %v14159_v51 = vpack.i.bf16 %v15872_v49, %v15864_v45  ;;  %v13518_v52 = vpack.c.bf16 %v15872_v49, %v15864_v45  ;;  %v15888_v55 = vpop.f32.mrb[3].mxu0  ;;  %959 = vmatmul.mubr.f32.vlgmr.msra.gmra.mrb[4].mxu0 %v15864_v45 }
 0x255   : > { %v14176_v53 = vpack.i.bf16 %v15874_v50, %v15866_v46  ;;  %v15886_v54 = vpack.c.bf16 %v15874_v50, %v15866_v46  ;;  %v15890_v56 = vpop.f32.mrb[3].mxu1  ;;  %v14167_v57 = vpack.i.bf16 %v15888_v55, %v15868_v47  ;;  %v15897_v58 = vpack.c.bf16 %v15888_v55, %v15868_v47  ;;  %1034 = vmatmul.mubr.f32.vlgmr.msra.gmra.mrb[4].mxu1 %v15866_v46 }
 0x256   : > { %v14184_v59 = vpack.i.bf16 %v15890_v56, %v15870_v48  ;;  %v15903_v60 = vpack.c.bf16 %v15890_v56, %v15870_v48  ;;  %963 = vmatprep.mubr.f32.mxu0 %v15888_v55  ;;  %1038 = vmatprep.mubr.f32.mxu1 %v15890_v56  ;;  %v6890_v48 = vld [vmem:[#allocation10 + $0xc98] sm:$0xff] }
 0x257   : > { %13519 = vmatprep.subr.bf16.mxu0 %v13518_v52  ;;  %v6898_v56 = vld [vmem:[#allocation10 + $0xcd8] sm:$0xff] }
 0x258   : > { %13521 = vmatpush3.bf16.msra.mxu0 %v13518_v52 }
 0x259   : > { %964 = vmatmul.mubr.f32.gmra.mrb[6].mxu0 %v15872_v49  ;;  %1039 = vmatmul.mubr.f32.gmra.mrb[6].mxu1 %v15874_v50 }
 0x25a   : > { %1988 = vmatprep.mubr.bf16.mxu1 %v17912_v0 }
 0x327   : > { %v13082_v61 = vpop.f32.mrb[4].mxu0 }
 0x328   : > { %v13120_v62 = vpop.f32.mrb[4].mxu1  ;;  %v13083_v63 = vpop.f32.mrb[5].mxu0 }
 0x329   : > { %v13084_v1 = vadd.f32 %v13083_v63, %v13082_v61  ;;  %v13121_v2 = vpop.f32.mrb[5].mxu1  ;;  %v15953_v63 = vsub.s32 1, %v15921_v14 }
 0x32a   : > { %v13122_v3 = vadd.f32 %v13121_v2, %v13120_v62 }
 0x32b   : > { %18031 = vst [vmem:[#allocation36_spill] sm:$0xff] %v15953_v63 }
 0x32c   : > { %v15911_v4 = vadd.f32 %v13122_v3, %v13084_v1  ;;  %v13085_v5 = vpop.f32.mrb[6].mxu0  ;;  %v13123_v6 = vpop.f32.mrb[6].mxu1 }
 0x32d   : > { %v13086_v7 = vpop.f32.mrb[7].mxu0  ;;  %v13124_v8 = vpop.f32.mrb[7].mxu1 }
 0x32e   : > { %v13087_v9 = vadd.f32 %v13086_v7, %v13085_v5  ;;  %v13125_v10 = vadd.f32 %v13124_v8, %v13123_v6  ;;  %1044 = vxpose.xlu1.b32.start [1/2] (short) (narrow) %v15911_v4, 16  ;;  %1078 = vperm.xlu0 %14156, %v15911_v4  }
 0x330   : > { %v15915_v11 = vadd.f32 %v13125_v10, %v13087_v9 }
 0x332   : > { %1045 = vxpose.xlu1.b32.end [2/2] (short) (narrow) %v15915_v11, 16  ;;  %1083 = vperm.xlu0 %14156, %v15915_v11  }
 0x336   : > { %14157 = vset.pattern.permute.xlu0 %v17911_v12 }
 0x350   : > { %14158 = vset.pattern.permute.xlu1 %v17911_v12 }
 0x3ad   : > { %v1079_v15 = vpop.permute.xlu0 %1078 }
 0x3ae   : > { %v1060_v16 = vpop.trf.xlu1 }
 0x3b1   : > { %v1084_v22 = vpop.permute.xlu0 %1083 }
 0x3b2   : > { %v15926_v18 = vpop.trf.xlu1 }
 0x3b3   : > { %v1089_v20 = vrot.slane %v15926_v18, %v15924_v17  ;;  %v1140_v2 = vrot.slane %v15926_v18, %v15953_v63 }
 0x3b5   : > { %v1091_v23 = vadd.f32 %v1089_v20, %v1084_v22  ;;  %v1090_v24 = vadd.f32 %v1089_v20, %v1079_v15 }
 0x3b7   : > { %vm1093_vm3 = vcmp.gt.f32.partialorder %v1091_v23, 0.0  ;;  %v1095_v25 = vmul.f32 0.2, %v1091_v23  ;;  %vm1092_vm4 = vcmp.gt.f32.partialorder %v1090_v24, 0.0  ;;  %v1094_v26 = vmul.f32 0.2, %v1090_v24 }
 0x3b9   : > { %v1097_v27 = vsel %vm1093_vm3, %v1091_v23, %v1095_v25  ;;  %v1096_v28 = vsel %vm1092_vm4, %v1090_v24, %v1094_v26 }
 0x3ba   : > { %v1101_v29 = vsel %vm1099_vm1, %v1097_v27, -1e+30  ;;  %v1100_v30 = vsel %vm1098_vm2, %v1096_v28, -1e+30 }
 0x3bb   : > { %v1106_v31 = vsel %vm1102_vm5, %v1101_v29, -inf  ;;  %v1103_v32 = vsel %vm1102_vm5, %v1100_v30, -inf  ;;  %v1576_v29 = vld [vmem:[#allocation10 + $0x40] sm:$0xff]  ;;  %v1571_v30 = vld [vmem:[#allocation10 + $0x18] sm:$0xff] }
 0x3bc   : > { %1107 = vmax.xlane.f32.xlu1 %v1106_v31  ;;  %1104 = vmax.xlane.f32.xlu0 %v1103_v32  ;;  %v1579_v32 = vld [vmem:[#allocation10 + $0x58] sm:$0xff] }
 0x3cd   : > { %1134 = vperm.xlu1 %14158, %v15915_v11  }
 0x3d1   : > { %14165 = vset.pattern.permute.xlu1 %v17909_v33 }
 0x449   : > { %v1108_v34 = vpop.xlane.xlu1 %1107  ;;  %v1105_v35 = vpop.xlane.xlu0 %1104 }
 0x44a   : > { %v1110_v36 = vsub.f32 %v1097_v27, %v1108_v34  ;;  %v1109_v37 = vsub.f32 %v1096_v28, %v1105_v35  ;;  %v1568_v28 = vld [vmem:[#allocation10] sm:$0xff]  ;;  %v12247_v35 = vcombine.low %v1571_v30, %v1579_v32 }
 0x44b   : > { %v12242_v31 = vcombine.high %v1568_v28, %v1576_v29  ;;  %v12241_v34 = vcombine.low %v1568_v28, %v1576_v29  ;;  %v15981_v28 = vld [vmem:[#allocation10 + $0x68] sm:$0xff] }
 0x44c   : > { %v1112_v38 = vmin.f32 %v1110_v36, 0.0  ;;  %v1111_v39 = vmin.f32 %v1109_v37, 0.0  ;;  %v12248_v36 = vcombine.high %v1571_v30, %v1579_v32  ;;  %v1584_v37 = vld [vmem:[#allocation10 + $0x80] sm:$0xff] }
 0x44d   : > { %v1135_v1 = vpop.permute.xlu1 %1134  ;;  %1956 = vmatprep.subr.bf16.mxu1 %v12242_v31 }
 0x44e   : > { %v1115_v40 = vmul.f32 1.442695, %v1112_v38  ;;  %v1113_v41 = vmul.f32 1.442695, %v1111_v39  ;;  %v1142_v3 = vadd.f32 %v1140_v2, %v1135_v1  ;;  %2085 = vmatprep.subr.bf16.mxu0 %v12248_v36  ;;  %1957 = vmatpush1.bf16.msra.mxu1 %v12241_v34  ;;  %v1592_v38 = vld [vmem:[#allocation10 + $0xc0] sm:$0xff]  ;;  %v1587_v39 = vld [vmem:[#allocation10 + $0x98] sm:$0xff] }
 0x450   : > { %14429 = vpow2.f32 %v1115_v40  ;;  %v1146_v5 = vmul.f32 0.2, %v1142_v3  ;;  %vm1144_vm6 = vcmp.gt.f32.partialorder %v1142_v3, 0.0  ;;  %v12258_v40 = vcombine.high %v1584_v37, %v1592_v38 }
 0x451   : > { %14431 = vpow2.f32 %v1113_v41  ;;  %v1595_v41 = vld [vmem:[#allocation10 + $0xd8] sm:$0xff] }
 0x452   : > { %v15957_v6 = vsel %vm1144_vm6, %v1142_v3, %v1146_v5  ;;  %1958 = vmatprep.subr.bf16.mxu1 %v12258_v40 }
 0x453   : > { %v1150_v7 = vsel %vm1099_vm1, %v15957_v6, -1e+30 }
 0x454   : > { %v1154_v8 = vsel %vm1102_vm5, %v1150_v7, -inf }
 0x45a   : > { %v14430_v42 = vpop.eup %14429 }
 0x45b   : > { %v14432_v43 = vpop.eup %14431  ;;  %v1118_v61 = vmul.f32 %v14430_v42, %v15929_v19  ;;  %v12257_v42 = vcombine.low %v1584_v37, %v1592_v38 }
 0x45c   : > { %v1117_v44 = vmul.f32 %v14432_v43, %v15934_v21  ;;  %v12263_v43 = vcombine.low %v1587_v39, %v1595_v41 }
 0x45d   : > { %v1122_v62 = vsel %vm1102_vm5, %v1118_v61, 0.0  ;;  %1959 = vmatpush1.bf16.msra.mxu1 %v12257_v42 }
 0x45e   : > { %v1119_v52 = vsel %vm1102_vm5, %v1117_v44, 0.0 }
 0x45f   : > { %1120 = vadd.xlane.f32.xlu0 %v1119_v52  ;;  %v1600_v52 = vld [vmem:[#allocation10 + $0x100] sm:$0xff] }
 0x463   : > { %1123 = vadd.xlane.f32.xlu0 %v1122_v62  ;;  %v1603_v62 = vld [vmem:[#allocation10 + $0x118] sm:$0xff] }
 0x479   : > { %1130 = vperm.xlu0 %14157, %v15911_v4  }
 0x47d   : > { %14164 = vset.pattern.permute.xlu0 %v17909_v33 }
 0x498   : > { %1155 = vmax.xlane.f32.xlu0 %v1154_v8  ;;  %v1616_v8 = vld [vmem:[#allocation10 + $0x180] sm:$0xff] }
 0x4ae   : > { %1178 = vperm.xlu0 %14164, %v15911_v4  }
 0x4ec   : > { %v1121_v9 = vpop.xlane.xlu0 %1120 }
 0x4ed   : > { %14433 = vrcp.f32 %v1121_v9  ;;  %v1624_v9 = vld [vmem:[#allocation10 + $0x1c0] sm:$0xff] }
 0x4f0   : > { %v1124_v10 = vpop.xlane.xlu0 %1123 }
 0x4f1   : > { %14435 = vrcp.f32 %v1124_v10  ;;  %v1619_v10 = vld [vmem:[#allocation10 + $0x198] sm:$0xff] }
 0x4f7   : > { %v14434_v13 = vpop.eup %14433 }
 0x4f8   : > { %v1131_v15 = vpop.permute.xlu0 %1130  ;;  %v1126_v16 = vmul.f32 %v14434_v13, %v1117_v44  ;;  %v12264_v44 = vcombine.high %v1587_v39, %v1595_v41  ;;  %v12290_v13 = vcombine.high %v1616_v8, %v1624_v9 }
 0x4f9   : > { %v1141_v20 = vadd.f32 %v1140_v2, %v1131_v15  ;;  %v1611_v2 = vld [vmem:[#allocation10 + $0x158] sm:$0xff] }
 0x4fa   : > { %13346 = vmatprep.mubr.msk.f32.mxu0 %vm1102_vm5, %v1126_v16  ;;  %v12279_v5 = vcombine.low %v1603_v62, %v1611_v2  ;;  %v12280_v7 = vcombine.high %v1603_v62, %v1611_v2  ;;  %v1627_v15 = vld [vmem:[#allocation10 + $0x1d8] sm:$0xff]  ;;  %v12289_v16 = vcombine.low %v1616_v8, %v1624_v9 }
 0x4fb   : > { %v14436_v22 = vpop.eup %14435  ;;  %v1145_v23 = vmul.f32 0.2, %v1141_v20  ;;  %vm1143_vm7 = vcmp.gt.f32.partialorder %v1141_v20, 0.0 }
 0x4fc   : > { %v1128_v24 = vmul.f32 %v14436_v22, %v1118_v61  ;;  %v1608_v61 = vld [vmem:[#allocation10 + $0x140] sm:$0xff]  ;;  %v12296_v22 = vcombine.high %v1619_v10, %v1627_v15 }
 0x4fd   : > { %v15965_v25 = vsel %vm1143_vm7, %v1141_v20, %v1145_v23  ;;  %v12274_v1 = vcombine.high %v1600_v52, %v1608_v61  ;;  %v12273_v3 = vcombine.low %v1600_v52, %v1608_v61  ;;  %v12295_v20 = vcombine.low %v1619_v10, %v1627_v15  ;;  %v15973_v23 = vld [vmem:[#allocation10 + $0x8] sm:$0xff] }
 0x4fe   : > { %13347 = vmatmul.mubr.msk.f32.vlgmr.msra.gmra.mrb[8].mxu0 %vm1102_vm5, %v1128_v24  ;;  %v1149_v26 = vsel %vm1098_vm2, %v15965_v25, -1e+30  ;;  %v15975_v24 = vld [vmem:[#allocation10 + $0x48] sm:$0xff] }
 0x4ff   : > { %v1151_v27 = vsel %vm1102_vm5, %v1149_v26, -inf  ;;  %2117 = vmatprep.mubr.bf16.mxu0 %v17912_v0  ;;  %2086 = vmatpush1.bf16.msra.mxu0 %v12247_v35  ;;  %v15977_v26 = vld [vmem:[#allocation10 + $0x28] sm:$0xff]  ;;  %v12243_v29 = vcombine.low %v15973_v23, %v15975_v24 }
 0x500   : > { %1152 = vmax.xlane.f32.xlu1 %v1151_v27  ;;  %2087 = vmatprep.subr.bf16.mxu0 %v12264_v44  ;;  %v12244_v27 = vcombine.high %v15973_v23, %v15975_v24  ;;  %v12251_v30 = vcombine.low %v15977_v26, %v15981_v28  ;;  %v12252_v31 = vcombine.high %v15977_v26, %v15981_v28 }
 0x501   : > { %1960 = vmatprep.subr.bf16.mxu1 %v12274_v1  ;;  %v12236_v1 = vld [vmem:[#allocation8] ss:$0 sm:$0xff] }
 0x502   : > { %1961 = vmatpush1.bf16.msra.mxu1 %v12273_v3 }
 0x503   : > { %2088 = vmatpush1.bf16.msra.mxu0 %v12263_v43  ;;  %1962 = vmatprep.subr.bf16.mxu1 %v12290_v13 }
 0x504   : > { %2089 = vmatprep.subr.bf16.mxu0 %v12280_v7 }
 0x506   : > { %1963 = vmatpush1.bf16.msra.mxu1 %v12289_v16 }
 0x507   : > { %2090 = vmatpush1.bf16.msra.mxu0 %v12279_v5  ;;  %1999 = vmatprep.subr.bf16.mxu1 %v12244_v27 }
 0x508   : > { %2091 = vmatprep.subr.bf16.mxu0 %v12296_v22 }
 0x50b   : > { %2092 = vmatpush1.bf16.msra.mxu0 %v12295_v20 }
 0x50c   : > { %2171 = vmatprep.subr.bf16.mxu0 %v12252_v31  ;;  %v1585_v31 = vld [vmem:[#allocation10 + $0x88] sm:$0xff] }
 0x525   : > { %v1156_v32 = vpop.xlane.xlu0 %1155 }
 0x526   : > { %v1158_v34 = vsub.f32 %v15957_v6, %v1156_v32 }
 0x528   : > { %v1160_v35 = vmin.f32 %v1158_v34, 0.0  ;;  %v1593_v34 = vld [vmem:[#allocation10 + $0xc8] sm:$0xff] }
 0x52a   : > { %v1163_v38 = vmul.f32 1.442695, %v1160_v35  ;;  %v1589_v35 = vld [vmem:[#allocation10 + $0xa8] sm:$0xff] }
 0x52c   : > { %14437 = vpow2.f32 %v1163_v38 }
 0x52d   : > { %v1179_v61 = vpop.permute.xlu0 %1178 }
 0x536   : > { %v14438_v41 = vpop.eup %14437 }
 0x537   : > { %v15997_v52 = vmul.f32 %v14438_v41, %v15929_v19 }
 0x539   : > { %v1170_v6 = vsel %vm1102_vm5, %v15997_v52, 0.0 }
 0x58d   : > { %v1153_v36 = vpop.xlane.xlu1 %1152 }
 0x58e   : > { %v1157_v37 = vsub.f32 %v15965_v25, %v1153_v36  ;;  %v16007_v25 = vsub.s32 2, %v15921_v14  ;;  %v1597_v36 = vld [vmem:[#allocation10 + $0xe8] sm:$0xff] }
 0x58f   : > { %v12268_v41 = vcombine.high %v1589_v35, %v1597_v36 }
 0x590   : > { %v1159_v39 = vmin.f32 %v1157_v37, 0.0  ;;  %18032 = vst [vmem:[#allocation37_spill] sm:$0xff] %v16007_v25  ;;  %v16011_v62 = vrot.slane %v15926_v18, %v16007_v25 }
 0x592   : > { %v1161_v40 = vmul.f32 1.442695, %v1159_v39  ;;  %v1189_v2 = vadd.f32 %v16011_v62, %v1179_v61  ;;  %v1613_v61 = vld [vmem:[#allocation10 + $0x168] sm:$0xff] }
 0x594   : > { %14439 = vpow2.f32 %v1161_v40  ;;  %v1193_v9 = vmul.f32 0.2, %v1189_v2  ;;  %vm1191_vm8 = vcmp.gt.f32.partialorder %v1189_v2, 0.0  ;;  %v12260_v40 = vcombine.high %v1585_v31, %v1593_v34 }
 0x596   : > { %v16014_v13 = vsel %vm1191_vm8, %v1189_v2, %v1193_v9  ;;  %v12267_v2 = vcombine.low %v1589_v35, %v1597_v36  ;;  %v1621_v9 = vld [vmem:[#allocation10 + $0x1a8] sm:$0xff] }
 0x597   : > { %v1197_v15 = vsel %vm1098_vm2, %v16014_v13, -1e+30 }
 0x598   : > { %v1199_v16 = vsel %vm1102_vm5, %v1197_v15, -inf }
 0x59e   : > { %v14440_v42 = vpop.eup %14439 }
 0x59f   : > { %v15992_v43 = vmul.f32 %v14440_v42, %v15934_v21  ;;  %v1601_v42 = vld [vmem:[#allocation10 + $0x108] sm:$0xff] }
 0x5a1   : > { %v1167_v44 = vsel %vm1102_vm5, %v15992_v43, 0.0 }
 0x5a2   : > { %1168 = vadd.xlane.f32.xlu1 %v1167_v44  ;;  %v1609_v44 = vld [vmem:[#allocation10 + $0x148] sm:$0xff] }
 0x5a3   : > { %v12275_v23 = vcombine.low %v1601_v42, %v1609_v44 }
 0x5a6   : > { %1171 = vadd.xlane.f32.xlu1 %v1170_v6  ;;  %v1605_v6 = vld [vmem:[#allocation10 + $0x128] sm:$0xff] }
 0x5a7   : > { %v12283_v24 = vcombine.low %v1605_v6, %v1613_v61 }
 0x5b7   : > { %14160 = vrot.lane.b32.xlu1 %v14159_v51, %s17977_s4 }
 0x5bb   : > { %1182 = vperm.xlu1 %14165, %v15915_v11  }
 0x5d1   : > { %v13348_v3 = vpop.f32.mrb[8].mxu0 }
 0x5d2   : > { %v1552_v5 = vadd.f32 %v13348_v3, %v12236_v1  ;;  %v1546_v7 = vpop.f32.mrb[9].mxu0  ;;  %v12276_v3 = vcombine.high %v1601_v42, %v1609_v44  ;;  %v1615_v42 = vld [vmem:[#allocation10 + $0x178] sm:$0xff] }
 0x5d3   : > { %v1547_v8 = vadd.f32 %v12236_v1, %v1546_v7  ;;  %v12259_v1 = vcombine.low %v1585_v31, %v1593_v34  ;;  %v1617_v7 = vld [vmem:[#allocation10 + $0x188] sm:$0xff]  ;;  %v1591_v31 = vld [vmem:[#allocation10 + $0xb8] sm:$0xff] }
 0x5d4   : > { %v1558_v45 = vmin.f32 %v1552_v5, 0.0  ;;  %vm1556_vm9 = vcmp.gt.f32.partialorder %v1552_v5, 0.0 }
 0x5d5   : > { %v1557_v49 = vmin.f32 %v1547_v8, 0.0  ;;  %vm1555_vm10 = vcmp.gt.f32.partialorder %v1547_v8, 0.0 }
 0x5d6   : > { %v1561_v51 = vmul.f32 1.442695, %v1558_v45  ;;  %v1629_v45 = vld [vmem:[#allocation10 + $0x1e8] sm:$0xff] }
 0x5d7   : > { %v1559_v10 = vmul.f32 1.442695, %v1557_v49  ;;  %v12300_v28 = vcombine.high %v1621_v9, %v1629_v45  ;;  %v1575_v49 = vld [vmem:[#allocation10 + $0x38] sm:$0xff]  ;;  %v12299_v15 = vcombine.low %v1621_v9, %v1629_v45 }
 0x5d8   : > { %14441 = vpow2.f32 %v1561_v51  ;;  %v1583_v51 = vld [vmem:[#allocation10 + $0x78] sm:$0xff] }
 0x5d9   : > { %14443 = vpow2.f32 %v1559_v10  ;;  %v12255_v35 = vcombine.low %v1575_v49, %v1583_v51 }
 0x5df   : > { %1200 = vmax.xlane.f32.xlu1 %v1199_v16 }
 0x5e2   : > { %v14442_v20 = vpop.eup %14441 }
 0x5e3   : > { %v14444_v22 = vpop.eup %14443  ;;  %v12240_v27 = vadd.f32 -1.0, %v14442_v20  ;;  %v12256_v20 = vcombine.high %v1575_v49, %v1583_v51  ;;  %v1588_v49 = vld [vmem:[#allocation10 + $0xa0] sm:$0xff] }
 0x5e4   : > { %v12239_v32 = vadd.f32 -1.0, %v14444_v22  ;;  %v1586_v22 = vld [vmem:[#allocation10 + $0x90] sm:$0xff]  ;;  %v1596_v51 = vld [vmem:[#allocation10 + $0xe0] sm:$0xff] }
 0x5e5   : > { %v1566_v37 = vsel %vm1556_vm9, %v1552_v5, %v12240_v27  ;;  %v12284_v5 = vcombine.high %v1605_v6, %v1613_v61  ;;  %v1594_v27 = vld [vmem:[#allocation10 + $0xd0] sm:$0xff] }
 0x5e6   : > { %v1565_v38 = vsel %vm1555_vm10, %v1547_v8, %v12239_v32  ;;  %v1625_v8 = vld [vmem:[#allocation10 + $0x1c8] sm:$0xff]  ;;  %v1599_v32 = vld [vmem:[#allocation10 + $0xf8] sm:$0xff]  ;;  %v12262_v36 = vcombine.high %v1586_v22, %v1594_v27  ;;  %v12261_v44 = vcombine.low %v1586_v22, %v1594_v27  ;;  %v12265_v22 = vcombine.low %v1588_v49, %v1596_v51 }
 0x5e7   : > { %v16020_v39 = vpack.c.bf16 %v1566_v37, %v1565_v38  ;;  %v12292_v26 = vcombine.high %v1617_v7, %v1625_v8  ;;  %v12291_v10 = vcombine.low %v1617_v7, %v1625_v8  ;;  %v12272_v37 = vcombine.high %v1591_v31, %v1599_v32  ;;  %v1602_v38 = vld [vmem:[#allocation10 + $0x110] sm:$0xff]  ;;  %v1631_v7 = vld [vmem:[#allocation10 + $0x1f8] sm:$0xff] }
 0x5e8   : > { %v12271_v6 = vcombine.low %v1591_v31, %v1599_v32  ;;  %v1620_v31 = vld [vmem:[#allocation10 + $0x1a0] sm:$0xff] }
 0x5e9   : > { %12305 = vmatmul.mubr.msk.bf16.vlgmr.msra.gmra.mrb[8].mxu1 %vm1952_vm11, %v16020_v39  ;;  %12308 = vmatmul.mubr.msk.bf16.vlgmr.msra.gmra.mrb[12].mxu0 %vm1952_vm11, %v16020_v39  ;;  %v1628_v32 = vld [vmem:[#allocation10 + $0x1e0] sm:$0xff] }
 0x5ea   : > { %2000 = vmatpush1.bf16.msra.mxu1 %v12243_v29  ;;  %2172 = vmatpush1.bf16.msra.mxu0 %v12251_v30  ;;  %v1570_v29 = vld [vmem:[#allocation10 + $0x10] sm:$0xff] }
 0x5eb   : > { %2001 = vmatprep.subr.bf16.mxu1 %v12260_v40  ;;  %2173 = vmatprep.subr.bf16.mxu0 %v12268_v41  ;;  %v1578_v30 = vld [vmem:[#allocation10 + $0x50] sm:$0xff]  ;;  %v1607_v41 = vld [vmem:[#allocation10 + $0x138] sm:$0xff] }
 0x5ec   : > { %2031 = vmatprep.mubr.bf16.mxu1 %v17912_v0  ;;  %2203 = vmatprep.mubr.bf16.mxu0 %v17912_v0  ;;  %v12246_v16 = vcombine.high %v1570_v29, %v1578_v30  ;;  %v12245_v34 = vcombine.low %v1570_v29, %v1578_v30  ;;  %v1610_v40 = vld [vmem:[#allocation10 + $0x150] sm:$0xff]  ;;  %v12287_v9 = vcombine.low %v1607_v41, %v1615_v42 }
 0x5ed   : > { %v12278_v61 = vcombine.high %v1602_v38, %v1610_v40  ;;  %v12277_v8 = vcombine.low %v1602_v38, %v1610_v40  ;;  %v12297_v38 = vcombine.low %v1620_v31, %v1628_v32 }
 0x5ee   : > { %2002 = vmatpush1.bf16.msra.mxu1 %v12259_v1  ;;  %2174 = vmatpush1.bf16.msra.mxu0 %v12267_v2  ;;  %v12288_v1 = vcombine.high %v1607_v41, %v1615_v42  ;;  %v1618_v2 = vld [vmem:[#allocation10 + $0x190] sm:$0xff] }
 0x5ef   : > { %2003 = vmatprep.subr.bf16.mxu1 %v12276_v3  ;;  %2175 = vmatprep.subr.bf16.mxu0 %v12284_v5  ;;  %v1626_v3 = vld [vmem:[#allocation10 + $0x1d0] sm:$0xff]  ;;  %v1623_v5 = vld [vmem:[#allocation10 + $0x1b8] sm:$0xff] }
 0x5f0   : > { %v12294_v45 = vcombine.high %v1618_v2, %v1626_v3  ;;  %v12303_v29 = vcombine.low %v1623_v5, %v1631_v7  ;;  %v1590_v41 = vld [vmem:[#allocation10 + $0xb0] sm:$0xff] }
 0x5f1   : > { %v1598_v42 = vld [vmem:[#allocation10 + $0xf0] sm:$0xff] }
 0x5f2   : > { %2004 = vmatpush1.bf16.msra.mxu1 %v12275_v23  ;;  %2176 = vmatpush1.bf16.msra.mxu0 %v12283_v24  ;;  %v12304_v23 = vcombine.high %v1623_v5, %v1631_v7  ;;  %v1572_v24 = vld [vmem:[#allocation10 + $0x20] sm:$0xff]  ;;  %v1622_v5 = vld [vmem:[#allocation10 + $0x1b0] sm:$0xff] }
 0x5f3   : > { %2005 = vmatprep.subr.bf16.mxu1 %v12292_v26  ;;  %2177 = vmatprep.subr.bf16.mxu0 %v12300_v28  ;;  %v1580_v26 = vld [vmem:[#allocation10 + $0x60] sm:$0xff]  ;;  %v12293_v28 = vcombine.low %v1618_v2, %v1626_v3  ;;  %v12269_v2 = vcombine.low %v1590_v41, %v1598_v42  ;;  %v1630_v7 = vld [vmem:[#allocation10 + $0x1f0] sm:$0xff] }
 0x5f4   : > { %v12250_v30 = vcombine.high %v1572_v24, %v1580_v26 }
 0x5f6   : > { %2006 = vmatpush1.bf16.msra.mxu1 %v12291_v10  ;;  %2178 = vmatpush1.bf16.msra.mxu0 %v12299_v15  ;;  %v12249_v10 = vcombine.low %v1572_v24, %v1580_v26  ;;  %v12266_v15 = vcombine.high %v1588_v49, %v1596_v51 }
 0x5f7   : > { %2042 = vmatprep.subr.bf16.mxu1 %v12246_v16  ;;  %2257 = vmatprep.subr.bf16.mxu0 %v12256_v20  ;;  %v1604_v16 = vld [vmem:[#allocation10 + $0x120] sm:$0xff] }
 0x5f8   : > { %v1612_v20 = vld [vmem:[#allocation10 + $0x160] sm:$0xff] }
 0x5f9   : > { %12306 = vmatmul.mubr.msk.bf16.vlgmr.msra.gmra.mrb[12].mxu1 %vm1952_vm11, %v16020_v39  ;;  %12310 = vmatmul.mubr.msk.bf16.vlgmr.msra.gmra.mrb[16].mxu0 %vm1952_vm11, %v16020_v39  ;;  %v12282_v27 = vcombine.high %v1604_v16, %v1612_v20 }
 0x5fa   : > { %2043 = vmatpush1.bf16.msra.mxu1 %v12245_v34  ;;  %2258 = vmatpush1.bf16.msra.mxu0 %v12255_v35  ;;  %v12281_v34 = vcombine.low %v1604_v16, %v1612_v20  ;;  %v12298_v35 = vcombine.high %v1620_v31, %v1628_v32 }
 0x5fb   : > { %2044 = vmatprep.subr.bf16.mxu1 %v12262_v36  ;;  %2259 = vmatprep.subr.bf16.mxu0 %v12272_v37  ;;  %v1574_v36 = vld [vmem:[#allocation10 + $0x30] sm:$0xff] }
 0x5fc   : > { %2074 = vmatprep.mubr.bf16.mxu1 %v17912_v0  ;;  %2289 = vmatprep.mubr.bf16.mxu0 %v17912_v0  ;;  %v1582_v37 = vld [vmem:[#allocation10 + $0x70] sm:$0xff] }
 0x5fd   : > { %v12254_v40 = vcombine.high %v1574_v36, %v1582_v37 }
 0x5fe   : > { %2045 = vmatpush1.bf16.msra.mxu1 %v12261_v44  ;;  %2260 = vmatpush1.bf16.msra.mxu0 %v12271_v6  ;;  %v12253_v44 = vcombine.low %v1574_v36, %v1582_v37  ;;  %v12270_v6 = vcombine.high %v1590_v41, %v1598_v42  ;;  %v2526_v41 = vld [vmem:[#allocation10 + $0x208] sm:$0xff] }
 0x5ff   : > { %2046 = vmatprep.subr.bf16.mxu1 %v12278_v61  ;;  %2261 = vmatprep.subr.bf16.mxu0 %v12288_v1  ;;  %v1606_v61 = vld [vmem:[#allocation10 + $0x130] sm:$0xff] }
 0x600   : > { %v1614_v1 = vld [vmem:[#allocation10 + $0x170] sm:$0xff] }
 0x601   : > { %v12286_v3 = vcombine.high %v1606_v61, %v1614_v1 }
 0x602   : > { %2047 = vmatpush1.bf16.msra.mxu1 %v12277_v8  ;;  %2262 = vmatpush1.bf16.msra.mxu0 %v12287_v9  ;;  %v12285_v8 = vcombine.low %v1606_v61, %v1614_v1  ;;  %v12302_v9 = vcombine.high %v1622_v5, %v1630_v7 }
 0x603   : > { %2048 = vmatprep.subr.bf16.mxu1 %v12294_v45  ;;  %2263 = vmatprep.subr.bf16.mxu0 %v12304_v23  ;;  %v12301_v45 = vcombine.low %v1622_v5, %v1630_v7  ;;  %v2550_v7 = vld [vmem:[#allocation10 + $0x2c8] sm:$0xff] }
 0x606   : > { %2049 = vmatpush1.bf16.msra.mxu1 %v12293_v28  ;;  %2264 = vmatpush1.bf16.msra.mxu0 %v12303_v29 }
 0x607   : > { %2128 = vmatprep.subr.bf16.mxu1 %v12250_v30 }
 0x609   : > { %12307 = vmatmul.mubr.msk.bf16.vlgmr.msra.gmra.mrb[16].mxu1 %vm1952_vm11, %v16020_v39  ;;  %12312 = vmatmul.mubr.msk.bf16.vlgmr.msra.gmra.mrb[20].mxu0 %vm1952_vm11, %v16020_v39 }
 0x60a   : > { %2129 = vmatpush1.bf16.msra.mxu1 %v12249_v10  ;;  %2160 = vmatprep.mubr.bf16.mxu1 %v17912_v0 }
 0x60b   : > { %2130 = vmatprep.subr.bf16.mxu1 %v12266_v15  ;;  %2987 = vmatprep.mubr.bf16.mxu0 %v17912_v0 }
 0x60e   : > { %2131 = vmatpush1.bf16.msra.mxu1 %v12265_v22 }
 0x60f   : > { %2132 = vmatprep.subr.bf16.mxu1 %v12282_v27 }
 0x612   : > { %2133 = vmatpush1.bf16.msra.mxu1 %v12281_v34 }
 0x613   : > { %2134 = vmatprep.subr.bf16.mxu1 %v12298_v35 }
 0x616   : > { %2135 = vmatpush1.bf16.msra.mxu1 %v12297_v38  ;;  %v2525_v38 = vld [vmem:[#allocation10 + $0x200] sm:$0xff] }
 0x617   : > { %2214 = vmatprep.subr.bf16.mxu1 %v12254_v40  ;;  %v2533_v40 = vld [vmem:[#allocation10 + $0x240] sm:$0xff] }
 0x618   : > { %v12319_v42 = vcombine.high %v2525_v38, %v2533_v40 }
 0x619   : > { %12309 = vmatmul.mubr.msk.bf16.vlgmr.msra.gmra.mrb[20].mxu1 %vm1952_vm11, %v16020_v39 }
 0x61a   : > { %2215 = vmatpush1.bf16.msra.mxu1 %v12253_v44  ;;  %2246 = vmatprep.mubr.bf16.mxu1 %v17912_v0  ;;  %v2534_v44 = vld [vmem:[#allocation10 + $0x248] sm:$0xff] }
 0x61b   : > { %2216 = vmatprep.subr.bf16.mxu1 %v12270_v6  ;;  %v12318_v6 = vcombine.low %v2525_v38, %v2533_v40  ;;  %v12320_v61 = vcombine.low %v2526_v41, %v2534_v44  ;;  %v12321_v1 = vcombine.high %v2526_v41, %v2534_v44  ;;  %v2536_v38 = vld [vmem:[#allocation10 + $0x258] sm:$0xff] }
 0x61d   : > { %2955 = vmatprep.subr.bf16.mxu0 %v12321_v1 }
 0x61e   : > { %2217 = vmatpush1.bf16.msra.mxu1 %v12269_v2  ;;  %v2549_v2 = vld [vmem:[#allocation10 + $0x2c0] sm:$0xff]  ;;  %2956 = vmatpush1.bf16.msra.mxu0 %v12320_v61 }
 0x61f   : > { %2218 = vmatprep.subr.bf16.mxu1 %v12286_v3  ;;  %v2542_v3 = vld [vmem:[#allocation10 + $0x288] sm:$0xff] }
 0x622   : > { %2219 = vmatpush1.bf16.msra.mxu1 %v12285_v8 }
 0x623   : > { %2220 = vmatprep.subr.bf16.mxu1 %v12302_v9  ;;  %v12336_v9 = vcombine.low %v2542_v3, %v2550_v7 }
 0x626   : > { %2221 = vmatpush1.bf16.msra.mxu1 %v12301_v45  ;;  %v12337_v45 = vcombine.high %v2542_v3, %v2550_v7 }
 0x628   : > { %2957 = vmatprep.subr.bf16.mxu0 %v12337_v45 }
 0x629   : > { %12311 = vmatmul.mubr.msk.bf16.vlgmr.msra.gmra.mrb[24].mxu1 %vm1952_vm11, %v16020_v39  ;;  %2958 = vmatpush1.bf16.msra.mxu0 %v12336_v9  ;;  %v17900_v9 = vmov 4  }
 0x62a   : > { %14173 = vset.pattern.permute.xlu0 %v17900_v9 }
 0x62f   : > { %v1169_v23 = vpop.xlane.xlu1 %1168 }
 0x630   : > { %14445 = vrcp.f32 %v1169_v23  ;;  %v2557_v23 = vld [vmem:[#allocation10 + $0x300] sm:$0xff] }
 0x633   : > { %v1172_v24 = vpop.xlane.xlu1 %1171 }
 0x634   : > { %14447 = vrcp.f32 %v1172_v24  ;;  %v2565_v24 = vld [vmem:[#allocation10 + $0x340] sm:$0xff] }
 0x637   : > { %v14161_v26 = vpop.permute.xlu1 %14160 }
 0x638   : > { %v14163_v28 = vunpack.i.h.bf16 %v14161_v26  ;;  %v14162_v29 = vunpack.i.l.bf16 %v14161_v26  ;;  %v2558_v26 = vld [vmem:[#allocation10 + $0x308] sm:$0xff] }
 0x63a   : > { %v14446_v30 = vpop.eup %14445  ;;  %v13522_v49 = vpack.c.bf16 %v14163_v28, %v14162_v29  ;;  %v12351_v28 = vcombine.high %v2557_v23, %v2565_v24  ;;  %v2566_v29 = vld [vmem:[#allocation10 + $0x348] sm:$0xff] }
 0x63b   : > { %v1183_v51 = vpop.permute.xlu1 %1182  ;;  %v1174_v10 = vmul.f32 %v14446_v30, %v15992_v43  ;;  %v12350_v30 = vcombine.low %v2557_v23, %v2565_v24 }
 0x63c   : > { %v1190_v15 = vadd.f32 %v16011_v62, %v1183_v51  ;;  %13523 = vmatprep.subr.bf16.mxu1 %v13522_v49  ;;  %v17907_v62 = vmov 3   ;;  %v12353_v51 = vcombine.high %v2558_v26, %v2566_v29 }
 0x63d   : > { %13525 = vmatpush3.bf16.msra.mxu1 %v13522_v49  ;;  %13353 = vmatprep.mubr.msk.f32.mxu1 %vm1102_vm5, %v1174_v10  ;;  %v12352_v49 = vcombine.low %v2558_v26, %v2566_v29  ;;  %v2573_v10 = vld [vmem:[#allocation10 + $0x380] sm:$0xff] }
 0x63e   : > { %v14448_v16 = vpop.eup %14447  ;;  %v1194_v39 = vmul.f32 0.2, %v1190_v15  ;;  %vm1192_vm12 = vcmp.gt.f32.partialorder %v1190_v15, 0.0  ;;  %14166 = vset.pattern.permute.xlu1 %v17907_v62  ;;  %2912 = vmatprep.subr.bf16.mxu1 %v12319_v42 }
 0x63f   : > { %v1176_v20 = vmul.f32 %v14448_v16, %v15997_v52  ;;  %2959 = vmatprep.subr.bf16.mxu0 %v12353_v51  ;;  %v2574_v16 = vld [vmem:[#allocation10 + $0x388] sm:$0xff] }
 0x640   : > { %v16055_v22 = vsel %vm1192_vm12, %v1190_v15, %v1194_v39  ;;  %v2581_v15 = vld [vmem:[#allocation10 + $0x3c0] sm:$0xff]  ;;  %2960 = vmatpush1.bf16.msra.mxu0 %v12352_v49 }
 0x641   : > { %13354 = vmatmul.mubr.msk.f32.vlgmr.msra.gmra.mrb[28].mxu1 %vm1102_vm5, %v1176_v20  ;;  %v1198_v27 = vsel %vm1099_vm1, %v16055_v22, -1e+30  ;;  %v12367_v39 = vcombine.high %v2573_v10, %v2581_v15  ;;  %v2582_v20 = vld [vmem:[#allocation10 + $0x3c8] sm:$0xff] }
 0x642   : > { %v1202_v43 = vsel %vm1102_vm5, %v1198_v27, -inf  ;;  %2944 = vmatprep.mubr.bf16.mxu1 %v17912_v0  ;;  %2913 = vmatpush1.bf16.msra.mxu1 %v12318_v6  ;;  %v12366_v27 = vcombine.low %v2573_v10, %v2581_v15 }
 0x643   : > { %1203 = vmax.xlane.f32.xlu1 %v1202_v43  ;;  %v12368_v43 = vcombine.low %v2574_v16, %v2582_v20 }
 0x66c   : > { %v1201_v31 = vpop.xlane.xlu1 %1200 }
 0x66d   : > { %v1205_v32 = vsub.f32 %v16014_v13, %v1201_v31  ;;  %v2541_v13 = vld [vmem:[#allocation10 + $0x280] sm:$0xff]  ;;  %v12369_v31 = vcombine.high %v2574_v16, %v2582_v20  ;;  %v2543_v16 = vld [vmem:[#allocation10 + $0x290] sm:$0xff] }
 0x66e   : > { %v12335_v5 = vcombine.high %v2541_v13, %v2549_v2  ;;  %v12334_v8 = vcombine.low %v2541_v13, %v2549_v2  ;;  %v2551_v20 = vld [vmem:[#allocation10 + $0x2d0] sm:$0xff] }
 0x66f   : > { %v1207_v52 = vmin.f32 %v1205_v32, 0.0  ;;  %2961 = vmatprep.subr.bf16.mxu0 %v12369_v31  ;;  %v2527_v32 = vld [vmem:[#allocation10 + $0x210] sm:$0xff] }
 0x670   : > { %2914 = vmatprep.subr.bf16.mxu1 %v12335_v5  ;;  %2962 = vmatpush1.bf16.msra.mxu0 %v12368_v43  ;;  %v2552_v43 = vld [vmem:[#allocation10 + $0x2d8] sm:$0xff] }
 0x671   : > { %v1209_v34 = vmul.f32 1.442695, %v1207_v52  ;;  %2915 = vmatpush1.bf16.msra.mxu1 %v12334_v8  ;;  %v2535_v52 = vld [vmem:[#allocation10 + $0x250] sm:$0xff] }
 0x672   : > { %2916 = vmatprep.subr.bf16.mxu1 %v12351_v28 }
 0x673   : > { %14449 = vpow2.f32 %v1209_v34  ;;  %v2528_v34 = vld [vmem:[#allocation10 + $0x218] sm:$0xff] }
 0x674   : > { %v12324_v40 = vcombine.low %v2528_v34, %v2536_v38  ;;  %v12325_v41 = vcombine.high %v2528_v34, %v2536_v38  ;;  %v12339_v34 = vcombine.high %v2543_v16, %v2551_v20  ;;  %v2559_v38 = vld [vmem:[#allocation10 + $0x310] sm:$0xff] }
 0x675   : > { %2917 = vmatpush1.bf16.msra.mxu1 %v12350_v30 }
 0x676   : > { %2918 = vmatprep.subr.bf16.mxu1 %v12367_v39  ;;  %3041 = vmatprep.subr.bf16.mxu0 %v12325_v41  ;;  %v2567_v41 = vld [vmem:[#allocation10 + $0x350] sm:$0xff] }
 0x679   : > { %2919 = vmatpush1.bf16.msra.mxu1 %v12366_v27  ;;  %v2544_v27 = vld [vmem:[#allocation10 + $0x298] sm:$0xff] }
 0x67d   : > { %v14450_v35 = vpop.eup %14449 }
 0x67e   : > { %v16066_v36 = vmul.f32 %v14450_v35, %v15934_v21  ;;  %v12322_v35 = vcombine.low %v2527_v32, %v2535_v52 }
 0x680   : > { %v1215_v37 = vsel %vm1102_vm5, %v16066_v36, 0.0 }
 0x681   : > { %1216 = vadd.xlane.f32.xlu0 %v1215_v37  ;;  %v12323_v37 = vcombine.high %v2527_v32, %v2535_v52 }
 0x683   : > { %2998 = vmatprep.subr.bf16.mxu1 %v12323_v37  ;;  %v12341_v37 = vcombine.high %v2544_v27, %v2552_v43 }
 0x6cc   : > { %v16070_v42 = vpop.f32.mrb[12].mxu1 }
 0x6cd   : > { %v16072_v44 = vpop.f32.mrb[13].mxu1 }
 0x6ce   : > { %v16074_v6 = vpop.f32.mrb[14].mxu1 }
 0x6cf   : > { %v16076_v61 = vpop.f32.mrb[15].mxu1 }
 0x6d0   : > { %v1204_v1 = vpop.xlane.xlu1 %1203 }
 0x6d1   : > { %v1206_v13 = vsub.f32 %v16055_v22, %v1204_v1  ;;  %v12313_v22 = vld [vmem:[#allocation8 + $0x1] ss:$0 sm:$0xff] }
 0x6d2   : > { %v2560_v1 = vld [vmem:[#allocation10 + $0x318] sm:$0xff] }
 0x6d3   : > { %v1208_v2 = vmin.f32 %v1206_v13, 0.0  ;;  %v2568_v13 = vld [vmem:[#allocation10 + $0x358] sm:$0xff] }
 0x6d5   : > { %v1211_v3 = vmul.f32 1.442695, %v1208_v2  ;;  %v12338_v2 = vcombine.low %v2543_v16, %v2551_v20  ;;  %v2545_v20 = vld [vmem:[#allocation10 + $0x2a0] sm:$0xff] }
 0x6d7   : > { %14451 = vpow2.f32 %v1211_v3  ;;  %v12340_v3 = vcombine.low %v2544_v27, %v2552_v43  ;;  %v2553_v27 = vld [vmem:[#allocation10 + $0x2e0] sm:$0xff]  ;;  %v2546_v43 = vld [vmem:[#allocation10 + $0x2a8] sm:$0xff] }
 0x6e1   : > { %v14452_v5 = vpop.eup %14451 }
 0x6e2   : > { %v16080_v7 = vmul.f32 %v14452_v5, %v15929_v19  ;;  %v12355_v5 = vcombine.high %v2559_v38, %v2567_v41 }
 0x6e4   : > { %v1218_v8 = vsel %vm1102_vm5, %v16080_v7, 0.0 }
 0x6e5   : > { %1219 = vadd.xlane.f32.xlu1 %v1218_v8  ;;  %v12357_v8 = vcombine.high %v2560_v1, %v2568_v13 }
 0x6f6   : > { %1226 = vperm.xlu1 %14166, %v15911_v4  }
 0x6fa   : > { %1230 = vperm.xlu1 %14166, %v15915_v11  }
 0x6fe   : > { %14172 = vset.pattern.permute.xlu1 %v17900_v9 }
 0x714   : > { %v13355_v45 = vpop.f32.mrb[28].mxu1 }
 0x715   : > { %v2508_v23 = vadd.f32 %v13355_v45, %v12313_v22  ;;  %v2502_v24 = vpop.f32.mrb[29].mxu1  ;;  %v2583_v45 = vld [vmem:[#allocation10 + $0x3d0] sm:$0xff] }
 0x716   : > { %v2503_v26 = vadd.f32 %v12313_v22, %v2502_v24  ;;  %v2575_v22 = vld [vmem:[#allocation10 + $0x390] sm:$0xff]  ;;  %v2584_v24 = vld [vmem:[#allocation10 + $0x3d8] sm:$0xff] }
 0x717   : > { %v2514_v28 = vmin.f32 %v2508_v23, 0.0  ;;  %vm2512_vm13 = vcmp.gt.f32.partialorder %v2508_v23, 0.0 }
 0x718   : > { %v2513_v29 = vmin.f32 %v2503_v26, 0.0  ;;  %vm2511_vm14 = vcmp.gt.f32.partialorder %v2503_v26, 0.0 }
 0x719   : > { %v2517_v30 = vmul.f32 1.442695, %v2514_v28  ;;  %v12356_v28 = vcombine.low %v2560_v1, %v2568_v13  ;;  %v2569_v1 = vld [vmem:[#allocation10 + $0x360] sm:$0xff]  ;;  %v2562_v13 = vld [vmem:[#allocation10 + $0x328] sm:$0xff] }
 0x71a   : > { %v2515_v49 = vmul.f32 1.442695, %v2513_v29  ;;  %v2529_v29 = vld [vmem:[#allocation10 + $0x220] sm:$0xff] }
 0x71b   : > { %14453 = vpow2.f32 %v2517_v30  ;;  %v2537_v30 = vld [vmem:[#allocation10 + $0x260] sm:$0xff] }
 0x71c   : > { %14455 = vpow2.f32 %v2515_v49  ;;  %v2530_v49 = vld [vmem:[#allocation10 + $0x228] sm:$0xff]  ;;  %v12327_v16 = vcombine.high %v2529_v29, %v2537_v30 }
 0x725   : > { %v14454_v51 = vpop.eup %14453 }
 0x726   : > { %v14456_v10 = vpop.eup %14455  ;;  %v12317_v15 = vadd.f32 -1.0, %v14454_v51  ;;  %v2538_v51 = vld [vmem:[#allocation10 + $0x268] sm:$0xff] }
 0x727   : > { %v12316_v39 = vadd.f32 -1.0, %v14456_v10  ;;  %v12370_v10 = vcombine.low %v2575_v22, %v2583_v45 }
 0x728   : > { %v2522_v31 = vsel %vm2512_vm13, %v2508_v23, %v12317_v15  ;;  %v2576_v23 = vld [vmem:[#allocation10 + $0x398] sm:$0xff] }
 0x729   : > { %v2521_v32 = vsel %vm2511_vm14, %v2503_v26, %v12316_v39  ;;  %v12354_v26 = vcombine.low %v2559_v38, %v2567_v41  ;;  %v12372_v15 = vcombine.low %v2576_v23, %v2584_v24  ;;  %v12329_v39 = vcombine.high %v2530_v49, %v2538_v51  ;;  %v2561_v41 = vld [vmem:[#allocation10 + $0x320] sm:$0xff] }
 0x72a   : > { %v16088_v52 = vpack.c.bf16 %v2522_v31, %v2521_v32  ;;  %v2554_v31 = vld [vmem:[#allocation10 + $0x2e8] sm:$0xff]  ;;  %v12326_v32 = vcombine.low %v2529_v29, %v2537_v30  ;;  %v2531_v30 = vld [vmem:[#allocation10 + $0x230] sm:$0xff] }
 0x72b   : > { %v12345_v38 = vcombine.high %v2546_v43, %v2554_v31 }
 0x72c   : > { %12382 = vmatmul.mubr.msk.bf16.vlgmr.msra.gmra.mrb[8].mxu1 %vm1952_vm11, %v16088_v52  ;;  %12383 = vmatmul.mubr.msk.bf16.vlgmr.msra.gmra.mrb[24].mxu0 %vm1952_vm11, %v16088_v52 }
 0x72d   : > { %2999 = vmatpush1.bf16.msra.mxu1 %v12322_v35  ;;  %3042 = vmatpush1.bf16.msra.mxu0 %v12324_v40  ;;  %v12371_v35 = vcombine.high %v2575_v22, %v2583_v45  ;;  %v12373_v40 = vcombine.high %v2576_v23, %v2584_v24  ;;  %v2577_v45 = vld [vmem:[#allocation10 + $0x3a0] sm:$0xff]  ;;  %v2578_v24 = vld [vmem:[#allocation10 + $0x3a8] sm:$0xff] }
 0x72e   : > { %3000 = vmatprep.subr.bf16.mxu1 %v12339_v34  ;;  %3043 = vmatprep.subr.bf16.mxu0 %v12341_v37  ;;  %v12328_v34 = vcombine.low %v2530_v49, %v2538_v51  ;;  %v12343_v37 = vcombine.high %v2545_v20, %v2553_v27  ;;  %v2585_v23 = vld [vmem:[#allocation10 + $0x3e0] sm:$0xff]  ;;  %v2539_v49 = vld [vmem:[#allocation10 + $0x270] sm:$0xff]  ;;  %v2532_v51 = vld [vmem:[#allocation10 + $0x238] sm:$0xff] }
 0x72f   : > { %3030 = vmatprep.mubr.bf16.mxu1 %v17912_v0  ;;  %3073 = vmatprep.mubr.bf16.mxu0 %v17912_v0 }
 0x731   : > { %3001 = vmatpush1.bf16.msra.mxu1 %v12338_v2  ;;  %3044 = vmatpush1.bf16.msra.mxu0 %v12340_v3  ;;  %v2570_v2 = vld [vmem:[#allocation10 + $0x368] sm:$0xff]  ;;  %v12342_v3 = vcombine.low %v2545_v20, %v2553_v27  ;;  %v2547_v27 = vld [vmem:[#allocation10 + $0x2b0] sm:$0xff] }
 0x732   : > { %3002 = vmatprep.subr.bf16.mxu1 %v12355_v5  ;;  %3045 = vmatprep.subr.bf16.mxu0 %v12357_v8  ;;  %v12344_v5 = vcombine.low %v2546_v43, %v2554_v31  ;;  %v12359_v8 = vcombine.high %v2561_v41, %v2569_v1  ;;  %v12361_v22 = vcombine.high %v2562_v13, %v2570_v2  ;;  %v2555_v43 = vld [vmem:[#allocation10 + $0x2f0] sm:$0xff]  ;;  %v2548_v31 = vld [vmem:[#allocation10 + $0x2b8] sm:$0xff] }
 0x735   : > { %3003 = vmatpush1.bf16.msra.mxu1 %v12354_v26  ;;  %3046 = vmatpush1.bf16.msra.mxu0 %v12356_v28  ;;  %v2586_v26 = vld [vmem:[#allocation10 + $0x3e8] sm:$0xff]  ;;  %v12358_v28 = vcombine.low %v2561_v41, %v2569_v1  ;;  %v2563_v1 = vld [vmem:[#allocation10 + $0x330] sm:$0xff] }
 0x736   : > { %3004 = vmatprep.subr.bf16.mxu1 %v12371_v35  ;;  %3047 = vmatprep.subr.bf16.mxu0 %v12373_v40  ;;  %v12360_v35 = vcombine.low %v2562_v13, %v2570_v2  ;;  %v12375_v40 = vcombine.high %v2577_v45, %v2585_v23  ;;  %v12377_v29 = vcombine.high %v2578_v24, %v2586_v26  ;;  %v1217_v13 = vpop.xlane.xlu0 %1216  ;;  %v2571_v2 = vld [vmem:[#allocation10 + $0x370] sm:$0xff] }
 0x737   : > { %14457 = vrcp.f32 %v1217_v13 }
 0x739   : > { %3005 = vmatpush1.bf16.msra.mxu1 %v12370_v10  ;;  %3048 = vmatpush1.bf16.msra.mxu0 %v12372_v15  ;;  %v2540_v10 = vld [vmem:[#allocation10 + $0x278] sm:$0xff]  ;;  %v12374_v15 = vcombine.low %v2577_v45, %v2585_v23  ;;  %v12363_v45 = vcombine.high %v2563_v1, %v2571_v2 }
 0x73a   : > { %3084 = vmatprep.subr.bf16.mxu1 %v12327_v16  ;;  %3127 = vmatprep.subr.bf16.mxu0 %v12329_v39  ;;  %v12376_v16 = vcombine.low %v2578_v24, %v2586_v26  ;;  %v12331_v39 = vcombine.high %v2531_v30, %v2539_v49  ;;  %v12333_v20 = vcombine.high %v2532_v51, %v2540_v10  ;;  %v2579_v24 = vld [vmem:[#allocation10 + $0x3b0] sm:$0xff] }
 0x73b   : > { %v2587_v26 = vld [vmem:[#allocation10 + $0x3f0] sm:$0xff] }
 0x73c   : > { %12384 = vmatmul.mubr.msk.bf16.vlgmr.msra.gmra.mrb[16].mxu1 %vm1952_vm11, %v16088_v52  ;;  %12385 = vmatmul.mubr.msk.bf16.vlgmr.msra.gmra.mrb[12].mxu0 %vm1952_vm11, %v16088_v52 }
 0x73d   : > { %3085 = vmatpush1.bf16.msra.mxu1 %v12326_v32  ;;  %3128 = vmatpush1.bf16.msra.mxu0 %v12328_v34  ;;  %v2556_v32 = vld [vmem:[#allocation10 + $0x2f8] sm:$0xff]  ;;  %v12330_v34 = vcombine.low %v2531_v30, %v2539_v49  ;;  %v12379_v30 = vcombine.high %v2579_v24, %v2587_v26 }
 0x73e   : > { %3086 = vmatprep.subr.bf16.mxu1 %v12343_v37  ;;  %3129 = vmatprep.subr.bf16.mxu0 %v12345_v38  ;;  %v12332_v37 = vcombine.low %v2532_v51, %v2540_v10  ;;  %v12347_v38 = vcombine.high %v2547_v27, %v2555_v43  ;;  %v12349_v41 = vcombine.high %v2548_v31, %v2556_v32 }
 0x73f   : > { %3116 = vmatprep.mubr.bf16.mxu1 %v17912_v0  ;;  %3159 = vmatprep.mubr.bf16.mxu0 %v17912_v0  ;;  %v12378_v51 = vcombine.low %v2579_v24, %v2587_v26 }
 0x741   : > { %3087 = vmatpush1.bf16.msra.mxu1 %v12342_v3  ;;  %3130 = vmatpush1.bf16.msra.mxu0 %v12344_v5  ;;  %v2564_v3 = vld [vmem:[#allocation10 + $0x338] sm:$0xff] }
 0x742   : > { %3088 = vmatprep.subr.bf16.mxu1 %v12359_v8  ;;  %3131 = vmatprep.subr.bf16.mxu0 %v12361_v22  ;;  %v2572_v5 = vld [vmem:[#allocation10 + $0x378] sm:$0xff]  ;;  %v12346_v8 = vcombine.low %v2547_v27, %v2555_v43  ;;  %v12348_v22 = vcombine.low %v2548_v31, %v2556_v32 }
 0x743   : > { %v12365_v23 = vcombine.high %v2564_v3, %v2572_v5 }
 0x745   : > { %3089 = vmatpush1.bf16.msra.mxu1 %v12358_v28  ;;  %3132 = vmatpush1.bf16.msra.mxu0 %v12360_v35  ;;  %v2580_v28 = vld [vmem:[#allocation10 + $0x3b8] sm:$0xff] }
 0x746   : > { %3090 = vmatprep.subr.bf16.mxu1 %v12375_v40  ;;  %3133 = vmatprep.subr.bf16.mxu0 %v12377_v29  ;;  %v2588_v35 = vld [vmem:[#allocation10 + $0x3f8] sm:$0xff]  ;;  %v12362_v40 = vcombine.low %v2563_v1, %v2571_v2  ;;  %v12364_v29 = vcombine.low %v2564_v3, %v2572_v5  ;;  %v3391_v5 = vld [vmem:[#allocation10 + $0x400] sm:$0xff] }
 0x747   : > { %v12381_v49 = vcombine.high %v2580_v28, %v2588_v35  ;;  %v12380_v10 = vcombine.low %v2580_v28, %v2588_v35  ;;  %v3407_v28 = vld [vmem:[#allocation10 + $0x480] sm:$0xff] }
 0x748   : > { %v3415_v35 = vld [vmem:[#allocation10 + $0x4c0] sm:$0xff] }
 0x749   : > { %3091 = vmatpush1.bf16.msra.mxu1 %v12374_v15  ;;  %3134 = vmatpush1.bf16.msra.mxu0 %v12376_v16  ;;  %v14458_v15 = vpop.eup %14457 }
 0x74a   : > { %3170 = vmatprep.subr.bf16.mxu1 %v12331_v39  ;;  %3213 = vmatprep.subr.bf16.mxu0 %v12333_v20  ;;  %v1222_v16 = vmul.f32 %v14458_v15, %v16066_v36  ;;  %v16118_v39 = vsub.s32 3, %v15921_v14  ;;  %v3423_v15 = vld [vmem:[#allocation10 + $0x500] sm:$0xff] }
 0x74c   : > { %12386 = vmatmul.mubr.msk.bf16.vlgmr.msra.gmra.mrb[20].mxu1 %vm1952_vm11, %v16088_v52  ;;  %12387 = vmatmul.mubr.msk.bf16.vlgmr.msra.gmra.mrb[16].mxu0 %vm1952_vm11, %v16088_v52  ;;  %18033 = vst [vmem:[#allocation38_spill] sm:$0xff] %v16118_v39  ;;  %v1236_v36 = vrot.slane %v15926_v18, %v16118_v39 }
 0x74d   : > { %3171 = vmatpush1.bf16.msra.mxu1 %v12330_v34  ;;  %3214 = vmatpush1.bf16.msra.mxu0 %v12332_v37 }
 0x74e   : > { %3172 = vmatprep.subr.bf16.mxu1 %v12347_v38  ;;  %3215 = vmatprep.subr.bf16.mxu0 %v12349_v41 }
 0x74f   : > { %3202 = vmatprep.mubr.bf16.mxu1 %v17912_v0  ;;  %3245 = vmatprep.mubr.bf16.mxu0 %v17912_v0 }
 0x751   : > { %3173 = vmatpush1.bf16.msra.mxu1 %v12346_v8  ;;  %3216 = vmatpush1.bf16.msra.mxu0 %v12348_v22  ;;  %v3399_v8 = vld [vmem:[#allocation10 + $0x440] sm:$0xff]  ;;  %v3392_v22 = vld [vmem:[#allocation10 + $0x408] sm:$0xff] }
 0x752   : > { %3174 = vmatprep.subr.bf16.mxu1 %v12363_v45  ;;  %3217 = vmatprep.subr.bf16.mxu0 %v12365_v23  ;;  %v3400_v45 = vld [vmem:[#allocation10 + $0x448] sm:$0xff]  ;;  %v12395_v23 = vcombine.low %v3391_v5, %v3399_v8 }
 0x753   : > { %v12397_v24 = vcombine.low %v3392_v22, %v3400_v45  ;;  %v12398_v26 = vcombine.high %v3392_v22, %v3400_v45  ;;  %v16142_v22 = vld [vmem:[#allocation10 + $0x418] sm:$0xff] }
 0x755   : > { %3175 = vmatpush1.bf16.msra.mxu1 %v12362_v40  ;;  %3218 = vmatpush1.bf16.msra.mxu0 %v12364_v29  ;;  %v3408_v40 = vld [vmem:[#allocation10 + $0x488] sm:$0xff]  ;;  %v12412_v29 = vcombine.high %v3407_v28, %v3415_v35 }
 0x756   : > { %3176 = vmatprep.subr.bf16.mxu1 %v12379_v30  ;;  %3219 = vmatprep.subr.bf16.mxu0 %v12381_v49  ;;  %v3416_v30 = vld [vmem:[#allocation10 + $0x4c8] sm:$0xff]  ;;  %v12411_v49 = vcombine.low %v3407_v28, %v3415_v35 }
 0x759   : > { %3177 = vmatpush1.bf16.msra.mxu1 %v12378_v51  ;;  %3220 = vmatpush1.bf16.msra.mxu0 %v12380_v10  ;;  %v12413_v51 = vcombine.low %v3408_v40, %v3416_v30  ;;  %v12414_v10 = vcombine.high %v3408_v40, %v3416_v30 }
 0x75a   : > { %13527 = vmatprep.subr.bf16.mxu0 %v15897_v58 }
 0x75c   : > { %12388 = vmatmul.mubr.msk.bf16.vlgmr.msra.gmra.mrb[24].mxu1 %vm1952_vm11, %v16088_v52  ;;  %12389 = vmatmul.mubr.msk.bf16.vlgmr.msra.gmra.mrb[20].mxu0 %vm1952_vm11, %v16088_v52 }
 0x75d   : > { %13529 = vmatpush3.bf16.msra.mxu0 %v15897_v58  ;;  %13360 = vmatprep.mubr.msk.f32.mxu0 %vm1102_vm5, %v1222_v16  ;;  %v3431_v16 = vld [vmem:[#allocation10 + $0x540] sm:$0xff] }
 0x75e   : > { %3810 = vmatprep.mubr.bf16.mxu1 %v17912_v0  ;;  %3821 = vmatprep.subr.bf16.mxu0 %v12398_v26 }
 0x772   : > { %v1220_v20 = vpop.xlane.xlu1 %1219 }
 0x773   : > { %14459 = vrcp.f32 %v1220_v20  ;;  %v3424_v20 = vld [vmem:[#allocation10 + $0x508] sm:$0xff] }
 0x776   : > { %v1227_v27 = vpop.permute.xlu1 %1226 }
 0x777   : > { %v1237_v43 = vadd.f32 %v1236_v36, %v1227_v27  ;;  %v3432_v27 = vld [vmem:[#allocation10 + $0x548] sm:$0xff] }
 0x779   : > { %v1241_v31 = vmul.f32 0.2, %v1237_v43  ;;  %vm1239_vm15 = vcmp.gt.f32.partialorder %v1237_v43, 0.0 }
 0x77a   : > { %v1231_v32 = vpop.permute.xlu1 %1230 }
 0x77b   : > { %v1238_v52 = vadd.f32 %v1236_v36, %v1231_v32  ;;  %v16122_v34 = vsel %vm1239_vm15, %v1237_v43, %v1241_v31  ;;  %v12428_v36 = vcombine.high %v3423_v15, %v3431_v16  ;;  %v12427_v43 = vcombine.low %v3423_v15, %v3431_v16  ;;  %v16157_v16 = vld [vmem:[%s15637_s12] sm:$0xff] }
 0x77c   : > { %v1245_v58 = vsel %vm1098_vm2, %v16122_v34, -1e+30  ;;  %v12429_v31 = vcombine.low %v3424_v20, %v3432_v27  ;;  %v12430_v32 = vcombine.high %v3424_v20, %v3432_v27 }
 0x77d   : > { %v14460_v37 = vpop.eup %14459  ;;  %v1242_v38 = vmul.f32 0.2, %v1238_v52  ;;  %v1247_v41 = vsel %vm1102_vm5, %v1245_v58, -inf  ;;  %vm1240_vm3 = vcmp.gt.f32.partialorder %v1238_v52, 0.0  ;;  %v3447_v58 = vld [vmem:[#allocation10 + $0x5c0] sm:$0xff] }
 0x77e   : > { %v1224_v1 = vmul.f32 %v14460_v37, %v16080_v7  ;;  %1248 = vmax.xlane.f32.xlu1 %v1247_v41  ;;  %v12396_v7 = vcombine.high %v3391_v5, %v3399_v8  ;;  %v3440_v37 = vld [vmem:[#allocation10 + $0x588] sm:$0xff]  ;;  %v16138_v5 = vld [vmem:[#allocation10 + $0x410] sm:$0xff] }
 0x77f   : > { %v16129_v13 = vsel %vm1240_vm3, %v1238_v52, %v1242_v38  ;;  %v3439_v52 = vld [vmem:[#allocation10 + $0x580] sm:$0xff]  ;;  %v3448_v41 = vld [vmem:[#allocation10 + $0x5c8] sm:$0xff]  ;;  %v16140_v8 = vld [vmem:[#allocation10 + $0x450] sm:$0xff] }
 0x780   : > { %13361 = vmatmul.mubr.msk.f32.vlgmr.msra.gmra.mrb[10].mxu0 %vm1102_vm5, %v1224_v1  ;;  %v1246_v2 = vsel %vm1099_vm1, %v16129_v13, -1e+30  ;;  %3778 = vmatprep.subr.bf16.mxu1 %v12396_v7  ;;  %v12444_v38 = vcombine.high %v3439_v52, %v3447_v58  ;;  %v12443_v1 = vcombine.low %v3439_v52, %v3447_v58  ;;  %v12399_v7 = vcombine.low %v16138_v5, %v16140_v8 }
 0x781   : > { %v1250_v3 = vsel %vm1102_vm5, %v1246_v2, -inf  ;;  %3853 = vmatprep.mubr.bf16.mxu0 %v17912_v0  ;;  %3779 = vmatpush1.bf16.msra.mxu1 %v12395_v23  ;;  %v12445_v2 = vcombine.low %v3440_v37, %v3448_v41  ;;  %v12400_v45 = vcombine.high %v16138_v5, %v16140_v8  ;;  %v16148_v23 = vld [vmem:[#allocation10 + $0x458] sm:$0xff] }
 0x782   : > { %1251 = vmax.xlane.f32.xlu0 %v1250_v3  ;;  %3822 = vmatpush1.bf16.msra.mxu0 %v12397_v24  ;;  %v12446_v3 = vcombine.high %v3440_v37, %v3448_v41  ;;  %v12401_v24 = vcombine.low %v16142_v22, %v16148_v23  ;;  %v12402_v26 = vcombine.high %v16142_v22, %v16148_v23  ;;  %v3395_v23 = vld [vmem:[#allocation10 + $0x420] sm:$0xff] }
 0x783   : > { %3780 = vmatprep.subr.bf16.mxu1 %v12412_v29  ;;  %3823 = vmatprep.subr.bf16.mxu0 %v12414_v10 }
 0x785   : > { %3781 = vmatpush1.bf16.msra.mxu1 %v12411_v49 }
 0x786   : > { %3824 = vmatpush1.bf16.msra.mxu0 %v12413_v51  ;;  %3782 = vmatprep.subr.bf16.mxu1 %v12428_v36 }
 0x787   : > { %3825 = vmatprep.subr.bf16.mxu0 %v12430_v32  ;;  %v16180_v32 = vsub.s32 4, %v15921_v14 }
 0x789   : > { %3783 = vmatpush1.bf16.msra.mxu1 %v12427_v43  ;;  %18034 = vst [vmem:[#allocation39_spill] sm:$0xff] %v16180_v32  ;;  %v16184_v58 = vrot.slane %v15926_v18, %v16180_v32 }
 0x78a   : > { %3826 = vmatpush1.bf16.msra.mxu0 %v12429_v31  ;;  %3784 = vmatprep.subr.bf16.mxu1 %v12444_v38  ;;  %v17905_v31 = vmov 5   ;;  %v12390_v38 = vld [vmem:[#allocation8 + $0x2] ss:$0 sm:$0xff] }
 0x78b   : > { %3827 = vmatprep.subr.bf16.mxu0 %v12446_v3 }
 0x78d   : > { %3785 = vmatpush1.bf16.msra.mxu1 %v12443_v1 }
 0x78e   : > { %3828 = vmatpush1.bf16.msra.mxu0 %v12445_v2  ;;  %3864 = vmatprep.subr.bf16.mxu1 %v12400_v45 }
 0x78f   : > { %1274 = vperm.xlu1 %14172, %v15911_v4   ;;  %3907 = vmatprep.subr.bf16.mxu0 %v12402_v26 }
 0x793   : > { %14175 = vset.pattern.permute.xlu1 %v17905_v31 }
 0x80b   : > { %v1249_v28 = vpop.xlane.xlu1 %1248 }
 0x80c   : > { %v1253_v35 = vsub.f32 %v16122_v34, %v1249_v28  ;;  %v16165_v34 = vld [vmem:[%s15637_s12 + $0x8] sm:$0xff] }
 0x80e   : > { %v1255_v40 = vmin.f32 %v1253_v35, 0.0 }
 0x80f   : > { %v1252_v29 = vpop.xlane.xlu0 %1251  ;;  %v1275_v52 = vpop.permute.xlu1 %1274 }
 0x810   : > { %v1257_v30 = vmul.f32 1.442695, %v1255_v40  ;;  %v1254_v49 = vsub.f32 %v16129_v13, %v1252_v29  ;;  %v1285_v37 = vadd.f32 %v16184_v58, %v1275_v52 }
 0x812   : > { %14461 = vpow2.f32 %v1257_v30  ;;  %v1256_v51 = vmin.f32 %v1254_v49, 0.0  ;;  %v1289_v47 = vmul.f32 0.2, %v1285_v37  ;;  %vm1287_vm4 = vcmp.gt.f32.partialorder %v1285_v37, 0.0 }
 0x814   : > { %v1259_v10 = vmul.f32 1.442695, %v1256_v51  ;;  %v16187_v3 = vsel %vm1287_vm4, %v1285_v37, %v1289_v47  ;;  %v3409_v51 = vld [vmem:[#allocation10 + $0x490] sm:$0xff] }
 0x815   : > { %v1293_v35 = vsel %vm1098_vm2, %v16187_v3, -1e+30 }
 0x816   : > { %14463 = vpow2.f32 %v1259_v10  ;;  %v1295_v40 = vsel %vm1102_vm5, %v1293_v35, -inf  ;;  %v3441_v35 = vld [vmem:[#allocation10 + $0x590] sm:$0xff] }
 0x81c   : > { %v14462_v15 = vpop.eup %14461 }
 0x81d   : > { %v16160_v20 = vmul.f32 %v16157_v16, %v14462_v15  ;;  %v3417_v15 = vld [vmem:[#allocation10 + $0x4d0] sm:$0xff] }
 0x81f   : > { %v1263_v36 = vsel %vm1102_vm5, %v16160_v20, 0.0 }
 0x820   : > { %v14464_v27 = vpop.eup %14463  ;;  %1264 = vadd.xlane.f32.xlu0 %v1263_v36  ;;  %v3410_v36 = vld [vmem:[#allocation10 + $0x498] sm:$0xff] }
 0x821   : > { %v16168_v43 = vmul.f32 %v16165_v34, %v14464_v27  ;;  %v3418_v27 = vld [vmem:[#allocation10 + $0x4d8] sm:$0xff] }
 0x822   : > { %v12418_v47 = vcombine.high %v3410_v36, %v3418_v27 }
 0x823   : > { %v1266_v13 = vsel %vm1102_vm5, %v16168_v43, 0.0 }
 0x824   : > { %1267 = vadd.xlane.f32.xlu0 %v1266_v13 }
 0x83a   : > { %14168 = vrot.lane.b32.xlu0 %v14167_v57, %s17977_s4 }
 0x83e   : > { %1278 = vperm.xlu0 %14173, %v15915_v11  }
 0x842   : > { %14174 = vset.pattern.permute.xlu0 %v17905_v31 }
 0x853   : > { %v13362_v55 = vpop.f32.mrb[10].mxu0 }
 0x854   : > { %v3374_v57 = vadd.f32 %v13362_v55, %v12390_v38  ;;  %v3368_v41 = vpop.f32.mrb[11].mxu0  ;;  %v3425_v55 = vld [vmem:[#allocation10 + $0x510] sm:$0xff] }
 0x855   : > { %v3369_v1 = vadd.f32 %v12390_v38, %v3368_v41  ;;  %v12416_v38 = vcombine.high %v3409_v51, %v3417_v15  ;;  %v3433_v41 = vld [vmem:[#allocation10 + $0x550] sm:$0xff] }
 0x856   : > { %v3380_v2 = vmin.f32 %v3374_v57, 0.0  ;;  %vm3378_vm6 = vcmp.gt.f32.partialorder %v3374_v57, 0.0  ;;  %v12431_v5 = vcombine.low %v3425_v55, %v3433_v41 }
 0x857   : > { %v3379_v45 = vmin.f32 %v3369_v1, 0.0  ;;  %vm3377_vm7 = vcmp.gt.f32.partialorder %v3369_v1, 0.0 }
 0x858   : > { %v3383_v26 = vmul.f32 1.442695, %v3380_v2  ;;  %v3426_v2 = vld [vmem:[#allocation10 + $0x518] sm:$0xff] }
 0x859   : > { %v3381_v28 = vmul.f32 1.442695, %v3379_v45  ;;  %v3434_v45 = vld [vmem:[#allocation10 + $0x558] sm:$0xff] }
 0x85a   : > { %14465 = vpow2.f32 %v3383_v26  ;;  %v12432_v26 = vcombine.high %v3425_v55, %v3433_v41  ;;  %v12433_v8 = vcombine.low %v3426_v2, %v3434_v45 }
 0x85b   : > { %14467 = vpow2.f32 %v3381_v28  ;;  %v12434_v28 = vcombine.high %v3426_v2, %v3434_v45 }
 0x85d   : > { %1296 = vmax.xlane.f32.xlu0 %v1295_v40  ;;  %v3449_v40 = vld [vmem:[#allocation10 + $0x5d0] sm:$0xff] }
 0x85e   : > { %v12448_v22 = vcombine.high %v3441_v35, %v3449_v40 }
 0x864   : > { %v14466_v29 = vpop.eup %14465 }
 0x865   : > { %v14468_v30 = vpop.eup %14467  ;;  %v12394_v49 = vadd.f32 -1.0, %v14466_v29  ;;  %v3442_v29 = vld [vmem:[#allocation10 + $0x598] sm:$0xff] }
 0x866   : > { %v12393_v10 = vadd.f32 -1.0, %v14468_v30  ;;  %v3450_v30 = vld [vmem:[#allocation10 + $0x5d8] sm:$0xff] }
 0x867   : > { %v3388_v13 = vsel %vm3378_vm6, %v3374_v57, %v12394_v49  ;;  %v12415_v57 = vcombine.low %v3409_v51, %v3417_v15  ;;  %v3396_v49 = vld [vmem:[#allocation10 + $0x428] sm:$0xff]  ;;  %v12449_v15 = vcombine.low %v3442_v29, %v3450_v30 }
 0x868   : > { %v3387_v52 = vsel %vm3377_vm7, %v3369_v1, %v12393_v10  ;;  %v12417_v1 = vcombine.low %v3410_v36, %v3418_v27  ;;  %v3404_v51 = vld [vmem:[#allocation10 + $0x468] sm:$0xff]  ;;  %v12447_v10 = vcombine.low %v3441_v35, %v3449_v40 }
 0x869   : > { %v16193_v37 = vpack.c.bf16 %v3388_v13, %v3387_v52  ;;  %v12406_v27 = vcombine.high %v3396_v49, %v3404_v51  ;;  %v3411_v13 = vld [vmem:[#allocation10 + $0x4a0] sm:$0xff]  ;;  %v12405_v41 = vcombine.low %v3396_v49, %v3404_v51 }
 0x86a   : > { %v3419_v52 = vld [vmem:[#allocation10 + $0x4e0] sm:$0xff] }
 0x86b   : > { %12459 = vmatmul.mubr.msk.bf16.vlgmr.msra.gmra.mrb[8].mxu1 %vm1952_vm11, %v16193_v37  ;;  %12460 = vmatmul.mubr.msk.bf16.vlgmr.msra.gmra.mrb[24].mxu0 %vm1952_vm11, %v16193_v37  ;;  %v12420_v2 = vcombine.high %v3411_v13, %v3419_v52  ;;  %v12419_v35 = vcombine.low %v3411_v13, %v3419_v52 }
 0x86c   : > { %3865 = vmatpush1.bf16.msra.mxu1 %v12399_v7  ;;  %3908 = vmatpush1.bf16.msra.mxu0 %v12401_v24  ;;  %v12450_v7 = vcombine.high %v3442_v29, %v3450_v30  ;;  %v3403_v24 = vld [vmem:[#allocation10 + $0x460] sm:$0xff] }
 0x86d   : > { %3866 = vmatprep.subr.bf16.mxu1 %v12416_v38  ;;  %3909 = vmatprep.subr.bf16.mxu0 %v12418_v47  ;;  %v12404_v36 = vcombine.high %v3395_v23, %v3403_v24  ;;  %v3412_v38 = vld [vmem:[#allocation10 + $0x4a8] sm:$0xff]  ;;  %v12403_v55 = vcombine.low %v3395_v23, %v3403_v24 }
 0x86e   : > { %3896 = vmatprep.mubr.bf16.mxu1 %v17912_v0  ;;  %3939 = vmatprep.mubr.bf16.mxu0 %v17912_v0  ;;  %v3420_v47 = vld [vmem:[#allocation10 + $0x4e8] sm:$0xff] }
 0x86f   : > { %v12422_v45 = vcombine.high %v3412_v38, %v3420_v47  ;;  %v12421_v40 = vcombine.low %v3412_v38, %v3420_v47 }
 0x870   : > { %3867 = vmatpush1.bf16.msra.mxu1 %v12415_v57  ;;  %3910 = vmatpush1.bf16.msra.mxu0 %v12417_v1  ;;  %v3427_v57 = vld [vmem:[#allocation10 + $0x520] sm:$0xff] }
 0x871   : > { %3868 = vmatprep.subr.bf16.mxu1 %v12432_v26  ;;  %3911 = vmatprep.subr.bf16.mxu0 %v12434_v28  ;;  %v3435_v1 = vld [vmem:[#allocation10 + $0x560] sm:$0xff]  ;;  %v3428_v26 = vld [vmem:[#allocation10 + $0x528] sm:$0xff] }
 0x872   : > { %v3436_v28 = vld [vmem:[#allocation10 + $0x568] sm:$0xff]  ;;  %v12436_v29 = vcombine.high %v3427_v57, %v3435_v1  ;;  %v12435_v23 = vcombine.low %v3427_v57, %v3435_v1 }
 0x873   : > { %v12438_v30 = vcombine.high %v3428_v26, %v3436_v28  ;;  %v12437_v24 = vcombine.low %v3428_v26, %v3436_v28 }
 0x874   : > { %3869 = vmatpush1.bf16.msra.mxu1 %v12431_v5  ;;  %3912 = vmatpush1.bf16.msra.mxu0 %v12433_v8  ;;  %v3443_v5 = vld [vmem:[#allocation10 + $0x5a0] sm:$0xff] }
 0x875   : > { %3870 = vmatprep.subr.bf16.mxu1 %v12448_v22  ;;  %3913 = vmatprep.subr.bf16.mxu0 %v12450_v7  ;;  %v3451_v8 = vld [vmem:[#allocation10 + $0x5e0] sm:$0xff]  ;;  %v3444_v22 = vld [vmem:[#allocation10 + $0x5a8] sm:$0xff] }
 0x876   : > { %v3452_v7 = vld [vmem:[#allocation10 + $0x5e8] sm:$0xff]  ;;  %v12452_v49 = vcombine.high %v3443_v5, %v3451_v8  ;;  %v12451_v13 = vcombine.low %v3443_v5, %v3451_v8 }
 0x877   : > { %v12454_v51 = vcombine.high %v3444_v22, %v3452_v7  ;;  %v12453_v52 = vcombine.low %v3444_v22, %v3452_v7 }
 0x878   : > { %3871 = vmatpush1.bf16.msra.mxu1 %v12447_v10  ;;  %3914 = vmatpush1.bf16.msra.mxu0 %v12449_v15  ;;  %v3397_v10 = vld [vmem:[#allocation10 + $0x430] sm:$0xff] }
 0x879   : > { %3950 = vmatprep.subr.bf16.mxu1 %v12404_v36  ;;  %3993 = vmatprep.subr.bf16.mxu0 %v12406_v27  ;;  %v3405_v15 = vld [vmem:[#allocation10 + $0x470] sm:$0xff]  ;;  %v3398_v36 = vld [vmem:[#allocation10 + $0x438] sm:$0xff] }
 0x87a   : > { %v3406_v27 = vld [vmem:[#allocation10 + $0x478] sm:$0xff]  ;;  %v12408_v38 = vcombine.high %v3397_v10, %v3405_v15  ;;  %v12407_v57 = vcombine.low %v3397_v10, %v3405_v15 }
 0x87b   : > { %12461 = vmatmul.mubr.msk.bf16.vlgmr.msra.gmra.mrb[16].mxu1 %vm1952_vm11, %v16193_v37  ;;  %12462 = vmatmul.mubr.msk.bf16.vlgmr.msra.gmra.mrb[12].mxu0 %vm1952_vm11, %v16193_v37  ;;  %v12410_v47 = vcombine.high %v3398_v36, %v3406_v27  ;;  %v12409_v1 = vcombine.low %v3398_v36, %v3406_v27 }
 0x87c   : > { %3951 = vmatpush1.bf16.msra.mxu1 %v12403_v55  ;;  %3994 = vmatpush1.bf16.msra.mxu0 %v12405_v41  ;;  %v3413_v55 = vld [vmem:[#allocation10 + $0x4b0] sm:$0xff] }
 0x87d   : > { %3952 = vmatprep.subr.bf16.mxu1 %v12420_v2  ;;  %3995 = vmatprep.subr.bf16.mxu0 %v12422_v45  ;;  %v3421_v41 = vld [vmem:[#allocation10 + $0x4f0] sm:$0xff]  ;;  %v3414_v2 = vld [vmem:[#allocation10 + $0x4b8] sm:$0xff] }
 0x87e   : > { %3982 = vmatprep.mubr.bf16.mxu1 %v17912_v0  ;;  %4025 = vmatprep.mubr.bf16.mxu0 %v17912_v0  ;;  %v3422_v45 = vld [vmem:[#allocation10 + $0x4f8] sm:$0xff]  ;;  %v12424_v26 = vcombine.high %v3413_v55, %v3421_v41  ;;  %v12423_v5 = vcombine.low %v3413_v55, %v3421_v41 }
 0x87f   : > { %v12426_v28 = vcombine.high %v3414_v2, %v3422_v45  ;;  %v12425_v8 = vcombine.low %v3414_v2, %v3422_v45 }
 0x880   : > { %3953 = vmatpush1.bf16.msra.mxu1 %v12419_v35  ;;  %3996 = vmatpush1.bf16.msra.mxu0 %v12421_v40  ;;  %v3429_v35 = vld [vmem:[#allocation10 + $0x530] sm:$0xff] }
 0x881   : > { %3954 = vmatprep.subr.bf16.mxu1 %v12436_v29  ;;  %3997 = vmatprep.subr.bf16.mxu0 %v12438_v30  ;;  %v3437_v40 = vld [vmem:[#allocation10 + $0x570] sm:$0xff]  ;;  %v3430_v29 = vld [vmem:[#allocation10 + $0x538] sm:$0xff] }
 0x882   : > { %v3438_v30 = vld [vmem:[#allocation10 + $0x578] sm:$0xff]  ;;  %v12440_v22 = vcombine.high %v3429_v35, %v3437_v40  ;;  %v12439_v10 = vcombine.low %v3429_v35, %v3437_v40 }
 0x883   : > { %v12442_v7 = vcombine.high %v3430_v29, %v3438_v30  ;;  %v12441_v15 = vcombine.low %v3430_v29, %v3438_v30 }
 0x884   : > { %3955 = vmatpush1.bf16.msra.mxu1 %v12435_v23  ;;  %3998 = vmatpush1.bf16.msra.mxu0 %v12437_v24  ;;  %v3445_v23 = vld [vmem:[#allocation10 + $0x5b0] sm:$0xff] }
 0x885   : > { %3956 = vmatprep.subr.bf16.mxu1 %v12452_v49  ;;  %3999 = vmatprep.subr.bf16.mxu0 %v12454_v51  ;;  %v3453_v24 = vld [vmem:[#allocation10 + $0x5f0] sm:$0xff]  ;;  %v3446_v49 = vld [vmem:[#allocation10 + $0x5b8] sm:$0xff] }
 0x886   : > { %v3454_v51 = vld [vmem:[#allocation10 + $0x5f8] sm:$0xff]  ;;  %v12456_v36 = vcombine.high %v3445_v23, %v3453_v24 }
 0x887   : > { %v12458_v27 = vcombine.high %v3446_v49, %v3454_v51 }
 0x888   : > { %3957 = vmatpush1.bf16.msra.mxu1 %v12451_v13  ;;  %4000 = vmatpush1.bf16.msra.mxu0 %v12453_v52  ;;  %v12455_v13 = vcombine.low %v3445_v23, %v3453_v24  ;;  %v12457_v52 = vcombine.low %v3446_v49, %v3454_v51  ;;  %v4265_v24 = vld [vmem:[#allocation10 + $0x600] sm:$0xff]  ;;  %v4266_v51 = vld [vmem:[#allocation10 + $0x608] sm:$0xff] }
 0x889   : > { %4036 = vmatprep.subr.bf16.mxu1 %v12408_v38  ;;  %4079 = vmatprep.subr.bf16.mxu0 %v12410_v47  ;;  %v4273_v49 = vld [vmem:[#allocation10 + $0x640] sm:$0xff] }
 0x88b   : > { %12463 = vmatmul.mubr.msk.bf16.vlgmr.msra.gmra.mrb[20].mxu1 %vm1952_vm11, %v16193_v37  ;;  %12464 = vmatmul.mubr.msk.bf16.vlgmr.msra.gmra.mrb[16].mxu0 %vm1952_vm11, %v16193_v37 }
 0x88c   : > { %4037 = vmatpush1.bf16.msra.mxu1 %v12407_v57  ;;  %4080 = vmatpush1.bf16.msra.mxu0 %v12409_v1 }
 0x88d   : > { %4038 = vmatprep.subr.bf16.mxu1 %v12424_v26  ;;  %4081 = vmatprep.subr.bf16.mxu0 %v12426_v28 }
 0x88e   : > { %4068 = vmatprep.mubr.bf16.mxu1 %v17912_v0  ;;  %4111 = vmatprep.mubr.bf16.mxu0 %v17912_v0 }
 0x890   : > { %4039 = vmatpush1.bf16.msra.mxu1 %v12423_v5  ;;  %4082 = vmatpush1.bf16.msra.mxu0 %v12425_v8 }
 0x891   : > { %4040 = vmatprep.subr.bf16.mxu1 %v12440_v22  ;;  %4083 = vmatprep.subr.bf16.mxu0 %v12442_v7 }
 0x894   : > { %4041 = vmatpush1.bf16.msra.mxu1 %v12439_v10  ;;  %4084 = vmatpush1.bf16.msra.mxu0 %v12441_v15  ;;  %v12473_v10 = vcombine.high %v4265_v24, %v4273_v49  ;;  %v4274_v15 = vld [vmem:[#allocation10 + $0x648] sm:$0xff] }
 0x895   : > { %4042 = vmatprep.subr.bf16.mxu1 %v12456_v36  ;;  %4085 = vmatprep.subr.bf16.mxu0 %v12458_v27  ;;  %v12472_v36 = vcombine.low %v4265_v24, %v4273_v49  ;;  %v12474_v27 = vcombine.low %v4266_v51, %v4274_v15  ;;  %v16243_v24 = vld [vmem:[#allocation10 + $0x610] sm:$0xff] }
 0x896   : > { %v16245_v49 = vld [vmem:[#allocation10 + $0x650] sm:$0xff] }
 0x898   : > { %4043 = vmatpush1.bf16.msra.mxu1 %v12455_v13  ;;  %4086 = vmatpush1.bf16.msra.mxu0 %v12457_v52  ;;  %v12475_v13 = vcombine.high %v4266_v51, %v4274_v15  ;;  %v4289_v52 = vld [vmem:[#allocation10 + $0x6c0] sm:$0xff]  ;;  %v16247_v51 = vld [vmem:[#allocation10 + $0x618] sm:$0xff]  ;;  %v12477_v15 = vcombine.high %v16243_v24, %v16245_v49 }
 0x89a   : > { %4695 = vmatprep.subr.bf16.mxu0 %v12475_v13 }
 0x89b   : > { %12465 = vmatmul.mubr.msk.bf16.vlgmr.msra.gmra.mrb[24].mxu1 %vm1952_vm11, %v16193_v37  ;;  %12466 = vmatmul.mubr.msk.bf16.vlgmr.msra.gmra.mrb[20].mxu0 %vm1952_vm11, %v16193_v37 }
 0x89c   : > { %4727 = vmatprep.mubr.bf16.mxu0 %v17912_v0  ;;  %4696 = vmatpush1.bf16.msra.mxu0 %v12474_v27 }
 0x8ad   : > { %v1265_v38 = vpop.xlane.xlu0 %1264 }
 0x8ae   : > { %14469 = vrcp.f32 %v1265_v38  ;;  %v4282_v38 = vld [vmem:[#allocation10 + $0x688] sm:$0xff] }
 0x8b1   : > { %v1268_v47 = vpop.xlane.xlu0 %1267 }
 0x8b2   : > { %14471 = vrcp.f32 %v1268_v47  ;;  %v4290_v47 = vld [vmem:[#allocation10 + $0x6c8] sm:$0xff] }
 0x8b5   : > { %v14169_v55 = vpop.permute.xlu0 %14168 }
 0x8b6   : > { %v14171_v41 = vunpack.i.h.bf16 %v14169_v55  ;;  %v14170_v2 = vunpack.i.l.bf16 %v14169_v55 }
 0x8b8   : > { %v14470_v45 = vpop.eup %14469  ;;  %v13530_v57 = vpack.c.bf16 %v14171_v41, %v14170_v2  ;;  %v12490_v41 = vcombine.low %v4282_v38, %v4290_v47  ;;  %v12491_v2 = vcombine.high %v4282_v38, %v4290_v47 }
 0x8b9   : > { %v1270_v1 = vmul.f32 %v14470_v45, %v16160_v20  ;;  %v4297_v45 = vld [vmem:[#allocation10 + $0x700] sm:$0xff] }
 0x8ba   : > { %13531 = vmatprep.subr.bf16.mxu1 %v13530_v57  ;;  %4697 = vmatprep.subr.bf16.mxu0 %v12491_v2 }
 0x8bb   : > { %13533 = vmatpush3.bf16.msra.mxu1 %v13530_v57  ;;  %13367 = vmatprep.mubr.msk.f32.mxu1 %vm1102_vm5, %v1270_v1  ;;  %v4305_v57 = vld [vmem:[#allocation10 + $0x740] sm:$0xff]  ;;  %v4298_v1 = vld [vmem:[#allocation10 + $0x708] sm:$0xff] }
 0x8bc   : > { %v14472_v26 = vpop.eup %14471  ;;  %4652 = vmatprep.subr.bf16.mxu1 %v12473_v10  ;;  %4698 = vmatpush1.bf16.msra.mxu0 %v12490_v41  ;;  %v12476_v10 = vcombine.low %v16243_v24, %v16245_v49 }
 0x8bd   : > { %v1279_v28 = vpop.permute.xlu0 %1278  ;;  %v1272_v37 = vmul.f32 %v14472_v26, %v16168_v43  ;;  %v12505_v26 = vcombine.high %v4297_v45, %v4305_v57 }
 0x8be   : > { %v1286_v35 = vadd.f32 %v16184_v58, %v1279_v28  ;;  %v4306_v28 = vld [vmem:[#allocation10 + $0x748] sm:$0xff] }
 0x8bf   : > { %13368 = vmatmul.mubr.msk.f32.vlgmr.msra.gmra.mrb[30].mxu1 %vm1102_vm5, %v1272_v37  ;;  %v12504_v37 = vcombine.low %v4297_v45, %v4305_v57  ;;  %v16265_v45 = vsub.s32 5, %v15921_v14 }
 0x8c0   : > { %v1290_v40 = vmul.f32 0.2, %v1286_v35  ;;  %vm1288_vm8 = vcmp.gt.f32.partialorder %v1286_v35, 0.0  ;;  %4684 = vmatprep.mubr.bf16.mxu1 %v17912_v0  ;;  %4653 = vmatpush1.bf16.msra.mxu1 %v12472_v36  ;;  %v4276_v36 = vld [vmem:[#allocation10 + $0x658] sm:$0xff] }
 0x8c1   : > { %v12478_v27 = vcombine.low %v16247_v51, %v4276_v36  ;;  %v12479_v13 = vcombine.high %v16247_v51, %v4276_v36  ;;  %18035 = vst [vmem:[#allocation40_spill] sm:$0xff] %v16265_v45  ;;  %v4283_v51 = vld [vmem:[#allocation10 + $0x690] sm:$0xff] }
 0x8c2   : > { %v16230_v29 = vsel %vm1288_vm8, %v1286_v35, %v1290_v40  ;;  %v12506_v35 = vcombine.low %v4298_v1, %v4306_v28  ;;  %v12507_v40 = vcombine.high %v4298_v1, %v4306_v28  ;;  %v4291_v36 = vld [vmem:[#allocation10 + $0x6d0] sm:$0xff] }
 0x8c3   : > { %v1294_v20 = vsel %vm1099_vm1, %v16230_v29, -1e+30 }
 0x8c4   : > { %v1298_v30 = vsel %vm1102_vm5, %v1294_v20, -inf  ;;  %4699 = vmatprep.subr.bf16.mxu0 %v12507_v40  ;;  %v4313_v20 = vld [vmem:[#allocation10 + $0x780] sm:$0xff] }
 0x8c5   : > { %1299 = vmax.xlane.f32.xlu1 %v1298_v30  ;;  %v4321_v30 = vld [vmem:[#allocation10 + $0x7c0] sm:$0xff]  ;;  %4700 = vmatpush1.bf16.msra.mxu0 %v12506_v35 }
 0x8d6   : > { %1326 = vperm.xlu1 %14175, %v15915_v11  }
 0x8ea   : > { %v1297_v43 = vpop.xlane.xlu0 %1296 }
 0x8eb   : > { %v1301_v58 = vsub.f32 %v16187_v3, %v1297_v43  ;;  %v4281_v3 = vld [vmem:[#allocation10 + $0x680] sm:$0xff]  ;;  %v4314_v43 = vld [vmem:[#allocation10 + $0x788] sm:$0xff] }
 0x8ec   : > { %v12488_v55 = vcombine.low %v4281_v3, %v4289_v52 }
 0x8ed   : > { %v1303_v5 = vmin.f32 %v1301_v58, 0.0  ;;  %v12521_v58 = vcombine.high %v4313_v20, %v4321_v30 }
 0x8ef   : > { %v1305_v8 = vmul.f32 1.442695, %v1303_v5  ;;  %v4322_v5 = vld [vmem:[#allocation10 + $0x7c8] sm:$0xff] }
 0x8f1   : > { %14473 = vpow2.f32 %v1305_v8  ;;  %v12520_v8 = vcombine.low %v4313_v20, %v4321_v30 }
 0x8fb   : > { %v14474_v22 = vpop.eup %14473 }
 0x8fc   : > { %v16239_v7 = vmul.f32 %v16157_v16, %v14474_v22  ;;  %v12489_v16 = vcombine.high %v4281_v3, %v4289_v52  ;;  %v12522_v22 = vcombine.low %v4314_v43, %v4322_v5  ;;  %v17903_v3 = vmov 6  }
 0x8fd   : > { %14182 = vset.pattern.permute.xlu1 %v17903_v3 }
 0x8fe   : > { %v1311_v23 = vsel %vm1102_vm5, %v16239_v7, 0.0  ;;  %4654 = vmatprep.subr.bf16.mxu1 %v12489_v16 }
 0x8ff   : > { %1312 = vadd.xlane.f32.xlu0 %v1311_v23  ;;  %4655 = vmatpush1.bf16.msra.mxu1 %v12488_v55  ;;  %v12523_v23 = vcombine.high %v4314_v43, %v4322_v5 }
 0x900   : > { %4656 = vmatprep.subr.bf16.mxu1 %v12505_v26 }
 0x901   : > { %4701 = vmatprep.subr.bf16.mxu0 %v12523_v23 }
 0x902   : > { %4702 = vmatpush1.bf16.msra.mxu0 %v12522_v22 }
 0x903   : > { %4657 = vmatpush1.bf16.msra.mxu1 %v12504_v37  ;;  %4781 = vmatprep.subr.bf16.mxu0 %v12479_v13  ;;  %v4284_v13 = vld [vmem:[#allocation10 + $0x698] sm:$0xff] }
 0x904   : > { %4658 = vmatprep.subr.bf16.mxu1 %v12521_v58 }
 0x907   : > { %4659 = vmatpush1.bf16.msra.mxu1 %v12520_v8 }
 0x908   : > { %4738 = vmatprep.subr.bf16.mxu1 %v12477_v15 }
 0x952   : > { %v1300_v52 = vpop.xlane.xlu1 %1299 }
 0x953   : > { %v1302_v38 = vsub.f32 %v16230_v29, %v1300_v52  ;;  %v16269_v29 = vrot.slane %v15926_v18, %v16265_v45  ;;  %v4292_v52 = vld [vmem:[#allocation10 + $0x6d8] sm:$0xff] }
 0x955   : > { %v1304_v16 = vmin.f32 %v1302_v38, 0.0 }
 0x956   : > { %v1327_v57 = vpop.permute.xlu1 %1326 }
 0x957   : > { %v1307_v47 = vmul.f32 1.442695, %v1304_v16  ;;  %v1334_v1 = vadd.f32 %v16269_v29, %v1327_v57  ;;  %v4299_v57 = vld [vmem:[#allocation10 + $0x710] sm:$0xff] }
 0x959   : > { %14475 = vpow2.f32 %v1307_v47  ;;  %v1338_v26 = vmul.f32 0.2, %v1334_v1  ;;  %vm1336_vm9 = vcmp.gt.f32.partialorder %v1334_v1, 0.0 }
 0x95b   : > { %v16272_v30 = vsel %vm1336_vm9, %v1334_v1, %v1338_v26  ;;  %v4307_v1 = vld [vmem:[#allocation10 + $0x750] sm:$0xff]  ;;  %v4308_v26 = vld [vmem:[#allocation10 + $0x758] sm:$0xff] }
 0x95c   : > { %v1342_v8 = vsel %vm1099_vm1, %v16272_v30, -1e+30 }
 0x95d   : > { %v1346_v22 = vsel %vm1102_vm5, %v1342_v8, -inf  ;;  %v12508_v8 = vcombine.low %v4299_v57, %v4307_v1 }
 0x963   : > { %v14476_v55 = vpop.eup %14475 }
 0x964   : > { %v16258_v41 = vmul.f32 %v16165_v34, %v14476_v55  ;;  %v12467_v34 = vld [vmem:[#allocation8 + $0x3] ss:$0 sm:$0xff]  ;;  %v12493_v55 = vcombine.high %v4283_v51, %v4291_v36 }
 0x966   : > { %v1314_v2 = vsel %vm1102_vm5, %v16258_v41, 0.0 }
 0x967   : > { %1315 = vadd.xlane.f32.xlu0 %v1314_v2  ;;  %v12495_v2 = vcombine.high %v4284_v13, %v4292_v52 }
 0x97d   : > { %1322 = vperm.xlu0 %14174, %v15911_v4  }
 0x981   : > { %14181 = vset.pattern.permute.xlu0 %v17903_v3 }
 0x992   : > { %v13369_v28 = vpop.f32.mrb[30].mxu1 }
 0x993   : > { %v4248_v37 = vadd.f32 %v13369_v28, %v12467_v34  ;;  %v4242_v35 = vpop.f32.mrb[31].mxu1  ;;  %v12492_v28 = vcombine.low %v4283_v51, %v4291_v36  ;;  %v4278_v51 = vld [vmem:[#allocation10 + $0x668] sm:$0xff] }
 0x994   : > { %v4243_v40 = vadd.f32 %v12467_v34, %v4242_v35  ;;  %v4300_v34 = vld [vmem:[#allocation10 + $0x718] sm:$0xff]  ;;  %v12509_v35 = vcombine.high %v4299_v57, %v4307_v1 }
 0x995   : > { %v4254_v20 = vmin.f32 %v4248_v37, 0.0  ;;  %vm4252_vm10 = vcmp.gt.f32.partialorder %v4248_v37, 0.0 }
 0x996   : > { %v4253_v43 = vmin.f32 %v4243_v40, 0.0  ;;  %vm4251_vm12 = vcmp.gt.f32.partialorder %v4243_v40, 0.0 }
 0x997   : > { %v4257_v58 = vmul.f32 1.442695, %v4254_v20  ;;  %v4315_v20 = vld [vmem:[#allocation10 + $0x790] sm:$0xff] }
 0x998   : > { %v4255_v5 = vmul.f32 1.442695, %v4253_v43  ;;  %v4323_v43 = vld [vmem:[#allocation10 + $0x7d0] sm:$0xff] }
 0x999   : > { %14477 = vpow2.f32 %v4257_v58  ;;  %v4316_v58 = vld [vmem:[#allocation10 + $0x798] sm:$0xff] }
 0x99a   : > { %14479 = vpow2.f32 %v4255_v5  ;;  %v4324_v5 = vld [vmem:[#allocation10 + $0x7d8] sm:$0xff] }
 0x99b   : > { %v12526_v36 = vcombine.low %v4316_v58, %v4324_v5 }
 0x99c   : > { %1347 = vmax.xlane.f32.xlu0 %v1346_v22  ;;  %v12510_v22 = vcombine.low %v4300_v34, %v4308_v26 }
 0x9a3   : > { %v14478_v23 = vpop.eup %14477 }
 0x9a4   : > { %v14480_v24 = vpop.eup %14479  ;;  %v12471_v49 = vadd.f32 -1.0, %v14478_v23  ;;  %v4269_v23 = vld [vmem:[#allocation10 + $0x620] sm:$0xff] }
 0x9a5   : > { %v12470_v15 = vadd.f32 -1.0, %v14480_v24  ;;  %v4277_v24 = vld [vmem:[#allocation10 + $0x660] sm:$0xff] }
 0x9a6   : > { %v4262_v38 = vsel %vm4252_vm10, %v4248_v37, %v12471_v49  ;;  %v12494_v37 = vcombine.low %v4284_v13, %v4292_v52  ;;  %v4270_v49 = vld [vmem:[#allocation10 + $0x628] sm:$0xff]  ;;  %v12481_v13 = vcombine.high %v4269_v23, %v4277_v24  ;;  %v12480_v57 = vcombine.low %v4269_v23, %v4277_v24 }
 0x9a7   : > { %v4261_v16 = vsel %vm4251_vm12, %v4243_v40, %v12470_v15  ;;  %v12511_v40 = vcombine.high %v4300_v34, %v4308_v26  ;;  %v12524_v15 = vcombine.low %v4315_v20, %v4323_v43  ;;  %v12483_v52 = vcombine.high %v4270_v49, %v4278_v51 }
 0x9a8   : > { %v16278_v47 = vpack.c.bf16 %v4262_v38, %v4261_v16  ;;  %v4285_v38 = vld [vmem:[#allocation10 + $0x6a0] sm:$0xff]  ;;  %v12482_v1 = vcombine.low %v4270_v49, %v4278_v51 }
 0x9a9   : > { %v4293_v16 = vld [vmem:[#allocation10 + $0x6e0] sm:$0xff] }
 0x9aa   : > { %12536 = vmatmul.mubr.msk.bf16.vlgmr.msra.gmra.mrb[8].mxu1 %vm1952_vm11, %v16278_v47  ;;  %12537 = vmatmul.mubr.msk.bf16.vlgmr.msra.gmra.mrb[24].mxu0 %vm1952_vm11, %v16278_v47  ;;  %v12497_v34 = vcombine.high %v4285_v38, %v4293_v16 }
 0x9ab   : > { %4739 = vmatpush1.bf16.msra.mxu1 %v12476_v10  ;;  %4782 = vmatpush1.bf16.msra.mxu0 %v12478_v27  ;;  %v12525_v10 = vcombine.high %v4315_v20, %v4323_v43  ;;  %v12527_v27 = vcombine.high %v4316_v58, %v4324_v5  ;;  %v12496_v20 = vcombine.low %v4285_v38, %v4293_v16 }
 0x9ac   : > { %4740 = vmatprep.subr.bf16.mxu1 %v12493_v55  ;;  %4783 = vmatprep.subr.bf16.mxu0 %v12495_v2  ;;  %v4286_v55 = vld [vmem:[#allocation10 + $0x6a8] sm:$0xff] }
 0x9ad   : > { %4770 = vmatprep.mubr.bf16.mxu1 %v17912_v0  ;;  %4813 = vmatprep.mubr.bf16.mxu0 %v17912_v0  ;;  %v4294_v2 = vld [vmem:[#allocation10 + $0x6e8] sm:$0xff] }
 0x9ae   : > { %v12499_v26 = vcombine.high %v4286_v55, %v4294_v2  ;;  %v12498_v43 = vcombine.low %v4286_v55, %v4294_v2 }
 0x9af   : > { %4741 = vmatpush1.bf16.msra.mxu1 %v12492_v28  ;;  %4784 = vmatpush1.bf16.msra.mxu0 %v12494_v37  ;;  %v4301_v28 = vld [vmem:[#allocation10 + $0x720] sm:$0xff] }
 0x9b0   : > { %4742 = vmatprep.subr.bf16.mxu1 %v12509_v35  ;;  %4785 = vmatprep.subr.bf16.mxu0 %v12511_v40  ;;  %v4309_v37 = vld [vmem:[#allocation10 + $0x760] sm:$0xff]  ;;  %v4302_v35 = vld [vmem:[#allocation10 + $0x728] sm:$0xff] }
 0x9b1   : > { %v4310_v40 = vld [vmem:[#allocation10 + $0x768] sm:$0xff]  ;;  %v12513_v58 = vcombine.high %v4301_v28, %v4309_v37  ;;  %v12512_v23 = vcombine.low %v4301_v28, %v4309_v37 }
 0x9b2   : > { %1370 = vperm.xlu0 %14181, %v15911_v4   ;;  %v12515_v5 = vcombine.high %v4302_v35, %v4310_v40  ;;  %v12514_v24 = vcombine.low %v4302_v35, %v4310_v40 }
 0x9b3   : > { %4743 = vmatpush1.bf16.msra.mxu1 %v12508_v8  ;;  %4786 = vmatpush1.bf16.msra.mxu0 %v12510_v22  ;;  %v4317_v8 = vld [vmem:[#allocation10 + $0x7a0] sm:$0xff] }
 0x9b4   : > { %4744 = vmatprep.subr.bf16.mxu1 %v12525_v10  ;;  %4787 = vmatprep.subr.bf16.mxu0 %v12527_v27  ;;  %v4325_v22 = vld [vmem:[#allocation10 + $0x7e0] sm:$0xff]  ;;  %v4318_v10 = vld [vmem:[#allocation10 + $0x7a8] sm:$0xff] }
 0x9b5   : > { %v4326_v27 = vld [vmem:[#allocation10 + $0x7e8] sm:$0xff]  ;;  %v12529_v49 = vcombine.high %v4317_v8, %v4325_v22  ;;  %v12528_v38 = vcombine.low %v4317_v8, %v4325_v22  ;;  %v4312_v8 = vld [vmem:[#allocation10 + $0x778] sm:$0xff] }
 0x9b6   : > { %14189 = vset.pattern.permute.xlu0 %v17911_v12  ;;  %v12531_v51 = vcombine.high %v4318_v10, %v4326_v27  ;;  %v12530_v16 = vcombine.low %v4318_v10, %v4326_v27 }
 0x9b7   : > { %4745 = vmatpush1.bf16.msra.mxu1 %v12524_v15  ;;  %4788 = vmatpush1.bf16.msra.mxu0 %v12526_v36  ;;  %v4271_v15 = vld [vmem:[#allocation10 + $0x630] sm:$0xff] }
 0x9b8   : > { %4824 = vmatprep.subr.bf16.mxu1 %v12481_v13  ;;  %4867 = vmatprep.subr.bf16.mxu0 %v12483_v52  ;;  %v4279_v36 = vld [vmem:[#allocation10 + $0x670] sm:$0xff]  ;;  %v4272_v13 = vld [vmem:[#allocation10 + $0x638] sm:$0xff] }
 0x9b9   : > { %v4280_v52 = vld [vmem:[#allocation10 + $0x678] sm:$0xff]  ;;  %v12485_v55 = vcombine.high %v4271_v15, %v4279_v36  ;;  %v12484_v28 = vcombine.low %v4271_v15, %v4279_v36 }
 0x9ba   : > { %12538 = vmatmul.mubr.msk.bf16.vlgmr.msra.gmra.mrb[16].mxu1 %vm1952_vm11, %v16278_v47  ;;  %12539 = vmatmul.mubr.msk.bf16.vlgmr.msra.gmra.mrb[12].mxu0 %vm1952_vm11, %v16278_v47  ;;  %v12487_v2 = vcombine.high %v4272_v13, %v4280_v52  ;;  %v12486_v37 = vcombine.low %v4272_v13, %v4280_v52  ;;  %v4328_v15 = vld [vmem:[#allocation10 + $0x7f8] sm:$0xff] }
 0x9bb   : > { %4825 = vmatpush1.bf16.msra.mxu1 %v12480_v57  ;;  %4868 = vmatpush1.bf16.msra.mxu0 %v12482_v1  ;;  %v4287_v57 = vld [vmem:[#allocation10 + $0x6b0] sm:$0xff] }
 0x9bc   : > { %4826 = vmatprep.subr.bf16.mxu1 %v12497_v34  ;;  %4869 = vmatprep.subr.bf16.mxu0 %v12499_v26  ;;  %v4295_v1 = vld [vmem:[#allocation10 + $0x6f0] sm:$0xff]  ;;  %v4288_v34 = vld [vmem:[#allocation10 + $0x6b8] sm:$0xff] }
 0x9bd   : > { %4856 = vmatprep.mubr.bf16.mxu1 %v17912_v0  ;;  %4899 = vmatprep.mubr.bf16.mxu0 %v17912_v0  ;;  %v4296_v26 = vld [vmem:[#allocation10 + $0x6f8] sm:$0xff]  ;;  %v12501_v35 = vcombine.high %v4287_v57, %v4295_v1  ;;  %v12500_v22 = vcombine.low %v4287_v57, %v4295_v1 }
 0x9be   : > { %v12503_v40 = vcombine.high %v4288_v34, %v4296_v26  ;;  %v12502_v10 = vcombine.low %v4288_v34, %v4296_v26 }
 0x9bf   : > { %4827 = vmatpush1.bf16.msra.mxu1 %v12496_v20  ;;  %4870 = vmatpush1.bf16.msra.mxu0 %v12498_v43  ;;  %v4303_v20 = vld [vmem:[#allocation10 + $0x730] sm:$0xff]  ;;  %v1313_v43 = vpop.xlane.xlu0 %1312 }
 0x9c0   : > { %4828 = vmatprep.subr.bf16.mxu1 %v12513_v58  ;;  %4871 = vmatprep.subr.bf16.mxu0 %v12515_v5  ;;  %v4311_v58 = vld [vmem:[#allocation10 + $0x770] sm:$0xff]  ;;  %v4304_v5 = vld [vmem:[#allocation10 + $0x738] sm:$0xff]  ;;  %14481 = vrcp.f32 %v1313_v43 }
 0x9c1   : > { %v12517_v27 = vcombine.high %v4303_v20, %v4311_v58  ;;  %v12516_v36 = vcombine.low %v4303_v20, %v4311_v58  ;;  %v12518_v13 = vcombine.low %v4304_v5, %v4312_v8  ;;  %v5132_v20 = vld [vmem:[#allocation10 + $0x808] sm:$0xff] }
 0x9c2   : > { %v5140_v58 = vld [vmem:[#allocation10 + $0x848] sm:$0xff] }
 0x9c3   : > { %4829 = vmatpush1.bf16.msra.mxu1 %v12512_v23  ;;  %4872 = vmatpush1.bf16.msra.mxu0 %v12514_v24  ;;  %v12519_v23 = vcombine.high %v4304_v5, %v4312_v8  ;;  %v4319_v24 = vld [vmem:[#allocation10 + $0x7b0] sm:$0xff]  ;;  %v12552_v8 = vcombine.high %v5132_v20, %v5140_v58 }
 0x9c4   : > { %4830 = vmatprep.subr.bf16.mxu1 %v12529_v49  ;;  %4873 = vmatprep.subr.bf16.mxu0 %v12531_v51  ;;  %v4327_v49 = vld [vmem:[#allocation10 + $0x7f0] sm:$0xff]  ;;  %v4320_v51 = vld [vmem:[#allocation10 + $0x7b8] sm:$0xff] }
 0x9c5   : > { %v12533_v52 = vcombine.high %v4319_v24, %v4327_v49 }
 0x9c7   : > { %4831 = vmatpush1.bf16.msra.mxu1 %v12528_v38  ;;  %4874 = vmatpush1.bf16.msra.mxu0 %v12530_v16  ;;  %v12535_v38 = vcombine.high %v4320_v51, %v4328_v15  ;;  %v12532_v16 = vcombine.low %v4319_v24, %v4327_v49  ;;  %v5156_v24 = vld [vmem:[#allocation10 + $0x8c8] sm:$0xff] }
 0x9c8   : > { %4910 = vmatprep.subr.bf16.mxu1 %v12485_v55  ;;  %4953 = vmatprep.subr.bf16.mxu0 %v12487_v2  ;;  %v12534_v55 = vcombine.low %v4320_v51, %v4328_v15 }
 0x9ca   : > { %12540 = vmatmul.mubr.msk.bf16.vlgmr.msra.gmra.mrb[20].mxu1 %vm1952_vm11, %v16278_v47  ;;  %12541 = vmatmul.mubr.msk.bf16.vlgmr.msra.gmra.mrb[16].mxu0 %vm1952_vm11, %v16278_v47  ;;  %v14482_v2 = vpop.eup %14481 }
 0x9cb   : > { %4911 = vmatpush1.bf16.msra.mxu1 %v12484_v28  ;;  %4954 = vmatpush1.bf16.msra.mxu0 %v12486_v37  ;;  %v1318_v57 = vmul.f32 %v14482_v2, %v16239_v7 }
 0x9cc   : > { %4912 = vmatprep.subr.bf16.mxu1 %v12501_v35  ;;  %4955 = vmatprep.subr.bf16.mxu0 %v12503_v40  ;;  %v5131_v40 = vld [vmem:[#allocation10 + $0x800] sm:$0xff] }
 0x9cd   : > { %4942 = vmatprep.mubr.bf16.mxu1 %v17912_v0  ;;  %4985 = vmatprep.mubr.bf16.mxu0 %v17912_v0 }
 0x9cf   : > { %4913 = vmatpush1.bf16.msra.mxu1 %v12500_v22  ;;  %4956 = vmatpush1.bf16.msra.mxu0 %v12502_v10  ;;  %v5147_v22 = vld [vmem:[#allocation10 + $0x880] sm:$0xff] }
 0x9d0   : > { %4914 = vmatprep.subr.bf16.mxu1 %v12517_v27  ;;  %4957 = vmatprep.subr.bf16.mxu0 %v12519_v23  ;;  %v5155_v10 = vld [vmem:[#allocation10 + $0x8c0] sm:$0xff]  ;;  %v5148_v27 = vld [vmem:[#allocation10 + $0x888] sm:$0xff] }
 0x9d1   : > { %v12566_v23 = vcombine.high %v5147_v22, %v5155_v10  ;;  %v12565_v49 = vcombine.low %v5147_v22, %v5155_v10  ;;  %v12567_v51 = vcombine.low %v5148_v27, %v5156_v24  ;;  %v12568_v15 = vcombine.high %v5148_v27, %v5156_v24 }
 0x9d3   : > { %4915 = vmatpush1.bf16.msra.mxu1 %v12516_v36  ;;  %4958 = vmatpush1.bf16.msra.mxu0 %v12518_v13  ;;  %v5163_v36 = vld [vmem:[#allocation10 + $0x900] sm:$0xff] }
 0x9d4   : > { %4916 = vmatprep.subr.bf16.mxu1 %v12533_v52  ;;  %4959 = vmatprep.subr.bf16.mxu0 %v12535_v38  ;;  %v5171_v13 = vld [vmem:[#allocation10 + $0x940] sm:$0xff]  ;;  %v5164_v52 = vld [vmem:[#allocation10 + $0x908] sm:$0xff] }
 0x9d5   : > { %v12582_v38 = vcombine.high %v5163_v36, %v5171_v13 }
 0x9d7   : > { %4917 = vmatpush1.bf16.msra.mxu1 %v12532_v16  ;;  %4960 = vmatpush1.bf16.msra.mxu0 %v12534_v55  ;;  %v5172_v16 = vld [vmem:[#allocation10 + $0x948] sm:$0xff]  ;;  %v12581_v55 = vcombine.low %v5163_v36, %v5171_v13 }
 0x9d8   : > { %13535 = vmatprep.subr.bf16.mxu0 %v15886_v54  ;;  %v12583_v2 = vcombine.low %v5164_v52, %v5172_v16 }
 0x9da   : > { %12542 = vmatmul.mubr.msk.bf16.vlgmr.msra.gmra.mrb[24].mxu1 %vm1952_vm11, %v16278_v47  ;;  %12543 = vmatmul.mubr.msk.bf16.vlgmr.msra.gmra.mrb[20].mxu0 %vm1952_vm11, %v16278_v47 }
 0x9db   : > { %13537 = vmatpush3.bf16.msra.mxu0 %v15886_v54  ;;  %13374 = vmatprep.mubr.msk.f32.mxu0 %vm1102_vm5, %v1318_v57  ;;  %v12584_v57 = vcombine.high %v5164_v52, %v5172_v16  ;;  %v16338_v52 = vld [vmem:[%s15637_s12] sm:$0xff] }
 0x9dc   : > { %5550 = vmatprep.mubr.bf16.mxu1 %v17912_v0  ;;  %5561 = vmatprep.subr.bf16.mxu0 %v12552_v8 }
 0x9f4   : > { %v1316_v1 = vpop.xlane.xlu0 %1315 }
 0x9f5   : > { %14483 = vrcp.f32 %v1316_v1  ;;  %v5179_v1 = vld [vmem:[#allocation10 + $0x980] sm:$0xff] }
 0x9fc   : > { %v1323_v34 = vpop.permute.xlu0 %1322 }
 0x9fd   : > { %v1333_v26 = vadd.f32 %v16269_v29, %v1323_v34  ;;  %v5139_v29 = vld [vmem:[#allocation10 + $0x840] sm:$0xff] }
 0x9fe   : > { %v12550_v43 = vcombine.high %v5131_v40, %v5139_v29  ;;  %v12549_v5 = vcombine.low %v5131_v40, %v5139_v29  ;;  %v5187_v34 = vld [vmem:[#allocation10 + $0x9c0] sm:$0xff]  ;;  %v16319_v40 = vld [vmem:[#allocation10 + $0x810] sm:$0xff] }
 0x9ff   : > { %v14484_v28 = vpop.eup %14483  ;;  %v1337_v37 = vmul.f32 0.2, %v1333_v26  ;;  %vm1335_vm13 = vcmp.gt.f32.partialorder %v1333_v26, 0.0  ;;  %v16321_v29 = vld [vmem:[#allocation10 + $0x850] sm:$0xff] }
 0xa00   : > { %v1320_v7 = vmul.f32 %v14484_v28, %v16258_v41  ;;  %v12551_v41 = vcombine.low %v5132_v20, %v5140_v58  ;;  %5518 = vmatprep.subr.bf16.mxu1 %v12550_v43  ;;  %v12598_v28 = vcombine.high %v5179_v1, %v5187_v34  ;;  %v16323_v20 = vld [vmem:[#allocation10 + $0x818] sm:$0xff]  ;;  %v12553_v43 = vcombine.low %v16319_v40, %v16321_v29 }
 0xa01   : > { %v16311_v35 = vsel %vm1335_vm13, %v1333_v26, %v1337_v37  ;;  %5519 = vmatpush1.bf16.msra.mxu1 %v12549_v5  ;;  %v5180_v26 = vld [vmem:[#allocation10 + $0x988] sm:$0xff]  ;;  %v12554_v58 = vcombine.high %v16319_v40, %v16321_v29  ;;  %v16329_v5 = vld [vmem:[#allocation10 + $0x858] sm:$0xff] }
 0xa02   : > { %13375 = vmatmul.mubr.msk.f32.vlgmr.msra.gmra.mrb[28].mxu0 %vm1102_vm5, %v1320_v7  ;;  %v1341_v54 = vsel %vm1098_vm2, %v16311_v35, -1e+30  ;;  %5520 = vmatprep.subr.bf16.mxu1 %v12566_v23  ;;  %v5188_v37 = vld [vmem:[#allocation10 + $0x9c8] sm:$0xff]  ;;  %v12597_v7 = vcombine.low %v5179_v1, %v5187_v34  ;;  %v12556_v8 = vcombine.high %v16323_v20, %v16329_v5  ;;  %v12544_v34 = vld [vmem:[#allocation8 + $0x4] ss:$0 sm:$0xff] }
 0xa03   : > { %v1343_v47 = vsel %vm1102_vm5, %v1341_v54, -inf  ;;  %5593 = vmatprep.mubr.bf16.mxu0 %v17912_v0  ;;  %5562 = vmatpush1.bf16.msra.mxu0 %v12551_v41  ;;  %v12599_v54 = vcombine.low %v5180_v26, %v5188_v37  ;;  %v12555_v41 = vcombine.low %v16323_v20, %v16329_v5  ;;  %v5135_v5 = vld [vmem:[#allocation10 + $0x820] sm:$0xff] }
 0xa04   : > { %1344 = vmax.xlane.f32.xlu1 %v1343_v47  ;;  %5563 = vmatprep.subr.bf16.mxu0 %v12568_v15  ;;  %v12600_v47 = vcombine.high %v5180_v26, %v5188_v37 }
 0xa05   : > { %5521 = vmatpush1.bf16.msra.mxu1 %v12565_v49 }
 0xa06   : > { %5522 = vmatprep.subr.bf16.mxu1 %v12582_v38 }
 0xa07   : > { %5564 = vmatpush1.bf16.msra.mxu0 %v12567_v51 }
 0xa08   : > { %5565 = vmatprep.subr.bf16.mxu0 %v12584_v57 }
 0xa09   : > { %5523 = vmatpush1.bf16.msra.mxu1 %v12581_v55 }
 0xa0a   : > { %5524 = vmatprep.subr.bf16.mxu1 %v12598_v28 }
 0xa0b   : > { %5566 = vmatpush1.bf16.msra.mxu0 %v12583_v2  ;;  %v16359_v2 = vsub.s32 6, %v15921_v14 }
 0xa0c   : > { %5567 = vmatprep.subr.bf16.mxu0 %v12600_v47 }
 0xa0d   : > { %5525 = vmatpush1.bf16.msra.mxu1 %v12597_v7  ;;  %18036 = vst [vmem:[#allocation41_spill] sm:$0xff] %v16359_v2  ;;  %v16363_v1 = vrot.slane %v15926_v18, %v16359_v2 }
 0xa0e   : > { %5604 = vmatprep.subr.bf16.mxu1 %v12554_v58 }
 0xa0f   : > { %5568 = vmatpush1.bf16.msra.mxu0 %v12599_v54 }
 0xa10   : > { %5647 = vmatprep.subr.bf16.mxu0 %v12556_v8 }
 0xa29   : > { %v1348_v22 = vpop.xlane.xlu0 %1347 }
 0xa2a   : > { %v1350_v10 = vsub.f32 %v16272_v30, %v1348_v22  ;;  %v16346_v30 = vld [vmem:[%s15637_s12 + $0x8] sm:$0xff] }
 0xa2c   : > { %v1352_v27 = vmin.f32 %v1350_v10, 0.0 }
 0xa2e   : > { %v1355_v49 = vmul.f32 1.442695, %v1352_v27 }
 0xa30   : > { %14485 = vpow2.f32 %v1355_v49  ;;  %v5149_v49 = vld [vmem:[#allocation10 + $0x890] sm:$0xff] }
 0xa31   : > { %v1371_v57 = vpop.permute.xlu0 %1370 }
 0xa32   : > { %v1381_v26 = vadd.f32 %v16363_v1, %v1371_v57 }
 0xa34   : > { %v1385_v47 = vmul.f32 0.2, %v1381_v26  ;;  %vm1383_vm14 = vcmp.gt.f32.partialorder %v1381_v26, 0.0 }
 0xa36   : > { %v16366_v8 = vsel %vm1383_vm14, %v1381_v26, %v1385_v47  ;;  %v5166_v47 = vld [vmem:[#allocation10 + $0x918] sm:$0xff] }
 0xa37   : > { %v1389_v22 = vsel %vm1098_vm2, %v16366_v8, -1e+30 }
 0xa38   : > { %v1391_v10 = vsel %vm1102_vm5, %v1389_v22, -inf  ;;  %v5189_v22 = vld [vmem:[#allocation10 + $0x9d0] sm:$0xff] }
 0xa3a   : > { %v14486_v36 = vpop.eup %14485 }
 0xa3b   : > { %v16349_v55 = vmul.f32 %v16346_v30, %v14486_v36  ;;  %v5150_v36 = vld [vmem:[#allocation10 + $0x898] sm:$0xff] }
 0xa91   : > { %v1345_v23 = vpop.xlane.xlu1 %1344 }
 0xa92   : > { %v1349_v24 = vsub.f32 %v16311_v35, %v1345_v23  ;;  %v1362_v35 = vsel %vm1102_vm5, %v16349_v55, 0.0 }
 0xa94   : > { %v1351_v51 = vmin.f32 %v1349_v24, 0.0 }
 0xa96   : > { %v1353_v15 = vmul.f32 1.442695, %v1351_v51 }
 0xa98   : > { %14487 = vpow2.f32 %v1353_v15  ;;  %v5157_v15 = vld [vmem:[#allocation10 + $0x8d0] sm:$0xff] }
 0xaa2   : > { %v14488_v13 = vpop.eup %14487 }
 0xaa3   : > { %v16341_v38 = vmul.f32 %v16338_v52, %v14488_v13  ;;  %v5158_v13 = vld [vmem:[#allocation10 + $0x8d8] sm:$0xff] }
 0xaa4   : > { %v12572_v26 = vcombine.high %v5150_v36, %v5158_v13 }
 0xaa5   : > { %v1359_v16 = vsel %vm1102_vm5, %v16341_v38, 0.0 }
 0xaa6   : > { %1360 = vadd.xlane.f32.xlu1 %v1359_v16 }
 0xaaa   : > { %1363 = vadd.xlane.f32.xlu1 %v1362_v35 }
 0xabb   : > { %14177 = vrot.lane.b32.xlu1 %v14176_v53, %s17977_s4 }
 0xabf   : > { %1374 = vperm.xlu1 %14182, %v15915_v11  }
 0xad5   : > { %v13376_v28 = vpop.f32.mrb[28].mxu0 }
 0xad6   : > { %v5114_v37 = vadd.f32 %v13376_v28, %v12544_v34  ;;  %v5108_v7 = vpop.f32.mrb[29].mxu0  ;;  %v5165_v28 = vld [vmem:[#allocation10 + $0x910] sm:$0xff] }
 0xad7   : > { %v5109_v54 = vadd.f32 %v12544_v34, %v5108_v7  ;;  %v12570_v34 = vcombine.high %v5149_v49, %v5157_v15  ;;  %v5173_v7 = vld [vmem:[#allocation10 + $0x950] sm:$0xff] }
 0xad8   : > { %v5120_v46 = vmin.f32 %v5114_v37, 0.0  ;;  %vm5118_vm15 = vcmp.gt.f32.partialorder %v5114_v37, 0.0  ;;  %v12585_v40 = vcombine.low %v5165_v28, %v5173_v7 }
 0xad9   : > { %v5119_v50 = vmin.f32 %v5109_v54, 0.0  ;;  %vm5117_vm3 = vcmp.gt.f32.partialorder %v5109_v54, 0.0 }
 0xada   : > { %v5123_v53 = vmul.f32 1.442695, %v5120_v46  ;;  %v5174_v46 = vld [vmem:[#allocation10 + $0x958] sm:$0xff] }
 0xadb   : > { %v5121_v58 = vmul.f32 1.442695, %v5119_v50  ;;  %v12586_v50 = vcombine.high %v5165_v28, %v5173_v7  ;;  %v12587_v29 = vcombine.low %v5166_v47, %v5174_v46 }
 0xadc   : > { %14489 = vpow2.f32 %v5123_v53  ;;  %v12588_v53 = vcombine.high %v5166_v47, %v5174_v46  ;;  %v5167_v46 = vld [vmem:[#allocation10 + $0x920] sm:$0xff] }
 0xadd   : > { %14491 = vpow2.f32 %v5121_v58  ;;  %v5181_v58 = vld [vmem:[#allocation10 + $0x990] sm:$0xff] }
 0xade   : > { %v12602_v20 = vcombine.high %v5181_v58, %v5189_v22 }
 0xae3   : > { %1392 = vmax.xlane.f32.xlu1 %v1391_v10  ;;  %v5182_v10 = vld [vmem:[#allocation10 + $0x998] sm:$0xff] }
 0xae6   : > { %v14490_v27 = vpop.eup %14489 }
 0xae7   : > { %v14492_v23 = vpop.eup %14491  ;;  %v12548_v24 = vadd.f32 -1.0, %v14490_v27  ;;  %v5190_v27 = vld [vmem:[#allocation10 + $0x9d8] sm:$0xff] }
 0xae8   : > { %v12547_v51 = vadd.f32 -1.0, %v14492_v23  ;;  %v5136_v23 = vld [vmem:[#allocation10 + $0x828] sm:$0xff] }
 0xae9   : > { %v5128_v16 = vsel %vm5118_vm15, %v5114_v37, %v12548_v24  ;;  %v12569_v37 = vcombine.low %v5149_v49, %v5157_v15  ;;  %v5144_v24 = vld [vmem:[#allocation10 + $0x868] sm:$0xff]  ;;  %v12601_v49 = vcombine.low %v5181_v58, %v5189_v22 }
 0xaea   : > { %v5127_v35 = vsel %vm5117_vm3, %v5109_v54, %v12547_v51  ;;  %v12571_v54 = vcombine.low %v5150_v36, %v5158_v13  ;;  %v12603_v51 = vcombine.low %v5182_v10, %v5190_v27  ;;  %v12560_v36 = vcombine.high %v5136_v23, %v5144_v24  ;;  %v5151_v13 = vld [vmem:[#allocation10 + $0x8a0] sm:$0xff] }
 0xaeb   : > { %v16372_v57 = vpack.c.bf16 %v5128_v16, %v5127_v35  ;;  %v5159_v16 = vld [vmem:[#allocation10 + $0x8e0] sm:$0xff]  ;;  %v5152_v35 = vld [vmem:[#allocation10 + $0x8a8] sm:$0xff]  ;;  %v12559_v28 = vcombine.low %v5136_v23, %v5144_v24  ;;  %v5137_v24 = vld [vmem:[#allocation10 + $0x830] sm:$0xff] }
 0xaec   : > { %v12574_v7 = vcombine.high %v5151_v13, %v5159_v16 }
 0xaed   : > { %12613 = vmatmul.mubr.msk.bf16.vlgmr.msra.gmra.mrb[8].mxu1 %vm1952_vm11, %v16372_v57  ;;  %12614 = vmatmul.mubr.msk.bf16.vlgmr.msra.gmra.mrb[24].mxu0 %vm1952_vm11, %v16372_v57 }
 0xaee   : > { %5605 = vmatpush1.bf16.msra.mxu1 %v12553_v43  ;;  %5648 = vmatpush1.bf16.msra.mxu0 %v12555_v41  ;;  %v12604_v43 = vcombine.high %v5182_v10, %v5190_v27  ;;  %v5143_v41 = vld [vmem:[#allocation10 + $0x860] sm:$0xff] }
 0xaef   : > { %5606 = vmatprep.subr.bf16.mxu1 %v12570_v34  ;;  %5649 = vmatprep.subr.bf16.mxu0 %v12572_v26  ;;  %v12558_v15 = vcombine.high %v5135_v5, %v5143_v41  ;;  %v5160_v34 = vld [vmem:[#allocation10 + $0x8e8] sm:$0xff]  ;;  %v12557_v26 = vcombine.low %v5135_v5, %v5143_v41  ;;  %v5183_v27 = vld [vmem:[#allocation10 + $0x9a0] sm:$0xff] }
 0xaf0   : > { %5636 = vmatprep.mubr.bf16.mxu1 %v17912_v0  ;;  %5679 = vmatprep.mubr.bf16.mxu0 %v17912_v0  ;;  %v12576_v47 = vcombine.high %v5152_v35, %v5160_v34  ;;  %v12575_v58 = vcombine.low %v5152_v35, %v5160_v34  ;;  %v5153_v34 = vld [vmem:[#allocation10 + $0x8b0] sm:$0xff] }
 0xaf2   : > { %5607 = vmatpush1.bf16.msra.mxu1 %v12569_v37  ;;  %5650 = vmatpush1.bf16.msra.mxu0 %v12571_v54  ;;  %v5175_v37 = vld [vmem:[#allocation10 + $0x960] sm:$0xff]  ;;  %v5168_v54 = vld [vmem:[#allocation10 + $0x928] sm:$0xff] }
 0xaf3   : > { %5608 = vmatprep.subr.bf16.mxu1 %v12586_v50  ;;  %5651 = vmatprep.subr.bf16.mxu0 %v12588_v53  ;;  %v5176_v50 = vld [vmem:[#allocation10 + $0x968] sm:$0xff]  ;;  %v12573_v53 = vcombine.low %v5151_v13, %v5159_v16  ;;  %v12590_v22 = vcombine.high %v5167_v46, %v5175_v37 }
 0xaf4   : > { %v12592_v10 = vcombine.high %v5168_v54, %v5176_v50  ;;  %v12591_v5 = vcombine.low %v5168_v54, %v5176_v50  ;;  %v5169_v50 = vld [vmem:[#allocation10 + $0x930] sm:$0xff] }
 0xaf6   : > { %5609 = vmatpush1.bf16.msra.mxu1 %v12585_v40  ;;  %5652 = vmatpush1.bf16.msra.mxu0 %v12587_v29  ;;  %v5191_v40 = vld [vmem:[#allocation10 + $0x9e0] sm:$0xff]  ;;  %v5184_v29 = vld [vmem:[#allocation10 + $0x9a8] sm:$0xff] }
 0xaf7   : > { %5610 = vmatprep.subr.bf16.mxu1 %v12602_v20  ;;  %5653 = vmatprep.subr.bf16.mxu0 %v12604_v43  ;;  %v5192_v20 = vld [vmem:[#allocation10 + $0x9e8] sm:$0xff]  ;;  %v12589_v43 = vcombine.low %v5167_v46, %v5175_v37  ;;  %v12606_v41 = vcombine.high %v5183_v27, %v5191_v40 }
 0xaf8   : > { %v12608_v23 = vcombine.high %v5184_v29, %v5192_v20  ;;  %v12607_v13 = vcombine.low %v5184_v29, %v5192_v20  ;;  %v5185_v20 = vld [vmem:[#allocation10 + $0x9b0] sm:$0xff] }
 0xafa   : > { %5611 = vmatpush1.bf16.msra.mxu1 %v12601_v49  ;;  %5654 = vmatpush1.bf16.msra.mxu0 %v12603_v51  ;;  %v5145_v49 = vld [vmem:[#allocation10 + $0x870] sm:$0xff]  ;;  %v5138_v51 = vld [vmem:[#allocation10 + $0x838] sm:$0xff] }
 0xafb   : > { %5690 = vmatprep.subr.bf16.mxu1 %v12558_v15  ;;  %5733 = vmatprep.subr.bf16.mxu0 %v12560_v36  ;;  %v5146_v15 = vld [vmem:[#allocation10 + $0x878] sm:$0xff]  ;;  %v12605_v36 = vcombine.low %v5183_v27, %v5191_v40  ;;  %v12562_v16 = vcombine.high %v5137_v24, %v5145_v49 }
 0xafc   : > { %v12564_v35 = vcombine.high %v5138_v51, %v5146_v15  ;;  %v12563_v46 = vcombine.low %v5138_v51, %v5146_v15 }
 0xafd   : > { %12615 = vmatmul.mubr.msk.bf16.vlgmr.msra.gmra.mrb[16].mxu1 %vm1952_vm11, %v16372_v57  ;;  %12616 = vmatmul.mubr.msk.bf16.vlgmr.msra.gmra.mrb[12].mxu0 %vm1952_vm11, %v16372_v57 }
 0xafe   : > { %5691 = vmatpush1.bf16.msra.mxu1 %v12557_v26  ;;  %5734 = vmatpush1.bf16.msra.mxu0 %v12559_v28  ;;  %v5161_v26 = vld [vmem:[#allocation10 + $0x8f0] sm:$0xff]  ;;  %v5154_v28 = vld [vmem:[#allocation10 + $0x8b8] sm:$0xff] }
 0xaff   : > { %5692 = vmatprep.subr.bf16.mxu1 %v12574_v7  ;;  %5735 = vmatprep.subr.bf16.mxu0 %v12576_v47  ;;  %v5162_v7 = vld [vmem:[#allocation10 + $0x8f8] sm:$0xff]  ;;  %v12561_v47 = vcombine.low %v5137_v24, %v5145_v49  ;;  %v12578_v37 = vcombine.high %v5153_v34, %v5161_v26 }
 0xb00   : > { %5722 = vmatprep.mubr.bf16.mxu1 %v17912_v0  ;;  %5765 = vmatprep.mubr.bf16.mxu0 %v17912_v0  ;;  %v12580_v54 = vcombine.high %v5154_v28, %v5162_v7  ;;  %v12579_v27 = vcombine.low %v5154_v28, %v5162_v7 }
 0xb02   : > { %5693 = vmatpush1.bf16.msra.mxu1 %v12573_v53  ;;  %5736 = vmatpush1.bf16.msra.mxu0 %v12575_v58  ;;  %v5177_v53 = vld [vmem:[#allocation10 + $0x970] sm:$0xff]  ;;  %v5170_v58 = vld [vmem:[#allocation10 + $0x938] sm:$0xff] }
 0xb03   : > { %5694 = vmatprep.subr.bf16.mxu1 %v12590_v22  ;;  %5737 = vmatprep.subr.bf16.mxu0 %v12592_v10  ;;  %v5178_v22 = vld [vmem:[#allocation10 + $0x978] sm:$0xff]  ;;  %v12577_v10 = vcombine.low %v5153_v34, %v5161_v26  ;;  %v12594_v40 = vcombine.high %v5169_v50, %v5177_v53 }
 0xb04   : > { %v12596_v29 = vcombine.high %v5170_v58, %v5178_v22  ;;  %v12595_v24 = vcombine.low %v5170_v58, %v5178_v22 }
 0xb06   : > { %5695 = vmatpush1.bf16.msra.mxu1 %v12589_v43  ;;  %5738 = vmatpush1.bf16.msra.mxu0 %v12591_v5  ;;  %v5193_v43 = vld [vmem:[#allocation10 + $0x9f0] sm:$0xff]  ;;  %v5186_v5 = vld [vmem:[#allocation10 + $0x9b8] sm:$0xff] }
 0xb07   : > { %5696 = vmatprep.subr.bf16.mxu1 %v12606_v41  ;;  %5739 = vmatprep.subr.bf16.mxu0 %v12608_v23  ;;  %v5194_v41 = vld [vmem:[#allocation10 + $0x9f8] sm:$0xff]  ;;  %v12593_v23 = vcombine.low %v5169_v50, %v5177_v53  ;;  %v12610_v49 = vcombine.high %v5185_v20, %v5193_v43  ;;  %v12609_v15 = vcombine.low %v5185_v20, %v5193_v43  ;;  %v6005_v43 = vld [vmem:[#allocation10 + $0xa00] sm:$0xff] }
 0xb08   : > { %v12612_v51 = vcombine.high %v5186_v5, %v5194_v41 }
 0xb0a   : > { %5697 = vmatpush1.bf16.msra.mxu1 %v12605_v36  ;;  %5740 = vmatpush1.bf16.msra.mxu0 %v12607_v13  ;;  %v12611_v36 = vcombine.low %v5186_v5, %v5194_v41  ;;  %v6013_v5 = vld [vmem:[#allocation10 + $0xa40] sm:$0xff]  ;;  %v6006_v41 = vld [vmem:[#allocation10 + $0xa08] sm:$0xff] }
 0xb0b   : > { %5776 = vmatprep.subr.bf16.mxu1 %v12562_v16  ;;  %5819 = vmatprep.subr.bf16.mxu0 %v12564_v35 }
 0xb0d   : > { %12617 = vmatmul.mubr.msk.bf16.vlgmr.msra.gmra.mrb[20].mxu1 %vm1952_vm11, %v16372_v57  ;;  %12618 = vmatmul.mubr.msk.bf16.vlgmr.msra.gmra.mrb[16].mxu0 %vm1952_vm11, %v16372_v57 }
 0xb0e   : > { %5777 = vmatpush1.bf16.msra.mxu1 %v12561_v47  ;;  %5820 = vmatpush1.bf16.msra.mxu0 %v12563_v46 }
 0xb0f   : > { %5778 = vmatprep.subr.bf16.mxu1 %v12578_v37  ;;  %5821 = vmatprep.subr.bf16.mxu0 %v12580_v54 }
 0xb10   : > { %5808 = vmatprep.mubr.bf16.mxu1 %v17912_v0  ;;  %5851 = vmatprep.mubr.bf16.mxu0 %v17912_v0 }
 0xb12   : > { %5779 = vmatpush1.bf16.msra.mxu1 %v12577_v10  ;;  %5822 = vmatpush1.bf16.msra.mxu0 %v12579_v27 }
 0xb13   : > { %5780 = vmatprep.subr.bf16.mxu1 %v12594_v40  ;;  %5823 = vmatprep.subr.bf16.mxu0 %v12596_v29 }
 0xb16   : > { %5781 = vmatpush1.bf16.msra.mxu1 %v12593_v23  ;;  %5824 = vmatpush1.bf16.msra.mxu0 %v12595_v24  ;;  %v12627_v23 = vcombine.high %v6005_v43, %v6013_v5  ;;  %v6014_v24 = vld [vmem:[#allocation10 + $0xa48] sm:$0xff] }
 0xb17   : > { %5782 = vmatprep.subr.bf16.mxu1 %v12610_v49  ;;  %5825 = vmatprep.subr.bf16.mxu0 %v12612_v51  ;;  %v12626_v49 = vcombine.low %v6005_v43, %v6013_v5  ;;  %v12628_v51 = vcombine.low %v6006_v41, %v6014_v24  ;;  %v6007_v43 = vld [vmem:[#allocation10 + $0xa10] sm:$0xff] }
 0xb18   : > { %v6015_v5 = vld [vmem:[#allocation10 + $0xa50] sm:$0xff] }
 0xb1a   : > { %5783 = vmatpush1.bf16.msra.mxu1 %v12609_v15  ;;  %5826 = vmatpush1.bf16.msra.mxu0 %v12611_v36  ;;  %v12629_v15 = vcombine.high %v6006_v41, %v6014_v24  ;;  %v6029_v36 = vld [vmem:[#allocation10 + $0xac0] sm:$0xff]  ;;  %v6008_v41 = vld [vmem:[#allocation10 + $0xa18] sm:$0xff]  ;;  %v12631_v24 = vcombine.high %v6007_v43, %v6015_v5 }
 0xb1c   : > { %6435 = vmatprep.subr.bf16.mxu0 %v12629_v15 }
 0xb1d   : > { %12619 = vmatmul.mubr.msk.bf16.vlgmr.msra.gmra.mrb[24].mxu1 %vm1952_vm11, %v16372_v57  ;;  %12620 = vmatmul.mubr.msk.bf16.vlgmr.msra.gmra.mrb[20].mxu0 %vm1952_vm11, %v16372_v57 }
 0xb1e   : > { %6467 = vmatprep.mubr.bf16.mxu0 %v17912_v0  ;;  %6436 = vmatpush1.bf16.msra.mxu0 %v12628_v51 }
 0xb33   : > { %v1361_v13 = vpop.xlane.xlu1 %1360 }
 0xb34   : > { %14493 = vrcp.f32 %v1361_v13  ;;  %v6022_v13 = vld [vmem:[#allocation10 + $0xa88] sm:$0xff] }
 0xb37   : > { %v1364_v16 = vpop.xlane.xlu1 %1363 }
 0xb38   : > { %14495 = vrcp.f32 %v1364_v16  ;;  %v6030_v16 = vld [vmem:[#allocation10 + $0xac8] sm:$0xff] }
 0xb3b   : > { %v14178_v35 = vpop.permute.xlu1 %14177 }
 0xb3c   : > { %v14180_v34 = vunpack.i.h.bf16 %v14178_v35  ;;  %v14179_v26 = vunpack.i.l.bf16 %v14178_v35 }
 0xb3e   : > { %v14494_v28 = vpop.eup %14493  ;;  %v13538_v7 = vpack.c.bf16 %v14180_v34, %v14179_v26  ;;  %v12644_v34 = vcombine.low %v6022_v13, %v6030_v16  ;;  %v12645_v26 = vcombine.high %v6022_v13, %v6030_v16 }
 0xb3f   : > { %v1375_v47 = vpop.permute.xlu1 %1374  ;;  %v1366_v46 = vmul.f32 %v14494_v28, %v16341_v38  ;;  %v6037_v28 = vld [vmem:[#allocation10 + $0xb00] sm:$0xff] }
 0xb40   : > { %v1382_v37 = vadd.f32 %v16363_v1, %v1375_v47  ;;  %13539 = vmatprep.subr.bf16.mxu1 %v13538_v7  ;;  %v17901_v1 = vmov 7   ;;  %6437 = vmatprep.subr.bf16.mxu0 %v12645_v26  ;;  %v6038_v47 = vld [vmem:[#allocation10 + $0xb08] sm:$0xff]  ;;  %v12621_v26 = vld [vmem:[#allocation8 + $0x5] ss:$0 sm:$0xff] }
 0xb41   : > { %13541 = vmatpush3.bf16.msra.mxu1 %v13538_v7  ;;  %13381 = vmatprep.mubr.msk.f32.mxu1 %vm1102_vm5, %v1366_v46  ;;  %v6045_v7 = vld [vmem:[#allocation10 + $0xb40] sm:$0xff] }
 0xb42   : > { %v14496_v57 = vpop.eup %14495  ;;  %v1386_v54 = vmul.f32 0.2, %v1382_v37  ;;  %vm1384_vm4 = vcmp.gt.f32.partialorder %v1382_v37, 0.0  ;;  %14183 = vset.pattern.permute.xlu1 %v17901_v1  ;;  %6392 = vmatprep.subr.bf16.mxu1 %v12627_v23  ;;  %v12659_v46 = vcombine.high %v6037_v28, %v6045_v7  ;;  %v12630_v23 = vcombine.low %v6007_v43, %v6015_v5  ;;  %v6039_v5 = vld [vmem:[#allocation10 + $0xb10] sm:$0xff] }
 0xb43   : > { %v1368_v50 = vmul.f32 %v14496_v57, %v16349_v55  ;;  %6438 = vmatpush1.bf16.msra.mxu0 %v12644_v34  ;;  %v12658_v57 = vcombine.low %v6037_v28, %v6045_v7 }
 0xb44   : > { %v16407_v53 = vsel %vm1384_vm4, %v1382_v37, %v1386_v54  ;;  %v6046_v37 = vld [vmem:[#allocation10 + $0xb48] sm:$0xff] }
 0xb45   : > { %13382 = vmatmul.mubr.msk.f32.vlgmr.msra.gmra.mrb[32].mxu1 %vm1102_vm5, %v1368_v50  ;;  %v1390_v58 = vsel %vm1099_vm1, %v16407_v53, -1e+30  ;;  %v12660_v54 = vcombine.low %v6038_v47, %v6046_v37  ;;  %v12661_v50 = vcombine.high %v6038_v47, %v6046_v37 }
 0xb46   : > { %v1394_v38 = vsel %vm1102_vm5, %v1390_v58, -inf  ;;  %6424 = vmatprep.mubr.bf16.mxu1 %v17912_v0  ;;  %6393 = vmatpush1.bf16.msra.mxu1 %v12626_v49  ;;  %v6053_v58 = vld [vmem:[#allocation10 + $0xb80] sm:$0xff]  ;;  %v6016_v49 = vld [vmem:[#allocation10 + $0xa58] sm:$0xff] }
 0xb47   : > { %1395 = vmax.xlane.f32.xlu0 %v1394_v38  ;;  %6439 = vmatprep.subr.bf16.mxu0 %v12661_v50  ;;  %v6061_v38 = vld [vmem:[#allocation10 + $0xbc0] sm:$0xff]  ;;  %v12632_v51 = vcombine.low %v6008_v41, %v6016_v49  ;;  %v12633_v15 = vcombine.high %v6008_v41, %v6016_v49  ;;  %v6047_v41 = vld [vmem:[#allocation10 + $0xb50] sm:$0xff]  ;;  %v6048_v49 = vld [vmem:[#allocation10 + $0xb58] sm:$0xff] }
 0xb48   : > { %6440 = vmatpush1.bf16.msra.mxu0 %v12660_v54 }
 0xb70   : > { %v1393_v22 = vpop.xlane.xlu1 %1392 }
 0xb71   : > { %v1397_v10 = vsub.f32 %v16366_v8, %v1393_v22  ;;  %v6021_v8 = vld [vmem:[#allocation10 + $0xa80] sm:$0xff]  ;;  %v6054_v22 = vld [vmem:[#allocation10 + $0xb88] sm:$0xff] }
 0xb72   : > { %v12642_v35 = vcombine.low %v6021_v8, %v6029_v36 }
 0xb73   : > { %v1399_v55 = vmin.f32 %v1397_v10, 0.0  ;;  %v12675_v10 = vcombine.high %v6053_v58, %v6061_v38 }
 0xb75   : > { %v1401_v27 = vmul.f32 1.442695, %v1399_v55  ;;  %v6062_v55 = vld [vmem:[#allocation10 + $0xbc8] sm:$0xff] }
 0xb77   : > { %14497 = vpow2.f32 %v1401_v27  ;;  %v12674_v27 = vcombine.low %v6053_v58, %v6061_v38  ;;  %v6023_v38 = vld [vmem:[#allocation10 + $0xa90] sm:$0xff] }
 0xb81   : > { %v14498_v40 = vpop.eup %14497 }
 0xb82   : > { %v16418_v29 = vmul.f32 %v16338_v52, %v14498_v40  ;;  %v12643_v52 = vcombine.high %v6021_v8, %v6029_v36  ;;  %v12676_v40 = vcombine.low %v6054_v22, %v6062_v55 }
 0xb84   : > { %v1407_v20 = vsel %vm1102_vm5, %v16418_v29, 0.0  ;;  %6394 = vmatprep.subr.bf16.mxu1 %v12643_v52 }
 0xb85   : > { %1408 = vadd.xlane.f32.xlu1 %v1407_v20  ;;  %6395 = vmatpush1.bf16.msra.mxu1 %v12642_v35  ;;  %v12677_v20 = vcombine.high %v6054_v22, %v6062_v55  ;;  %v6024_v22 = vld [vmem:[#allocation10 + $0xa98] sm:$0xff] }
 0xb86   : > { %6396 = vmatprep.subr.bf16.mxu1 %v12659_v46 }
 0xb87   : > { %6441 = vmatprep.subr.bf16.mxu0 %v12677_v20 }
 0xb88   : > { %6442 = vmatpush1.bf16.msra.mxu0 %v12676_v40 }
 0xb89   : > { %6397 = vmatpush1.bf16.msra.mxu1 %v12658_v57  ;;  %6521 = vmatprep.subr.bf16.mxu0 %v12633_v15 }
 0xb8a   : > { %6398 = vmatprep.subr.bf16.mxu1 %v12675_v10  ;;  %v6032_v10 = vld [vmem:[#allocation10 + $0xad8] sm:$0xff] }
 0xb8b   : > { %v12649_v43 = vcombine.high %v6024_v22, %v6032_v10 }
 0xb8d   : > { %6399 = vmatpush1.bf16.msra.mxu1 %v12674_v27 }
 0xb8e   : > { %6478 = vmatprep.subr.bf16.mxu1 %v12631_v24  ;;  %v6040_v24 = vld [vmem:[#allocation10 + $0xb18] sm:$0xff] }
 0xbd4   : > { %v1396_v8 = vpop.xlane.xlu0 %1395 }
 0xbd5   : > { %v1398_v36 = vsub.f32 %v16407_v53, %v1396_v8  ;;  %v12648_v8 = vcombine.low %v6024_v22, %v6032_v10 }
 0xbd7   : > { %v1400_v13 = vmin.f32 %v1398_v36, 0.0  ;;  %v12663_v36 = vcombine.high %v6039_v5, %v6047_v41 }
 0xbd9   : > { %v1403_v52 = vmul.f32 1.442695, %v1400_v13  ;;  %v12665_v13 = vcombine.high %v6040_v24, %v6048_v49 }
 0xbdb   : > { %14499 = vpow2.f32 %v1403_v52  ;;  %v6055_v52 = vld [vmem:[#allocation10 + $0xb90] sm:$0xff] }
 0xbe5   : > { %v14500_v16 = vpop.eup %14499 }
 0xbe6   : > { %v16424_v35 = vmul.f32 %v16346_v30, %v14500_v16  ;;  %v6063_v16 = vld [vmem:[#allocation10 + $0xbd0] sm:$0xff] }
 0xbe8   : > { %v1410_v34 = vsel %vm1102_vm5, %v16424_v35, 0.0 }
 0xbe9   : > { %1411 = vadd.xlane.f32.xlu1 %v1410_v34  ;;  %v6056_v34 = vld [vmem:[#allocation10 + $0xb98] sm:$0xff] }
 0xbfa   : > { %1418 = vperm.xlu1 %14183, %v15911_v4  }
 0xbfe   : > { %1422 = vperm.xlu1 %14183, %v15915_v11   ;;  %v6031_v11 = vld [vmem:[#allocation10 + $0xad0] sm:$0xff] }
 0xbff   : > { %v12647_v20 = vcombine.high %v6023_v38, %v6031_v11  ;;  %v12646_v15 = vcombine.low %v6023_v38, %v6031_v11  ;;  %v6033_v38 = vld [vmem:[#allocation10 + $0xae0] sm:$0xff]  ;;  %v6034_v11 = vld [vmem:[#allocation10 + $0xae8] sm:$0xff] }
 0xc02   : > { %14192 = vset.pattern.permute.xlu1 %v17900_v9 }
 0xc18   : > { %v13383_v28 = vpop.f32.mrb[32].mxu1 }
 0xc19   : > { %v5988_v53 = vadd.f32 %v13383_v28, %v12621_v26  ;;  %v5982_v7 = vpop.f32.mrb[33].mxu1  ;;  %v12662_v28 = vcombine.low %v6039_v5, %v6047_v41  ;;  %v6042_v5 = vld [vmem:[#allocation10 + $0xb28] sm:$0xff] }
 0xc1a   : > { %v5983_v47 = vadd.f32 %v12621_v26, %v5982_v7  ;;  %v6064_v26 = vld [vmem:[#allocation10 + $0xbd8] sm:$0xff]  ;;  %v6009_v7 = vld [vmem:[#allocation10 + $0xa20] sm:$0xff]  ;;  %v6050_v41 = vld [vmem:[#allocation10 + $0xb68] sm:$0xff] }
 0xc1b   : > { %v5994_v46 = vmin.f32 %v5988_v53, 0.0  ;;  %vm5992_vm6 = vcmp.gt.f32.partialorder %v5988_v53, 0.0 }
 0xc1c   : > { %v5993_v37 = vmin.f32 %v5983_v47, 0.0  ;;  %vm5991_vm7 = vcmp.gt.f32.partialorder %v5983_v47, 0.0 }
 0xc1d   : > { %v5997_v57 = vmul.f32 1.442695, %v5994_v46  ;;  %v6010_v46 = vld [vmem:[#allocation10 + $0xa28] sm:$0xff] }
 0xc1e   : > { %v5995_v30 = vmul.f32 1.442695, %v5993_v37  ;;  %v6018_v37 = vld [vmem:[#allocation10 + $0xa68] sm:$0xff] }
 0xc1f   : > { %14501 = vpow2.f32 %v5997_v57  ;;  %v12678_v57 = vcombine.low %v6055_v52, %v6063_v16  ;;  %v12636_v10 = vcombine.low %v6010_v46, %v6018_v37 }
 0xc20   : > { %14503 = vpow2.f32 %v5995_v30  ;;  %v12680_v30 = vcombine.low %v6056_v34, %v6064_v26 }
 0xc29   : > { %v14502_v54 = vpop.eup %14501 }
 0xc2a   : > { %v14504_v50 = vpop.eup %14503  ;;  %v12625_v58 = vadd.f32 -1.0, %v14502_v54 }
 0xc2b   : > { %v12624_v4 = vadd.f32 -1.0, %v14504_v50  ;;  %v12637_v50 = vcombine.high %v6010_v46, %v6018_v37 }
 0xc2c   : > { %v6002_v55 = vsel %vm5992_vm6, %v5988_v53, %v12625_v58  ;;  %v12664_v53 = vcombine.low %v6040_v24, %v6048_v49  ;;  %v6025_v58 = vld [vmem:[#allocation10 + $0xaa0] sm:$0xff] }
 0xc2d   : > { %v6001_v27 = vsel %vm5991_vm7, %v5983_v47, %v12624_v4  ;;  %v6017_v47 = vld [vmem:[#allocation10 + $0xa60] sm:$0xff]  ;;  %v6026_v4 = vld [vmem:[#allocation10 + $0xaa8] sm:$0xff]  ;;  %v12650_v24 = vcombine.low %v6025_v58, %v6033_v38 }
 0xc2e   : > { %v16431_v40 = vpack.c.bf16 %v6002_v55, %v6001_v27  ;;  %v12635_v54 = vcombine.high %v6009_v7, %v6017_v47  ;;  %v12634_v22 = vcombine.low %v6009_v7, %v6017_v47  ;;  %v12651_v55 = vcombine.high %v6025_v58, %v6033_v38  ;;  %v6012_v7 = vld [vmem:[#allocation10 + $0xa38] sm:$0xff] }
 0xc2f   : > { %v12653_v27 = vcombine.high %v6026_v4, %v6034_v11  ;;  %v12652_v49 = vcombine.low %v6026_v4, %v6034_v11  ;;  %v6020_v47 = vld [vmem:[#allocation10 + $0xa78] sm:$0xff] }
 0xc30   : > { %12690 = vmatmul.mubr.msk.bf16.vlgmr.msra.gmra.mrb[8].mxu1 %vm1952_vm11, %v16431_v40  ;;  %12691 = vmatmul.mubr.msk.bf16.vlgmr.msra.gmra.mrb[24].mxu0 %vm1952_vm11, %v16431_v40  ;;  %v6028_v58 = vld [vmem:[#allocation10 + $0xab8] sm:$0xff]  ;;  %v12640_v11 = vcombine.low %v6012_v7, %v6020_v47 }
 0xc31   : > { %6479 = vmatpush1.bf16.msra.mxu1 %v12630_v23  ;;  %6522 = vmatpush1.bf16.msra.mxu0 %v12632_v51  ;;  %v12679_v23 = vcombine.high %v6055_v52, %v6063_v16  ;;  %v12681_v51 = vcombine.high %v6056_v34, %v6064_v26  ;;  %v6058_v52 = vld [vmem:[#allocation10 + $0xba8] sm:$0xff]  ;;  %v12668_v26 = vcombine.low %v6042_v5, %v6050_v41  ;;  %v6036_v38 = vld [vmem:[#allocation10 + $0xaf8] sm:$0xff] }
 0xc32   : > { %6480 = vmatprep.subr.bf16.mxu1 %v12647_v20  ;;  %6523 = vmatprep.subr.bf16.mxu0 %v12649_v43  ;;  %v6041_v20 = vld [vmem:[#allocation10 + $0xb20] sm:$0xff]  ;;  %v6066_v16 = vld [vmem:[#allocation10 + $0xbe8] sm:$0xff] }
 0xc33   : > { %6510 = vmatprep.mubr.bf16.mxu1 %v17912_v0  ;;  %6553 = vmatprep.mubr.bf16.mxu0 %v17912_v0  ;;  %v6049_v43 = vld [vmem:[#allocation10 + $0xb60] sm:$0xff]  ;;  %v12684_v37 = vcombine.low %v6058_v52, %v6066_v16 }
 0xc34   : > { %v12666_v34 = vcombine.low %v6041_v20, %v6049_v43 }
 0xc35   : > { %6481 = vmatpush1.bf16.msra.mxu1 %v12646_v15  ;;  %6524 = vmatpush1.bf16.msra.mxu0 %v12648_v8  ;;  %v12667_v15 = vcombine.high %v6041_v20, %v6049_v43  ;;  %v12669_v8 = vcombine.high %v6042_v5, %v6050_v41  ;;  %v6051_v20 = vld [vmem:[#allocation10 + $0xb70] sm:$0xff]  ;;  %v6044_v43 = vld [vmem:[#allocation10 + $0xb38] sm:$0xff] }
 0xc36   : > { %6482 = vmatprep.subr.bf16.mxu1 %v12663_v36  ;;  %6525 = vmatprep.subr.bf16.mxu0 %v12665_v13  ;;  %v6057_v36 = vld [vmem:[#allocation10 + $0xba0] sm:$0xff]  ;;  %v6052_v5 = vld [vmem:[#allocation10 + $0xb78] sm:$0xff] }
 0xc37   : > { %v6065_v13 = vld [vmem:[#allocation10 + $0xbe0] sm:$0xff] }
 0xc38   : > { %v12682_v46 = vcombine.low %v6057_v36, %v6065_v13 }
 0xc39   : > { %6483 = vmatpush1.bf16.msra.mxu1 %v12662_v28  ;;  %6526 = vmatpush1.bf16.msra.mxu0 %v12664_v53  ;;  %v12683_v28 = vcombine.high %v6057_v36, %v6065_v13  ;;  %v12685_v53 = vcombine.high %v6058_v52, %v6066_v16  ;;  %v6067_v36 = vld [vmem:[#allocation10 + $0xbf0] sm:$0xff]  ;;  %v6060_v13 = vld [vmem:[#allocation10 + $0xbb8] sm:$0xff] }
 0xc3a   : > { %6484 = vmatprep.subr.bf16.mxu1 %v12679_v23  ;;  %6527 = vmatprep.subr.bf16.mxu0 %v12681_v51  ;;  %v6011_v23 = vld [vmem:[#allocation10 + $0xa30] sm:$0xff]  ;;  %v6068_v52 = vld [vmem:[#allocation10 + $0xbf8] sm:$0xff] }
 0xc3b   : > { %v6019_v51 = vld [vmem:[#allocation10 + $0xa70] sm:$0xff] }
 0xc3c   : > { %v12638_v4 = vcombine.low %v6011_v23, %v6019_v51 }
 0xc3d   : > { %6485 = vmatpush1.bf16.msra.mxu1 %v12678_v57  ;;  %6528 = vmatpush1.bf16.msra.mxu0 %v12680_v30  ;;  %v12639_v57 = vcombine.high %v6011_v23, %v6019_v51  ;;  %v12641_v30 = vcombine.high %v6012_v7, %v6020_v47  ;;  %v12688_v23 = vcombine.low %v6060_v13, %v6068_v52  ;;  %v16461_v47 = vsub.s32 7, %v15921_v14 }
 0xc3e   : > { %6564 = vmatprep.subr.bf16.mxu1 %v12635_v54  ;;  %6607 = vmatprep.subr.bf16.mxu0 %v12637_v50  ;;  %v6027_v54 = vld [vmem:[#allocation10 + $0xab0] sm:$0xff] }
 0xc3f   : > { %v6035_v50 = vld [vmem:[#allocation10 + $0xaf0] sm:$0xff]  ;;  %18037 = vst [vmem:[#allocation42_spill] sm:$0xff] %v16461_v47 }
 0xc40   : > { %12692 = vmatmul.mubr.msk.bf16.vlgmr.msra.gmra.mrb[16].mxu1 %vm1952_vm11, %v16431_v40  ;;  %12693 = vmatmul.mubr.msk.bf16.vlgmr.msra.gmra.mrb[12].mxu0 %vm1952_vm11, %v16431_v40  ;;  %v12654_v41 = vcombine.low %v6027_v54, %v6035_v50 }
 0xc41   : > { %6565 = vmatpush1.bf16.msra.mxu1 %v12634_v22  ;;  %6608 = vmatpush1.bf16.msra.mxu0 %v12636_v10  ;;  %v12655_v22 = vcombine.high %v6027_v54, %v6035_v50  ;;  %v12657_v10 = vcombine.high %v6028_v58, %v6036_v38 }
 0xc42   : > { %6566 = vmatprep.subr.bf16.mxu1 %v12651_v55  ;;  %6609 = vmatprep.subr.bf16.mxu0 %v12653_v27  ;;  %v6043_v55 = vld [vmem:[#allocation10 + $0xb30] sm:$0xff]  ;;  %v1409_v27 = vpop.xlane.xlu1 %1408 }
 0xc43   : > { %6596 = vmatprep.mubr.bf16.mxu1 %v17912_v0  ;;  %6639 = vmatprep.mubr.bf16.mxu0 %v17912_v0  ;;  %14505 = vrcp.f32 %v1409_v27  ;;  %v12670_v16 = vcombine.low %v6043_v55, %v6051_v20  ;;  %v6872_v27 = vld [vmem:[#allocation10 + $0xc08] sm:$0xff] }
 0xc45   : > { %6567 = vmatpush1.bf16.msra.mxu1 %v12650_v24  ;;  %6610 = vmatpush1.bf16.msra.mxu0 %v12652_v49  ;;  %v12656_v24 = vcombine.low %v6028_v58, %v6036_v38  ;;  %v12671_v49 = vcombine.high %v6043_v55, %v6051_v20  ;;  %v6879_v55 = vld [vmem:[#allocation10 + $0xc40] sm:$0xff] }
 0xc46   : > { %6568 = vmatprep.subr.bf16.mxu1 %v12667_v15  ;;  %6611 = vmatprep.subr.bf16.mxu0 %v12669_v8  ;;  %v12673_v15 = vcombine.high %v6044_v43, %v6052_v5  ;;  %v6059_v8 = vld [vmem:[#allocation10 + $0xbb0] sm:$0xff] }
 0xc49   : > { %6569 = vmatpush1.bf16.msra.mxu1 %v12666_v34  ;;  %6612 = vmatpush1.bf16.msra.mxu0 %v12668_v26  ;;  %v12672_v34 = vcombine.low %v6044_v43, %v6052_v5  ;;  %v12687_v26 = vcombine.high %v6059_v8, %v6067_v36  ;;  %v6880_v43 = vld [vmem:[#allocation10 + $0xc48] sm:$0xff] }
 0xc4a   : > { %6570 = vmatprep.subr.bf16.mxu1 %v12683_v28  ;;  %6613 = vmatprep.subr.bf16.mxu0 %v12685_v53  ;;  %v12689_v28 = vcombine.high %v6060_v13, %v6068_v52  ;;  %v12686_v53 = vcombine.low %v6059_v8, %v6067_v36  ;;  %v12705_v5 = vcombine.low %v6872_v27, %v6880_v43  ;;  %v6896_v36 = vld [vmem:[#allocation10 + $0xcc8] sm:$0xff] }
 0xc4d   : > { %6571 = vmatpush1.bf16.msra.mxu1 %v12682_v46  ;;  %6614 = vmatpush1.bf16.msra.mxu0 %v12684_v37  ;;  %v14506_v51 = vpop.eup %14505 }
 0xc4e   : > { %6650 = vmatprep.subr.bf16.mxu1 %v12639_v57  ;;  %6693 = vmatprep.subr.bf16.mxu0 %v12641_v30  ;;  %v1414_v7 = vmul.f32 %v14506_v51, %v16418_v29  ;;  %v1428_v29 = vrot.slane %v15926_v18, %v16461_v47 }
 0xc50   : > { %12694 = vmatmul.mubr.msk.bf16.vlgmr.msra.gmra.mrb[20].mxu1 %vm1952_vm11, %v16431_v40  ;;  %12695 = vmatmul.mubr.msk.bf16.vlgmr.msra.gmra.mrb[16].mxu0 %vm1952_vm11, %v16431_v40 }
 0xc51   : > { %6651 = vmatpush1.bf16.msra.mxu1 %v12638_v4  ;;  %6694 = vmatpush1.bf16.msra.mxu0 %v12640_v11 }
 0xc52   : > { %6652 = vmatprep.subr.bf16.mxu1 %v12655_v22  ;;  %6695 = vmatprep.subr.bf16.mxu0 %v12657_v10  ;;  %v6871_v10 = vld [vmem:[#allocation10 + $0xc00] sm:$0xff] }
 0xc53   : > { %6682 = vmatprep.mubr.bf16.mxu1 %v17912_v0  ;;  %6725 = vmatprep.mubr.bf16.mxu0 %v17912_v0  ;;  %v12704_v20 = vcombine.high %v6871_v10, %v6879_v55 }
 0xc55   : > { %6653 = vmatpush1.bf16.msra.mxu1 %v12654_v41  ;;  %6696 = vmatpush1.bf16.msra.mxu0 %v12656_v24  ;;  %v12706_v41 = vcombine.high %v6872_v27, %v6880_v43  ;;  %v6887_v24 = vld [vmem:[#allocation10 + $0xc80] sm:$0xff] }
 0xc56   : > { %6654 = vmatprep.subr.bf16.mxu1 %v12671_v49  ;;  %6697 = vmatprep.subr.bf16.mxu0 %v12673_v15  ;;  %v6895_v49 = vld [vmem:[#allocation10 + $0xcc0] sm:$0xff]  ;;  %v6888_v15 = vld [vmem:[#allocation10 + $0xc88] sm:$0xff] }
 0xc57   : > { %v12720_v8 = vcombine.high %v6887_v24, %v6895_v49  ;;  %v12719_v13 = vcombine.low %v6887_v24, %v6895_v49  ;;  %v12721_v52 = vcombine.low %v6888_v15, %v6896_v36 }
 0xc59   : > { %6655 = vmatpush1.bf16.msra.mxu1 %v12670_v16  ;;  %6698 = vmatpush1.bf16.msra.mxu0 %v12672_v34  ;;  %v12722_v16 = vcombine.high %v6888_v15, %v6896_v36  ;;  %v6903_v34 = vld [vmem:[#allocation10 + $0xd00] sm:$0xff]  ;;  %v14681_v36 = vld [vmem:[%s15637_s12] sm:$0xff] }
 0xc5a   : > { %6656 = vmatprep.subr.bf16.mxu1 %v12687_v26  ;;  %6699 = vmatprep.subr.bf16.mxu0 %v12689_v28  ;;  %v6911_v26 = vld [vmem:[#allocation10 + $0xd40] sm:$0xff]  ;;  %v6904_v28 = vld [vmem:[#allocation10 + $0xd08] sm:$0xff] }
 0xc5b   : > { %v12735_v51 = vcombine.low %v6903_v34, %v6911_v26 }
 0xc5d   : > { %6657 = vmatpush1.bf16.msra.mxu1 %v12686_v53  ;;  %6700 = vmatpush1.bf16.msra.mxu0 %v12688_v23  ;;  %v12736_v53 = vcombine.high %v6903_v34, %v6911_v26  ;;  %v6912_v23 = vld [vmem:[#allocation10 + $0xd48] sm:$0xff]  ;;  %v14682_v34 = vld [vmem:[%s15637_s12 + $0x8] sm:$0xff] }
 0xc5e   : > { %13543 = vmatprep.subr.bf16.mxu0 %v15903_v60  ;;  %7258 = vmatprep.subr.bf16.mxu1 %v12704_v20 }
 0xc60   : > { %12696 = vmatmul.mubr.msk.bf16.vlgmr.msra.gmra.mrb[24].mxu1 %vm1952_vm11, %v16431_v40  ;;  %12697 = vmatmul.mubr.msk.bf16.vlgmr.msra.gmra.mrb[20].mxu0 %vm1952_vm11, %v16431_v40 }
 0xc61   : > { %13545 = vmatpush3.bf16.msra.mxu0 %v15903_v60  ;;  %13388 = vmatprep.mubr.msk.f32.mxu0 %vm1102_vm5, %v1414_v7  ;;  %v12737_v7 = vcombine.low %v6904_v28, %v6912_v23 }
 0xc62   : > { %7290 = vmatprep.mubr.bf16.mxu1 %v17912_v0  ;;  %7301 = vmatprep.subr.bf16.mxu0 %v12706_v41 }
 0xc76   : > { %v1412_v46 = vpop.xlane.xlu1 %1411 }
 0xc77   : > { %14507 = vrcp.f32 %v1412_v46  ;;  %v12738_v46 = vcombine.high %v6904_v28, %v6912_v23 }
 0xc7a   : > { %v1419_v37 = vpop.permute.xlu1 %1418 }
 0xc7b   : > { %v1429_v57 = vadd.f32 %v1428_v29, %v1419_v37  ;;  %v6927_v37 = vld [vmem:[#allocation10 + $0xdc0] sm:$0xff] }
 0xc7d   : > { %v1433_v30 = vmul.f32 0.2, %v1429_v57  ;;  %vm1431_vm8 = vcmp.gt.f32.partialorder %v1429_v57, 0.0 }
 0xc7e   : > { %v1423_v54 = vpop.permute.xlu1 %1422 }
 0xc7f   : > { %v1430_v40 = vadd.f32 %v1428_v29, %v1423_v54  ;;  %v16465_v50 = vsel %vm1431_vm8, %v1429_v57, %v1433_v30  ;;  %v6919_v29 = vld [vmem:[#allocation10 + $0xd80] sm:$0xff]  ;;  %v6920_v57 = vld [vmem:[#allocation10 + $0xd88] sm:$0xff] }
 0xc80   : > { %v1437_v60 = vsel %vm1098_vm2, %v16465_v50, -1e+30  ;;  %v12752_v30 = vcombine.high %v6919_v29, %v6927_v37  ;;  %v6928_v54 = vld [vmem:[#allocation10 + $0xdc8] sm:$0xff] }
 0xc81   : > { %v14508_v58 = vpop.eup %14507  ;;  %v1434_v14 = vmul.f32 0.2, %v1430_v40  ;;  %v1439_v38 = vsel %vm1102_vm5, %v1437_v60, -inf  ;;  %vm1432_vm9 = vcmp.gt.f32.partialorder %v1430_v40, 0.0  ;;  %v12753_v60 = vcombine.low %v6920_v57, %v6928_v54 }
 0xc82   : > { %v1416_v4 = vmul.f32 %v14508_v58, %v16424_v35  ;;  %1440 = vmax.xlane.f32.xlu0 %v1439_v38  ;;  %v12703_v35 = vcombine.low %v6871_v10, %v6879_v55  ;;  %v12754_v58 = vcombine.high %v6920_v57, %v6928_v54  ;;  %v16482_v38 = vld [vmem:[#allocation10 + $0xc50] sm:$0xff]  ;;  %v6882_v10 = vld [vmem:[#allocation10 + $0xc58] sm:$0xff] }
 0xc83   : > { %v16472_v18 = vsel %vm1432_vm9, %v1430_v40, %v1434_v14  ;;  %v12751_v40 = vcombine.low %v6919_v29, %v6927_v37  ;;  %v16480_v14 = vld [vmem:[#allocation10 + $0xc10] sm:$0xff] }
 0xc84   : > { %13389 = vmatmul.mubr.msk.f32.vlgmr.msra.gmra.mrb[30].mxu0 %vm1102_vm5, %v1416_v4  ;;  %v1438_v11 = vsel %vm1099_vm1, %v16472_v18, -1e+30  ;;  %7259 = vmatpush1.bf16.msra.mxu1 %v12703_v35  ;;  %v16484_v4 = vld [vmem:[#allocation10 + $0xc18] sm:$0xff] }
 0xc85   : > { %v1442_v22 = vsel %vm1102_vm5, %v1438_v11, -inf  ;;  %7333 = vmatprep.mubr.bf16.mxu0 %v17912_v0  ;;  %7302 = vmatpush1.bf16.msra.mxu0 %v12705_v5  ;;  %v12707_v11 = vcombine.low %v16480_v14, %v16482_v38  ;;  %v12709_v55 = vcombine.low %v16484_v4, %v6882_v10  ;;  %v12710_v27 = vcombine.high %v16484_v4, %v6882_v10  ;;  %v6905_v10 = vld [vmem:[#allocation10 + $0xd10] sm:$0xff] }
 0xc86   : > { %1443 = vmax.xlane.f32.xlu1 %v1442_v22  ;;  %7260 = vmatprep.subr.bf16.mxu1 %v12720_v8  ;;  %v12708_v22 = vcombine.high %v16480_v14, %v16482_v38 }
 0xc87   : > { %7303 = vmatprep.subr.bf16.mxu0 %v12722_v16 }
 0xc88   : > { %7261 = vmatpush1.bf16.msra.mxu1 %v12719_v13 }
 0xc89   : > { %7304 = vmatpush1.bf16.msra.mxu0 %v12721_v52  ;;  %7262 = vmatprep.subr.bf16.mxu1 %v12736_v53 }
 0xc8a   : > { %7305 = vmatprep.subr.bf16.mxu0 %v12738_v46 }
 0xc8c   : > { %7263 = vmatpush1.bf16.msra.mxu1 %v12735_v51 }
 0xc8d   : > { %7306 = vmatpush1.bf16.msra.mxu0 %v12737_v7  ;;  %7264 = vmatprep.subr.bf16.mxu1 %v12752_v30 }
 0xc8e   : > { %7307 = vmatprep.subr.bf16.mxu0 %v12754_v58  ;;  %v6897_v58 = vld [vmem:[#allocation10 + $0xcd0] sm:$0xff] }
 0xc90   : > { %7265 = vmatpush1.bf16.msra.mxu1 %v12751_v40  ;;  %v6889_v40 = vld [vmem:[#allocation10 + $0xc90] sm:$0xff] }
 0xc91   : > { %7308 = vmatpush1.bf16.msra.mxu0 %v12753_v60  ;;  %7344 = vmatprep.subr.bf16.mxu1 %v12708_v22  ;;  %v12724_v4 = vcombine.high %v6889_v40, %v6897_v58  ;;  %v12726_v22 = vcombine.high %v6890_v48, %v6898_v56 }
 0xc92   : > { %7387 = vmatprep.subr.bf16.mxu0 %v12710_v27  ;;  %v6913_v27 = vld [vmem:[#allocation10 + $0xd50] sm:$0xff] }
 0xd0f   : > { %v1441_v20 = vpop.xlane.xlu0 %1440 }
 0xd10   : > { %v1445_v43 = vsub.f32 %v16465_v50, %v1441_v20  ;;  %v6906_v20 = vld [vmem:[#allocation10 + $0xd18] sm:$0xff] }
 0xd12   : > { %v1447_v35 = vmin.f32 %v1445_v43, 0.0  ;;  %v6914_v43 = vld [vmem:[#allocation10 + $0xd58] sm:$0xff] }
 0xd13   : > { %v1444_v5 = vpop.xlane.xlu1 %1443 }
 0xd14   : > { %v1449_v41 = vmul.f32 1.442695, %v1447_v35  ;;  %v1446_v24 = vsub.f32 %v16472_v18, %v1444_v5  ;;  %v12698_v18 = vld [vmem:[#allocation8 + $0x6] ss:$0 sm:$0xff]  ;;  %v12723_v35 = vcombine.low %v6889_v40, %v6897_v58  ;;  %v12725_v5 = vcombine.low %v6890_v48, %v6898_v56  ;;  %v6907_v58 = vld [vmem:[#allocation10 + $0xd20] sm:$0xff]  ;;  %v6908_v56 = vld [vmem:[#allocation10 + $0xd28] sm:$0xff] }
 0xd15   : > { %v6915_v48 = vld [vmem:[#allocation10 + $0xd60] sm:$0xff] }
 0xd16   : > { %14509 = vpow2.f32 %v1449_v41  ;;  %v1448_v49 = vmin.f32 %v1446_v24, 0.0  ;;  %v12740_v41 = vcombine.high %v6905_v10, %v6913_v27  ;;  %v12742_v24 = vcombine.high %v6906_v20, %v6914_v43 }
 0xd18   : > { %v1451_v15 = vmul.f32 1.442695, %v1448_v49  ;;  %v6921_v49 = vld [vmem:[#allocation10 + $0xd90] sm:$0xff] }
 0xd1a   : > { %14511 = vpow2.f32 %v1451_v15  ;;  %v6929_v15 = vld [vmem:[#allocation10 + $0xdd0] sm:$0xff] }
 0xd20   : > { %v14510_v8 = vpop.eup %14509 }
 0xd21   : > { %v16495_v13 = vmul.f32 %v14681_v36, %v14510_v8  ;;  %v6922_v8 = vld [vmem:[#allocation10 + $0xd98] sm:$0xff] }
 0xd22   : > { %v6930_v36 = vld [vmem:[#allocation10 + $0xdd8] sm:$0xff] }
 0xd23   : > { %v1455_v52 = vsel %vm1102_vm5, %v16495_v13, 0.0 }
 0xd24   : > { %v14512_v16 = vpop.eup %14511  ;;  %1456 = vadd.xlane.f32.xlu0 %v1455_v52  ;;  %v12739_v52 = vcombine.low %v6905_v10, %v6913_v27  ;;  %v6923_v27 = vld [vmem:[#allocation10 + $0xda0] sm:$0xff] }
 0xd25   : > { %v16500_v50 = vmul.f32 %v14682_v34, %v14512_v16  ;;  %v12741_v16 = vcombine.low %v6906_v20, %v6914_v43  ;;  %v6875_v34 = vld [vmem:[#allocation10 + $0xc20] sm:$0xff]  ;;  %v6924_v43 = vld [vmem:[#allocation10 + $0xda8] sm:$0xff] }
 0xd26   : > { %v6931_v20 = vld [vmem:[#allocation10 + $0xde0] sm:$0xff] }
 0xd27   : > { %v1458_v26 = vsel %vm1102_vm5, %v16500_v50, 0.0 }
 0xd28   : > { %1459 = vadd.xlane.f32.xlu0 %v1458_v26  ;;  %v6883_v26 = vld [vmem:[#allocation10 + $0xc60] sm:$0xff] }
 0xd3e   : > { %14185 = vrot.lane.b32.xlu0 %v14184_v59, %s17977_s4  ;;  %s18146_s4 = smov 64  }
 0xd57   : > { %v13390_v28 = vpop.f32.mrb[30].mxu0 }
 0xd58   : > { %v6854_v53 = vadd.f32 %v13390_v28, %v12698_v18  ;;  %v6848_v23 = vpop.f32.mrb[31].mxu0  ;;  %v6884_v28 = vld [vmem:[#allocation10 + $0xc68] sm:$0xff] }
 0xd59   : > { %v6849_v51 = vadd.f32 %v12698_v18, %v6848_v23  ;;  %v6876_v18 = vld [vmem:[#allocation10 + $0xc28] sm:$0xff]  ;;  %v12757_v23 = vcombine.low %v6922_v8, %v6930_v36 }
 0xd5a   : > { %v6860_v7 = vmin.f32 %v6854_v53, 0.0  ;;  %vm6858_vm10 = vcmp.gt.f32.partialorder %v6854_v53, 0.0 }
 0xd5b   : > { %v6859_v46 = vmin.f32 %v6849_v51, 0.0  ;;  %vm6857_vm12 = vcmp.gt.f32.partialorder %v6849_v51, 0.0 }
 0xd5c   : > { %v6863_v29 = vmul.f32 1.442695, %v6860_v7  ;;  %v12714_v7 = vcombine.high %v6876_v18, %v6884_v28 }
 0xd5d   : > { %v6861_v37 = vmul.f32 1.442695, %v6859_v46  ;;  %v6891_v46 = vld [vmem:[#allocation10 + $0xca0] sm:$0xff] }
 0xd5e   : > { %14513 = vpow2.f32 %v6863_v29  ;;  %v6899_v29 = vld [vmem:[#allocation10 + $0xce0] sm:$0xff] }
 0xd5f   : > { %14515 = vpow2.f32 %v6861_v37  ;;  %v6892_v37 = vld [vmem:[#allocation10 + $0xca8] sm:$0xff]  ;;  %v12728_v40 = vcombine.high %v6891_v46, %v6899_v29 }
 0xd68   : > { %v14514_v57 = vpop.eup %14513 }
 0xd69   : > { %v14516_v30 = vpop.eup %14515  ;;  %v12702_v54 = vadd.f32 -1.0, %v14514_v57  ;;  %v6900_v57 = vld [vmem:[#allocation10 + $0xce8] sm:$0xff] }
 0xd6a   : > { %v12701_v60 = vadd.f32 -1.0, %v14516_v30  ;;  %v12711_v30 = vcombine.low %v6875_v34, %v6883_v26 }
 0xd6b   : > { %v6868_v59 = vsel %vm6858_vm10, %v6854_v53, %v12702_v54  ;;  %v12755_v53 = vcombine.low %v6921_v49, %v6929_v15  ;;  %v12713_v54 = vcombine.low %v6876_v18, %v6884_v28  ;;  %v6901_v18 = vld [vmem:[#allocation10 + $0xcf0] sm:$0xff]  ;;  %v6894_v28 = vld [vmem:[#allocation10 + $0xcb8] sm:$0xff] }
 0xd6c   : > { %v6867_v14 = vsel %vm6857_vm12, %v6849_v51, %v12701_v60  ;;  %v12712_v51 = vcombine.high %v6875_v34, %v6883_v26  ;;  %v12730_v60 = vcombine.high %v6892_v37, %v6900_v57  ;;  %v6893_v26 = vld [vmem:[#allocation10 + $0xcb0] sm:$0xff] }
 0xd6d   : > { %v16508_v38 = vpack.c.bf16 %v6868_v59, %v6867_v14  ;;  %v6916_v59 = vld [vmem:[#allocation10 + $0xd68] sm:$0xff]  ;;  %v12727_v14 = vcombine.low %v6891_v46, %v6899_v29  ;;  %v6909_v29 = vld [vmem:[#allocation10 + $0xd30] sm:$0xff] }
 0xd6e   : > { %v12746_v10 = vcombine.high %v6908_v56, %v6916_v59 }
 0xd6f   : > { %12767 = vmatmul.mubr.msk.bf16.vlgmr.msra.gmra.mrb[8].mxu1 %vm1952_vm11, %v16508_v38  ;;  %12768 = vmatmul.mubr.msk.bf16.vlgmr.msra.gmra.mrb[24].mxu0 %vm1952_vm11, %v16508_v38 }
 0xd70   : > { %7345 = vmatpush1.bf16.msra.mxu1 %v12707_v11  ;;  %7388 = vmatpush1.bf16.msra.mxu0 %v12709_v55  ;;  %v12756_v11 = vcombine.high %v6921_v49, %v6929_v15  ;;  %v12758_v55 = vcombine.high %v6922_v8, %v6930_v36  ;;  %v6877_v15 = vld [vmem:[#allocation10 + $0xc30] sm:$0xff]  ;;  %v6878_v36 = vld [vmem:[#allocation10 + $0xc38] sm:$0xff] }
 0xd71   : > { %7346 = vmatprep.subr.bf16.mxu1 %v12724_v4  ;;  %7389 = vmatprep.subr.bf16.mxu0 %v12726_v22  ;;  %v12729_v4 = vcombine.low %v6892_v37, %v6900_v57  ;;  %v12744_v22 = vcombine.high %v6907_v58, %v6915_v48  ;;  %v6885_v8 = vld [vmem:[#allocation10 + $0xc70] sm:$0xff]  ;;  %v6910_v57 = vld [vmem:[#allocation10 + $0xd38] sm:$0xff] }
 0xd72   : > { %7376 = vmatprep.mubr.bf16.mxu1 %v17912_v0  ;;  %7419 = vmatprep.mubr.bf16.mxu0 %v17912_v0  ;;  %v6917_v37 = vld [vmem:[#allocation10 + $0xd70] sm:$0xff] }
 0xd74   : > { %7347 = vmatpush1.bf16.msra.mxu1 %v12723_v35  ;;  %7390 = vmatpush1.bf16.msra.mxu0 %v12725_v5  ;;  %v6932_v35 = vld [vmem:[#allocation10 + $0xde8] sm:$0xff]  ;;  %v12743_v5 = vcombine.low %v6907_v58, %v6915_v48  ;;  %v6925_v48 = vld [vmem:[#allocation10 + $0xdb0] sm:$0xff] }
 0xd75   : > { %7348 = vmatprep.subr.bf16.mxu1 %v12740_v41  ;;  %7391 = vmatprep.subr.bf16.mxu0 %v12742_v24  ;;  %v12745_v41 = vcombine.low %v6908_v56, %v6916_v59  ;;  %v12760_v24 = vcombine.high %v6923_v27, %v6931_v20  ;;  %v12762_v49 = vcombine.high %v6924_v43, %v6932_v35  ;;  %v6933_v56 = vld [vmem:[#allocation10 + $0xdf0] sm:$0xff]  ;;  %v6926_v59 = vld [vmem:[#allocation10 + $0xdb8] sm:$0xff] }
 0xd78   : > { %7349 = vmatpush1.bf16.msra.mxu1 %v12739_v52  ;;  %7392 = vmatpush1.bf16.msra.mxu0 %v12741_v16  ;;  %v6886_v52 = vld [vmem:[#allocation10 + $0xc78] sm:$0xff]  ;;  %v12759_v16 = vcombine.low %v6923_v27, %v6931_v20  ;;  %v12763_v20 = vcombine.low %v6925_v48, %v6933_v56 }
 0xd79   : > { %7350 = vmatprep.subr.bf16.mxu1 %v12756_v11  ;;  %7393 = vmatprep.subr.bf16.mxu0 %v12758_v55  ;;  %v12761_v11 = vcombine.low %v6924_v43, %v6932_v35  ;;  %v12716_v55 = vcombine.high %v6877_v15, %v6885_v8  ;;  %v12718_v34 = vcombine.high %v6878_v36, %v6886_v52 }
 0xd7c   : > { %7351 = vmatpush1.bf16.msra.mxu1 %v12755_v53  ;;  %7394 = vmatpush1.bf16.msra.mxu0 %v12757_v23  ;;  %v6902_v53 = vld [vmem:[#allocation10 + $0xcf8] sm:$0xff]  ;;  %v12715_v23 = vcombine.low %v6877_v15, %v6885_v8 }
 0xd7d   : > { %7430 = vmatprep.subr.bf16.mxu1 %v12712_v51  ;;  %7473 = vmatprep.subr.bf16.mxu0 %v12714_v7  ;;  %v12717_v51 = vcombine.low %v6878_v36, %v6886_v52  ;;  %v12732_v7 = vcombine.high %v6893_v26, %v6901_v18  ;;  %v12734_v46 = vcombine.high %v6894_v28, %v6902_v53 }
 0xd7f   : > { %12769 = vmatmul.mubr.msk.bf16.vlgmr.msra.gmra.mrb[16].mxu1 %vm1952_vm11, %v16508_v38  ;;  %12770 = vmatmul.mubr.msk.bf16.vlgmr.msra.gmra.mrb[12].mxu0 %vm1952_vm11, %v16508_v38 }
 0xd80   : > { %7431 = vmatpush1.bf16.msra.mxu1 %v12711_v30  ;;  %7474 = vmatpush1.bf16.msra.mxu0 %v12713_v54  ;;  %v6918_v30 = vld [vmem:[#allocation10 + $0xd78] sm:$0xff]  ;;  %v12731_v54 = vcombine.low %v6893_v26, %v6901_v18  ;;  %v7754_v26 = vld [vmem:[#allocation10 + $0xe48] sm:$0xff] }
 0xd81   : > { %7432 = vmatprep.subr.bf16.mxu1 %v12728_v40  ;;  %7475 = vmatprep.subr.bf16.mxu0 %v12730_v60  ;;  %v12733_v40 = vcombine.low %v6894_v28, %v6902_v53  ;;  %v12748_v60 = vcombine.high %v6909_v29, %v6917_v37  ;;  %v12750_v58 = vcombine.high %v6910_v57, %v6918_v30 }
 0xd82   : > { %7462 = vmatprep.mubr.bf16.mxu1 %v17912_v0  ;;  %7505 = vmatprep.mubr.bf16.mxu0 %v17912_v0 }
 0xd84   : > { %7433 = vmatpush1.bf16.msra.mxu1 %v12727_v14  ;;  %7476 = vmatpush1.bf16.msra.mxu0 %v12729_v4  ;;  %v6934_v14 = vld [vmem:[#allocation10 + $0xdf8] sm:$0xff]  ;;  %v12747_v4 = vcombine.low %v6909_v29, %v6917_v37 }
 0xd85   : > { %7434 = vmatprep.subr.bf16.mxu1 %v12744_v22  ;;  %7477 = vmatprep.subr.bf16.mxu0 %v12746_v10  ;;  %v12749_v22 = vcombine.low %v6910_v57, %v6918_v30  ;;  %v12764_v10 = vcombine.high %v6925_v48, %v6933_v56  ;;  %v12766_v27 = vcombine.high %v6926_v59, %v6934_v14  ;;  %v7777_v57 = vld [vmem:[#allocation10 + $0xf00] sm:$0xff] }
 0xd86   : > { %v12765_v43 = vcombine.low %v6926_v59, %v6934_v14  ;;  %v7785_v30 = vld [vmem:[#allocation10 + $0xf40] sm:$0xff] }
 0xd87   : > { %v7793_v59 = vld [vmem:[#allocation10 + $0xf80] sm:$0xff] }
 0xd88   : > { %7435 = vmatpush1.bf16.msra.mxu1 %v12743_v5  ;;  %7478 = vmatpush1.bf16.msra.mxu0 %v12745_v41  ;;  %v7801_v14 = vld [vmem:[#allocation10 + $0xfc0] sm:$0xff] }
 0xd89   : > { %7436 = vmatprep.subr.bf16.mxu1 %v12760_v24  ;;  %7479 = vmatprep.subr.bf16.mxu0 %v12762_v49 }
 0xd8c   : > { %7437 = vmatpush1.bf16.msra.mxu1 %v12759_v16  ;;  %7480 = vmatpush1.bf16.msra.mxu0 %v12761_v11  ;;  %v7745_v16 = vld [vmem:[#allocation10 + $0xe00] sm:$0xff] }
 0xd8d   : > { %7516 = vmatprep.subr.bf16.mxu1 %v12716_v55  ;;  %7559 = vmatprep.subr.bf16.mxu0 %v12718_v34  ;;  %v7753_v11 = vld [vmem:[#allocation10 + $0xe40] sm:$0xff]  ;;  %v7746_v55 = vld [vmem:[#allocation10 + $0xe08] sm:$0xff] }
 0xd8e   : > { %v12781_v34 = vcombine.high %v7745_v16, %v7753_v11  ;;  %v12780_v18 = vcombine.low %v7745_v16, %v7753_v11  ;;  %v12782_v28 = vcombine.low %v7746_v55, %v7754_v26  ;;  %v12783_v53 = vcombine.high %v7746_v55, %v7754_v26 }
 0xd8f   : > { %12771 = vmatmul.mubr.msk.bf16.vlgmr.msra.gmra.mrb[20].mxu1 %vm1952_vm11, %v16508_v38  ;;  %12772 = vmatmul.mubr.msk.bf16.vlgmr.msra.gmra.mrb[16].mxu0 %vm1952_vm11, %v16508_v38 }
 0xd90   : > { %7517 = vmatpush1.bf16.msra.mxu1 %v12715_v23  ;;  %7560 = vmatpush1.bf16.msra.mxu0 %v12717_v51  ;;  %v7769_v23 = vld [vmem:[#allocation10 + $0xec0] sm:$0xff]  ;;  %v7762_v51 = vld [vmem:[#allocation10 + $0xe88] sm:$0xff] }
 0xd91   : > { %7518 = vmatprep.subr.bf16.mxu1 %v12732_v7  ;;  %7561 = vmatprep.subr.bf16.mxu0 %v12734_v46  ;;  %v7770_v7 = vld [vmem:[#allocation10 + $0xec8] sm:$0xff] }
 0xd92   : > { %7548 = vmatprep.mubr.bf16.mxu1 %v17912_v0  ;;  %7591 = vmatprep.mubr.bf16.mxu0 %v17912_v0  ;;  %v12798_v29 = vcombine.low %v7762_v51, %v7770_v7  ;;  %v12799_v37 = vcombine.high %v7762_v51, %v7770_v7  ;;  %v7763_v51 = vld [vmem:[#allocation10 + $0xe90] sm:$0xff] }
 0xd93   : > { %v7771_v7 = vld [vmem:[#allocation10 + $0xed0] sm:$0xff] }
 0xd94   : > { %7519 = vmatpush1.bf16.msra.mxu1 %v12731_v54  ;;  %7562 = vmatpush1.bf16.msra.mxu0 %v12733_v40  ;;  %v7778_v54 = vld [vmem:[#allocation10 + $0xf08] sm:$0xff]  ;;  %v12813_v40 = vcombine.high %v7777_v57, %v7785_v30 }
 0xd95   : > { %7520 = vmatprep.subr.bf16.mxu1 %v12748_v60  ;;  %7563 = vmatprep.subr.bf16.mxu0 %v12750_v58  ;;  %v7786_v60 = vld [vmem:[#allocation10 + $0xf48] sm:$0xff]  ;;  %v12812_v58 = vcombine.low %v7777_v57, %v7785_v30 }
 0xd96   : > { %v12814_v48 = vcombine.low %v7778_v54, %v7786_v60  ;;  %v12815_v56 = vcombine.high %v7778_v54, %v7786_v60  ;;  %v12801_v54 = vcombine.high %v7763_v51, %v7771_v7  ;;  %v7779_v60 = vld [vmem:[#allocation10 + $0xf10] sm:$0xff] }
 0xd98   : > { %7521 = vmatpush1.bf16.msra.mxu1 %v12747_v4  ;;  %7564 = vmatpush1.bf16.msra.mxu0 %v12749_v22  ;;  %v7794_v4 = vld [vmem:[#allocation10 + $0xf88] sm:$0xff]  ;;  %v12829_v22 = vcombine.high %v7793_v59, %v7801_v14 }
 0xd99   : > { %7522 = vmatprep.subr.bf16.mxu1 %v12764_v10  ;;  %7565 = vmatprep.subr.bf16.mxu0 %v12766_v27  ;;  %v7802_v10 = vld [vmem:[#allocation10 + $0xfc8] sm:$0xff]  ;;  %v12828_v27 = vcombine.low %v7793_v59, %v7801_v14  ;;  %v12800_v59 = vcombine.low %v7763_v51, %v7771_v7  ;;  %v7781_v51 = vld [vmem:[#allocation10 + $0xf20] sm:$0xff] }
 0xd9a   : > { %v7782_v7 = vld [vmem:[#allocation10 + $0xf28] sm:$0xff] }
 0xd9c   : > { %7523 = vmatpush1.bf16.msra.mxu1 %v12763_v20  ;;  %7566 = vmatpush1.bf16.msra.mxu0 %v12765_v43  ;;  %v12830_v20 = vcombine.low %v7794_v4, %v7802_v10  ;;  %v12831_v43 = vcombine.high %v7794_v4, %v7802_v10  ;;  %v7795_v10 = vld [vmem:[#allocation10 + $0xf90] sm:$0xff] }
 0xd9d   : > { %8175 = vmatprep.subr.bf16.mxu0 %v12783_v53 }
 0xd9f   : > { %12773 = vmatmul.mubr.msk.bf16.vlgmr.msra.gmra.mrb[24].mxu1 %vm1952_vm11, %v16508_v38  ;;  %12774 = vmatmul.mubr.msk.bf16.vlgmr.msra.gmra.mrb[20].mxu0 %vm1952_vm11, %v16508_v38 }
 0xda0   : > { %8207 = vmatprep.mubr.bf16.mxu0 %v17912_v0  ;;  %8176 = vmatpush1.bf16.msra.mxu0 %v12782_v28 }
 0xda1   : > { %8177 = vmatprep.subr.bf16.mxu0 %v12799_v37 }
 0xda4   : > { %8178 = vmatpush1.bf16.msra.mxu0 %v12798_v29  ;;  %v7772_v29 = vld [vmem:[#allocation10 + $0xed8] sm:$0xff] }
 0xda5   : > { %8179 = vmatprep.subr.bf16.mxu0 %v12815_v56  ;;  %v7788_v56 = vld [vmem:[#allocation10 + $0xf58] sm:$0xff] }
 0xda8   : > { %8180 = vmatpush1.bf16.msra.mxu0 %v12814_v48  ;;  %v7780_v48 = vld [vmem:[#allocation10 + $0xf18] sm:$0xff] }
 0xda9   : > { %8181 = vmatprep.subr.bf16.mxu0 %v12831_v43  ;;  %v7804_v43 = vld [vmem:[#allocation10 + $0xfd8] sm:$0xff] }
 0xdac   : > { %8182 = vmatpush1.bf16.msra.mxu0 %v12830_v20  ;;  %v7796_v20 = vld [vmem:[#allocation10 + $0xf98] sm:$0xff] }
 0xdb1   : > { %v1457_v35 = vpop.xlane.xlu0 %1456 }
 0xdb2   : > { %14517 = vrcp.f32 %v1457_v35  ;;  %v7747_v35 = vld [vmem:[#allocation10 + $0xe10] sm:$0xff] }
 0xdb5   : > { %v1460_v5 = vpop.xlane.xlu0 %1459 }
 0xdb6   : > { %14519 = vrcp.f32 %v1460_v5  ;;  %v7755_v5 = vld [vmem:[#allocation10 + $0xe50] sm:$0xff] }
 0xdb9   : > { %v14186_v41 = vpop.permute.xlu0 %14185 }
 0xdba   : > { %v14188_v24 = vunpack.i.h.bf16 %v14186_v41  ;;  %v14187_v49 = vunpack.i.l.bf16 %v14186_v41  ;;  %v7748_v41 = vld [vmem:[#allocation10 + $0xe18] sm:$0xff] }
 0xdbc   : > { %v14518_v15 = vpop.eup %14517  ;;  %v13546_v8 = vpack.c.bf16 %v14188_v24, %v14187_v49  ;;  %v12784_v24 = vcombine.low %v7747_v35, %v7755_v5  ;;  %v12785_v49 = vcombine.high %v7747_v35, %v7755_v5  ;;  %v12818_v5 = vcombine.low %v7780_v48, %v7788_v56 }
 0xdbd   : > { %v1462_v36 = vmul.f32 %v14518_v15, %v16495_v13  ;;  %v7761_v13 = vld [vmem:[#allocation10 + $0xe80] sm:$0xff]  ;;  %v7756_v15 = vld [vmem:[#allocation10 + $0xe58] sm:$0xff] }
 0xdbe   : > { %13547 = vmatprep.subr.bf16.mxu1 %v13546_v8  ;;  %v12796_v46 = vcombine.low %v7761_v13, %v7769_v23 }
 0xdbf   : > { %13549 = vmatpush3.bf16.msra.mxu1 %v13546_v8  ;;  %13395 = vmatprep.mubr.msk.f32.mxu1 %vm1102_vm5, %v1462_v36  ;;  %v12786_v8 = vcombine.low %v7748_v41, %v7756_v15  ;;  %v12787_v36 = vcombine.high %v7748_v41, %v7756_v15  ;;  %v7757_v15 = vld [vmem:[#allocation10 + $0xe60] sm:$0xff] }
 0xdc0   : > { %v14520_v52 = vpop.eup %14519  ;;  %8132 = vmatprep.subr.bf16.mxu1 %v12781_v34 }
 0xdc1   : > { %v1464_v38 = vmul.f32 %v14520_v52, %v16500_v50  ;;  %v12797_v50 = vcombine.high %v7761_v13, %v7769_v23  ;;  %8261 = vmatprep.subr.bf16.mxu0 %v12787_v36  ;;  %v12775_v52 = vld [vmem:[#allocation8 + $0x7] ss:$0 sm:$0xff]  ;;  %v7758_v36 = vld [vmem:[#allocation10 + $0xe68] sm:$0xff] }
 0xdc3   : > { %13396 = vmatmul.mubr.msk.f32.vlgmr.msra.gmra.mrb[34].mxu1 %vm1102_vm5, %v1464_v38 }
 0xdc4   : > { %8164 = vmatprep.mubr.bf16.mxu1 %v17912_v0  ;;  %8133 = vmatpush1.bf16.msra.mxu1 %v12780_v18 }
 0xdc5   : > { %8134 = vmatprep.subr.bf16.mxu1 %v12797_v50 }
 0xdc8   : > { %8135 = vmatpush1.bf16.msra.mxu1 %v12796_v46  ;;  %v7764_v46 = vld [vmem:[#allocation10 + $0xe98] sm:$0xff] }
 0xdc9   : > { %8136 = vmatprep.subr.bf16.mxu1 %v12813_v40  ;;  %v12803_v40 = vcombine.high %v7764_v46, %v7772_v29  ;;  %v12802_v14 = vcombine.low %v7764_v46, %v7772_v29  ;;  %v7790_v46 = vld [vmem:[#allocation10 + $0xf68] sm:$0xff] }
 0xdcc   : > { %8137 = vmatpush1.bf16.msra.mxu1 %v12812_v58  ;;  %v7787_v58 = vld [vmem:[#allocation10 + $0xf50] sm:$0xff] }
 0xdcd   : > { %8138 = vmatprep.subr.bf16.mxu1 %v12829_v22  ;;  %v12817_v4 = vcombine.high %v7779_v60, %v7787_v58  ;;  %v12819_v22 = vcombine.high %v7780_v48, %v7788_v56  ;;  %v12816_v35 = vcombine.low %v7779_v60, %v7787_v58  ;;  %v7805_v60 = vld [vmem:[#allocation10 + $0xfe0] sm:$0xff]  ;;  %v7798_v58 = vld [vmem:[#allocation10 + $0xfa8] sm:$0xff] }
 0xdce   : > { %v7806_v48 = vld [vmem:[#allocation10 + $0xfe8] sm:$0xff] }
 0xdd0   : > { %8139 = vmatpush1.bf16.msra.mxu1 %v12828_v27  ;;  %v7803_v27 = vld [vmem:[#allocation10 + $0xfd0] sm:$0xff] }
 0xdd1   : > { %8218 = vmatprep.subr.bf16.mxu1 %v12785_v49  ;;  %v12833_v41 = vcombine.high %v7795_v10, %v7803_v27  ;;  %v7749_v49 = vld [vmem:[#allocation10 + $0xe20] sm:$0xff] }
 0xe96   : > { %v13397_v38 = vpop.f32.mrb[34].mxu1 }
 0xe97   : > { %v7728_v16 = vadd.f32 %v13397_v38, %v12775_v52  ;;  %v7722_v11 = vpop.f32.mrb[35].mxu1  ;;  %v12834_v38 = vcombine.low %v7796_v20, %v7804_v43 }
 0xe98   : > { %v7723_v55 = vadd.f32 %v12775_v52, %v7722_v11  ;;  %v12832_v52 = vcombine.low %v7795_v10, %v7803_v27  ;;  %v7759_v10 = vld [vmem:[#allocation10 + $0xe70] sm:$0xff]  ;;  %v7752_v27 = vld [vmem:[#allocation10 + $0xe38] sm:$0xff] }
 0xe99   : > { %v7734_v34 = vmin.f32 %v7728_v16, 0.0  ;;  %vm7732_vm13 = vcmp.gt.f32.partialorder %v7728_v16, 0.0 }
 0xe9a   : > { %v7733_v26 = vmin.f32 %v7723_v55, 0.0  ;;  %vm7731_vm14 = vcmp.gt.f32.partialorder %v7723_v55, 0.0 }
 0xe9b   : > { %v7737_v18 = vmul.f32 1.442695, %v7734_v34  ;;  %v7773_v34 = vld [vmem:[#allocation10 + $0xee0] sm:$0xff] }
 0xe9c   : > { %v7735_v28 = vmul.f32 1.442695, %v7733_v26  ;;  %v7766_v26 = vld [vmem:[#allocation10 + $0xea8] sm:$0xff] }
 0xe9d   : > { %14521 = vpow2.f32 %v7737_v18  ;;  %v7774_v18 = vld [vmem:[#allocation10 + $0xee8] sm:$0xff] }
 0xe9e   : > { %14523 = vpow2.f32 %v7735_v28  ;;  %v12788_v28 = vcombine.low %v7749_v49, %v7757_v15 }
 0xea7   : > { %v14522_v53 = vpop.eup %14521 }
 0xea8   : > { %v14524_v13 = vpop.eup %14523  ;;  %v12779_v23 = vadd.f32 -1.0, %v14522_v53 }
 0xea9   : > { %v12778_v50 = vadd.f32 -1.0, %v14524_v13 }
 0xeaa   : > { %v7742_v37 = vsel %vm7732_vm13, %v7728_v16, %v12779_v23  ;;  %v12789_v16 = vcombine.high %v7749_v49, %v7757_v15  ;;  %v12807_v23 = vcombine.high %v7766_v26, %v7774_v18  ;;  %v7775_v49 = vld [vmem:[#allocation10 + $0xef0] sm:$0xff]  ;;  %v7768_v15 = vld [vmem:[#allocation10 + $0xeb8] sm:$0xff] }
 0xeab   : > { %v7741_v57 = vsel %vm7731_vm14, %v7723_v55, %v12778_v50  ;;  %v7765_v55 = vld [vmem:[#allocation10 + $0xea0] sm:$0xff] }
 0xeac   : > { %v16538_v30 = vpack.c.bf16 %v7742_v37, %v7741_v57  ;;  %v12805_v13 = vcombine.high %v7765_v55, %v7773_v34  ;;  %v7789_v50 = vld [vmem:[#allocation10 + $0xf60] sm:$0xff]  ;;  %v12804_v29 = vcombine.low %v7765_v55, %v7773_v34  ;;  %v12806_v37 = vcombine.low %v7766_v26, %v7774_v18  ;;  %v7791_v55 = vld [vmem:[#allocation10 + $0xf70] sm:$0xff]  ;;  %v7784_v34 = vld [vmem:[#allocation10 + $0xf38] sm:$0xff] }
 0xead   : > { %v12821_v57 = vcombine.high %v7781_v51, %v7789_v50  ;;  %v12820_v56 = vcombine.low %v7781_v51, %v7789_v50  ;;  %v7792_v26 = vld [vmem:[#allocation10 + $0xf78] sm:$0xff]  ;;  %v7807_v51 = vld [vmem:[#allocation10 + $0xff0] sm:$0xff] }
 0xeae   : > { %12844 = vmatmul.mubr.msk.bf16.vlgmr.msra.gmra.mrb[8].mxu1 %vm1952_vm11, %v16538_v30  ;;  %12845 = vmatmul.mubr.msk.bf16.vlgmr.msra.gmra.mrb[24].mxu0 %vm1952_vm11, %v16538_v30  ;;  %v7800_v50 = vld [vmem:[#allocation10 + $0xfb8] sm:$0xff] }
 0xeaf   : > { %8219 = vmatpush1.bf16.msra.mxu1 %v12784_v24  ;;  %8262 = vmatpush1.bf16.msra.mxu0 %v12786_v8  ;;  %v12835_v24 = vcombine.high %v7796_v20, %v7804_v43  ;;  %v7750_v8 = vld [vmem:[#allocation10 + $0xe28] sm:$0xff]  ;;  %v7760_v20 = vld [vmem:[#allocation10 + $0xe78] sm:$0xff] }
 0xeb0   : > { %8220 = vmatprep.subr.bf16.mxu1 %v12801_v54  ;;  %8263 = vmatprep.subr.bf16.mxu0 %v12803_v40  ;;  %v12791_v11 = vcombine.high %v7750_v8, %v7758_v36  ;;  %v12790_v53 = vcombine.low %v7750_v8, %v7758_v36  ;;  %v12823_v54 = vcombine.high %v7782_v7, %v7790_v46  ;;  %v7797_v40 = vld [vmem:[#allocation10 + $0xfa0] sm:$0xff]  ;;  %v7776_v8 = vld [vmem:[#allocation10 + $0xef8] sm:$0xff] }
 0xeb1   : > { %8250 = vmatprep.mubr.bf16.mxu1 %v17912_v0  ;;  %8293 = vmatprep.mubr.bf16.mxu0 %v17912_v0  ;;  %v12836_v43 = vcombine.low %v7797_v40, %v7805_v60 }
 0xeb3   : > { %8221 = vmatpush1.bf16.msra.mxu1 %v12800_v59  ;;  %8264 = vmatpush1.bf16.msra.mxu0 %v12802_v14  ;;  %v12822_v59 = vcombine.low %v7782_v7, %v7790_v46  ;;  %v12837_v14 = vcombine.high %v7797_v40, %v7805_v60  ;;  %v7808_v7 = vld [vmem:[#allocation10 + $0xff8] sm:$0xff] }
 0xeb4   : > { %8222 = vmatprep.subr.bf16.mxu1 %v12817_v4  ;;  %8265 = vmatprep.subr.bf16.mxu0 %v12819_v22  ;;  %v12839_v4 = vcombine.high %v7798_v58, %v7806_v48  ;;  %v7751_v22 = vld [vmem:[#allocation10 + $0xe30] sm:$0xff]  ;;  %v12842_v40 = vcombine.low %v7800_v50, %v7808_v7  ;;  %v8580_v60 = vld [vmem:[%s18038_s29 + $0x80] sm:$0xff] }
 0xeb5   : > { %v12792_v36 = vcombine.low %v7751_v22, %v7759_v10 }
 0xeb7   : > { %8223 = vmatpush1.bf16.msra.mxu1 %v12816_v35  ;;  %8266 = vmatpush1.bf16.msra.mxu0 %v12818_v5  ;;  %v12838_v35 = vcombine.low %v7798_v58, %v7806_v48  ;;  %v12793_v5 = vcombine.high %v7751_v22, %v7759_v10  ;;  %v8581_v58 = vld [vmem:[%s18038_s29 + $0x88] sm:$0xff]  ;;  %v8612_v48 = vld [vmem:[%s18038_s29 + $0x180] sm:$0xff] }
 0xeb8   : > { %8224 = vmatprep.subr.bf16.mxu1 %v12833_v41  ;;  %8267 = vmatprep.subr.bf16.mxu0 %v12835_v24  ;;  %v12795_v41 = vcombine.high %v7752_v27, %v7760_v20  ;;  %v7767_v24 = vld [vmem:[#allocation10 + $0xeb0] sm:$0xff]  ;;  %v8596_v10 = vld [vmem:[%s18038_s29 + $0x100] sm:$0xff] }
 0xeb9   : > { %v12808_v18 = vcombine.low %v7767_v24, %v7775_v49 }
 0xebb   : > { %8225 = vmatpush1.bf16.msra.mxu1 %v12832_v52  ;;  %8268 = vmatpush1.bf16.msra.mxu0 %v12834_v38  ;;  %v12794_v52 = vcombine.low %v7752_v27, %v7760_v20  ;;  %v12809_v38 = vcombine.high %v7767_v24, %v7775_v49  ;;  %v8597_v27 = vld [vmem:[%s18038_s29 + $0x108] sm:$0xff]  ;;  %v8582_v20 = vld [vmem:[%s18038_s29 + $0x90] sm:$0xff] }
 0xebc   : > { %8304 = vmatprep.subr.bf16.mxu1 %v12789_v16  ;;  %8347 = vmatprep.subr.bf16.mxu0 %v12791_v11  ;;  %v12811_v16 = vcombine.high %v7768_v15, %v7776_v8  ;;  %v7783_v11 = vld [vmem:[#allocation10 + $0xf30] sm:$0xff] }
 0xebd   : > { %v12824_v46 = vcombine.low %v7783_v11, %v7791_v55 }
 0xebe   : > { %12846 = vmatmul.mubr.msk.bf16.vlgmr.msra.gmra.mrb[16].mxu1 %vm1952_vm11, %v16538_v30  ;;  %12847 = vmatmul.mubr.msk.bf16.vlgmr.msra.gmra.mrb[12].mxu0 %vm1952_vm11, %v16538_v30 }
 0xebf   : > { %8305 = vmatpush1.bf16.msra.mxu1 %v12788_v28  ;;  %8348 = vmatpush1.bf16.msra.mxu0 %v12790_v53  ;;  %v12810_v28 = vcombine.low %v7768_v15, %v7776_v8  ;;  %v12825_v53 = vcombine.high %v7783_v11, %v7791_v55  ;;  %v8566_v15 = vld [vmem:[%s18038_s29 + $0x10] sm:$0xff]  ;;  %v8567_v8 = vld [vmem:[%s18038_s29 + $0x18] sm:$0xff]  ;;  %v8584_v11 = vld [vmem:[%s18038_s29 + $0xa0] sm:$0xff] }
 0xec0   : > { %8306 = vmatprep.subr.bf16.mxu1 %v12805_v13  ;;  %8349 = vmatprep.subr.bf16.mxu0 %v12807_v23  ;;  %v12827_v13 = vcombine.high %v7784_v34, %v7792_v26  ;;  %v7799_v23 = vld [vmem:[#allocation10 + $0xfb0] sm:$0xff]  ;;  %v8585_v55 = vld [vmem:[%s18038_s29 + $0xa8] sm:$0xff] }
 0xec1   : > { %8336 = vmatprep.mubr.bf16.mxu1 %v17912_v0  ;;  %8379 = vmatprep.mubr.bf16.mxu0 %v17912_v0 }
 0xec3   : > { %8307 = vmatpush1.bf16.msra.mxu1 %v12804_v29  ;;  %8350 = vmatpush1.bf16.msra.mxu0 %v12806_v37  ;;  %v12826_v29 = vcombine.low %v7784_v34, %v7792_v26  ;;  %v12841_v37 = vcombine.high %v7799_v23, %v7807_v51  ;;  %v8616_v34 = vld [vmem:[%s18038_s29 + $0x1a0] sm:$0xff]  ;;  %v13558_v26 = vpack.c.bf16 %v8585_v55, %v8584_v11  ;;  %v8574_v11 = vld [vmem:[%s18038_s29 + $0x50] sm:$0xff]  ;;  %v8575_v55 = vld [vmem:[%s18038_s29 + $0x58] sm:$0xff] }
 0xec4   : > { %8308 = vmatprep.subr.bf16.mxu1 %v12821_v57  ;;  %8351 = vmatprep.subr.bf16.mxu0 %v12823_v54  ;;  %v12843_v57 = vcombine.high %v7800_v50, %v7808_v7  ;;  %v12840_v54 = vcombine.low %v7799_v23, %v7807_v51  ;;  %v8600_v51 = vld [vmem:[%s18038_s29 + $0x120] sm:$0xff]  ;;  %v8601_v50 = vld [vmem:[%s18038_s29 + $0x128] sm:$0xff] }
 0xec5   : > { %v13592_v7 = vpack.c.bf16 %v8601_v50, %v8600_v51  ;;  %v8625_v50 = vld [vmem:[%s18038_s29 + $0x1e8] sm:$0xff] }
 0xec7   : > { %8309 = vmatpush1.bf16.msra.mxu1 %v12820_v56  ;;  %8352 = vmatpush1.bf16.msra.mxu0 %v12822_v59  ;;  %v13550_v56 = vpack.c.bf16 %v8581_v58, %v8580_v60  ;;  %v8613_v59 = vld [vmem:[%s18038_s29 + $0x188] sm:$0xff]  ;;  %v8571_v60 = vld [vmem:[%s18038_s29 + $0x38] sm:$0xff] }
 0xec8   : > { %8310 = vmatprep.subr.bf16.mxu1 %v12837_v14  ;;  %8353 = vmatprep.subr.bf16.mxu0 %v12839_v4  ;;  %v8565_v14 = vld [vmem:[%s18038_s29 + $0x8] sm:$0xff]  ;;  %v13582_v4 = vpack.c.bf16 %v8613_v59, %v8612_v48  ;;  %v8603_v59 = vld [vmem:[%s18038_s29 + $0x138] sm:$0xff] }
 0xecb   : > { %8311 = vmatpush1.bf16.msra.mxu1 %v12836_v43  ;;  %8354 = vmatpush1.bf16.msra.mxu0 %v12838_v35  ;;  %v13584_v43 = vpack.c.bf16 %v8597_v27, %v8596_v10  ;;  %v8583_v35 = vld [vmem:[%s18038_s29 + $0x98] sm:$0xff]  ;;  %v8621_v27 = vld [vmem:[%s18038_s29 + $0x1c8] sm:$0xff] }
 0xecc   : > { %8390 = vmatprep.subr.bf16.mxu1 %v12793_v5  ;;  %8433 = vmatprep.subr.bf16.mxu0 %v12795_v41  ;;  %v8614_v5 = vld [vmem:[%s18038_s29 + $0x190] sm:$0xff]  ;;  %v8615_v41 = vld [vmem:[%s18038_s29 + $0x198] sm:$0xff]  ;;  %v13554_v24 = vpack.c.bf16 %v8583_v35, %v8582_v20  ;;  %v8572_v20 = vld [vmem:[%s18038_s29 + $0x40] sm:$0xff] }
 0xecd   : > { %v13586_v49 = vpack.c.bf16 %v8615_v41, %v8614_v5  ;;  %v8604_v41 = vld [vmem:[%s18038_s29 + $0x140] sm:$0xff] }
 0xece   : > { %12848 = vmatmul.mubr.msk.bf16.vlgmr.msra.gmra.mrb[20].mxu1 %vm1952_vm11, %v16538_v30  ;;  %12849 = vmatmul.mubr.msk.bf16.vlgmr.msra.gmra.mrb[16].mxu0 %vm1952_vm11, %v16538_v30 }
 0xecf   : > { %8391 = vmatpush1.bf16.msra.mxu1 %v12792_v36  ;;  %8434 = vmatpush1.bf16.msra.mxu0 %v12794_v52  ;;  %v8598_v36 = vld [vmem:[%s18038_s29 + $0x110] sm:$0xff]  ;;  %v13556_v52 = vpack.c.bf16 %v8567_v8, %v8566_v15  ;;  %v8591_v8 = vld [vmem:[%s18038_s29 + $0xd8] sm:$0xff] }
 0xed0   : > { %8392 = vmatprep.subr.bf16.mxu1 %v12809_v38  ;;  %8435 = vmatprep.subr.bf16.mxu0 %v12811_v16  ;;  %v8599_v38 = vld [vmem:[%s18038_s29 + $0x118] sm:$0xff] }
 0xed1   : > { %8422 = vmatprep.mubr.bf16.mxu1 %v17912_v0  ;;  %8465 = vmatprep.mubr.bf16.mxu0 %v17912_v0  ;;  %v13588_v16 = vpack.c.bf16 %v8599_v38, %v8598_v36  ;;  %v8622_v36 = vld [vmem:[%s18038_s29 + $0x1d0] sm:$0xff] }
 0xed3   : > { %8393 = vmatpush1.bf16.msra.mxu1 %v12808_v18  ;;  %8436 = vmatpush1.bf16.msra.mxu0 %v12810_v28  ;;  %v8617_v18 = vld [vmem:[%s18038_s29 + $0x1a8] sm:$0xff]  ;;  %v8568_v28 = vld [vmem:[%s18038_s29 + $0x20] sm:$0xff] }
 0xed4   : > { %8394 = vmatprep.subr.bf16.mxu1 %v12825_v53  ;;  %8437 = vmatprep.subr.bf16.mxu0 %v12827_v13  ;;  %v8569_v53 = vld [vmem:[%s18038_s29 + $0x28] sm:$0xff]  ;;  %v13590_v13 = vpack.c.bf16 %v8617_v18, %v8616_v34  ;;  %v8606_v34 = vld [vmem:[%s18038_s29 + $0x150] sm:$0xff]  ;;  %v8607_v18 = vld [vmem:[%s18038_s29 + $0x158] sm:$0xff] }
 0xed5   : > { %v13560_v23 = vpack.c.bf16 %v8569_v53, %v8568_v28  ;;  %v13604_v28 = vpack.c.bf16 %v8607_v18, %v8606_v34  ;;  %v8592_v53 = vld [vmem:[%s18038_s29 + $0xe0] sm:$0xff] }
 0xed7   : > { %8395 = vmatpush1.bf16.msra.mxu1 %v12824_v46  ;;  %8438 = vmatpush1.bf16.msra.mxu0 %v12826_v29  ;;  %v8586_v46 = vld [vmem:[%s18038_s29 + $0xb0] sm:$0xff]  ;;  %v8587_v29 = vld [vmem:[%s18038_s29 + $0xb8] sm:$0xff] }
 0xed8   : > { %8396 = vmatprep.subr.bf16.mxu1 %v12841_v37  ;;  %8439 = vmatprep.subr.bf16.mxu0 %v12843_v57  ;;  %v8618_v37 = vld [vmem:[%s18038_s29 + $0x1b0] sm:$0xff]  ;;  %v13562_v57 = vpack.c.bf16 %v8587_v29, %v8586_v46  ;;  %v8577_v46 = vld [vmem:[%s18038_s29 + $0x68] sm:$0xff] }
 0xedb   : > { %8397 = vmatpush1.bf16.msra.mxu1 %v12840_v54  ;;  %8440 = vmatpush1.bf16.msra.mxu0 %v12842_v40  ;;  %v8619_v54 = vld [vmem:[%s18038_s29 + $0x1b8] sm:$0xff]  ;;  %v8570_v40 = vld [vmem:[%s18038_s29 + $0x30] sm:$0xff] }
 0xedc   : > { %13551 = vmatprep.subr.bf16.mxu0 %v13550_v56  ;;  %13583 = vmatprep.subr.bf16.mxu1 %v13582_v4  ;;  %v13594_v58 = vpack.c.bf16 %v8619_v54, %v8618_v37  ;;  %v13564_v48 = vpack.c.bf16 %v8571_v60, %v8570_v40  ;;  %v8602_v56 = vld [vmem:[%s18038_s29 + $0x130] sm:$0xff]  ;;  %v8589_v4 = vld [vmem:[%s18038_s29 + $0xc8] sm:$0xff] }
 0xedd   : > { %v8609_v54 = vld [vmem:[%s18038_s29 + $0x168] sm:$0xff]  ;;  %v8594_v60 = vld [vmem:[%s18038_s29 + $0xf0] sm:$0xff] }
 0xede   : > { %12850 = vmatmul.mubr.msk.bf16.vlgmr.msra.gmra.mrb[24].mxu1 %vm1952_vm11, %v16538_v30  ;;  %12851 = vmatmul.mubr.msk.bf16.vlgmr.msra.gmra.mrb[20].mxu0 %vm1952_vm11, %v16538_v30  ;;  %v8564_v30 = vld [vmem:[%s18038_s29] sm:$0xff] }
 0xedf   : > { %v13552_v22 = vpack.c.bf16 %v8565_v14, %v8564_v30  ;;  %13585 = vmatpush3.bf16.msra.mxu1 %v13584_v43  ;;  %v13596_v30 = vpack.c.bf16 %v8603_v59, %v8602_v56  ;;  %v8588_v14 = vld [vmem:[%s18038_s29 + $0xc0] sm:$0xff]  ;;  %v8573_v43 = vld [vmem:[%s18038_s29 + $0x48] sm:$0xff]  ;;  %v8627_v59 = vld [vmem:[%s18038_s29 + $0x1f8] sm:$0xff] }
 0xee0   : > { %13587 = vmatprep.subr.bf16.mxu1 %v13586_v49  ;;  %v13566_v10 = vpack.c.bf16 %v8589_v4, %v8588_v14  ;;  %v13568_v5 = vpack.c.bf16 %v8573_v43, %v8572_v20  ;;  %v8590_v49 = vld [vmem:[%s18038_s29 + $0xd0] sm:$0xff]  ;;  %v8579_v14 = vld [vmem:[%s18038_s29 + $0x78] sm:$0xff]  ;;  %v1465_v43 = vld [vmem:[#allocation11] sm:$0xff] }
 0xee1   : > { %13553 = vmatpush3.bf16.msra.mxu0 %v13552_v22  ;;  %v8620_v22 = vld [vmem:[%s18038_s29 + $0x1c0] sm:$0xff]  ;;  %v13570_v38 = vpack.c.bf16 %v8591_v8, %v8590_v49 }
 0xee2   : > { %13555 = vmatprep.subr.bf16.mxu0 %v13554_v24  ;;  %v13598_v35 = vpack.c.bf16 %v8621_v27, %v8620_v22  ;;  %v8605_v24 = vld [vmem:[%s18038_s29 + $0x148] sm:$0xff]  ;;  %v8611_v27 = vld [vmem:[%s18038_s29 + $0x178] sm:$0xff] }
 0xee3   : > { %13589 = vmatpush3.bf16.msra.mxu1 %v13588_v16  ;;  %v13600_v15 = vpack.c.bf16 %v8605_v24, %v8604_v41 }
 0xee4   : > { %13591 = vmatprep.subr.bf16.mxu1 %v13590_v13  ;;  %v8593_v13 = vld [vmem:[%s18038_s29 + $0xe8] sm:$0xff] }
 0xee5   : > { %13557 = vmatpush3.bf16.msra.mxu0 %v13556_v52  ;;  %v8623_v52 = vld [vmem:[%s18038_s29 + $0x1d8] sm:$0xff]  ;;  %v13574_v51 = vpack.c.bf16 %v8593_v13, %v8592_v53 }
 0xee6   : > { %13559 = vmatprep.subr.bf16.mxu0 %v13558_v26  ;;  %v13602_v16 = vpack.c.bf16 %v8623_v52, %v8622_v36  ;;  %v13572_v26 = vpack.c.bf16 %v8575_v55, %v8574_v11 }
 0xee7   : > { %13593 = vmatpush3.bf16.msra.mxu1 %v13592_v7  ;;  %v8576_v7 = vld [vmem:[%s18038_s29 + $0x60] sm:$0xff] }
 0xee8   : > { %13595 = vmatprep.subr.bf16.mxu1 %v13594_v58  ;;  %v13576_v37 = vpack.c.bf16 %v8577_v46, %v8576_v7  ;;  %v8595_v58 = vld [vmem:[%s18038_s29 + $0xf8] sm:$0xff]  ;;  %v2309_v46 = vrot.slane %v1465_v43, %v15953_v63 }
 0xee9   : > { %13561 = vmatpush3.bf16.msra.mxu0 %v13560_v23  ;;  %v8624_v23 = vld [vmem:[%s18038_s29 + $0x1e0] sm:$0xff]  ;;  %v13578_v56 = vpack.c.bf16 %v8595_v58, %v8594_v60  ;;  %v2329_v60 = vrot.slane %v1465_v43, %v16359_v2 }
 0xeea   : > { %13563 = vmatprep.subr.bf16.mxu0 %v13562_v57  ;;  %v13606_v29 = vpack.c.bf16 %v8625_v50, %v8624_v23  ;;  %v8608_v57 = vld [vmem:[%s18038_s29 + $0x160] sm:$0xff] }
 0xeeb   : > { %13597 = vmatpush3.bf16.msra.mxu1 %v13596_v30  ;;  %v13608_v40 = vpack.c.bf16 %v8609_v54, %v8608_v57  ;;  %v8578_v30 = vld [vmem:[%s18038_s29 + $0x70] sm:$0xff] }
 0xeec   : > { %13599 = vmatprep.subr.bf16.mxu1 %v13598_v35  ;;  %v13580_v22 = vpack.c.bf16 %v8579_v14, %v8578_v30  ;;  %v2313_v35 = vrot.slane %v1465_v43, %v16007_v25  ;;  %v2333_v30 = vrot.slane %v1465_v43, %v16461_v47 }
 0xeed   : > { %13565 = vmatpush3.bf16.msra.mxu0 %v13564_v48  ;;  %v8626_v48 = vld [vmem:[%s18038_s29 + $0x1f0] sm:$0xff] }
 0xeee   : > { %13567 = vmatprep.subr.bf16.mxu0 %v13566_v10  ;;  %v13610_v4 = vpack.c.bf16 %v8627_v59, %v8626_v48  ;;  %v8610_v10 = vld [vmem:[%s18038_s29 + $0x170] sm:$0xff]  ;;  %v2384_v41 = vadd.f32 %v2313_v35, %v16070_v42  ;;  %v2400_v8 = vadd.f32 %v2313_v35, %v16074_v6  ;;  %v2325_v59 = vrot.slane %v1465_v43, %v16265_v45 }
 0xeef   : > { %13601 = vmatpush3.bf16.msra.mxu1 %v13600_v15  ;;  %v13612_v20 = vpack.c.bf16 %v8611_v27, %v8610_v10 }
 0xef0   : > { %13603 = vmatprep.subr.bf16.mxu1 %v13602_v16 }
 0xef1   : > { %13569 = vmatpush3.bf16.msra.mxu0 %v13568_v5  ;;  %v2317_v5 = vrot.slane %v1465_v43, %v16118_v39 }
 0xef2   : > { %13571 = vmatprep.subr.bf16.mxu0 %v13570_v38 }
 0xef3   : > { %13605 = vmatpush3.bf16.msra.mxu1 %v13604_v28  ;;  %v2385_v24 = vadd.f32 %v2317_v5, %v16072_v44  ;;  %v2401_v16 = vadd.f32 %v2317_v5, %v16076_v61  ;;  %v2305_v61 = vrot.slane %v1465_v43, %v15924_v17 }
 0xef4   : > { %13607 = vmatprep.subr.bf16.mxu1 %v13606_v29  ;;  %v1466_v29 = vld [vmem:[#allocation11 + $0x8] sm:$0xff] }
 0xef5   : > { %13573 = vmatpush3.bf16.msra.mxu0 %v13572_v26  ;;  %v2345_v10 = vrot.slane %v1466_v29, %v16007_v25  ;;  %v2341_v27 = vrot.slane %v1466_v29, %v15953_v63 }
 0xef6   : > { %13575 = vmatprep.subr.bf16.mxu0 %v13574_v51 }
 0xef7   : > { %13609 = vmatpush3.bf16.msra.mxu1 %v13608_v40  ;;  %v2321_v40 = vrot.slane %v1465_v43, %v16180_v32  ;;  %v16789_v43 = vrot.slane %v1466_v29, %v16265_v45 }
 0xef8   : > { %13611 = vmatprep.subr.bf16.mxu1 %v13610_v4 }
 0xef9   : > { %13577 = vmatpush3.bf16.msra.mxu0 %v13576_v37 }
 0xefa   : > { %13579 = vmatprep.subr.bf16.mxu0 %v13578_v56 }
 0xefb   : > { %13613 = vmatpush3.bf16.msra.mxu1 %v13612_v20  ;;  %v2349_v20 = vrot.slane %v1466_v29, %v16118_v39 }
 0xefd   : > { %13581 = vmatpush3.bf16.msra.mxu0 %v13580_v22  ;;  %v2337_v22 = vrot.slane %v1466_v29, %v15924_v17 }
 0xf81   : > { %v8166_v49 = vpop.f32.mrb[8].mxu1  ;;  %v8209_v15 = vpop.f32.mrb[24].mxu0 }
 0xf82   : > { %v16759_v36 = vadd.f32 %v8209_v15, %v2384_v41  ;;  %v8168_v52 = vpop.f32.mrb[9].mxu1  ;;  %v8211_v38 = vpop.f32.mrb[25].mxu0  ;;  %v16770_v54 = vadd.f32 %v8166_v49, %v2305_v61  ;;  %v16783_v41 = vrot.slane %v1466_v29, %v16180_v32  ;;  %v16792_v49 = vrot.slane %v1466_v29, %v16461_v47 }
 0xf83   : > { %v16762_v11 = vadd.f32 %v8211_v38, %v2385_v24  ;;  %v8170_v55 = vpop.f32.mrb[10].mxu1  ;;  %v8213_v34 = vpop.f32.mrb[26].mxu0  ;;  %v16774_v56 = vadd.f32 %v8168_v52, %v2309_v46  ;;  %v16786_v24 = vrot.slane %v1466_v29, %v16359_v2 }
 0xf84   : > { %18039 = vst [vmem:[#allocation43_spill] sm:$0xff] %v16759_v36  ;;  %v16764_v26 = vadd.f32 %v8213_v34, %v2400_v8  ;;  %v8172_v18 = vpop.f32.mrb[11].mxu1  ;;  %v8215_v42 = vpop.f32.mrb[27].mxu0  ;;  %v17915_v15 = vmax.f32 %v16770_v54, 0.0  ;;  %v16795_v8 = vadd.f32 %v8170_v55, %v2305_v61 }
 0xf85   : > { %v16766_v28 = vadd.f32 %v8215_v42, %v2401_v16  ;;  %v17917_v16 = vmax.f32 %v16759_v36, 0.0  ;;  %v17931_v34 = vmax.f32 %v16774_v56, 0.0 }
 0xf86   : > { %18040 = vst [vmem:[#allocation44_spill] sm:$0xff] %v16764_v26  ;;  %18042 = vst [vmem:[#allocation46_spill] sm:$0xff] %v16795_v8 }
 0xf87   : > { %18041 = vst [vmem:[#allocation45_spill] sm:$0xff] %v16766_v28 }
 0xf91   : > { %v8252_v44 = vpop.f32.mrb[16].mxu1  ;;  %v8295_v53 = vpop.f32.mrb[12].mxu0 }
 0xf92   : > { %v8254_v13 = vpop.f32.mrb[17].mxu1  ;;  %v8297_v6 = vpop.f32.mrb[13].mxu0  ;;  %v16797_v52 = vadd.f32 %v8252_v44, %v2321_v40  ;;  %v16799_v38 = vadd.f32 %v8295_v53, %v2329_v60  ;;  %v17921_v44 = vmax.f32 %v16762_v11, 0.0  ;;  %v16816_v53 = vadd.f32 %v8172_v18, %v2309_v46 }
 0xf93   : > { %v8256_v23 = vpop.f32.mrb[18].mxu1  ;;  %v8299_v51 = vpop.f32.mrb[14].mxu0  ;;  %v16803_v42 = vadd.f32 %v8254_v13, %v2325_v59  ;;  %v16805_v9 = vadd.f32 %v8297_v6, %v2333_v30  ;;  %v17919_v13 = vmax.f32 %v16795_v8, 0.0  ;;  %v17923_v6 = vmax.f32 %v16764_v26, 0.0 }
 0xf94   : > { %v8258_v50 = vpop.f32.mrb[19].mxu1  ;;  %v8301_v7 = vpop.f32.mrb[15].mxu0  ;;  %18043 = vst [vmem:[#allocation47_spill] sm:$0xff] %v16799_v38  ;;  %v16807_v1 = vadd.f32 %v8256_v23, %v2321_v40  ;;  %v16809_v29 = vadd.f32 %v8299_v51, %v2329_v60  ;;  %18049 = vst [vmem:[#allocation53_spill] sm:$0xff] %v16816_v53  ;;  %v17914_v23 = vmax.f32 %v16797_v52, 0.0  ;;  %v17916_v51 = vmax.f32 %v16799_v38, 0.0 }
 0xf95   : > { %18044 = vst [vmem:[#allocation48_spill] sm:$0xff] %v16805_v9  ;;  %v16811_v3 = vadd.f32 %v8258_v50, %v2325_v59  ;;  %v16813_v55 = vadd.f32 %v8301_v7, %v2333_v30  ;;  %v17924_v50 = vmax.f32 %v16803_v42, 0.0  ;;  %v17920_v7 = vmax.f32 %v16805_v9, 0.0 }
 0xf96   : > { %18045 = vst [vmem:[#allocation49_spill] sm:$0xff] %v16807_v1  ;;  %18046 = vst [vmem:[#allocation50_spill] sm:$0xff] %v16809_v29  ;;  %v17918_v46 = vmax.f32 %v16807_v1, 0.0  ;;  %v17926_v59 = vmax.f32 %v16816_v53, 0.0  ;;  %v17928_v30 = vmax.f32 %v16766_v28, 0.0 }
 0xf97   : > { %18047 = vst [vmem:[#allocation51_spill] sm:$0xff] %v16811_v3  ;;  %18048 = vst [vmem:[#allocation52_spill] sm:$0xff] %v16813_v55  ;;  %v17927_v60 = vmax.f32 %v16813_v55, 0.0  ;;  %v8541_v62 = vadd.f32 %v17924_v50, %v17931_v34  ;;  %v8543_v33 = vadd.f32 %v17920_v7, %v17921_v44 }
 0xfa1   : > { %v8338_v37 = vpop.f32.mrb[20].mxu1  ;;  %v8381_v57 = vpop.f32.mrb[16].mxu0 }
 0xfa2   : > { %v8340_v58 = vpop.f32.mrb[21].mxu1  ;;  %v8383_v48 = vpop.f32.mrb[17].mxu0  ;;  %v16818_v61 = vadd.f32 %v8338_v37, %v2337_v22  ;;  %v16820_v31 = vadd.f32 %v8381_v57, %v2345_v10  ;;  %v17922_v37 = vmax.f32 %v16809_v29, 0.0  ;;  %v17925_v57 = vmax.f32 %v16811_v3, 0.0  ;;  %v8819_v3 = vld [vmem:[#allocation16 + $0x8] sm:$0xff] }
 0xfa3   : > { %v8342_v14 = vpop.f32.mrb[22].mxu1  ;;  %v8385_v4 = vpop.f32.mrb[18].mxu0  ;;  %v16828_v40 = vadd.f32 %v8340_v58, %v2341_v27  ;;  %v16830_v18 = vadd.f32 %v8383_v48, %v2349_v20  ;;  %v8540_v58 = vadd.f32 %v17914_v23, %v17915_v15  ;;  %v8542_v48 = vadd.f32 %v17916_v51, %v17917_v16 }
 0xfa4   : > { %v8344_v35 = vpop.f32.mrb[23].mxu1  ;;  %v8387_v5 = vpop.f32.mrb[19].mxu0  ;;  %18050 = vst [vmem:[#allocation54_spill] sm:$0xff] %v16820_v31  ;;  %v18054_v51 = vmax.f32 %v16818_v61, 0.0  ;;  %v16882_v7 = vadd.f32 %v8342_v14, %v2337_v22  ;;  %v16884_v44 = vadd.f32 %v8385_v4, %v2345_v10  ;;  %v8877_v29 = vrot.slane %v8819_v3, %v16265_v45 }
 0xfa5   : > { %18051 = vst [vmem:[#allocation55_spill] sm:$0xff] %v16830_v18  ;;  %v16848_v12 = vadd.f32 %v8344_v35, %v2341_v27  ;;  %v16850_v0 = vadd.f32 %v8387_v5, %v2349_v20  ;;  %v17929_v23 = vmax.f32 %v16828_v40, 0.0  ;;  %v17930_v15 = vmax.f32 %v16830_v18, 0.0 }
 0xfa6   : > { %v8544_v27 = vadd.f32 %v17918_v46, %v17919_v13  ;;  %v8546_v20 = vadd.f32 %v17922_v37, %v17923_v6  ;;  %v8545_v35 = vadd.f32 %v17925_v57, %v17926_v59  ;;  %v8547_v5 = vadd.f32 %v17927_v60, %v17928_v30  ;;  %18056 = vst [vmem:[#allocation58_spill] sm:$0xff] %v16882_v7 }
 0xfa7   : > { %18052 = vst [vmem:[#allocation56_spill] sm:$0xff] %v16848_v12  ;;  %18053 = vst [vmem:[#allocation57_spill] sm:$0xff] %v16850_v0  ;;  %v8548_v16 = vadd.f32 %v8540_v58, %v18054_v51  ;;  %v18055_v46 = vmax.f32 %v16820_v31, 0.0  ;;  %v17933_v50 = vmax.f32 %v16848_v12, 0.0  ;;  %v17932_v57 = vmax.f32 %v16850_v0, 0.0 }
 0xfa8   : > { %18057 = vst [vmem:[#allocation59_spill] sm:$0xff] %v16884_v44  ;;  %v8549_v14 = vadd.f32 %v8541_v62, %v17929_v23  ;;  %v8551_v4 = vadd.f32 %v8543_v33, %v17930_v15  ;;  %v8885_v31 = vrot.slane %v8819_v3, %v16461_v47 }
 0xfa9   : > { %v8550_v13 = vadd.f32 %v8542_v48, %v18055_v46 }
 0xfb1   : > { %v8424_v37 = vpop.f32.mrb[24].mxu1  ;;  %v8467_v6 = vpop.f32.mrb[20].mxu0 }
 0xfb2   : > { %v16889_v59 = vadd.f32 %v8424_v37, %v16783_v41  ;;  %v16892_v60 = vadd.f32 %v8467_v6, %v16786_v24  ;;  %v8426_v51 = vpop.f32.mrb[25].mxu1  ;;  %v8469_v58 = vpop.f32.mrb[21].mxu0 }
 0xfb3   : > { %v16899_v22 = vadd.f32 %v8426_v51, %v16789_v43  ;;  %v16902_v10 = vadd.f32 %v8469_v58, %v16792_v49  ;;  %v8428_v46 = vpop.f32.mrb[26].mxu1  ;;  %v8471_v37 = vpop.f32.mrb[22].mxu0 }
 0xfb4   : > { %18058 = vst [vmem:[#allocation60_spill] sm:$0xff] %v16892_v60  ;;  %v17939_v48 = vmax.f32 %v16889_v59, 0.0  ;;  %v16907_v30 = vadd.f32 %v8428_v46, %v16783_v41  ;;  %v16910_v62 = vadd.f32 %v8471_v37, %v16786_v24  ;;  %v8430_v23 = vpop.f32.mrb[27].mxu1  ;;  %v8473_v33 = vpop.f32.mrb[23].mxu0  ;;  %v8553_v24 = vadd.f32 %v8545_v35, %v17933_v50 }
 0xfb5   : > { %18059 = vst [vmem:[#allocation61_spill] sm:$0xff] %v16902_v10  ;;  %v17940_v51 = vmax.f32 %v16899_v22, 0.0  ;;  %v17934_v15 = vmax.f32 %v16902_v10, 0.0  ;;  %v16915_v58 = vadd.f32 %v8430_v23, %v16789_v43  ;;  %v16918_v34 = vadd.f32 %v8473_v33, %v16792_v49 }
 0xfb6   : > { %18060 = vst [vmem:[#allocation62_spill] sm:$0xff] %v16907_v30  ;;  %18061 = vst [vmem:[#allocation63_spill] sm:$0xff] %v16910_v62  ;;  %v8555_v46 = vadd.f32 %v8547_v5, %v17932_v57  ;;  %v8556_v33 = vadd.f32 %v8548_v16, %v17939_v48  ;;  %v18064_v41 = vmax.f32 %v16892_v60, 0.0  ;;  %v17938_v35 = vmax.f32 %v16907_v30, 0.0 }
 0xfb7   : > { %18062 = vst [vmem:[#allocation64_spill] sm:$0xff] %v16915_v58  ;;  %18063 = vst [vmem:[#allocation65_spill] sm:$0xff] %v16918_v34  ;;  %v8557_v37 = vadd.f32 %v8549_v14, %v17940_v51  ;;  %v8559_v43 = vadd.f32 %v8551_v4, %v17934_v15  ;;  %v17936_v23 = vmax.f32 %v16915_v58, 0.0  ;;  %v17935_v49 = vmax.f32 %v16918_v34, 0.0 }
 0xfb8   : > { %v8558_v6 = vadd.f32 %v8550_v13, %v18064_v41  ;;  %v17937_v5 = vmax.f32 %v16910_v62, 0.0  ;;  %v18065_v57 = vmax.f32 %v16882_v7, 0.0  ;;  %v18066_v16 = vmax.f32 %v16884_v44, 0.0 }
 0xfb9   : > { %v8561_v14 = vadd.f32 %v8553_v24, %v17936_v23  ;;  %v8563_v4 = vadd.f32 %v8555_v46, %v17935_v49  ;;  %8699 = vmatprep.mubr.f32.mxu0 %v8557_v37  ;;  %8774 = vmatprep.mubr.f32.mxu1 %v8559_v43  ;;  %v18067_v24 = vmov 0   ;;  %v8787_v46 = vld [vmem:[#allocation14 + $0x8] sm:$0xff]  ;;  %v8788_v23 = vld [vmem:[#allocation14 + $0x10] sm:$0xff]  ;;  %v8865_v44 = vrot.slane %v8819_v3, %v16007_v25 }
 0xfba   : > { %v8552_v50 = vadd.f32 %v8544_v27, %v18065_v57  ;;  %v8554_v15 = vadd.f32 %v8546_v20, %v18066_v16  ;;  %8700 = vmatmul.mubr.f32.vlgmr.msra.gmra.mrb[32].mxu0 %v8556_v33  ;;  %8775 = vmatmul.mubr.f32.vlgmr.msra.gmra.mrb[36].mxu1 %v8558_v6  ;;  %v8786_v57 = vld [vmem:[#allocation14] sm:$0xff]  ;;  %v8795_v37 = vld [vmem:[#allocation14 + $0x48] sm:$0xff]  ;;  %v8873_v60 = vrot.slane %v8819_v3, %v16180_v32 }
 0xfbb   : > { %8704 = vmatprep.mubr.f32.mxu0 %v8561_v14  ;;  %8779 = vmatprep.mubr.f32.mxu1 %v8563_v4  ;;  %v8794_v27 = vld [vmem:[#allocation14 + $0x40] sm:$0xff]  ;;  %v12855_v43 = vcombine.low %v8787_v46, %v8795_v37  ;;  %v12856_v33 = vcombine.high %v8787_v46, %v8795_v37  ;;  %v8811_v16 = vld [vmem:[#allocation14 + $0xc8] sm:$0xff]  ;;  %v8797_v46 = vld [vmem:[#allocation14 + $0x58] sm:$0xff] }
 0xfbc   : > { %v8560_v13 = vadd.f32 %v8552_v50, %v17938_v35  ;;  %v8562_v41 = vadd.f32 %v8554_v15, %v17937_v5  ;;  %v12854_v20 = vcombine.high %v8786_v57, %v8794_v27  ;;  %v12853_v6 = vcombine.low %v8786_v57, %v8794_v27  ;;  %v8802_v50 = vld [vmem:[#allocation14 + $0x80] sm:$0xff]  ;;  %v8803_v15 = vld [vmem:[#allocation14 + $0x88] sm:$0xff]  ;;  %v8796_v5 = vld [vmem:[#allocation14 + $0x50] sm:$0xff] }
 0xfbd   : > { %9108 = vmatprep.subr.bf16.mxu1 %v12856_v33  ;;  %v8810_v14 = vld [vmem:[#allocation14 + $0xc0] sm:$0xff]  ;;  %v12872_v49 = vcombine.high %v8803_v15, %v8811_v16  ;;  %v8789_v57 = vld [vmem:[#allocation14 + $0x18] sm:$0xff]  ;;  %v12858_v27 = vcombine.high %v8788_v23, %v8796_v5 }
 0xfbe   : > { %8705 = vmatmul.mubr.f32.gmra.mrb[34].mxu0 %v8560_v13  ;;  %8780 = vmatmul.mubr.f32.gmra.mrb[38].mxu1 %v8562_v41  ;;  %v12870_v4 = vcombine.high %v8802_v50, %v8810_v14  ;;  %v12869_v13 = vcombine.low %v8802_v50, %v8810_v14  ;;  %v12871_v41 = vcombine.low %v8803_v15, %v8811_v16  ;;  %v12852_v35 = vld [vmem:[#allocation13] ss:$0 sm:$0xff] }
 0xfbf   : > { %9097 = vmatprep.mubr.bf16.mxu0 %v18067_v24  ;;  %9140 = vmatprep.mubr.bf16.mxu1 %v18067_v24  ;;  %v12859_v37 = vcombine.low %v8789_v57, %v8797_v46 }
 0xfc0   : > { %9065 = vmatprep.subr.bf16.mxu0 %v12854_v20  ;;  %9109 = vmatpush1.bf16.msra.mxu1 %v12855_v43  ;;  %v12857_v20 = vcombine.low %v8788_v23, %v8796_v5  ;;  %v8804_v5 = vld [vmem:[#allocation14 + $0x90] sm:$0xff] }
 0xfc1   : > { %9066 = vmatpush1.bf16.msra.mxu0 %v12853_v6  ;;  %9110 = vmatprep.subr.bf16.mxu1 %v12872_v49  ;;  %v12860_v6 = vcombine.high %v8789_v57, %v8797_v46  ;;  %v8812_v57 = vld [vmem:[#allocation14 + $0xd0] sm:$0xff]  ;;  %v8813_v46 = vld [vmem:[#allocation14 + $0xd8] sm:$0xff] }
 0xfc2   : > { %9067 = vmatprep.subr.bf16.mxu0 %v12870_v4  ;;  %v12874_v0 = vcombine.high %v8804_v5, %v8812_v57 }
 0xfc4   : > { %9111 = vmatpush1.bf16.msra.mxu1 %v12871_v41 }
 0xfc5   : > { %9068 = vmatpush1.bf16.msra.mxu0 %v12869_v13  ;;  %9194 = vmatprep.subr.bf16.mxu1 %v12860_v6 }
 0xfc6   : > { %9151 = vmatprep.subr.bf16.mxu0 %v12858_v27  ;;  %v8805_v27 = vld [vmem:[#allocation14 + $0x98] sm:$0xff] }
 0xfc7   : > { %v12876_v55 = vcombine.high %v8805_v27, %v8813_v46 }
0x108d   : > { %v13190_v43 = vpop.f32.mrb[32].mxu0  ;;  %v13228_v33 = vpop.f32.mrb[36].mxu1 }
0x108e   : > { %v13191_v50 = vpop.f32.mrb[33].mxu0  ;;  %v13229_v14 = vpop.f32.mrb[37].mxu1 }
0x108f   : > { %v13192_v15 = vadd.f32 %v13191_v50, %v13190_v43  ;;  %v13230_v4 = vadd.f32 %v13229_v14, %v13228_v33  ;;  %v8790_v43 = vld [vmem:[#allocation14 + $0x20] sm:$0xff]  ;;  %v8791_v50 = vld [vmem:[#allocation14 + $0x28] sm:$0xff] }
0x1090   : > { %v8798_v33 = vld [vmem:[#allocation14 + $0x60] sm:$0xff]  ;;  %v8799_v14 = vld [vmem:[#allocation14 + $0x68] sm:$0xff] }
0x1091   : > { %v8702_v49 = vadd.f32 %v13192_v15, %v12852_v35  ;;  %v13193_v16 = vpop.f32.mrb[34].mxu0  ;;  %v13231_v13 = vpop.f32.mrb[38].mxu1  ;;  %v8814_v15 = vld [vmem:[#allocation14 + $0xe0] sm:$0xff] }
0x1092   : > { %v13194_v48 = vpop.f32.mrb[35].mxu0  ;;  %v13232_v51 = vpop.f32.mrb[39].mxu1 }
0x1093   : > { %v8777_v41 = vadd.f32 %v13230_v4, %v8702_v49  ;;  %v13195_v21 = vadd.f32 %v13194_v48, %v13193_v16  ;;  %v13233_v19 = vadd.f32 %v13232_v51, %v13231_v13  ;;  %v12875_v48 = vcombine.low %v8805_v27, %v8813_v46  ;;  %v8807_v4 = vld [vmem:[#allocation14 + $0xa8] sm:$0xff] }
0x1094   : > { %v12864_v51 = vcombine.high %v8791_v50, %v8799_v14  ;;  %v8815_v49 = vld [vmem:[#allocation14 + $0xe8] sm:$0xff]  ;;  %v12861_v16 = vcombine.low %v8790_v43, %v8798_v33  ;;  %v12863_v13 = vcombine.low %v8791_v50, %v8799_v14  ;;  %v8817_v50 = vld [vmem:[#allocation14 + $0xf8] sm:$0xff] }
0x1095   : > { %v8707_v23 = vadd.f32 %v13195_v21, %v12852_v35  ;;  %v12873_v21 = vcombine.low %v8804_v5, %v8812_v57  ;;  %v8806_v35 = vld [vmem:[#allocation14 + $0xa0] sm:$0xff]  ;;  %v12879_v57 = vcombine.low %v8807_v4, %v8815_v49 }
0x1096   : > { %v12877_v5 = vcombine.low %v8806_v35, %v8814_v15 }
0x1097   : > { %v8782_v6 = vadd.f32 %v13233_v19, %v8707_v23  ;;  %v12862_v19 = vcombine.high %v8790_v43, %v8798_v33  ;;  %v8801_v23 = vld [vmem:[#allocation14 + $0x78] sm:$0xff]  ;;  %v8816_v43 = vld [vmem:[#allocation14 + $0xf0] sm:$0xff] }
0x1098   : > { %v8809_v33 = vld [vmem:[#allocation14 + $0xb8] sm:$0xff] }
0x1099   : > { %v16952_v34 = vpack.c.bf16 %v8782_v6, %v8777_v41  ;;  %v8793_v41 = vld [vmem:[#allocation14 + $0x38] sm:$0xff]  ;;  %v8808_v6 = vld [vmem:[#allocation14 + $0xb0] sm:$0xff] }
0x109a   : > { %v12868_v46 = vcombine.high %v8793_v41, %v8801_v23 }
0x109b   : > { %12885 = vmatmul.mubr.msk.bf16.vlgmr.msra.gmra.mrb[36].mxu0 %vm740_vm0, %v16952_v34  ;;  %12886 = vmatmul.mubr.msk.bf16.vlgmr.msra.gmra.mrb[40].mxu1 %vm740_vm0, %v16952_v34 }
0x109c   : > { %9152 = vmatpush1.bf16.msra.mxu0 %v12857_v20  ;;  %9195 = vmatpush1.bf16.msra.mxu1 %v12859_v37  ;;  %v12878_v20 = vcombine.high %v8806_v35, %v8814_v15  ;;  %v12880_v37 = vcombine.high %v8807_v4, %v8815_v49  ;;  %v12883_v35 = vcombine.low %v8809_v33, %v8817_v50  ;;  %v14237_v15 = vld [vmem:[#allocation17] ss:$16 sps:$4 sm:$0xff]   ;;  %v14239_v4 = vld [vmem:[#allocation17 + $0x4] ss:$16 sps:$4 sm:$0xff]   ;;  %v14240_v49 = vld [vmem:[#allocation17 + $0x8] ss:$16 sps:$4 sm:$0xff]  }
0x109d   : > { %9153 = vmatprep.subr.bf16.mxu0 %v12874_v0  ;;  %9196 = vmatprep.subr.bf16.mxu1 %v12876_v55  ;;  %v8792_v0 = vld [vmem:[#allocation14 + $0x30] sm:$0xff] }
0x109e   : > { %9183 = vmatprep.mubr.bf16.mxu0 %v18067_v24  ;;  %9226 = vmatprep.mubr.bf16.mxu1 %v18067_v24  ;;  %v8800_v55 = vld [vmem:[#allocation14 + $0x70] sm:$0xff] }
0x109f   : > { %v12866_v27 = vcombine.high %v8792_v0, %v8800_v55  ;;  %v12865_v14 = vcombine.low %v8792_v0, %v8800_v55  ;;  %v14246_v0 = vld [vmem:[#allocation17 + $0x28] ss:$16 sps:$4 sm:$0xff]   ;;  %v14251_v55 = vld [vmem:[#allocation17 + $0x44] ss:$16 sps:$4 sm:$0xff]  }
0x10a0   : > { %9154 = vmatpush1.bf16.msra.mxu0 %v12873_v21  ;;  %9197 = vmatpush1.bf16.msra.mxu1 %v12875_v48  ;;  %v12867_v21 = vcombine.low %v8793_v41, %v8801_v23  ;;  %v12882_v48 = vcombine.high %v8808_v6, %v8816_v43  ;;  %v14254_v41 = vld [vmem:[#allocation17 + $0x4c] ss:$16 sps:$4 sm:$0xff]   ;;  %v14249_v23 = vld [vmem:[#allocation17 + $0x40] ss:$16 sps:$4 sm:$0xff]  }
0x10a1   : > { %9237 = vmatprep.subr.bf16.mxu0 %v12862_v19  ;;  %9280 = vmatprep.subr.bf16.mxu1 %v12864_v51  ;;  %v12884_v19 = vcombine.high %v8809_v33, %v8817_v50  ;;  %v12881_v51 = vcombine.low %v8808_v6, %v8816_v43  ;;  %v14261_v6 = vld [vmem:[#allocation17 + $0x80] ss:$16 sps:$4 sm:$0xff]   ;;  %v14263_v43 = vld [vmem:[#allocation17 + $0x84] ss:$16 sps:$4 sm:$0xff]   ;;  %v14264_v33 = vld [vmem:[#allocation17 + $0x88] ss:$16 sps:$4 sm:$0xff]  }
0x10a2   : > { %v14266_v50 = vld [vmem:[#allocation17 + $0x8c] ss:$16 sps:$4 sm:$0xff]  }
0x10a3   : > { %12887 = vmatmul.mubr.msk.bf16.vlgmr.msra.gmra.mrb[40].mxu0 %vm740_vm0, %v16952_v34  ;;  %12888 = vmatmul.mubr.msk.bf16.vlgmr.msra.gmra.mrb[44].mxu1 %vm740_vm0, %v16952_v34 }
0x10a4   : > { %9238 = vmatpush1.bf16.msra.mxu0 %v12861_v16  ;;  %9281 = vmatpush1.bf16.msra.mxu1 %v12863_v13  ;;  %v14242_v16 = vld [vmem:[#allocation17 + $0xc] ss:$16 sps:$4 sm:$0xff]   ;;  %v14245_v13 = vld [vmem:[#allocation17 + $0x24] ss:$16 sps:$4 sm:$0xff]  }
0x10a5   : > { %9239 = vmatprep.subr.bf16.mxu0 %v12878_v20  ;;  %9282 = vmatprep.subr.bf16.mxu1 %v12880_v37  ;;  %v14248_v20 = vld [vmem:[#allocation17 + $0x2c] ss:$16 sps:$4 sm:$0xff]   ;;  %v14243_v37 = vld [vmem:[#allocation17 + $0x20] ss:$16 sps:$4 sm:$0xff]  }
0x10a6   : > { %9269 = vmatprep.mubr.bf16.mxu0 %v18067_v24  ;;  %9312 = vmatprep.mubr.bf16.mxu1 %v18067_v24 }
0x10a8   : > { %9240 = vmatpush1.bf16.msra.mxu0 %v12877_v5  ;;  %9283 = vmatpush1.bf16.msra.mxu1 %v12879_v57  ;;  %v14257_v5 = vld [vmem:[#allocation17 + $0x64] ss:$16 sps:$4 sm:$0xff]   ;;  %v14260_v57 = vld [vmem:[#allocation17 + $0x6c] ss:$16 sps:$4 sm:$0xff]  }
0x10a9   : > { %9323 = vmatprep.subr.bf16.mxu0 %v12866_v27  ;;  %9366 = vmatprep.subr.bf16.mxu1 %v12868_v46  ;;  %v14255_v27 = vld [vmem:[#allocation17 + $0x60] ss:$16 sps:$4 sm:$0xff]   ;;  %v14258_v46 = vld [vmem:[#allocation17 + $0x68] ss:$16 sps:$4 sm:$0xff]  }
0x10ab   : > { %12889 = vmatmul.mubr.msk.bf16.vlgmr.msra.gmra.mrb[44].mxu0 %vm740_vm0, %v16952_v34  ;;  %12890 = vmatmul.mubr.msk.bf16.vlgmr.msra.gmra.mrb[48].mxu1 %vm740_vm0, %v16952_v34 }
0x10ac   : > { %9324 = vmatpush1.bf16.msra.mxu0 %v12865_v14  ;;  %9367 = vmatpush1.bf16.msra.mxu1 %v12867_v21  ;;  %v14269_v14 = vld [vmem:[#allocation17 + $0xa4] ss:$16 sps:$4 sm:$0xff]   ;;  %v14272_v21 = vld [vmem:[#allocation17 + $0xac] ss:$16 sps:$4 sm:$0xff]  }
0x10ad   : > { %9325 = vmatprep.subr.bf16.mxu0 %v12882_v48  ;;  %9368 = vmatprep.subr.bf16.mxu1 %v12884_v19  ;;  %v14267_v48 = vld [vmem:[#allocation17 + $0xa0] ss:$16 sps:$4 sm:$0xff]   ;;  %v14270_v19 = vld [vmem:[#allocation17 + $0xa8] ss:$16 sps:$4 sm:$0xff]  }
0x10ae   : > { %9355 = vmatprep.mubr.bf16.mxu0 %v18067_v24  ;;  %9398 = vmatprep.mubr.bf16.mxu1 %v18067_v24 }
0x10b0   : > { %9326 = vmatpush1.bf16.msra.mxu0 %v12881_v51  ;;  %9369 = vmatpush1.bf16.msra.mxu1 %v12883_v35  ;;  %v14275_v51 = vld [vmem:[#allocation17 + $0xc4] ss:$16 sps:$4 sm:$0xff]   ;;  %v14278_v35 = vld [vmem:[#allocation17 + $0xcc] ss:$16 sps:$4 sm:$0xff]  }
0x10b1   : > { %10413 = vmatprep.subr.bf16.mxu0 %v14239_v4  ;;  %10499 = vmatprep.subr.bf16.mxu1 %v14242_v16  ;;  %v14276_v4 = vld [vmem:[#allocation17 + $0xc8] ss:$16 sps:$4 sm:$0xff]   ;;  %v14284_v16 = vld [vmem:[#allocation17 + $0xec] ss:$16 sps:$4 sm:$0xff]  }
0x10b3   : > { %12891 = vmatmul.mubr.msk.bf16.vlgmr.msra.gmra.mrb[48].mxu0 %vm740_vm0, %v16952_v34  ;;  %12892 = vmatmul.mubr.msk.bf16.vlgmr.msra.gmra.mrb[52].mxu1 %vm740_vm0, %v16952_v34  ;;  %v14252_v34 = vld [vmem:[#allocation17 + $0x48] ss:$16 sps:$4 sm:$0xff]  }
0x10b4   : > { %10414 = vmatpush1.bf16.msra.mxu0 %v14237_v15  ;;  %10500 = vmatpush1.bf16.msra.mxu1 %v14240_v49  ;;  %v14273_v15 = vld [vmem:[#allocation17 + $0xc0] ss:$16 sps:$4 sm:$0xff]   ;;  %v14281_v49 = vld [vmem:[#allocation17 + $0xe4] ss:$16 sps:$4 sm:$0xff]  }
0x10b5   : > { %10415 = vmatprep.subr.bf16.mxu0 %v14245_v13  ;;  %10501 = vmatprep.subr.bf16.mxu1 %v14248_v20  ;;  %v14279_v13 = vld [vmem:[#allocation17 + $0xe0] ss:$16 sps:$4 sm:$0xff]   ;;  %v14282_v20 = vld [vmem:[#allocation17 + $0xe8] ss:$16 sps:$4 sm:$0xff]  }
0x10b8   : > { %10416 = vmatpush1.bf16.msra.mxu0 %v14243_v37  ;;  %10502 = vmatpush1.bf16.msra.mxu1 %v14246_v0  ;;  %v14287_v37 = vld [vmem:[#allocation17 + $0x104] ss:$16 sps:$4 sm:$0xff]   ;;  %v14290_v0 = vld [vmem:[#allocation17 + $0x10c] ss:$16 sps:$4 sm:$0xff]  }
0x10b9   : > { %10417 = vmatprep.subr.bf16.mxu0 %v14251_v55  ;;  %10503 = vmatprep.subr.bf16.mxu1 %v14254_v41  ;;  %v14285_v55 = vld [vmem:[#allocation17 + $0x100] ss:$16 sps:$4 sm:$0xff]   ;;  %v14288_v41 = vld [vmem:[#allocation17 + $0x108] ss:$16 sps:$4 sm:$0xff]  }
0x10bc   : > { %10418 = vmatpush1.bf16.msra.mxu0 %v14249_v23  ;;  %10504 = vmatpush1.bf16.msra.mxu1 %v14252_v34  ;;  %v14293_v23 = vld [vmem:[#allocation17 + $0x124] ss:$16 sps:$4 sm:$0xff]   ;;  %v14296_v34 = vld [vmem:[#allocation17 + $0x12c] ss:$16 sps:$4 sm:$0xff]  }
0x10bd   : > { %10419 = vmatprep.subr.bf16.mxu0 %v14257_v5  ;;  %10505 = vmatprep.subr.bf16.mxu1 %v14260_v57  ;;  %v14291_v5 = vld [vmem:[#allocation17 + $0x120] ss:$16 sps:$4 sm:$0xff]   ;;  %v14294_v57 = vld [vmem:[#allocation17 + $0x128] ss:$16 sps:$4 sm:$0xff]  }
0x10c0   : > { %10420 = vmatpush1.bf16.msra.mxu0 %v14255_v27  ;;  %10506 = vmatpush1.bf16.msra.mxu1 %v14258_v46  ;;  %v14299_v27 = vld [vmem:[#allocation17 + $0x144] ss:$16 sps:$4 sm:$0xff]   ;;  %v14302_v46 = vld [vmem:[#allocation17 + $0x14c] ss:$16 sps:$4 sm:$0xff]  }
0x10c1   : > { %10421 = vmatprep.subr.bf16.mxu0 %v14263_v43  ;;  %10507 = vmatprep.subr.bf16.mxu1 %v14266_v50  ;;  %v14300_v43 = vld [vmem:[#allocation17 + $0x148] ss:$16 sps:$4 sm:$0xff]   ;;  %v14308_v50 = vld [vmem:[#allocation17 + $0x16c] ss:$16 sps:$4 sm:$0xff]  }
0x10c4   : > { %10422 = vmatpush1.bf16.msra.mxu0 %v14261_v6  ;;  %10508 = vmatpush1.bf16.msra.mxu1 %v14264_v33  ;;  %v14297_v6 = vld [vmem:[#allocation17 + $0x140] ss:$16 sps:$4 sm:$0xff]   ;;  %v14305_v33 = vld [vmem:[#allocation17 + $0x164] ss:$16 sps:$4 sm:$0xff]  }
0x10c5   : > { %10423 = vmatprep.subr.bf16.mxu0 %v14269_v14  ;;  %10509 = vmatprep.subr.bf16.mxu1 %v14272_v21  ;;  %v14303_v14 = vld [vmem:[#allocation17 + $0x160] ss:$16 sps:$4 sm:$0xff]   ;;  %v14306_v21 = vld [vmem:[#allocation17 + $0x168] ss:$16 sps:$4 sm:$0xff]  }
0x10c8   : > { %10424 = vmatpush1.bf16.msra.mxu0 %v14267_v48  ;;  %10510 = vmatpush1.bf16.msra.mxu1 %v14270_v19  ;;  %v14309_v48 = vld [vmem:[#allocation17 + $0x180] ss:$16 sps:$4 sm:$0xff]   ;;  %v14311_v19 = vld [vmem:[#allocation17 + $0x184] ss:$16 sps:$4 sm:$0xff]  }
0x10c9   : > { %10425 = vmatprep.subr.bf16.mxu0 %v14275_v51  ;;  %10511 = vmatprep.subr.bf16.mxu1 %v14278_v35  ;;  %v14312_v51 = vld [vmem:[#allocation17 + $0x188] ss:$16 sps:$4 sm:$0xff]   ;;  %v14314_v35 = vld [vmem:[#allocation17 + $0x18c] ss:$16 sps:$4 sm:$0xff]  }
0x10cc   : > { %10426 = vmatpush1.bf16.msra.mxu0 %v14273_v15  ;;  %10512 = vmatpush1.bf16.msra.mxu1 %v14276_v4  ;;  %v14317_v15 = vld [vmem:[#allocation17 + $0x1a4] ss:$16 sps:$4 sm:$0xff]   ;;  %v14320_v4 = vld [vmem:[#allocation17 + $0x1ac] ss:$16 sps:$4 sm:$0xff]  }
0x10cd   : > { %10427 = vmatprep.subr.bf16.mxu0 %v14281_v49  ;;  %10513 = vmatprep.subr.bf16.mxu1 %v14284_v16  ;;  %v14315_v49 = vld [vmem:[#allocation17 + $0x1a0] ss:$16 sps:$4 sm:$0xff]   ;;  %v14318_v16 = vld [vmem:[#allocation17 + $0x1a8] ss:$16 sps:$4 sm:$0xff]  }
0x10d0   : > { %10428 = vmatpush1.bf16.msra.mxu0 %v14279_v13  ;;  %10514 = vmatpush1.bf16.msra.mxu1 %v14282_v20  ;;  %v14323_v13 = vld [vmem:[#allocation17 + $0x1c4] ss:$16 sps:$4 sm:$0xff]   ;;  %v14326_v20 = vld [vmem:[#allocation17 + $0x1cc] ss:$16 sps:$4 sm:$0xff]  }
0x10d1   : > { %10429 = vmatprep.subr.bf16.mxu0 %v14287_v37  ;;  %10515 = vmatprep.subr.bf16.mxu1 %v14290_v0  ;;  %v14321_v37 = vld [vmem:[#allocation17 + $0x1c0] ss:$16 sps:$4 sm:$0xff]   ;;  %v14324_v0 = vld [vmem:[#allocation17 + $0x1c8] ss:$16 sps:$4 sm:$0xff]  }
0x10d4   : > { %10430 = vmatpush1.bf16.msra.mxu0 %v14285_v55  ;;  %10516 = vmatpush1.bf16.msra.mxu1 %v14288_v41  ;;  %v14329_v55 = vld [vmem:[#allocation17 + $0x1e4] ss:$16 sps:$4 sm:$0xff]   ;;  %v14332_v41 = vld [vmem:[#allocation17 + $0x1ec] ss:$16 sps:$4 sm:$0xff]  }
0x10d5   : > { %10431 = vmatprep.subr.bf16.mxu0 %v14293_v23  ;;  %10517 = vmatprep.subr.bf16.mxu1 %v14296_v34  ;;  %v14327_v23 = vld [vmem:[#allocation17 + $0x1e0] ss:$16 sps:$4 sm:$0xff]   ;;  %v14330_v34 = vld [vmem:[#allocation17 + $0x1e8] ss:$16 sps:$4 sm:$0xff]  }
0x10d8   : > { %10432 = vmatpush1.bf16.msra.mxu0 %v14291_v5  ;;  %10518 = vmatpush1.bf16.msra.mxu1 %v14294_v57  ;;  %v14335_v5 = vld [vmem:[#allocation17 + $0x204] ss:$16 sps:$4 sm:$0xff]   ;;  %v14338_v57 = vld [vmem:[#allocation17 + $0x20c] ss:$16 sps:$4 sm:$0xff]  }
0x10d9   : > { %10433 = vmatprep.subr.bf16.mxu0 %v14299_v27  ;;  %10519 = vmatprep.subr.bf16.mxu1 %v14302_v46 }
0x10dc   : > { %10434 = vmatpush1.bf16.msra.mxu0 %v14297_v6  ;;  %10520 = vmatpush1.bf16.msra.mxu1 %v14300_v43  ;;  %v8818_v6 = vld [vmem:[#allocation16] sm:$0xff] }
0x10dd   : > { %10435 = vmatprep.subr.bf16.mxu0 %v14305_v33  ;;  %10521 = vmatprep.subr.bf16.mxu1 %v14308_v50 }
0x10e0   : > { %10436 = vmatpush1.bf16.msra.mxu0 %v14303_v14  ;;  %10522 = vmatpush1.bf16.msra.mxu1 %v14306_v21 }
0x10e1   : > { %10437 = vmatprep.subr.bf16.mxu0 %v14311_v19  ;;  %10523 = vmatprep.subr.bf16.mxu1 %v14314_v35  ;;  %v8825_v19 = vrot.slane %v8818_v6, %v15924_v17  ;;  %v8829_v35 = vrot.slane %v8818_v6, %v15953_v63 }
0x10e4   : > { %10438 = vmatpush1.bf16.msra.mxu0 %v14309_v48  ;;  %10524 = vmatpush1.bf16.msra.mxu1 %v14312_v51  ;;  %v8833_v51 = vrot.slane %v8818_v6, %v16007_v25 }
0x10e5   : > { %10439 = vmatprep.subr.bf16.mxu0 %v14317_v15  ;;  %10525 = vmatprep.subr.bf16.mxu1 %v14320_v4  ;;  %v8837_v15 = vrot.slane %v8818_v6, %v16118_v39  ;;  %v8841_v4 = vrot.slane %v8818_v6, %v16180_v32 }
0x10e8   : > { %10440 = vmatpush1.bf16.msra.mxu0 %v14315_v49  ;;  %10526 = vmatpush1.bf16.msra.mxu1 %v14318_v16  ;;  %v8849_v49 = vrot.slane %v8818_v6, %v16359_v2  ;;  %v8845_v16 = vrot.slane %v8818_v6, %v16265_v45 }
0x10e9   : > { %10441 = vmatprep.subr.bf16.mxu0 %v14323_v13  ;;  %10527 = vmatprep.subr.bf16.mxu1 %v14326_v20  ;;  %v8853_v13 = vrot.slane %v8818_v6, %v16461_v47 }
0x10ec   : > { %10442 = vmatpush1.bf16.msra.mxu0 %v14321_v37  ;;  %10528 = vmatpush1.bf16.msra.mxu1 %v14324_v0 }
0x10ed   : > { %10443 = vmatprep.subr.bf16.mxu0 %v14329_v55  ;;  %10529 = vmatprep.subr.bf16.mxu1 %v14332_v41 }
0x10f0   : > { %10444 = vmatpush1.bf16.msra.mxu0 %v14327_v23  ;;  %10530 = vmatpush1.bf16.msra.mxu1 %v14330_v34 }
0x10f1   : > { %10456 = vmatprep.subr.bf16.mxu0 %v14335_v5  ;;  %10542 = vmatprep.subr.bf16.mxu1 %v14338_v57 }
0x116e   : > { %v9099_v27 = vpop.f32.mrb[36].mxu0  ;;  %v9142_v46 = vpop.f32.mrb[40].mxu1 }
0x116f   : > { %v9101_v43 = vpop.f32.mrb[37].mxu0  ;;  %v9144_v33 = vpop.f32.mrb[41].mxu1  ;;  %v16984_v20 = vadd.f32 %v9099_v27, %v8825_v19  ;;  %v16986_v37 = vadd.f32 %v9142_v46, %v8833_v51 }
0x1170   : > { %v9103_v50 = vpop.f32.mrb[38].mxu0  ;;  %v9146_v14 = vpop.f32.mrb[42].mxu1  ;;  %v16988_v0 = vadd.f32 %v9101_v43, %v8829_v35  ;;  %v16990_v55 = vadd.f32 %v9144_v33, %v8837_v15 }
0x1171   : > { %v9105_v21 = vpop.f32.mrb[39].mxu0  ;;  %v9148_v48 = vpop.f32.mrb[43].mxu1  ;;  %v16992_v34 = vadd.f32 %v9103_v50, %v8825_v19  ;;  %v16994_v5 = vadd.f32 %v9146_v14, %v8833_v51 }
0x1172   : > { %v17000_v27 = vadd.f32 %v9105_v21, %v8829_v35  ;;  %v17002_v46 = vadd.f32 %v9148_v48, %v8837_v15 }
0x1176   : > { %v9185_v41 = vpop.f32.mrb[40].mxu0  ;;  %v9228_v23 = vpop.f32.mrb[44].mxu1 }
0x1177   : > { %v16996_v57 = vadd.f32 %v9185_v41, %v8841_v4  ;;  %v16998_v24 = vadd.f32 %v9228_v23, %v8849_v49  ;;  %v9187_v28 = vpop.f32.mrb[41].mxu0  ;;  %v9230_v6 = vpop.f32.mrb[45].mxu1  ;;  %v8857_v23 = vrot.slane %v8819_v3, %v15924_v17 }
0x1178   : > { %v17004_v43 = vadd.f32 %v9187_v28, %v8845_v16  ;;  %v17006_v33 = vadd.f32 %v9230_v6, %v8853_v13  ;;  %v9189_v58 = vpop.f32.mrb[42].mxu0  ;;  %v9232_v12 = vpop.f32.mrb[46].mxu1 }
0x1179   : > { %v9409_v50 = vmax.f32 %v16984_v20, %v16996_v57  ;;  %v9411_v14 = vmax.f32 %v16986_v37, %v16998_v24  ;;  %v17012_v19 = vadd.f32 %v9189_v58, %v8841_v4  ;;  %v17014_v51 = vadd.f32 %v9232_v12, %v8849_v49  ;;  %v9191_v21 = vpop.f32.mrb[43].mxu0  ;;  %v9234_v35 = vpop.f32.mrb[47].mxu1 }
0x117a   : > { %v9410_v28 = vmax.f32 %v16988_v0, %v17004_v43  ;;  %v9412_v48 = vmax.f32 %v16990_v55, %v17006_v33  ;;  %v17020_v15 = vadd.f32 %v9191_v21, %v8845_v16  ;;  %v17022_v41 = vadd.f32 %v9234_v35, %v8853_v13 }
0x117b   : > { %v8861_v58 = vrot.slane %v8819_v3, %v15953_v63  ;;  %v8869_v12 = vrot.slane %v8819_v3, %v16118_v39  ;;  %v8881_v4 = vrot.slane %v8819_v3, %v16359_v2 }
0x117e   : > { %v9271_v49 = vpop.f32.mrb[44].mxu0  ;;  %v9314_v6 = vpop.f32.mrb[48].mxu1 }
0x117f   : > { %v9273_v62 = vpop.f32.mrb[45].mxu0  ;;  %v9316_v16 = vpop.f32.mrb[49].mxu1  ;;  %v9272_v26 = vadd.f32 %v9271_v49, %v8857_v23  ;;  %v9315_v38 = vadd.f32 %v9314_v6, %v8865_v44 }
0x1180   : > { %v9275_v21 = vpop.f32.mrb[46].mxu0  ;;  %v9318_v13 = vpop.f32.mrb[50].mxu1  ;;  %v17040_v30 = vadd.f32 %v9273_v62, %v8861_v58  ;;  %v17042_v7 = vadd.f32 %v9316_v16, %v8869_v12 }
0x1181   : > { %v9277_v35 = vpop.f32.mrb[47].mxu0  ;;  %v9320_v53 = vpop.f32.mrb[51].mxu1  ;;  %v17044_v36 = vadd.f32 %v9275_v21, %v8857_v23  ;;  %v17046_v63 = vadd.f32 %v9318_v13, %v8865_v44 }
0x1182   : > { %v17048_v8 = vadd.f32 %v9277_v35, %v8861_v58  ;;  %v17050_v45 = vadd.f32 %v9320_v53, %v8869_v12 }
0x1186   : > { %v9357_v17 = vpop.f32.mrb[48].mxu0  ;;  %v9400_v25 = vpop.f32.mrb[52].mxu1 }
0x1187   : > { %v9358_v39 = vadd.f32 %v9357_v17, %v8873_v60  ;;  %v9401_v32 = vadd.f32 %v9400_v25, %v8881_v4  ;;  %v9359_v1 = vpop.f32.mrb[49].mxu0  ;;  %v9402_v2 = vpop.f32.mrb[53].mxu1 }
0x1188   : > { %v9360_v3 = vadd.f32 %v9359_v1, %v8877_v29  ;;  %v9403_v49 = vadd.f32 %v9402_v2, %v8885_v31  ;;  %v9361_v62 = vpop.f32.mrb[50].mxu0  ;;  %v9404_v6 = vpop.f32.mrb[54].mxu1 }
0x1189   : > { %v9417_v16 = vmax.f32 %v9272_v26, %v9358_v39  ;;  %v9419_v47 = vmax.f32 %v9315_v38, %v9401_v32  ;;  %v17052_v10 = vadd.f32 %v9361_v62, %v8873_v60  ;;  %v17054_v23 = vadd.f32 %v9404_v6, %v8881_v4  ;;  %v9363_v44 = vpop.f32.mrb[51].mxu0  ;;  %v9406_v21 = vpop.f32.mrb[55].mxu1 }
0x118a   : > { %v9418_v17 = vmax.f32 %v17040_v30, %v9360_v3  ;;  %v9420_v25 = vmax.f32 %v17042_v7, %v9403_v49  ;;  %v17058_v58 = vadd.f32 %v9363_v44, %v8877_v29  ;;  %v17060_v53 = vadd.f32 %v9406_v21, %v8885_v31 }
0x118b   : > { %v9425_v1 = vmax.f32 %v9409_v50, %v9417_v16  ;;  %v9427_v2 = vmax.f32 %v9411_v14, %v9419_v47  ;;  %v9421_v12 = vmax.f32 %v17044_v36, %v17052_v10  ;;  %v9423_v60 = vmax.f32 %v17046_v63, %v17054_v23 }
0x118c   : > { %v9426_v4 = vmax.f32 %v9410_v28, %v9418_v17  ;;  %v9428_v13 = vmax.f32 %v9412_v48, %v9420_v25  ;;  %v9422_v35 = vmax.f32 %v17048_v8, %v17058_v58  ;;  %v9424_v62 = vmax.f32 %v17050_v45, %v17060_v53 }
0x118d   : > { %v9433_v29 = vsub.f32 %v16984_v20, %v9425_v1  ;;  %v9457_v31 = vsub.f32 %v16996_v57, %v9425_v1  ;;  %v9481_v50 = vsub.f32 %v9272_v26, %v9425_v1  ;;  %v9505_v47 = vsub.f32 %v9358_v39, %v9425_v1 }
0x118e   : > { %v9435_v14 = vsub.f32 %v16986_v37, %v9427_v2  ;;  %v9459_v6 = vsub.f32 %v16998_v24, %v9427_v2  ;;  %v9483_v16 = vsub.f32 %v9315_v38, %v9427_v2  ;;  %v9507_v44 = vsub.f32 %v9401_v32, %v9427_v2 }
0x118f   : > { %v9441_v28 = vmul.f32 1.442695, %v9433_v29  ;;  %v9465_v48 = vmul.f32 1.442695, %v9457_v31  ;;  %v9489_v21 = vmul.f32 1.442695, %v9481_v50  ;;  %v9434_v17 = vsub.f32 %v16988_v0, %v9426_v4 }
0x1190   : > { %v9513_v25 = vmul.f32 1.442695, %v9505_v47  ;;  %v9445_v18 = vmul.f32 1.442695, %v9435_v14  ;;  %v9458_v9 = vsub.f32 %v17004_v43, %v9426_v4  ;;  %v9469_v20 = vmul.f32 1.442695, %v9459_v6 }
0x1191   : > { %14525 = vpow2.f32 %v9441_v28  ;;  %v9493_v57 = vmul.f32 1.442695, %v9483_v16  ;;  %v9517_v26 = vmul.f32 1.442695, %v9507_v44  ;;  %v9443_v39 = vmul.f32 1.442695, %v9434_v17 }
0x1192   : > { %14527 = vpow2.f32 %v9465_v48  ;;  %v9482_v37 = vsub.f32 %v17040_v30, %v9426_v4  ;;  %v9506_v24 = vsub.f32 %v9360_v3, %v9426_v4  ;;  %v9436_v32 = vsub.f32 %v16990_v55, %v9428_v13 }
0x1193   : > { %14529 = vpow2.f32 %v9489_v21  ;;  %v9460_v38 = vsub.f32 %v17006_v33, %v9428_v13  ;;  %v9484_v0 = vsub.f32 %v17042_v7, %v9428_v13  ;;  %v9467_v1 = vmul.f32 1.442695, %v9458_v9 }
0x1194   : > { %14531 = vpow2.f32 %v9513_v25  ;;  %v9491_v2 = vmul.f32 1.442695, %v9482_v37  ;;  %v9508_v43 = vsub.f32 %v9403_v49, %v9428_v13  ;;  %v9515_v29 = vmul.f32 1.442695, %v9506_v24 }
0x1195   : > { %14533 = vpow2.f32 %v9445_v18  ;;  %v9447_v31 = vmul.f32 1.442695, %v9436_v32  ;;  %v9471_v50 = vmul.f32 1.442695, %v9460_v38  ;;  %v9495_v47 = vmul.f32 1.442695, %v9484_v0 }
0x1196   : > { %14535 = vpow2.f32 %v9469_v20  ;;  %v18068_v30 = vmax.f32 %v16992_v34, %v17012_v19  ;;  %v18069_v55 = vmax.f32 %v16994_v5, %v17014_v51  ;;  %v9519_v7 = vmul.f32 1.442695, %v9508_v43 }
0x1197   : > { %14537 = vpow2.f32 %v9493_v57  ;;  %v18070_v9 = vmax.f32 %v17000_v27, %v17020_v15  ;;  %v18071_v18 = vmax.f32 %v17002_v46, %v17022_v41 }
0x1198   : > { %v9429_v3 = vmax.f32 %v18068_v30, %v9421_v12  ;;  %v9431_v33 = vmax.f32 %v18069_v55, %v9423_v60  ;;  %14539 = vpow2.f32 %v9517_v26 }
0x1199   : > { %v9430_v49 = vmax.f32 %v18070_v9, %v9422_v35  ;;  %v17092_v4 = vmax.f32 %v18071_v18, %v9424_v62  ;;  %14541 = vpow2.f32 %v9443_v39  ;;  %v18074_v9 = vmax.f32 %v16797_v52, 0.0 }
0x119a   : > { %v9437_v13 = vsub.f32 %v16992_v34, %v9429_v3  ;;  %v9461_v12 = vsub.f32 %v17012_v19, %v9429_v3  ;;  %v9485_v14 = vsub.f32 %v17044_v36, %v9429_v3  ;;  %v9509_v60 = vsub.f32 %v17052_v10, %v9429_v3 }
0x119b   : > { %v9439_v6 = vsub.f32 %v16994_v5, %v9431_v33  ;;  %v9463_v16 = vsub.f32 %v17014_v51, %v9431_v33  ;;  %14543 = vpow2.f32 %v9467_v1  ;;  %v14526_v62 = vpop.eup %14525  ;;  %v9487_v36 = vsub.f32 %v17046_v63, %v9431_v33 }
0x119c   : > { %v9449_v35 = vmul.f32 1.442695, %v9437_v13  ;;  %v9473_v44 = vmul.f32 1.442695, %v9461_v12  ;;  %v9497_v28 = vmul.f32 1.442695, %v9485_v14  ;;  %14545 = vpow2.f32 %v9491_v2  ;;  %v14528_v17 = vpop.eup %14527 }
0x119d   : > { %v9521_v48 = vmul.f32 1.442695, %v9509_v60  ;;  %v9453_v21 = vmul.f32 1.442695, %v9439_v6  ;;  %v9477_v34 = vmul.f32 1.442695, %v9463_v16  ;;  %14547 = vpow2.f32 %v9515_v29  ;;  %v14530_v5 = vpop.eup %14529 }
0x119e   : > { %v9511_v19 = vsub.f32 %v17054_v23, %v9431_v33  ;;  %v9438_v10 = vsub.f32 %v17000_v27, %v9430_v49  ;;  %v9529_v25 = vadd.f32 %v14528_v17, %v14526_v62  ;;  %14549 = vpow2.f32 %v9447_v31  ;;  %v14532_v57 = vpop.eup %14531 }
0x119f   : > { %v9462_v51 = vsub.f32 %v17020_v15, %v9430_v49  ;;  %v9486_v20 = vsub.f32 %v17048_v8, %v9430_v49  ;;  %14551 = vpow2.f32 %v9471_v50  ;;  %v9501_v26 = vmul.f32 1.442695, %v9487_v36  ;;  %v17107_v24 = vpop.eup %14533 }
0x11a0   : > { %v9525_v39 = vmul.f32 1.442695, %v9511_v19  ;;  %v17105_v37 = vmul.f32 1.442695, %v9438_v10  ;;  %v9537_v63 = vadd.f32 %v14530_v5, %v9529_v25  ;;  %14553 = vpow2.f32 %v9495_v47  ;;  %v17113_v32 = vpop.eup %14535 }
0x11a1   : > { %v17109_v23 = vmul.f32 1.442695, %v9462_v51  ;;  %v17111_v27 = vmul.f32 1.442695, %v9486_v20  ;;  %14555 = vpow2.f32 %v9519_v7  ;;  %v9510_v15 = vsub.f32 %v17058_v58, %v9430_v49  ;;  %v17120_v0 = vpop.eup %14537 }
0x11a2   : > { %v9440_v8 = vsub.f32 %v17002_v46, %v17092_v4  ;;  %v9464_v38 = vsub.f32 %v17022_v41, %v17092_v4  ;;  %v9545_v1 = vadd.f32 %v14532_v57, %v9537_v63  ;;  %v9531_v2 = vadd.f32 %v17113_v32, %v17107_v24  ;;  %v17126_v29 = vpop.eup %14539 }
0x11a3   : > { %14557 = vpow2.f32 %v9449_v35  ;;  %v9488_v43 = vsub.f32 %v17050_v45, %v17092_v4  ;;  %v17128_v58 = vmul.f32 1.442695, %v9510_v15  ;;  %v14542_v41 = vpop.eup %14541  ;;  %v9512_v30 = vsub.f32 %v17060_v53, %v17092_v4 }
0x11a4   : > { %14559 = vpow2.f32 %v9473_v44  ;;  %v17130_v31 = vmul.f32 1.442695, %v9440_v8  ;;  %v17132_v46 = vmul.f32 1.442695, %v9464_v38  ;;  %v9539_v50 = vadd.f32 %v17120_v0, %v9531_v2  ;;  %v18085_v38 = vld [vmem:[#allocation61_spill] sm:$0xff] }
0x11a5   : > { %14561 = vrcp.f32 %v9545_v1  ;;  %v17135_v47 = vmul.f32 1.442695, %v9488_v43  ;;  %v14544_v3 = vpop.eup %14543  ;;  %v18072_v45 = vmax.f32 %v16774_v56, 0.0  ;;  %v18073_v33 = vmax.f32 %v16770_v54, 0.0 }
0x11a6   : > { %14563 = vpow2.f32 %v9497_v28  ;;  %v9577_v49 = vmul.f32 %v14528_v17, %v18074_v9  ;;  %v14546_v18 = vpop.eup %14545  ;;  %v9547_v13 = vadd.f32 %v17126_v29, %v9539_v50  ;;  %v9530_v12 = vadd.f32 %v14544_v3, %v14542_v41 }
0x11a7   : > { %v9570_v55 = vmul.f32 %v14542_v41, %v18072_v45  ;;  %v9569_v7 = vmul.f32 %v14526_v62, %v18073_v33  ;;  %14565 = vpow2.f32 %v9521_v48  ;;  %v17146_v14 = vmul.f32 1.442695, %v9512_v30  ;;  %v14548_v60 = vpop.eup %14547  ;;  %v18089_v33 = vld [vmem:[#allocation49_spill] sm:$0xff] }
0x11a8   : > { %14567 = vpow2.f32 %v9453_v21  ;;  %v18075_v53 = vmax.f32 %v16803_v42, 0.0  ;;  %v18076_v56 = vmax.f32 %v16828_v40, 0.0  ;;  %v14550_v16 = vpop.eup %14549  ;;  %v9538_v52 = vadd.f32 %v14546_v18, %v9530_v12 }
0x11a9   : > { %v9585_v54 = vadd.f32 %v9577_v49, %v9569_v7  ;;  %14569 = vrcp.f32 %v9547_v13  ;;  %v18077_v35 = vmax.f32 %v16899_v22, 0.0  ;;  %v18078_v28 = vmax.f32 %v16818_v61, 0.0  ;;  %v14552_v48 = vpop.eup %14551  ;;  %v18081_v61 = vld [vmem:[#allocation48_spill] sm:$0xff]  ;;  %v18091_v13 = vld [vmem:[#allocation43_spill] sm:$0xff] }
0x11aa   : > { %v9578_v4 = vmul.f32 %v14544_v3, %v18075_v53  ;;  %v9594_v6 = vmul.f32 %v14546_v18, %v18076_v56  ;;  %14571 = vpow2.f32 %v9477_v34  ;;  %v18079_v42 = vmax.f32 %v16889_v59, 0.0  ;;  %v14554_v19 = vpop.eup %14553  ;;  %v18083_v34 = vld [vmem:[#allocation55_spill] sm:$0xff] }
0x11ab   : > { %v9610_v44 = vmul.f32 %v14548_v60, %v18077_v35  ;;  %v9593_v62 = vmul.f32 %v14530_v5, %v18078_v28  ;;  %v18080_v40 = vmax.f32 %v16762_v11, 0.0  ;;  %v9546_v10 = vadd.f32 %v14548_v60, %v9538_v52  ;;  %v14556_v20 = vpop.eup %14555  ;;  %v18095_v52 = vld [vmem:[#allocation62_spill] sm:$0xff] }
0x11ac   : > { %v9586_v21 = vadd.f32 %v9578_v4, %v9570_v55  ;;  %v9609_v17 = vmul.f32 %v14532_v57, %v18079_v42  ;;  %v9532_v25 = vadd.f32 %v14552_v48, %v14550_v16  ;;  %14573 = vpow2.f32 %v9501_v26 }
0x11ad   : > { %v9572_v36 = vmul.f32 %v14550_v16, %v18080_v40  ;;  %v9601_v51 = vadd.f32 %v9593_v62, %v9585_v54  ;;  %14575 = vpow2.f32 %v9525_v39  ;;  %v18082_v5 = vmax.f32 %v18081_v61, 0.0  ;;  %v14558_v59 = vpop.eup %14557  ;;  %v18087_v39 = vld [vmem:[#allocation46_spill] sm:$0xff] }
0x11ae   : > { %v9602_v22 = vadd.f32 %v9594_v6, %v9586_v21  ;;  %v18084_v15 = vmax.f32 %v18083_v34, 0.0  ;;  %14577 = vrcp.f32 %v9546_v10  ;;  %v9540_v57 = vadd.f32 %v14554_v19, %v9532_v25  ;;  %v14560_v43 = vpop.eup %14559  ;;  %v18093_v6 = vld [vmem:[#allocation58_spill] sm:$0xff] }
0x11af   : > { %v9580_v63 = vmul.f32 %v14552_v48, %v18082_v5  ;;  %v9617_v11 = vadd.f32 %v9609_v17, %v9601_v51  ;;  %v18086_v1 = vmax.f32 %v18085_v38, 0.0  ;;  %14579 = vpow2.f32 %v17105_v37  ;;  %v14562_v3 = vpop.eup %14561  ;;  %v18101_v10 = vld [vmem:[#allocation54_spill] sm:$0xff] }
0x11b0   : > { %v9596_v8 = vmul.f32 %v14554_v19, %v18084_v15  ;;  %v9618_v26 = vadd.f32 %v9610_v44, %v9602_v22  ;;  %v18088_v41 = vmax.f32 %v18087_v39, 0.0  ;;  %v9548_v45 = vadd.f32 %v14556_v20, %v9540_v57  ;;  %v14564_v49 = vpop.eup %14563  ;;  %v18097_v44 = vld [vmem:[#allocation47_spill] sm:$0xff]  ;;  %v18103_v61 = vld [vmem:[#allocation50_spill] sm:$0xff]  ;;  %v18105_v15 = vld [vmem:[#allocation60_spill] sm:$0xff] }
0x11b1   : > { %v9612_v2 = vmul.f32 %v14556_v20, %v18086_v1  ;;  %v9588_v30 = vadd.f32 %v9580_v63, %v9572_v36  ;;  %v9533_v55 = vadd.f32 %v14560_v43, %v14558_v59  ;;  %14581 = vpow2.f32 %v17109_v23  ;;  %v14566_v53 = vpop.eup %14565 }
0x11b2   : > { %v9573_v50 = vmul.f32 %v14558_v59, %v18088_v41  ;;  %v18090_v7 = vmax.f32 %v18089_v33, 0.0  ;;  %14583 = vpow2.f32 %v17111_v27  ;;  %v17174_v18 = vmul.f32 %v14562_v3, %v9617_v11  ;;  %v14568_v16 = vpop.eup %14567  ;;  %v18107_v11 = vld [vmem:[#allocation59_spill] sm:$0xff] }
0x11b3   : > { %v9604_v37 = vadd.f32 %v9596_v8, %v9588_v30  ;;  %v18092_v12 = vmax.f32 %v18091_v13, 0.0  ;;  %14585 = vrcp.f32 %v9548_v45  ;;  %v9541_v4 = vadd.f32 %v14564_v49, %v9533_v55  ;;  %v14570_v48 = vpop.eup %14569 }
0x11b4   : > { %v9581_v9 = vmul.f32 %v14560_v43, %v18090_v7  ;;  %v18094_v54 = vmax.f32 %v18093_v6, 0.0  ;;  %14587 = vpow2.f32 %v17128_v58  ;;  %v18096_v35 = vmax.f32 %v18095_v52, 0.0  ;;  %9633 = vst [vmem:[%s17186_s8] sm:$0xff] %v17174_v18  ;;  %v18099_v58 = vld [vmem:[#allocation44_spill] sm:$0xff]  ;;  %v14572_v36 = vpop.eup %14571 }
0x11b5   : > { %v9571_v60 = vmul.f32 %v17107_v24, %v18092_v12  ;;  %v9620_v24 = vadd.f32 %v9612_v2, %v9604_v37  ;;  %v18098_v28 = vmax.f32 %v18097_v44, 0.0  ;;  %v9549_v21 = vadd.f32 %v14566_v53, %v9541_v4  ;;  %v18117_v44 = vld [vmem:[#allocation64_spill] sm:$0xff] }
0x11b6   : > { %v9589_v56 = vadd.f32 %v9581_v9, %v9573_v50  ;;  %v9597_v23 = vmul.f32 %v14564_v49, %v18094_v54  ;;  %v9613_v27 = vmul.f32 %v14566_v53, %v18096_v35  ;;  %14589 = vpow2.f32 %v17130_v31  ;;  %v14574_v20 = vpop.eup %14573 }
0x11b7   : > { %v9579_v62 = vmul.f32 %v17113_v32, %v18098_v28  ;;  %v18100_v17 = vmax.f32 %v18099_v58, 0.0  ;;  %14591 = vpow2.f32 %v17132_v46  ;;  %v18102_v25 = vmax.f32 %v18101_v10, 0.0  ;;  %v14576_v31 = vpop.eup %14575 }
0x11b8   : > { %v9605_v42 = vadd.f32 %v9597_v23, %v9589_v56  ;;  %14593 = vrcp.f32 %v9549_v21  ;;  %v9535_v22 = vadd.f32 %v14572_v36, %v14568_v16  ;;  %v18104_v5 = vmax.f32 %v18103_v61, 0.0  ;;  %v14578_v59 = vpop.eup %14577  ;;  %v18115_v56 = vld [vmem:[#allocation56_spill] sm:$0xff]  ;;  %v18123_v61 = vld [vmem:[#allocation57_spill] sm:$0xff] }
0x11b9   : > { %v9575_v40 = vmul.f32 %v14568_v16, %v18100_v17  ;;  %v9587_v19 = vadd.f32 %v9579_v62, %v9571_v60  ;;  %v9595_v51 = vmul.f32 %v17120_v0, %v18102_v25  ;;  %14595 = vpow2.f32 %v17135_v47  ;;  %v14580_v2 = vpop.eup %14579  ;;  %v18109_v47 = vld [vmem:[#allocation53_spill] sm:$0xff] }
0x11ba   : > { %v9621_v32 = vadd.f32 %v9613_v27, %v9605_v42  ;;  %v9583_v63 = vmul.f32 %v14572_v36, %v18104_v5  ;;  %v18106_v8 = vmax.f32 %v18105_v15, 0.0  ;;  %v9543_v57 = vadd.f32 %v14574_v20, %v9535_v22 }
0x11bb   : > { %v9603_v34 = vadd.f32 %v9595_v51, %v9587_v19  ;;  %14597 = vpow2.f32 %v17146_v14  ;;  %v18108_v38 = vmax.f32 %v18107_v11, 0.0  ;;  %v9626_v43 = vmul.f32 %v14578_v59, %v9618_v26  ;;  %v14582_v41 = vpop.eup %14581  ;;  %v18113_v14 = vld [vmem:[#allocation51_spill] sm:$0xff] }
0x11bc   : > { %v9611_v46 = vmul.f32 %v17126_v29, %v18106_v8  ;;  %v9591_v0 = vadd.f32 %v9583_v63, %v9575_v40  ;;  %v9551_v50 = vadd.f32 %v14576_v31, %v9543_v57  ;;  %v18110_v30 = vmax.f32 %v18109_v47, 0.0  ;;  %v18111_v29 = vld [vmem:[#allocation63_spill] sm:$0xff]  ;;  %v14584_v7 = vpop.eup %14583  ;;  %v18121_v40 = vld [vmem:[#allocation52_spill] sm:$0xff]  ;;  %v18125_v8 = vld [vmem:[#allocation65_spill] sm:$0xff] }
0x11bd   : > { %v9599_v1 = vmul.f32 %v14574_v20, %v18108_v38  ;;  %v18112_v55 = vmax.f32 %v18111_v29, 0.0  ;;  %v9534_v9 = vadd.f32 %v14582_v41, %v14580_v2  ;;  %v18114_v49 = vmax.f32 %v18113_v14, 0.0  ;;  %9634 = vst [vmem:[%s17186_s8 + $0x8] sm:$0xff] %v9626_v43  ;;  %v14586_v26 = vpop.eup %14585  ;;  %v14356_v14 = vld [vmem:[#allocation17 + $0x26c] ss:$16 sps:$4 sm:$0xff]  }
0x11be   : > { %v9619_v39 = vadd.f32 %v9611_v46, %v9603_v34  ;;  %v9574_v3 = vmul.f32 %v14580_v2, %v18110_v30  ;;  %14599 = vrcp.f32 %v9551_v50  ;;  %v14588_v60 = vpop.eup %14587  ;;  %v18116_v6 = vmax.f32 %v18115_v56, 0.0  ;;  %v14344_v50 = vld [vmem:[#allocation17 + $0x22c] ss:$16 sps:$4 sm:$0xff]   ;;  %v14363_v56 = vld [vmem:[#allocation17 + $0x2a0] ss:$16 sps:$4 sm:$0xff]  }
0x11bf   : > { %v9607_v45 = vadd.f32 %v9599_v1, %v9591_v0  ;;  %v9615_v33 = vmul.f32 %v14576_v31, %v18112_v55  ;;  %v9582_v37 = vmul.f32 %v14582_v41, %v18114_v49  ;;  %v9542_v53 = vadd.f32 %v14584_v7, %v9534_v9  ;;  %v14336_v41 = vld [vmem:[#allocation17 + $0x208] ss:$16 sps:$4 sm:$0xff]   ;;  %v14347_v55 = vld [vmem:[#allocation17 + $0x244] ss:$16 sps:$4 sm:$0xff]   ;;  %v14351_v49 = vld [vmem:[#allocation17 + $0x260] ss:$16 sps:$4 sm:$0xff]  }
0x11c0   : > { %v9627_v13 = vmul.f32 %v14570_v48, %v9619_v39  ;;  %v9598_v54 = vmul.f32 %v14584_v7, %v18116_v6  ;;  %v9628_v23 = vmul.f32 %v14586_v26, %v9620_v24  ;;  %v14590_v16 = vpop.eup %14589  ;;  %v18118_v28 = vmax.f32 %v18117_v44, 0.0  ;;  %v18119_v48 = vld [vmem:[#allocation45_spill] sm:$0xff]  ;;  %v14362_v26 = vld [vmem:[#allocation17 + $0x28c] ss:$16 sps:$4 sm:$0xff]  }
0x11c1   : > { %v9623_v12 = vadd.f32 %v9615_v33, %v9607_v45  ;;  %v9590_v4 = vadd.f32 %v9582_v37, %v9574_v3  ;;  %v14592_v52 = vpop.eup %14591  ;;  %v9550_v35 = vadd.f32 %v14588_v60, %v9542_v53  ;;  %v18120_v21 = vmax.f32 %v18119_v48, 0.0  ;;  %v14333_v39 = vld [vmem:[#allocation17 + $0x200] ss:$16 sps:$4 sm:$0xff]   ;;  %v14342_v45 = vld [vmem:[#allocation17 + $0x228] ss:$16 sps:$4 sm:$0xff]  }
0x11c2   : > { %9635 = vst [vmem:[%s17186_s8 + $0x10] sm:$0xff] %v9627_v13  ;;  %v9614_v62 = vmul.f32 %v14588_v60, %v18118_v28  ;;  %9636 = vst [vmem:[%s17186_s8 + $0x18] sm:$0xff] %v9628_v23  ;;  %v14594_v58 = vpop.eup %14593  ;;  %v9536_v17 = vadd.f32 %v14592_v52, %v14590_v16  ;;  %v18122_v36 = vmax.f32 %v18121_v40, 0.0  ;;  %v18124_v5 = vmax.f32 %v18123_v61, 0.0  ;;  %v14339_v3 = vld [vmem:[#allocation17 + $0x220] ss:$16 sps:$4 sm:$0xff]  }
0x11c3   : > { %v9606_v27 = vadd.f32 %v9598_v54, %v9590_v4  ;;  %v9576_v42 = vmul.f32 %v14590_v16, %v18120_v21  ;;  %v14596_v10 = vpop.eup %14595  ;;  %14601 = vrcp.f32 %v9550_v35  ;;  %v9629_v25 = vmul.f32 %v14594_v58, %v9621_v32  ;;  %v14345_v33 = vld [vmem:[#allocation17 + $0x240] ss:$16 sps:$4 sm:$0xff]   ;;  %v14348_v7 = vld [vmem:[#allocation17 + $0x248] ss:$16 sps:$4 sm:$0xff]   ;;  %v14353_v9 = vld [vmem:[#allocation17 + $0x264] ss:$16 sps:$4 sm:$0xff]  }
0x11c4   : > { %v9584_v19 = vmul.f32 %v14592_v52, %v18122_v36  ;;  %v9544_v20 = vadd.f32 %v14596_v10, %v9536_v17  ;;  %v9600_v63 = vmul.f32 %v14596_v10, %v18124_v5  ;;  %v18126_v46 = vmax.f32 %v18125_v8, 0.0  ;;  %v14354_v37 = vld [vmem:[#allocation17 + $0x268] ss:$16 sps:$4 sm:$0xff]   ;;  %v14365_v53 = vld [vmem:[#allocation17 + $0x2a4] ss:$16 sps:$4 sm:$0xff]  }
0x11c5   : > { %v9622_v24 = vadd.f32 %v9614_v62, %v9606_v27  ;;  %v14598_v51 = vpop.eup %14597  ;;  %9637 = vst [vmem:[%s17186_s8 + $0x20] sm:$0xff] %v9629_v25  ;;  %v9641_v31 = vpack.c.bf16 %v9629_v25, %v17174_v18  ;;  %v14341_v18 = vld [vmem:[#allocation17 + $0x224] ss:$16 sps:$4 sm:$0xff]   ;;  %v14360_v60 = vld [vmem:[#allocation17 + $0x288] ss:$16 sps:$4 sm:$0xff]  }
0x11c6   : > { %v9592_v22 = vadd.f32 %v9584_v19, %v9576_v42  ;;  %v9552_v34 = vadd.f32 %v14598_v51, %v9544_v20  ;;  %v9616_v59 = vmul.f32 %v14598_v51, %v18126_v46  ;;  %v14368_v4 = vld [vmem:[#allocation17 + $0x2ac] ss:$16 sps:$4 sm:$0xff]   ;;  %v14366_v6 = vld [vmem:[#allocation17 + $0x2a8] ss:$16 sps:$4 sm:$0xff]   ;;  %v14371_v54 = vld [vmem:[#allocation17 + $0x2c4] ss:$16 sps:$4 sm:$0xff]  }
0x11c7   : > { %v14369_v16 = vld [vmem:[#allocation17 + $0x2c0] ss:$16 sps:$4 sm:$0xff]   ;;  %v14372_v52 = vld [vmem:[#allocation17 + $0x2c8] ss:$16 sps:$4 sm:$0xff]   ;;  %v14377_v35 = vld [vmem:[#allocation17 + $0x2e4] ss:$16 sps:$4 sm:$0xff]  }
0x11c8   : > { %v9608_v15 = vadd.f32 %v9600_v63, %v9592_v22  ;;  %v14600_v57 = vpop.eup %14599  ;;  %14603 = vrcp.f32 %v9552_v34  ;;  %v14380_v27 = vld [vmem:[#allocation17 + $0x2ec] ss:$16 sps:$4 sm:$0xff]   ;;  %v14375_v44 = vld [vmem:[#allocation17 + $0x2e0] ss:$16 sps:$4 sm:$0xff]   ;;  %v14378_v28 = vld [vmem:[#allocation17 + $0x2e8] ss:$16 sps:$4 sm:$0xff]  }
0x11c9   : > { %v9631_v11 = vmul.f32 %v14600_v57, %v9623_v12  ;;  %v14357_v12 = vld [vmem:[#allocation17 + $0x280] ss:$16 sps:$4 sm:$0xff]   ;;  %v14383_v62 = vld [vmem:[#allocation17 + $0x304] ss:$16 sps:$4 sm:$0xff]   ;;  %v14386_v48 = vld [vmem:[#allocation17 + $0x30c] ss:$16 sps:$4 sm:$0xff]  }
0x11ca   : > { %v9624_v0 = vadd.f32 %v9616_v59, %v9608_v15  ;;  %v14381_v21 = vld [vmem:[#allocation17 + $0x300] ss:$16 sps:$4 sm:$0xff]   ;;  %v14384_v42 = vld [vmem:[#allocation17 + $0x308] ss:$16 sps:$4 sm:$0xff]   ;;  %v14389_v58 = vld [vmem:[#allocation17 + $0x324] ss:$16 sps:$4 sm:$0xff]  }
0x11cb   : > { %9639 = vst [vmem:[%s17186_s8 + $0x30] sm:$0xff] %v9631_v11  ;;  %v17233_v32 = vpack.c.bf16 %v9631_v11, %v9627_v13  ;;  %v14359_v13 = vld [vmem:[#allocation17 + $0x284] ss:$16 sps:$4 sm:$0xff]   ;;  %v14392_v17 = vld [vmem:[#allocation17 + $0x32c] ss:$16 sps:$4 sm:$0xff]  }
0x11cc   : > { %v14387_v40 = vld [vmem:[#allocation17 + $0x320] ss:$16 sps:$4 sm:$0xff]   ;;  %v14390_v36 = vld [vmem:[#allocation17 + $0x328] ss:$16 sps:$4 sm:$0xff]   ;;  %v14395_v19 = vld [vmem:[#allocation17 + $0x344] ss:$16 sps:$4 sm:$0xff]  }
0x11cd   : > { %v14602_v38 = vpop.eup %14601  ;;  %v14398_v10 = vld [vmem:[#allocation17 + $0x34c] ss:$16 sps:$4 sm:$0xff]   ;;  %v14396_v25 = vld [vmem:[#allocation17 + $0x348] ss:$16 sps:$4 sm:$0xff]   ;;  %v14401_v51 = vld [vmem:[#allocation17 + $0x364] ss:$16 sps:$4 sm:$0xff]  }
0x11ce   : > { %v9630_v1 = vmul.f32 %v14602_v38, %v9622_v24  ;;  %v14393_v24 = vld [vmem:[#allocation17 + $0x340] ss:$16 sps:$4 sm:$0xff]   ;;  %v14404_v20 = vld [vmem:[#allocation17 + $0x36c] ss:$16 sps:$4 sm:$0xff]   ;;  %v14402_v61 = vld [vmem:[#allocation17 + $0x368] ss:$16 sps:$4 sm:$0xff]  }
0x11cf   : > { %v14399_v22 = vld [vmem:[#allocation17 + $0x360] ss:$16 sps:$4 sm:$0xff]   ;;  %v14407_v5 = vld [vmem:[#allocation17 + $0x384] ss:$16 sps:$4 sm:$0xff]   ;;  %v14410_v63 = vld [vmem:[#allocation17 + $0x38c] ss:$16 sps:$4 sm:$0xff]  }
0x11d0   : > { %9638 = vst [vmem:[%s17186_s8 + $0x28] sm:$0xff] %v9630_v1  ;;  %v9642_v2 = vpack.c.bf16 %v9630_v1, %v9626_v43  ;;  %v14350_v43 = vld [vmem:[#allocation17 + $0x24c] ss:$16 sps:$4 sm:$0xff]   ;;  %v14408_v34 = vld [vmem:[#allocation17 + $0x388] ss:$16 sps:$4 sm:$0xff]  }
0x11d1   : > { %v14413_v15 = vld [vmem:[#allocation17 + $0x3a4] ss:$16 sps:$4 sm:$0xff]   ;;  %v14416_v8 = vld [vmem:[#allocation17 + $0x3ac] ss:$16 sps:$4 sm:$0xff]   ;;  %v14411_v46 = vld [vmem:[#allocation17 + $0x3a0] ss:$16 sps:$4 sm:$0xff]  }
0x11d2   : > { %v14604_v47 = vpop.eup %14603  ;;  %10445 = vmatprep.mubr.bf16.mxu0 %v9642_v2  ;;  %10531 = vmatprep.mubr.bf16.mxu1 %v9642_v2  ;;  %v14414_v59 = vld [vmem:[#allocation17 + $0x3a8] ss:$16 sps:$4 sm:$0xff]   ;;  %v14419_v57 = vld [vmem:[#allocation17 + $0x3c4] ss:$16 sps:$4 sm:$0xff]   ;;  %v14417_v11 = vld [vmem:[#allocation17 + $0x3c0] ss:$16 sps:$4 sm:$0xff]  }
0x11d3   : > { %10446 = vmatmul.mubr.bf16.vlgmr.msra.gmra.mrb[52].mxu0 %v9641_v31  ;;  %10532 = vmatmul.mubr.bf16.vlgmr.msra.gmra.mrb[56].mxu1 %v9641_v31  ;;  %v9632_v30 = vmul.f32 %v14604_v47, %v9624_v0  ;;  %v14405_v31 = vld [vmem:[#allocation17 + $0x380] ss:$16 sps:$4 sm:$0xff]   ;;  %v14422_v0 = vld [vmem:[#allocation17 + $0x3cc] ss:$16 sps:$4 sm:$0xff]   ;;  %v14420_v38 = vld [vmem:[#allocation17 + $0x3c8] ss:$16 sps:$4 sm:$0xff]  }
0x11d4   : > { %10457 = vmatpush1.bf16.msra.mxu0 %v14333_v39  ;;  %10543 = vmatpush1.bf16.msra.mxu1 %v14336_v41  ;;  %v14425_v1 = vld [vmem:[#allocation17 + $0x3e4] ss:$16 sps:$4 sm:$0xff]   ;;  %v14428_v2 = vld [vmem:[#allocation17 + $0x3ec] ss:$16 sps:$4 sm:$0xff]   ;;  %v14423_v47 = vld [vmem:[#allocation17 + $0x3e0] ss:$16 sps:$4 sm:$0xff]  }
0x11d5   : > { %9640 = vst [vmem:[%s17186_s8 + $0x38] sm:$0xff] %v9632_v30  ;;  %v9644_v29 = vpack.c.bf16 %v9632_v30, %v9628_v23  ;;  %10458 = vmatprep.subr.bf16.mxu0 %v14341_v18  ;;  %10544 = vmatprep.subr.bf16.mxu1 %v14344_v50  ;;  %v14374_v23 = vld [vmem:[#allocation17 + $0x2cc] ss:$16 sps:$4 sm:$0xff]   ;;  %v14426_v30 = vld [vmem:[#allocation17 + $0x3e8] ss:$16 sps:$4 sm:$0xff]   ;;  %s15003_s8 = scalar_lea.vmem %s15002_s22, 2048 }
0x11d6   : > { %v10601_v39 = vld [vmem:[%s18127_s6 + $0x80] sm:$0xff]  ;;  %v10602_v41 = vld [vmem:[%s18127_s6 + $0x88] sm:$0xff]  ;;  %p15005_p3 = scmp.lt.s32.totalorder %s15003_s8, %s14997_s0 }
0x11d7   : > { %10488 = vmatprep.mubr.bf16.mxu0 %v9644_v29  ;;  %10574 = vmatprep.mubr.bf16.mxu1 %v9644_v29  ;;  %v10633_v18 = vld [vmem:[%s18127_s6 + $0x180] sm:$0xff]  ;;  %v10634_v50 = vld [vmem:[%s18127_s6 + $0x188] sm:$0xff]  ;;  %v13614_v29 = vpack.c.bf16 %v10602_v41, %v10601_v39 }
0x11d8   : > { %10459 = vmatpush1.bf16.msra.mxu0 %v14339_v3  ;;  %10545 = vmatpush1.bf16.msra.mxu1 %v14342_v45  ;;  %v10585_v3 = vld [vmem:[%s18127_s6] sm:$0xff]  ;;  %v10586_v45 = vld [vmem:[%s18127_s6 + $0x8] sm:$0xff]  ;;  %p15006_p10 = por %p15005_p3, %p15004_p4 }
0x11d9   : > { %10460 = vmatprep.subr.bf16.mxu0 %v14347_v55  ;;  %10546 = vmatprep.subr.bf16.mxu1 %v14350_v43  ;;  %v13646_v55 = vpack.c.bf16 %v10634_v50, %v10633_v18  ;;  %v10617_v43 = vld [vmem:[%s18127_s6 + $0x100] sm:$0xff]  ;;  %v10595_v18 = vld [vmem:[%s18127_s6 + $0x50] sm:$0xff]  ;;  %v10596_v50 = vld [vmem:[%s18127_s6 + $0x58] sm:$0xff] }
0x11da   : > { %p15007_p1 = pnand %p15006_p10, %p15000_p8 }
0x11dc   : > { %10461 = vmatpush1.bf16.msra.mxu0 %v14345_v33  ;;  %10547 = vmatpush1.bf16.msra.mxu1 %v14348_v7  ;;  %v10618_v33 = vld [vmem:[%s18127_s6 + $0x108] sm:$0xff]  ;;  %v10603_v7 = vld [vmem:[%s18127_s6 + $0x90] sm:$0xff] }
0x11dd   : > { %10462 = vmatprep.subr.bf16.mxu0 %v14353_v9  ;;  %10548 = vmatprep.subr.bf16.mxu1 %v14356_v14  ;;  %v10604_v9 = vld [vmem:[%s18127_s6 + $0x98] sm:$0xff]  ;;  %v10635_v14 = vld [vmem:[%s18127_s6 + $0x190] sm:$0xff] }
0x11e0   : > { %10463 = vmatpush1.bf16.msra.mxu0 %v14351_v49  ;;  %10549 = vmatpush1.bf16.msra.mxu1 %v14354_v37  ;;  %v10636_v49 = vld [vmem:[%s18127_s6 + $0x198] sm:$0xff]  ;;  %v13616_v37 = vpack.c.bf16 %v10586_v45, %v10585_v3  ;;  %v10627_v3 = vld [vmem:[%s18127_s6 + $0x150] sm:$0xff] }
0x11e1   : > { %10464 = vmatprep.subr.bf16.mxu0 %v14359_v13  ;;  %10550 = vmatprep.subr.bf16.mxu1 %v14362_v26  ;;  %v13648_v13 = vpack.c.bf16 %v10618_v33, %v10617_v43  ;;  %v10587_v26 = vld [vmem:[%s18127_s6 + $0x10] sm:$0xff]  ;;  %v10628_v45 = vld [vmem:[%s18127_s6 + $0x158] sm:$0xff]  ;;  %v10645_v43 = vld [vmem:[%s18127_s6 + $0x1e0] sm:$0xff] }
0x11e2   : > { %v10646_v33 = vld [vmem:[%s18127_s6 + $0x1e8] sm:$0xff] }
0x11e4   : > { %10465 = vmatpush1.bf16.msra.mxu0 %v14357_v12  ;;  %10551 = vmatpush1.bf16.msra.mxu1 %v14360_v60  ;;  %v10588_v12 = vld [vmem:[%s18127_s6 + $0x18] sm:$0xff]  ;;  %v13618_v60 = vpack.c.bf16 %v10604_v9, %v10603_v7  ;;  %v13636_v7 = vpack.c.bf16 %v10596_v50, %v10595_v18  ;;  %v13668_v9 = vpack.c.bf16 %v10628_v45, %v10627_v3  ;;  %v18130_v18 = vmov 3  }
0x11e5   : > { %10466 = vmatprep.subr.bf16.mxu0 %v14365_v53  ;;  %10552 = vmatprep.subr.bf16.mxu1 %v14368_v4  ;;  %v13650_v53 = vpack.c.bf16 %v10636_v49, %v10635_v14  ;;  %v10619_v4 = vld [vmem:[%s18127_s6 + $0x110] sm:$0xff]  ;;  %v10597_v14 = vld [vmem:[%s18127_s6 + $0x60] sm:$0xff]  ;;  %v10598_v49 = vld [vmem:[%s18127_s6 + $0x68] sm:$0xff]  ;;  %v18131_v50 = vmov 5   ;;  %v18134_v3 = vmov 0   ;;  %v18135_v45 = vmov 4  }
0x11e8   : > { %10467 = vmatpush1.bf16.msra.mxu0 %v14363_v56  ;;  %10553 = vmatpush1.bf16.msra.mxu1 %v14366_v6  ;;  %v10620_v56 = vld [vmem:[%s18127_s6 + $0x118] sm:$0xff]  ;;  %v10605_v6 = vld [vmem:[%s18127_s6 + $0xa0] sm:$0xff] }
0x11e9   : > { %10468 = vmatprep.subr.bf16.mxu0 %v14371_v54  ;;  %10554 = vmatprep.subr.bf16.mxu1 %v14374_v23  ;;  %v10606_v54 = vld [vmem:[%s18127_s6 + $0xa8] sm:$0xff]  ;;  %v10637_v23 = vld [vmem:[%s18127_s6 + $0x1a0] sm:$0xff] }
0x11ec   : > { %10469 = vmatpush1.bf16.msra.mxu0 %v14369_v16  ;;  %10555 = vmatpush1.bf16.msra.mxu1 %v14372_v52  ;;  %v10638_v16 = vld [vmem:[%s18127_s6 + $0x1a8] sm:$0xff]  ;;  %v13620_v52 = vpack.c.bf16 %v10588_v12, %v10587_v26  ;;  %v10629_v26 = vld [vmem:[%s18127_s6 + $0x160] sm:$0xff] }
0x11ed   : > { %10470 = vmatprep.subr.bf16.mxu0 %v14377_v35  ;;  %10556 = vmatprep.subr.bf16.mxu1 %v14380_v27  ;;  %v13652_v35 = vpack.c.bf16 %v10620_v56, %v10619_v4  ;;  %v10589_v27 = vld [vmem:[%s18127_s6 + $0x20] sm:$0xff]  ;;  %v10630_v12 = vld [vmem:[%s18127_s6 + $0x168] sm:$0xff]  ;;  %v10647_v4 = vld [vmem:[%s18127_s6 + $0x1f0] sm:$0xff] }
0x11ee   : > { %v10648_v56 = vld [vmem:[%s18127_s6 + $0x1f8] sm:$0xff] }
0x11f0   : > { %10471 = vmatpush1.bf16.msra.mxu0 %v14375_v44  ;;  %10557 = vmatpush1.bf16.msra.mxu1 %v14378_v28  ;;  %v10590_v44 = vld [vmem:[%s18127_s6 + $0x28] sm:$0xff]  ;;  %v13622_v28 = vpack.c.bf16 %v10606_v54, %v10605_v6  ;;  %v13640_v6 = vpack.c.bf16 %v10598_v49, %v10597_v14  ;;  %v13672_v54 = vpack.c.bf16 %v10630_v12, %v10629_v26 }
0x11f1   : > { %10472 = vmatprep.subr.bf16.mxu0 %v14383_v62  ;;  %10558 = vmatprep.subr.bf16.mxu1 %v14386_v48  ;;  %v13654_v62 = vpack.c.bf16 %v10638_v16, %v10637_v23  ;;  %v10622_v48 = vld [vmem:[%s18127_s6 + $0x128] sm:$0xff]  ;;  %v13674_v16 = vpack.c.bf16 %v10648_v56, %v10647_v4 }
0x11f2   : > { %v18137_v4 = vld [vmem:[#allocation37_spill] sm:$0xff] }
0x11f4   : > { %10473 = vmatpush1.bf16.msra.mxu0 %v14381_v21  ;;  %10559 = vmatpush1.bf16.msra.mxu1 %v14384_v42  ;;  %v10607_v21 = vld [vmem:[%s18127_s6 + $0xb0] sm:$0xff]  ;;  %v10608_v42 = vld [vmem:[%s18127_s6 + $0xb8] sm:$0xff] }
0x11f5   : > { %10474 = vmatprep.subr.bf16.mxu0 %v14389_v58  ;;  %10560 = vmatprep.subr.bf16.mxu1 %v14392_v17  ;;  %v10639_v58 = vld [vmem:[%s18127_s6 + $0x1b0] sm:$0xff]  ;;  %v10640_v17 = vld [vmem:[%s18127_s6 + $0x1b8] sm:$0xff] }
0x11f8   : > { %10475 = vmatpush1.bf16.msra.mxu0 %v14387_v40  ;;  %10561 = vmatpush1.bf16.msra.mxu1 %v14390_v36  ;;  %v13624_v40 = vpack.c.bf16 %v10590_v44, %v10589_v27  ;;  %v10631_v27 = vld [vmem:[%s18127_s6 + $0x170] sm:$0xff] }
0x11f9   : > { %10476 = vmatprep.subr.bf16.mxu0 %v14395_v19  ;;  %10562 = vmatprep.subr.bf16.mxu1 %v14398_v10  ;;  %v10591_v19 = vld [vmem:[%s18127_s6 + $0x30] sm:$0xff]  ;;  %v10592_v10 = vld [vmem:[%s18127_s6 + $0x38] sm:$0xff] }
0x11fc   : > { %10477 = vmatpush1.bf16.msra.mxu0 %v14393_v24  ;;  %10563 = vmatpush1.bf16.msra.mxu1 %v14396_v25  ;;  %v13626_v24 = vpack.c.bf16 %v10608_v42, %v10607_v21  ;;  %v13658_v25 = vpack.c.bf16 %v10640_v17, %v10639_v58 }
0x11fd   : > { %10478 = vmatprep.subr.bf16.mxu0 %v14401_v51  ;;  %10564 = vmatprep.subr.bf16.mxu1 %v14404_v20  ;;  %v10623_v51 = vld [vmem:[%s18127_s6 + $0x130] sm:$0xff]  ;;  %v10624_v20 = vld [vmem:[%s18127_s6 + $0x138] sm:$0xff] }
0x1200   : > { %10479 = vmatpush1.bf16.msra.mxu0 %v14399_v22  ;;  %10565 = vmatpush1.bf16.msra.mxu1 %v14402_v61  ;;  %v10609_v22 = vld [vmem:[%s18127_s6 + $0xc0] sm:$0xff]  ;;  %v10610_v61 = vld [vmem:[%s18127_s6 + $0xc8] sm:$0xff] }
0x1201   : > { %10480 = vmatprep.subr.bf16.mxu0 %v14407_v5  ;;  %10566 = vmatprep.subr.bf16.mxu1 %v14410_v63  ;;  %v10641_v5 = vld [vmem:[%s18127_s6 + $0x1c0] sm:$0xff]  ;;  %v10642_v63 = vld [vmem:[%s18127_s6 + $0x1c8] sm:$0xff] }
0x1204   : > { %10481 = vmatpush1.bf16.msra.mxu0 %v14405_v31  ;;  %10567 = vmatpush1.bf16.msra.mxu1 %v14408_v34  ;;  %v13628_v31 = vpack.c.bf16 %v10592_v10, %v10591_v19  ;;  %v13660_v34 = vpack.c.bf16 %v10624_v20, %v10623_v51 }
0x1205   : > { %10482 = vmatprep.subr.bf16.mxu0 %v14413_v15  ;;  %10568 = vmatprep.subr.bf16.mxu1 %v14416_v8  ;;  %v10593_v15 = vld [vmem:[%s18127_s6 + $0x40] sm:$0xff]  ;;  %v10594_v8 = vld [vmem:[%s18127_s6 + $0x48] sm:$0xff] }
0x1206   : > { %v13632_v39 = vpack.c.bf16 %v10594_v8, %v10593_v15 }
0x1208   : > { %10483 = vmatpush1.bf16.msra.mxu0 %v14411_v46  ;;  %10569 = vmatpush1.bf16.msra.mxu1 %v14414_v59  ;;  %v13630_v46 = vpack.c.bf16 %v10610_v61, %v10609_v22  ;;  %v13662_v59 = vpack.c.bf16 %v10642_v63, %v10641_v5 }
0x1209   : > { %10484 = vmatprep.subr.bf16.mxu0 %v14419_v57  ;;  %10570 = vmatprep.subr.bf16.mxu1 %v14422_v0  ;;  %v10625_v57 = vld [vmem:[%s18127_s6 + $0x140] sm:$0xff]  ;;  %v10626_v0 = vld [vmem:[%s18127_s6 + $0x148] sm:$0xff] }
0x120a   : > { %v13664_v41 = vpack.c.bf16 %v10626_v0, %v10625_v57 }
0x120c   : > { %10485 = vmatpush1.bf16.msra.mxu0 %v14417_v11  ;;  %10571 = vmatpush1.bf16.msra.mxu1 %v14420_v38  ;;  %v10611_v11 = vld [vmem:[%s18127_s6 + $0xd0] sm:$0xff]  ;;  %v10612_v38 = vld [vmem:[%s18127_s6 + $0xd8] sm:$0xff] }
0x120d   : > { %10486 = vmatprep.subr.bf16.mxu0 %v14425_v1  ;;  %10572 = vmatprep.subr.bf16.mxu1 %v14428_v2  ;;  %v10643_v1 = vld [vmem:[%s18127_s6 + $0x1d0] sm:$0xff]  ;;  %v10644_v2 = vld [vmem:[%s18127_s6 + $0x1d8] sm:$0xff] }
0x1210   : > { %10487 = vmatpush1.bf16.msra.mxu0 %v14423_v47  ;;  %10573 = vmatpush1.bf16.msra.mxu1 %v14426_v30  ;;  %v13634_v47 = vpack.c.bf16 %v10612_v38, %v10611_v11  ;;  %v13666_v30 = vpack.c.bf16 %v10644_v2, %v10643_v1 }
0x1211   : > { %13615 = vmatprep.subr.bf16.mxu0 %v13614_v29  ;;  %13647 = vmatprep.subr.bf16.mxu1 %v13646_v55  ;;  %v10613_v29 = vld [vmem:[%s18127_s6 + $0xe0] sm:$0xff]  ;;  %v10614_v55 = vld [vmem:[%s18127_s6 + $0xe8] sm:$0xff] }
0x1213   : > { %10489 = vmatmul.mubr.bf16.vlgmr.msra.gmra.mrb[52].mxu0 %v17233_v32  ;;  %10575 = vmatmul.mubr.bf16.vlgmr.msra.gmra.mrb[56].mxu1 %v17233_v32  ;;  %v10621_v32 = vld [vmem:[%s18127_s6 + $0x120] sm:$0xff] }
0x1214   : > { %13617 = vmatpush3.bf16.msra.mxu0 %v13616_v37  ;;  %13649 = vmatpush3.bf16.msra.mxu1 %v13648_v13  ;;  %v13656_v36 = vpack.c.bf16 %v10622_v48, %v10621_v32  ;;  %v13638_v37 = vpack.c.bf16 %v10614_v55, %v10613_v29  ;;  %v13670_v13 = vpack.c.bf16 %v10646_v33, %v10645_v43 }
0x1215   : > { %13619 = vmatprep.subr.bf16.mxu0 %v13618_v60  ;;  %13651 = vmatprep.subr.bf16.mxu1 %v13650_v53  ;;  %v10615_v60 = vld [vmem:[%s18127_s6 + $0xf0] sm:$0xff]  ;;  %v10616_v53 = vld [vmem:[%s18127_s6 + $0xf8] sm:$0xff] }
0x1216   : > { %v13642_v23 = vpack.c.bf16 %v10616_v53, %v10615_v60  ;;  %v18136_v60 = vld [vmem:[#allocation36_spill] sm:$0xff] }
0x1218   : > { %13621 = vmatpush3.bf16.msra.mxu0 %v13620_v52  ;;  %13653 = vmatpush3.bf16.msra.mxu1 %v13652_v35  ;;  %v10599_v52 = vld [vmem:[%s18127_s6 + $0x70] sm:$0xff]  ;;  %v10600_v35 = vld [vmem:[%s18127_s6 + $0x78] sm:$0xff] }
0x1219   : > { %13623 = vmatprep.subr.bf16.mxu0 %v13622_v28  ;;  %13655 = vmatprep.subr.bf16.mxu1 %v13654_v62  ;;  %v13644_v44 = vpack.c.bf16 %v10600_v35, %v10599_v52  ;;  %v10632_v28 = vld [vmem:[%s18127_s6 + $0x178] sm:$0xff]  ;;  %v18140_v52 = vld [vmem:[#allocation33_spill] sm:$0xff] }
0x121a   : > { %v13676_v62 = vpack.c.bf16 %v10632_v28, %v10631_v27  ;;  %v18141_v27 = vld [vmem:[#allocation38_spill] sm:$0xff] }
0x121c   : > { %13625 = vmatpush3.bf16.msra.mxu0 %v13624_v40  ;;  %13657 = vmatpush3.bf16.msra.mxu1 %v13656_v36 }
0x121d   : > { %13627 = vmatprep.subr.bf16.mxu0 %v13626_v24  ;;  %13659 = vmatprep.subr.bf16.mxu1 %v13658_v25 }
0x1220   : > { %13629 = vmatpush3.bf16.msra.mxu0 %v13628_v31  ;;  %13661 = vmatpush3.bf16.msra.mxu1 %v13660_v34 }
0x1221   : > { %13631 = vmatprep.subr.bf16.mxu0 %v13630_v46  ;;  %13663 = vmatprep.subr.bf16.mxu1 %v13662_v59 }
0x1224   : > { %13633 = vmatpush3.bf16.msra.mxu0 %v13632_v39  ;;  %13665 = vmatpush3.bf16.msra.mxu1 %v13664_v41  ;;  %v18128_v39 = vmov 1   ;;  %v18129_v41 = vmov 2  }
0x1225   : > { %13635 = vmatprep.subr.bf16.mxu0 %v13634_v47  ;;  %13667 = vmatprep.subr.bf16.mxu1 %v13666_v30  ;;  %v18132_v47 = vmov 6   ;;  %v18133_v30 = vmov 7  }
0x1228   : > { %13637 = vmatpush3.bf16.msra.mxu0 %v13636_v7  ;;  %13669 = vmatpush3.bf16.msra.mxu1 %v13668_v9 }
0x1229   : > { %13639 = vmatprep.subr.bf16.mxu0 %v13638_v37  ;;  %13671 = vmatprep.subr.bf16.mxu1 %v13670_v13 }
0x122c   : > { %13641 = vmatpush3.bf16.msra.mxu0 %v13640_v6  ;;  %13673 = vmatpush3.bf16.msra.mxu1 %v13672_v54  ;;  %v18138_v6 = vld [vmem:[#allocation41_spill] sm:$0xff] }
0x122d   : > { %13643 = vmatprep.subr.bf16.mxu0 %v13642_v23  ;;  %13675 = vmatprep.subr.bf16.mxu1 %v13674_v16  ;;  %v18139_v23 = vld [vmem:[#allocation42_spill] sm:$0xff] }
0x1230   : > { %13645 = vmatpush3.bf16.msra.mxu0 %v13644_v44  ;;  %13677 = vmatpush3.bf16.msra.mxu1 %v13676_v62 }
0x12e6   : > { %v17431_v32 = vpop.f32.mrb[52].mxu0  ;;  %v17433_v48 = vpop.f32.mrb[56].mxu1 }
0x12e7   : > { %v17435_v21 = vpop.f32.mrb[53].mxu0  ;;  %v17437_v42 = vpop.f32.mrb[57].mxu1 }
0x12e8   : > { %v17439_v58 = vpop.f32.mrb[54].mxu0  ;;  %v17441_v17 = vpop.f32.mrb[58].mxu1  ;;  %10713 = vmatprep.mubr.f32.mxu0 %v17435_v21  ;;  %10788 = vmatprep.mubr.f32.mxu1 %v17437_v42 }
0x12e9   : > { %v14205_v40 = vpack.i.bf16 %v17439_v58, %v17431_v32  ;;  %v17449_v36 = vpack.c.bf16 %v17439_v58, %v17431_v32  ;;  %v14215_v19 = vpack.i.bf16 %v17441_v17, %v17433_v48  ;;  %v17455_v10 = vpack.c.bf16 %v17441_v17, %v17433_v48  ;;  %v17457_v24 = vpop.f32.mrb[55].mxu0  ;;  %v17459_v25 = vpop.f32.mrb[59].mxu1  ;;  %10714 = vmatmul.mubr.f32.vlgmr.msra.gmra.mrb[56].mxu0 %v17431_v32 }
0x12ea   : > { %v14210_v51 = vpack.i.bf16 %v17457_v24, %v17435_v21  ;;  %v17466_v20 = vpack.c.bf16 %v17457_v24, %v17435_v21  ;;  %v14220_v22 = vpack.i.bf16 %v17459_v25, %v17437_v42  ;;  %v17472_v61 = vpack.c.bf16 %v17459_v25, %v17437_v42  ;;  %10789 = vmatmul.mubr.f32.vlgmr.msra.gmra.mrb[60].mxu1 %v17433_v48 }
0x12eb   : > { %10718 = vmatprep.mubr.f32.mxu0 %v17457_v24  ;;  %10793 = vmatprep.mubr.f32.mxu1 %v17459_v25 }
0x12ed   : > { %10719 = vmatmul.mubr.f32.gmra.mrb[58].mxu0 %v17439_v58 }
0x12ee   : > { %10794 = vmatmul.mubr.f32.gmra.mrb[62].mxu1 %v17441_v17 }
0x13bc   : > { %v13266_v5 = vpop.f32.mrb[56].mxu0 }
0x13bd   : > { %v13304_v63 = vpop.f32.mrb[60].mxu1  ;;  %v13267_v31 = vpop.f32.mrb[57].mxu0 }
0x13be   : > { %v13268_v34 = vadd.f32 %v13267_v31, %v13266_v5  ;;  %v13305_v15 = vpop.f32.mrb[61].mxu1 }
0x13bf   : > { %v13306_v8 = vadd.f32 %v13305_v15, %v13304_v63 }
0x13c0   : > { %v13269_v46 = vpop.f32.mrb[58].mxu0 }
0x13c1   : > { %v10791_v59 = vadd.f32 %v13306_v8, %v13268_v34  ;;  %v13307_v57 = vpop.f32.mrb[62].mxu1  ;;  %v13270_v0 = vpop.f32.mrb[59].mxu0 }
0x13c2   : > { %v13271_v11 = vadd.f32 %v13270_v0, %v13269_v46  ;;  %v13308_v38 = vpop.f32.mrb[63].mxu1 }
0x13c3   : > { %v13309_v1 = vadd.f32 %v13308_v38, %v13307_v57  ;;  %11285 = vperm.xlu1 %14192, %v10791_v59   ;;  %10882 = vperm.xlu0 %14189, %v10791_v59  }
0x13c5   : > { %v10796_v2 = vadd.f32 %v13309_v1, %v13271_v11 }
0x13c7   : > { %14197 = vset.pattern.permute.xlu1 %v18128_v39  ;;  %14190 = vset.pattern.permute.xlu0 %v18129_v41 }
0x13c8   : > { %10886 = vperm.xlu1 %14197, %v10796_v2   ;;  %11019 = vperm.xlu0 %14190, %v10791_v59  }
0x13cc   : > { %14199 = vset.pattern.permute.xlu1 %v18130_v18  ;;  %14191 = vset.pattern.permute.xlu0 %v18130_v18 }
0x13cd   : > { %11152 = vperm.xlu1 %14199, %v10796_v2   ;;  %11148 = vperm.xlu0 %14191, %v10791_v59  }
0x13d1   : > { %14193 = vset.pattern.permute.xlu0 %v18131_v50 }
0x13d2   : > { %11414 = vperm.xlu0 %14193, %v10791_v59  }
0x13d6   : > { %14194 = vset.pattern.permute.xlu0 %v18132_v47 }
0x13d7   : > { %11551 = vperm.xlu0 %14194, %v10791_v59  }
0x13db   : > { %14195 = vset.pattern.permute.xlu0 %v18133_v30 }
0x13dc   : > { %11680 = vperm.xlu0 %14195, %v10791_v59  }
0x13e0   : > { %14196 = vset.pattern.permute.xlu0 %v18134_v3 }
0x13e1   : > { %10833 = vperm.xlu0 %14196, %v10791_v59  }
0x13e5   : > { %14198 = vset.pattern.permute.xlu0 %v18129_v41 }
0x13e6   : > { %11023 = vperm.xlu0 %14198, %v10796_v2  }
0x13ea   : > { %14200 = vset.pattern.permute.xlu0 %v18135_v45 }
0x13eb   : > { %11289 = vperm.xlu0 %14200, %v10796_v2  }
0x13ef   : > { %14201 = vset.pattern.permute.xlu0 %v18131_v50 }
0x13f0   : > { %11418 = vperm.xlu0 %14201, %v10796_v2  }
0x13f4   : > { %14202 = vset.pattern.permute.xlu0 %v18132_v47 }
0x13f5   : > { %11555 = vperm.xlu0 %14202, %v10796_v2  }
0x13f6   : > { %10799 = vxpose.xlu1.b32.start [1/2] (short) (narrow) %v10791_v59, 16 }
0x13f9   : > { %14203 = vset.pattern.permute.xlu0 %v18133_v30 }
0x13fa   : > { %10800 = vxpose.xlu1.b32.end [2/2] (short) (narrow) %v10796_v2, 16  ;;  %11684 = vperm.xlu0 %14203, %v10796_v2  }
0x1418   : > { %14204 = vset.pattern.permute.xlu1 %v18134_v3 }
0x1419   : > { %10838 = vperm.xlu1 %14204, %v10796_v2  }
0x1442   : > { %v10883_v29 = vpop.permute.xlu0 %10882  ;;  %v17495_v7 = vpop.permute.xlu1 %11285 }
0x1447   : > { %v11020_v55 = vpop.permute.xlu0 %11019  ;;  %v10887_v14 = vpop.permute.xlu1 %10886 }
0x144c   : > { %v11149_v43 = vpop.permute.xlu0 %11148  ;;  %v11153_v37 = vpop.permute.xlu1 %11152 }
0x1451   : > { %v17493_v33 = vpop.permute.xlu0 %11414 }
0x1456   : > { %v11552_v9 = vpop.permute.xlu0 %11551 }
0x145b   : > { %v11681_v49 = vpop.permute.xlu0 %11680 }
0x1460   : > { %v10834_v26 = vpop.permute.xlu0 %10833 }
0x1465   : > { %v11024_v28 = vpop.permute.xlu0 %11023 }
0x1476   : > { %v10815_v13 = vpop.trf.xlu1 }
0x147a   : > { %v17497_v12 = vpop.trf.xlu1 }
0x147b   : > { %v10892_v53 = vrot.slane %v17497_v12, %v18136_v60  ;;  %v11029_v56 = vrot.slane %v17497_v12, %v18137_v4  ;;  %v17505_v54 = vrot.slane %v17497_v12, %v18138_v6  ;;  %v17509_v16 = vrot.slane %v17497_v12, %v18139_v23 }
0x147c   : > { %v17513_v35 = vrot.slane %v17497_v12, %v18140_v52  ;;  %v11158_v44 = vrot.slane %v17497_v12, %v18141_v27 }
0x147d   : > { %v10894_v62 = vadd.f32 %v10892_v53, %v10887_v14  ;;  %v10893_v5 = vadd.f32 %v10892_v53, %v10883_v29  ;;  %v11030_v63 = vadd.f32 %v11029_v56, %v11020_v55  ;;  %v11562_v31 = vadd.f32 %v17505_v54, %v11552_v9  ;;  %v18144_v14 = vld [vmem:[#allocation39_spill] sm:$0xff] }
0x147e   : > { %v11691_v34 = vadd.f32 %v17509_v16, %v11681_v49  ;;  %v11031_v15 = vadd.f32 %v11029_v56, %v11024_v28  ;;  %v10845_v8 = vadd.f32 %v17513_v35, %v10834_v26  ;;  %v11159_v46 = vadd.f32 %v11158_v44, %v11149_v43 }
0x147f   : > { %vm10896_vm0 = vcmp.gt.f32.partialorder %v10894_v62, 0.0  ;;  %v10898_v59 = vmul.f32 0.2, %v10894_v62  ;;  %vm10895_vm15 = vcmp.gt.f32.partialorder %v10893_v5, 0.0  ;;  %v10897_v57 = vmul.f32 0.2, %v10893_v5 }
0x1480   : > { %vm11032_vm3 = vcmp.gt.f32.partialorder %v11030_v63, 0.0  ;;  %v11034_v0 = vmul.f32 0.2, %v11030_v63  ;;  %vm11564_vm4 = vcmp.gt.f32.partialorder %v11562_v31, 0.0  ;;  %v11566_v11 = vmul.f32 0.2, %v11562_v31 }
0x1481   : > { %v17520_v38 = vsel %vm10896_vm0, %v10894_v62, %v10898_v59  ;;  %v17522_v1 = vsel %vm10895_vm15, %v10893_v5, %v10897_v57  ;;  %vm11693_vm6 = vcmp.gt.f32.partialorder %v11691_v34, 0.0  ;;  %v11695_v2 = vmul.f32 0.2, %v11691_v34 }
0x1482   : > { %v10902_v41 = vsel %vm1099_vm1, %v17520_v38, -1e+30  ;;  %v10901_v50 = vsel %vm1098_vm2, %v17522_v1, -1e+30  ;;  %v17530_v47 = vsel %vm11032_vm3, %v11030_v63, %v11034_v0  ;;  %v17532_v30 = vsel %vm11564_vm4, %v11562_v31, %v11566_v11 }
0x1483   : > { %v10906_v3 = vsel %vm1102_vm5, %v10902_v41, -inf  ;;  %v10903_v45 = vsel %vm1102_vm5, %v10901_v50, -inf  ;;  %v11038_v29 = vsel %vm1098_vm2, %v17530_v47, -1e+30  ;;  %v11570_v55 = vsel %vm1098_vm2, %v17532_v30, -1e+30 }
0x1484   : > { %10907 = vmax.xlane.f32.xlu1 %v10906_v3  ;;  %10904 = vmax.xlane.f32.xlu0 %v10903_v45  ;;  %vm11033_vm7 = vcmp.gt.f32.partialorder %v11031_v15, 0.0  ;;  %v17542_v43 = vsel %vm11693_vm6, %v11691_v34, %v11695_v2  ;;  %v11035_v9 = vmul.f32 0.2, %v11031_v15  ;;  %vm10847_vm8 = vcmp.gt.f32.partialorder %v10845_v8, 0.0 }
0x1485   : > { %v11295_v49 = vrot.slane %v17497_v12, %v18144_v14  ;;  %v10849_v13 = vmul.f32 0.2, %v10845_v8  ;;  %vm11161_vm9 = vcmp.gt.f32.partialorder %v11159_v46, 0.0  ;;  %v11163_v26 = vmul.f32 0.2, %v11159_v46 }
0x1486   : > { %v11160_v60 = vadd.f32 %v11158_v44, %v11153_v37  ;;  %v11040_v53 = vsel %vm1102_vm5, %v11038_v29, -inf  ;;  %v11572_v4 = vsel %vm1102_vm5, %v11570_v55, -inf  ;;  %v17548_v56 = vsel %vm11033_vm7, %v11031_v15, %v11035_v9  ;;  %v11290_v44 = vpop.permute.xlu0 %11289 }
0x1487   : > { %v11699_v6 = vsel %vm1098_vm2, %v17542_v43, -1e+30  ;;  %v11039_v23 = vsel %vm1099_vm1, %v17548_v56, -1e+30  ;;  %v17556_v52 = vsel %vm10847_vm8, %v10845_v8, %v10849_v13  ;;  %v17558_v27 = vsel %vm11161_vm9, %v11159_v46, %v11163_v26  ;;  %v18145_v8 = vld [vmem:[#allocation40_spill] sm:$0xff] }
0x1488   : > { %11041 = vmax.xlane.f32.xlu0 %v11040_v53  ;;  %11573 = vmax.xlane.f32.xlu1 %v11572_v4  ;;  %v11296_v37 = vadd.f32 %v11295_v49, %v17495_v7  ;;  %vm11162_vm10 = vcmp.gt.f32.partialorder %v11160_v60, 0.0  ;;  %v11164_v28 = vmul.f32 0.2, %v11160_v60  ;;  %v11701_v62 = vsel %vm1102_vm5, %v11699_v6, -inf }
0x1489   : > { %v11043_v5 = vsel %vm1102_vm5, %v11039_v23, -inf  ;;  %v10853_v63 = vsel %vm1098_vm2, %v17556_v52, -1e+30  ;;  %v11167_v31 = vsel %vm1098_vm2, %v17558_v27, -1e+30  ;;  %v11297_v15 = vadd.f32 %v11295_v49, %v11290_v44 }
0x148a   : > { %v17569_v34 = vsel %vm11162_vm10, %v11160_v60, %v11164_v28  ;;  %v11300_v7 = vmul.f32 0.2, %v11296_v37  ;;  %v11424_v46 = vrot.slane %v17497_v12, %v18145_v8  ;;  %vm11298_vm12 = vcmp.gt.f32.partialorder %v11296_v37, 0.0  ;;  %v11419_v0 = vpop.permute.xlu0 %11418 }
0x148b   : > { %v10855_v59 = vsel %vm1102_vm5, %v10853_v63, -inf  ;;  %v11169_v57 = vsel %vm1102_vm5, %v11167_v31, -inf  ;;  %v11168_v11 = vsel %vm1099_vm1, %v17569_v34, -1e+30  ;;  %v11301_v41 = vmul.f32 0.2, %v11297_v15 }
0x148c   : > { %11702 = vmax.xlane.f32.xlu1 %v11701_v62  ;;  %11044 = vmax.xlane.f32.xlu0 %v11043_v5  ;;  %v17578_v2 = vsel %vm11298_vm12, %v11296_v37, %v11300_v7  ;;  %v11425_v50 = vadd.f32 %v11424_v46, %v17493_v33  ;;  %vm11299_vm13 = vcmp.gt.f32.partialorder %v11297_v15, 0.0  ;;  %v11172_v12 = vsel %vm1102_vm5, %v11168_v11, -inf }
0x148d   : > { %v11304_v3 = vsel %vm1098_vm2, %v17578_v2, -1e+30  ;;  %v17585_v45 = vsel %vm11299_vm13, %v11297_v15, %v11301_v41  ;;  %v11426_v55 = vadd.f32 %v11424_v46, %v11419_v0 }
0x148e   : > { %v11429_v29 = vmul.f32 0.2, %v11425_v50  ;;  %v11556_v9 = vpop.permute.xlu0 %11555  ;;  %vm11427_vm14 = vcmp.gt.f32.partialorder %v11425_v50, 0.0  ;;  %v11306_v14 = vsel %vm1102_vm5, %v11304_v3, -inf  ;;  %v11305_v33 = vsel %vm1099_vm1, %v17585_v45, -1e+30 }
0x148f   : > { %v11430_v13 = vmul.f32 0.2, %v11426_v55  ;;  %v11563_v26 = vadd.f32 %v17505_v54, %v11556_v9  ;;  %vm11428_vm0 = vcmp.gt.f32.partialorder %v11426_v55, 0.0  ;;  %v11309_v60 = vsel %vm1102_vm5, %v11305_v33, -inf }
0x1490   : > { %10856 = vmax.xlane.f32.xlu1 %v10855_v59  ;;  %11170 = vmax.xlane.f32.xlu0 %v11169_v57  ;;  %v17591_v49 = vsel %vm11427_vm14, %v11425_v50, %v11429_v29 }
0x1491   : > { %v11433_v4 = vsel %vm1098_vm2, %v17591_v49, -1e+30  ;;  %v17598_v6 = vsel %vm11428_vm0, %v11426_v55, %v11430_v13  ;;  %v11567_v23 = vmul.f32 0.2, %v11563_v26  ;;  %vm11565_vm15 = vcmp.gt.f32.partialorder %v11563_v26, 0.0 }
0x1492   : > { %v11685_v53 = vpop.permute.xlu0 %11684  ;;  %v11435_v28 = vsel %vm1102_vm5, %v11433_v4, -inf  ;;  %v11434_v54 = vsel %vm1099_vm1, %v17598_v6, -1e+30 }
0x1493   : > { %v11692_v37 = vadd.f32 %v17509_v16, %v11685_v53  ;;  %v17610_v18 = vsel %vm11565_vm15, %v11563_v26, %v11567_v23  ;;  %v11438_v16 = vsel %vm1102_vm5, %v11434_v54, -inf }
0x1494   : > { %11173 = vmax.xlane.f32.xlu0 %v11172_v12  ;;  %v11571_v63 = vsel %vm1099_vm1, %v17610_v18, -1e+30 }
0x1495   : > { %v11696_v5 = vmul.f32 0.2, %v11692_v37  ;;  %vm11694_vm2 = vcmp.gt.f32.partialorder %v11692_v37, 0.0 }
0x1497   : > { %v17616_v7 = vsel %vm11694_vm2, %v11692_v37, %v11696_v5  ;;  %v17635_v37 = vld [vmem:[%s15637_s12] sm:$0xff] }
0x1498   : > { %11307 = vmax.xlane.f32.xlu0 %v11306_v14  ;;  %v10839_v44 = vpop.permute.xlu1 %10838  ;;  %v11700_v32 = vsel %vm1099_vm1, %v17616_v7, -1e+30 }
0x1499   : > { %v10846_v62 = vadd.f32 %v17513_v35, %v10839_v44  ;;  %v11575_v35 = vsel %vm1102_vm5, %v11571_v63, -inf }
0x149b   : > { %v10850_v31 = vmul.f32 0.2, %v10846_v62  ;;  %vm10848_vm3 = vcmp.gt.f32.partialorder %v10846_v62, 0.0 }
0x149c   : > { %11310 = vmax.xlane.f32.xlu0 %v11309_v60 }
0x149d   : > { %v17622_v58 = vsel %vm10848_vm3, %v10846_v62, %v10850_v31 }
0x149e   : > { %v10854_v15 = vsel %vm1099_vm1, %v17622_v58, -1e+30 }
0x149f   : > { %v10858_v8 = vsel %vm1102_vm5, %v10854_v15, -inf }
0x14a0   : > { %11436 = vmax.xlane.f32.xlu0 %v11435_v28 }
0x14a1   : > { %14206 = vrot.lane.b32.xlu1 %v14205_v40, %s18146_s4  ;;  %v11704_v40 = vsel %vm1102_vm5, %v11700_v32, -inf }
0x14a4   : > { %11439 = vmax.xlane.f32.xlu0 %v11438_v16 }
0x14a8   : > { %11576 = vmax.xlane.f32.xlu0 %v11575_v35 }
0x14ac   : > { %11705 = vmax.xlane.f32.xlu0 %v11704_v40 }
0x14b0   : > { %10859 = vmax.xlane.f32.xlu0 %v10858_v8 }
0x1511   : > { %v10908_v46 = vpop.xlane.xlu1 %10907  ;;  %v10905_v59 = vpop.xlane.xlu0 %10904 }
0x1512   : > { %v10909_v57 = vsub.f32 %v17522_v1, %v10905_v59 }
0x1514   : > { %v10911_v0 = vmin.f32 %v10909_v57, 0.0  ;;  %v10910_v57 = vsub.f32 %v17520_v38, %v10908_v46 }
0x1515   : > { %v11574_v11 = vpop.xlane.xlu1 %11573  ;;  %v11042_v41 = vpop.xlane.xlu0 %11041 }
0x1516   : > { %v10913_v50 = vmul.f32 1.442695, %v10911_v0  ;;  %v11046_v12 = vsub.f32 %v17530_v47, %v11042_v41  ;;  %v11578_v5 = vsub.f32 %v17532_v30, %v11574_v11 }
0x1518   : > { %v11048_v3 = vmin.f32 %v11046_v12, 0.0  ;;  %14605 = vpow2.f32 %v10913_v50  ;;  %v11580_v32 = vmin.f32 %v11578_v5, 0.0 }
0x1519   : > { %v11703_v29 = vpop.xlane.xlu1 %11702  ;;  %v11045_v55 = vpop.xlane.xlu0 %11044 }
0x151a   : > { %v11050_v39 = vmul.f32 1.442695, %v11048_v3  ;;  %v11707_v40 = vsub.f32 %v17542_v43, %v11703_v29  ;;  %v11582_v59 = vmul.f32 1.442695, %v11580_v32  ;;  %v10912_v43 = vmin.f32 %v10910_v57, 0.0 }
0x151b   : > { %v11047_v29 = vsub.f32 %v17548_v56, %v11045_v55 }
0x151c   : > { %14607 = vpow2.f32 %v11050_v39  ;;  %v11709_v0 = vmin.f32 %v11707_v40, 0.0  ;;  %v10915_v46 = vmul.f32 1.442695, %v10912_v43 }
0x151d   : > { %v17631_v9 = vpop.xlane.xlu1 %10856  ;;  %v11171_v14 = vpop.xlane.xlu0 %11170 }
0x151e   : > { %v11175_v33 = vsub.f32 %v17558_v27, %v11171_v14  ;;  %v11711_v3 = vmul.f32 1.442695, %v11709_v0  ;;  %v11049_v14 = vmin.f32 %v11047_v29, 0.0 }
0x1520   : > { %v11177_v13 = vmin.f32 %v11175_v33, 0.0 }
0x1521   : > { %v14207_v1 = vpop.permute.xlu1 %14206  ;;  %v11174_v26 = vpop.xlane.xlu0 %11173 }
0x1522   : > { %v11179_v60 = vmul.f32 1.442695, %v11177_v13  ;;  %v14209_v53 = vunpack.i.h.bf16 %v14207_v1  ;;  %v14208_v4 = vunpack.i.l.bf16 %v14207_v1  ;;  %v14606_v23 = vpop.eup %14605  ;;  %v11176_v33 = vsub.f32 %v17569_v34, %v11174_v26 }
0x1523   : > { %v17638_v44 = vmul.f32 %v17635_v37, %v14606_v23 }
0x1524   : > { %v13678_v47 = vpack.c.bf16 %v14209_v53, %v14208_v4  ;;  %14609 = vpow2.f32 %v11179_v60  ;;  %v11052_v60 = vmul.f32 1.442695, %v11049_v14  ;;  %v11178_v53 = vmin.f32 %v11176_v33, 0.0 }
0x1525   : > { %v11308_v28 = vpop.xlane.xlu0 %11307  ;;  %v10919_v27 = vsel %vm1102_vm5, %v17638_v44, 0.0 }
0x1526   : > { %v11312_v54 = vsub.f32 %v17578_v2, %v11308_v28  ;;  %13679 = vmatprep.subr.bf16.mxu0 %v13678_v47  ;;  %v14608_v62 = vpop.eup %14607  ;;  %10920 = vadd.xlane.f32.xlu1 %v10919_v27 }
0x1527   : > { %13681 = vmatpush3.bf16.msra.mxu0 %v13678_v47  ;;  %v17646_v63 = vmul.f32 %v17635_v37, %v14608_v62  ;;  %v11181_v47 = vmul.f32 1.442695, %v11178_v53 }
0x1528   : > { %v11314_v16 = vmin.f32 %v11312_v54, 0.0  ;;  %13683 = vmatprep.subr.bf16.mxu0 %v17466_v20 }
0x1529   : > { %v11311_v31 = vpop.xlane.xlu0 %11310  ;;  %v11056_v2 = vsel %vm1102_vm5, %v17646_v63, 0.0 }
0x152a   : > { %v11316_v35 = vmul.f32 1.442695, %v11314_v16  ;;  %11057 = vadd.xlane.f32.xlu1 %v11056_v2  ;;  %v11313_v56 = vsub.f32 %v17585_v45, %v11311_v31 }
0x152c   : > { %14611 = vpow2.f32 %v11316_v35  ;;  %v11315_v28 = vmin.f32 %v11313_v56, 0.0 }
0x152d   : > { %v11437_v15 = vpop.xlane.xlu0 %11436  ;;  %14613 = vpow2.f32 %v11582_v59 }
0x152e   : > { %v11441_v30 = vsub.f32 %v17591_v49, %v11437_v15  ;;  %v14610_v8 = vpop.eup %14609  ;;  %v11318_v45 = vmul.f32 1.442695, %v11315_v28 }
0x152f   : > { %v17654_v41 = vmul.f32 %v17635_v37, %v14610_v8 }
0x1530   : > { %v11443_v11 = vmin.f32 %v11441_v30, 0.0 }
0x1531   : > { %v11185_v12 = vsel %vm1102_vm5, %v17654_v41, 0.0  ;;  %v11440_v49 = vpop.xlane.xlu0 %11439 }
0x1532   : > { %v11445_v50 = vmul.f32 1.442695, %v11443_v11  ;;  %11186 = vadd.xlane.f32.xlu1 %v11185_v12  ;;  %v11442_v34 = vsub.f32 %v17598_v6, %v11440_v49 }
0x1534   : > { %14615 = vpow2.f32 %v11445_v50  ;;  %v11444_v5 = vmin.f32 %v11442_v34, 0.0  ;;  %v10861_v34 = vsub.f32 %v17556_v52, %v17631_v9 }
0x1535   : > { %14617 = vpow2.f32 %v11711_v3  ;;  %v11577_v1 = vpop.xlane.xlu0 %11576 }
0x1536   : > { %v14612_v39 = vpop.eup %14611  ;;  %14619 = vpow2.f32 %v10915_v46  ;;  %v11447_v2 = vmul.f32 1.442695, %v11444_v5  ;;  %v11579_v21 = vsub.f32 %v17610_v18, %v11577_v1 }
0x1537   : > { %v17660_v38 = vmul.f32 %v17635_v37, %v14612_v39  ;;  %v14614_v55 = vpop.eup %14613  ;;  %14621 = vpow2.f32 %v11052_v60 }
0x1538   : > { %v17673_v27 = vmul.f32 %v17635_v37, %v14614_v55  ;;  %14623 = vpow2.f32 %v11181_v47  ;;  %v11581_v0 = vmin.f32 %v11579_v21, 0.0 }
0x1539   : > { %v11322_v13 = vsel %vm1102_vm5, %v17660_v38, 0.0  ;;  %v11706_v26 = vpop.xlane.xlu0 %11705  ;;  %14625 = vpow2.f32 %v11318_v45 }
0x153a   : > { %11323 = vadd.xlane.f32.xlu0 %v11322_v13  ;;  %v11708_v16 = vsub.f32 %v17616_v7, %v11706_v26  ;;  %v11588_v6 = vsel %vm1102_vm5, %v17673_v27, 0.0  ;;  %v14684_v7 = vld [vmem:[%s15637_s12 + $0x8] sm:$0xff]  ;;  %14627 = vpow2.f32 %v11447_v2  ;;  %v11584_v43 = vmul.f32 1.442695, %v11581_v0  ;;  %s13049_s12 = sshll.u32 %s15255_s24, 10 }
0x153b   : > { %v10863_v26 = vmin.f32 %v10861_v34, 0.0  ;;  %s17788_s14 = scalar_lea.hbm %s18147_s1, %s13049_s12 }
0x153c   : > { %v11710_v32 = vmin.f32 %v11708_v16, 0.0 }
0x153d   : > { %v10860_v24 = vpop.xlane.xlu0 %10859 }
0x153e   : > { %v14616_v4 = vpop.eup %14615  ;;  %v10862_v11 = vsub.f32 %v17622_v58, %v10860_v24 }
0x153f   : > { %v17667_v23 = vmul.f32 %v17635_v37, %v14616_v4  ;;  %v14618_v62 = vpop.eup %14617 }
0x1540   : > { %v17683_v31 = vmul.f32 %v17635_v37, %v14618_v62  ;;  %v14620_v35 = vpop.eup %14619  ;;  %v10864_v3 = vmin.f32 %v10862_v11, 0.0 }
0x1541   : > { %v11451_v54 = vsel %vm1102_vm5, %v17667_v23, 0.0  ;;  %v17688_v15 = vmul.f32 %v14684_v7, %v14620_v35  ;;  %v14622_v30 = vpop.eup %14621 }
0x1542   : > { %11452 = vadd.xlane.f32.xlu0 %v11451_v54  ;;  %v11717_v40 = vsel %vm1102_vm5, %v17683_v31, 0.0  ;;  %v17693_v59 = vmul.f32 %v14684_v7, %v14622_v30  ;;  %v14624_v57 = vpop.eup %14623  ;;  %v10867_v46 = vmul.f32 1.442695, %v10864_v3  ;;  %v10865_v54 = vmul.f32 1.442695, %v10863_v26 }
0x1543   : > { %14211 = vrot.lane.b32.xlu1 %v14210_v51, %s18146_s4  ;;  %v11713_v51 = vmul.f32 1.442695, %v11710_v32  ;;  %v10922_v8 = vsel %vm1102_vm5, %v17688_v15, 0.0  ;;  %v17698_v12 = vmul.f32 %v14684_v7, %v14624_v57  ;;  %v14626_v18 = vpop.eup %14625 }
0x1544   : > { %v11059_v50 = vsel %vm1102_vm5, %v17693_v59, 0.0  ;;  %v17702_v49 = vmul.f32 %v14684_v7, %v14626_v18  ;;  %v14628_v39 = vpop.eup %14627 }
0x1545   : > { %14629 = vpow2.f32 %v11713_v51  ;;  %v11188_v29 = vsel %vm1102_vm5, %v17698_v12, 0.0  ;;  %v17706_v14 = vmul.f32 %v14684_v7, %v14628_v39 }
0x1546   : > { %11589 = vadd.xlane.f32.xlu0 %v11588_v6  ;;  %14631 = vpow2.f32 %v11584_v43  ;;  %v11325_v58 = vsel %vm1102_vm5, %v17702_v49, 0.0 }
0x1547   : > { %14633 = vpow2.f32 %v10867_v46  ;;  %v11454_v13 = vsel %vm1102_vm5, %v17706_v14, 0.0 }
0x1548   : > { %14635 = vpow2.f32 %v10865_v54 }
0x154a   : > { %11718 = vadd.xlane.f32.xlu0 %v11717_v40 }
0x154e   : > { %10923 = vadd.xlane.f32.xlu0 %v10922_v8 }
0x154f   : > { %v14630_v33 = vpop.eup %14629 }
0x1550   : > { %v17710_v1 = vmul.f32 %v14684_v7, %v14630_v33  ;;  %v14632_v60 = vpop.eup %14631 }
0x1551   : > { %v17714_v56 = vmul.f32 %v14684_v7, %v14632_v60  ;;  %v14634_v55 = vpop.eup %14633 }
0x1552   : > { %11060 = vadd.xlane.f32.xlu0 %v11059_v50  ;;  %v11720_v53 = vsel %vm1102_vm5, %v17710_v1, 0.0  ;;  %v17718_v47 = vmul.f32 %v14684_v7, %v14634_v55  ;;  %v14636_v62 = vpop.eup %14635 }
0x1553   : > { %v11591_v4 = vsel %vm1102_vm5, %v17714_v56, 0.0  ;;  %v17733_v45 = vmul.f32 %v17635_v37, %v14636_v62 }
0x1554   : > { %v10874_v28 = vsel %vm1102_vm5, %v17718_v47, 0.0 }
0x1555   : > { %v10871_v5 = vsel %vm1102_vm5, %v17733_v45, 0.0 }
0x1556   : > { %11189 = vadd.xlane.f32.xlu0 %v11188_v29 }
0x155a   : > { %11326 = vadd.xlane.f32.xlu0 %v11325_v58 }
0x155e   : > { %11455 = vadd.xlane.f32.xlu0 %v11454_v13 }
0x1562   : > { %11721 = vadd.xlane.f32.xlu0 %v11720_v53 }
0x1567   : > { %11592 = vadd.xlane.f32.xlu1 %v11591_v4 }
0x156b   : > { %10875 = vadd.xlane.f32.xlu1 %v10874_v28 }
0x1578   : > { %14216 = vrot.lane.b32.xlu0 %v14215_v19, %s18146_s4 }
0x157c   : > { %14221 = vrot.lane.b32.xlu1 %v14220_v22, %s18146_s4 }
0x1597   : > { %10872 = vadd.xlane.f32.xlu0 %v10871_v5 }
0x15b3   : > { %v10921_v48 = vpop.xlane.xlu1 %10920 }
0x15b4   : > { %14637 = vrcp.f32 %v10921_v48 }
0x15b7   : > { %v11058_v9 = vpop.xlane.xlu1 %11057 }
0x15b8   : > { %14639 = vrcp.f32 %v11058_v9 }
0x15be   : > { %v14638_v17 = vpop.eup %14637 }
0x15bf   : > { %v10926_v19 = vmul.f32 %v14638_v17, %v17638_v44  ;;  %v11187_v37 = vpop.xlane.xlu1 %11186  ;;  %v13037_v17 = vld [vmem:[#allocation19] ss:$0 sm:$0xff] }
0x15c1   : > { %13402 = vmatprep.mubr.msk.f32.mxu0 %vm1102_vm5, %v10926_v19 }
0x15c2   : > { %v14640_v32 = vpop.eup %14639 }
0x15c3   : > { %v14212_v35 = vpop.permute.xlu1 %14211  ;;  %v11063_v24 = vmul.f32 %v14640_v32, %v17646_v63 }
0x15c4   : > { %v14214_v40 = vunpack.i.h.bf16 %v14212_v35  ;;  %v14213_v7 = vunpack.i.l.bf16 %v14212_v35 }
0x15c6   : > { %v13686_v51 = vpack.c.bf16 %v14214_v40, %v14213_v7 }
0x15c7   : > { %v11324_v52 = vpop.xlane.xlu0 %11323 }
0x15cf   : > { %v11453_v42 = vpop.xlane.xlu0 %11452 }
0x15d3   : > { %v11590_v25 = vpop.xlane.xlu0 %11589 }
0x15d7   : > { %v11719_v22 = vpop.xlane.xlu0 %11718 }
0x15db   : > { %v10924_v16 = vpop.xlane.xlu0 %10923 }
0x15dc   : > { %14641 = vrcp.f32 %v10924_v16 }
0x15df   : > { %v11061_v6 = vpop.xlane.xlu0 %11060 }
0x15e0   : > { %14643 = vrcp.f32 %v11061_v6 }
0x15e1   : > { %14645 = vrcp.f32 %v11187_v37 }
0x15e3   : > { %v11190_v2 = vpop.xlane.xlu0 %11189 }
0x15e4   : > { %14647 = vrcp.f32 %v11190_v2 }
0x15e5   : > { %14649 = vrcp.f32 %v11324_v52 }
0x15e6   : > { %v14642_v44 = vpop.eup %14641 }
0x15e7   : > { %v10928_v30 = vmul.f32 %v14642_v44, %v17688_v15  ;;  %v11327_v21 = vpop.xlane.xlu0 %11326 }
0x15e8   : > { %14651 = vrcp.f32 %v11327_v21 }
0x15e9   : > { %13403 = vmatmul.mubr.msk.f32.vlgmr.msra.gmra.mrb[60].mxu0 %vm1102_vm5, %v10928_v30  ;;  %14653 = vrcp.f32 %v11453_v42 }
0x15ea   : > { %13685 = vmatpush3.bf16.msra.mxu0 %v17466_v20  ;;  %13409 = vmatprep.mubr.msk.f32.mxu0 %vm1102_vm5, %v11063_v24  ;;  %v14644_v57 = vpop.eup %14643 }
0x15eb   : > { %13687 = vmatprep.subr.bf16.mxu0 %v13686_v51  ;;  %v11456_v8 = vpop.xlane.xlu0 %11455  ;;  %v14646_v0 = vpop.eup %14645  ;;  %v11065_v11 = vmul.f32 %v14644_v57, %v17693_v59 }
0x15ec   : > { %v11192_v15 = vmul.f32 %v14646_v0, %v17654_v41  ;;  %14655 = vrcp.f32 %v11456_v8 }
0x15ed   : > { %14657 = vrcp.f32 %v11590_v25 }
0x15ee   : > { %v14648_v63 = vpop.eup %14647 }
0x15ef   : > { %v11722_v50 = vpop.xlane.xlu0 %11721  ;;  %v14650_v18 = vpop.eup %14649  ;;  %v11194_v59 = vmul.f32 %v14648_v63, %v17698_v12 }
0x15f0   : > { %v11329_v39 = vmul.f32 %v14650_v18, %v17660_v38 }
0x15f1   : > { %13410 = vmatmul.mubr.msk.f32.vlgmr.msra.gmra.mrb[60].mxu0 %vm1102_vm5, %v11065_v11 }
0x15f2   : > { %13689 = vmatpush3.bf16.msra.mxu0 %v13686_v51  ;;  %13416 = vmatprep.mubr.msk.f32.mxu0 %vm1102_vm5, %v11192_v15  ;;  %v14652_v46 = vpop.eup %14651 }
0x15f3   : > { %13691 = vmatprep.subr.bf16.mxu0 %v17455_v10  ;;  %v14217_v20 = vpop.permute.xlu0 %14216  ;;  %v14654_v33 = vpop.eup %14653  ;;  %v11331_v13 = vmul.f32 %v14652_v46, %v17702_v49 }
0x15f4   : > { %v14219_v43 = vunpack.i.h.bf16 %v14217_v20  ;;  %v14218_v3 = vunpack.i.l.bf16 %v14217_v20  ;;  %v11593_v29 = vpop.xlane.xlu1 %11592  ;;  %v11458_v60 = vmul.f32 %v14654_v33, %v17667_v23 }
0x15f5   : > { %14659 = vrcp.f32 %v11593_v29 }
0x15f6   : > { %v13694_v41 = vpack.c.bf16 %v14219_v43, %v14218_v3  ;;  %14661 = vrcp.f32 %v11719_v22 }
0x15f7   : > { %14663 = vrcp.f32 %v11722_v50 }
0x15f8   : > { %v10876_v58 = vpop.xlane.xlu1 %10875 }
0x15f9   : > { %13417 = vmatmul.mubr.msk.f32.vlgmr.msra.gmra.mrb[60].mxu0 %vm1102_vm5, %v11194_v59  ;;  %14665 = vrcp.f32 %v10876_v58 }
0x15fa   : > { %13693 = vmatpush3.bf16.msra.mxu0 %v17455_v10  ;;  %13423 = vmatprep.mubr.msk.f32.mxu0 %vm1102_vm5, %v11329_v39  ;;  %v14656_v10 = vpop.eup %14655 }
0x15fb   : > { %13695 = vmatprep.subr.bf16.mxu0 %v13694_v41  ;;  %v14658_v12 = vpop.eup %14657  ;;  %v11460_v4 = vmul.f32 %v14656_v10, %v17706_v14 }
0x15fc   : > { %v14222_v38 = vpop.permute.xlu1 %14221  ;;  %v11595_v49 = vmul.f32 %v14658_v12, %v17673_v27 }
0x15fd   : > { %v14224_v53 = vunpack.i.h.bf16 %v14222_v38  ;;  %v14223_v55 = vunpack.i.l.bf16 %v14222_v38 }
0x15ff   : > { %v13702_v28 = vpack.c.bf16 %v14224_v53, %v14223_v55  ;;  %v14660_v23 = vpop.eup %14659 }
0x1600   : > { %v14662_v34 = vpop.eup %14661  ;;  %v11597_v26 = vmul.f32 %v14660_v23, %v17714_v56 }
0x1601   : > { %13424 = vmatmul.mubr.msk.f32.vlgmr.msra.gmra.mrb[60].mxu0 %vm1102_vm5, %v11331_v13  ;;  %v11724_v54 = vmul.f32 %v14662_v34, %v17683_v31  ;;  %v14664_v27 = vpop.eup %14663 }
0x1602   : > { %13697 = vmatpush3.bf16.msra.mxu0 %v13694_v41  ;;  %13430 = vmatprep.mubr.msk.f32.mxu0 %vm1102_vm5, %v11458_v60  ;;  %v11726_v14 = vmul.f32 %v14664_v27, %v17710_v1 }
0x1603   : > { %13699 = vmatprep.subr.bf16.mxu0 %v17472_v61  ;;  %v14666_v56 = vpop.eup %14665 }
0x1604   : > { %v10880_v5 = vmul.f32 %v14666_v56, %v17718_v47 }
0x1609   : > { %13431 = vmatmul.mubr.msk.f32.vlgmr.msra.gmra.mrb[60].mxu0 %vm1102_vm5, %v11460_v4 }
0x160a   : > { %13701 = vmatpush3.bf16.msra.mxu0 %v17472_v61  ;;  %13437 = vmatprep.mubr.msk.f32.mxu0 %vm1102_vm5, %v11595_v49 }
0x160b   : > { %13703 = vmatprep.subr.bf16.mxu0 %v13702_v28 }
0x1611   : > { %13438 = vmatmul.mubr.msk.f32.vlgmr.msra.gmra.mrb[60].mxu0 %vm1102_vm5, %v11597_v26 }
0x1612   : > { %13705 = vmatpush3.bf16.msra.mxu0 %v13702_v28  ;;  %13444 = vmatprep.mubr.msk.f32.mxu0 %vm1102_vm5, %v11724_v54 }
0x1613   : > { %13707 = vmatprep.subr.bf16.mxu0 %v17449_v36 }
0x1619   : > { %13445 = vmatmul.mubr.msk.f32.vlgmr.msra.gmra.mrb[60].mxu0 %vm1102_vm5, %v11726_v14 }
0x161a   : > { %13709 = vmatpush3.bf16.msra.mxu0 %v17449_v36 }
0x1624   : > { %v10873_v61 = vpop.xlane.xlu0 %10872 }
0x1625   : > { %14667 = vrcp.f32 %v10873_v61 }
0x162f   : > { %v14668_v62 = vpop.eup %14667 }
0x1630   : > { %v10878_v31 = vmul.f32 %v14668_v62, %v17733_v45 }
0x1632   : > { %13451 = vmatprep.mubr.msk.f32.mxu0 %vm1102_vm5, %v10878_v31 }
0x1633   : > { %13452 = vmatmul.mubr.msk.f32.vlgmr.msra.gmra.mrb[60].mxu0 %vm1102_vm5, %v10880_v5 }
0x1706   : > { %v13453_v48 = vpop.f32.mrb[60].mxu0 }
0x1707   : > { %v11910_v1 = vmul.f32 0.125, %v13453_v48  ;;  %v11888_v19 = vpop.f32.mrb[61].mxu0 }
0x1708   : > { %v11909_v52 = vmul.f32 0.125, %v11888_v19 }
0x1709   : > { %v11919_v42 = vadd.f32 %v13037_v17, %v11910_v1 }
0x170a   : > { %v11918_v36 = vadd.f32 %v13037_v17, %v11909_v52 }
0x170b   : > { %v11923_v25 = vsel %vm1952_vm11, %v11919_v42, -inf }
0x170c   : > { %11924 = vmax.xlane.f32.xlu0 %v11923_v25  ;;  %v11920_v22 = vsel %vm1952_vm11, %v11918_v36, -inf }
0x170d   : > { %11921 = vmax.xlane.f32.xlu1 %v11920_v22 }
0x1799   : > { %v11925_v47 = vpop.xlane.xlu0 %11924 }
0x179a   : > { %v17778_v45 = vsub.f32 %v11919_v42, %v11925_v47  ;;  %v11922_v9 = vpop.xlane.xlu1 %11921 }
0x179b   : > { %v11926_v16 = vsub.f32 %v11918_v36, %v11922_v9 }
0x179c   : > { %v11930_v37 = vmul.f32 1.442695, %v17778_v45 }
0x179d   : > { %v11928_v6 = vmul.f32 1.442695, %v11926_v16 }
0x179f   : > { %14669 = vpow2.f32 %v11928_v6 }
0x17a0   : > { %14671 = vpow2.f32 %v11930_v37 }
0x17a9   : > { %v14670_v35 = vpop.eup %14669 }
0x17aa   : > { %v11932_v2 = vsel %vm1952_vm11, %v14670_v35, 0.0  ;;  %v14672_v32 = vpop.eup %14671 }
0x17ab   : > { %11933 = vadd.xlane.f32.xlu0 %v11932_v2  ;;  %v11935_v40 = vsel %vm1952_vm11, %v14672_v32, 0.0 }
0x17af   : > { %11936 = vadd.xlane.f32.xlu0 %v11935_v40 }
0x17b0   : > { %15010 = shalt.err (!%p15007_p1)
}
0x17b1   : > { %s15011_s9 = scalar_lea.hbm %s17788_s14, 1024  ;;  %s15015_s12 = scalar_lea.hbm %s18147_s1, 2048 }
0x17b2   : > { %p15012_p11 = scmp.ne.s32.totalorder %s17788_s14, %s15011_s9  ;;  %p15016_p13 = scmp.lt.u32.totalorder %s17788_s14, %s18147_s1 }
0x17b3   : > { %p15017_p7 = scmp.lt.u32.totalorder %s15015_s12, %s15011_s9  ;;  %p15019_p0 = scmp.lt.u32.totalorder %s15011_s9, %s17788_s14 }
0x17b4   : > { %p15013_p12 = pnand %p15012_p11, %p18148_p2 }
0x17b5   : > { %p15018_p9 = por %p15017_p7, %p15016_p13 }
0x17b6   : > { %p15014_p6 = pneg %p15013_p12 }
0x17b7   : > { %p15020_p5 = por %p15019_p0, %p15018_p9 }
0x17b9   : > { %p15021_p8 = pnand %p15020_p5, %p15014_p6 }
0x17bb   : > { %15024 = shalt.err (!%p15021_p8)
}
0x17bc   : > { %s15149_s0 = smov 512   ;;  %s15150_s5 = smov 32  }
0x17bd   : > { %14029 = dma.vmem_to_hbm [thread:$0]  (%p18148_p2), %s17790_s23, 1024, %s17788_s14, %s11952_s30, %s15149_s0, %s15149_s0, %s15150_s5  }
0x17be   : > { %s13048_s22 = sshll.u32 %s15255_s24, 8  ;;  %s678_s8 = scalar_lea.vmem [#allocation20], %s15627_s28 }
0x17bf   : > { %s11965_s9 = sshll.u32 %s678_s8, 4  ;;  %s18149_s12 = sld [smem:[#allocation77_spill]]  ;;  %s17824_s9 = int_to_ptr.vmem [resolvable:$true] %s11965_s9 }
0x17c0   : > { %s11947_s24 = scalar_lea.sflag [#allocation4], %s15624_s27  ;;  %s15025_s28 = scalar_lea.vmem %s17824_s9, 256 }
0x17c1   : > { %p15026_p4 = scmp.ne.s32.totalorder %s17824_s9, %s15025_s28  ;;  %s15151_s14 = smov [#allocation20]  }
0x17c2   : > { %s15029_s30 = sshll.u32 %s15151_s14, 4  ;;  %s15030_s30 = int_to_ptr.vmem [resolvable:$false] %s15029_s30 }
0x17c3   : > { %p15027_p3 = pnand %p15026_p4, %p18148_p2  ;;  %s15031_s7 = scalar_lea.vmem %s15030_s30, 512 }
0x17c4   : > { %p15032_p1 = scmp.lt.s32.totalorder %s17824_s9, %s15030_s30  ;;  %p15033_p11 = scmp.lt.s32.totalorder %s15031_s7, %s15025_s28 }
0x17c5   : > { %s17822_s23 = scalar_lea.hbm %s18149_s12, %s13048_s22  ;;  %p15028_p10 = pneg %p15027_p3 }
0x17c6   : > { %p15034_p12 = por %p15033_p11, %p15032_p1 }
0x17c8   : > { %p15035_p6 = pnand %p15034_p12, %p15028_p10 }
0x1838   : > { %v11934_v7 = vpop.xlane.xlu0 %11933 }
0x1839   : > { %14673 = vlog2.f32 %v11934_v7 }
0x183c   : > { %v11937_v44 = vpop.xlane.xlu0 %11936 }
0x183d   : > { %14675 = vlog2.f32 %v11937_v44 }
0x1843   : > { %v14674_v30 = vpop.eup %14673 }
0x1844   : > { %v11939_v21 = vmul.f32 0.6931472, %v14674_v30 }
0x1846   : > { %v11942_v24 = vsub.f32 %v11926_v16, %v11939_v21 }
0x1847   : > { %v14676_v51 = vpop.eup %14675 }
0x1848   : > { %11944 = vst.msk [vmem:[%s678_s8] sm:$0xff] %vm1952_vm11, %v11942_v24  ;;  %v11941_v8 = vmul.f32 0.6931472, %v14676_v51 }
0x184a   : > { %v11943_v57 = vsub.f32 %v17778_v45, %v11941_v8 }
0x184c   : > { %11945 = vst.msk [vmem:[%s678_s8 + $0x8] sm:$0xff] %vm1952_vm11, %v11943_v57 }
0x184d   : > { %15038 = shalt.err (!%p15035_p6)
}
0x184e   : > { %s15039_s16 = scalar_lea.hbm %s17822_s23, 256  ;;  %s15043_s22 = scalar_lea.hbm %s18149_s12, 512 }
0x184f   : > { %p15040_p13 = scmp.ne.s32.totalorder %s17822_s23, %s15039_s16  ;;  %p15044_p0 = scmp.lt.u32.totalorder %s17822_s23, %s18149_s12 }
0x1850   : > { %p15045_p5 = scmp.lt.u32.totalorder %s15043_s22, %s15039_s16  ;;  %p15047_p4 = scmp.lt.u32.totalorder %s15039_s16, %s17822_s23 }
0x1851   : > { %p15041_p7 = pnand %p15040_p13, %p18148_p2 }
0x1852   : > { %p15046_p8 = por %p15045_p5, %p15044_p0 }
0x1853   : > { %p15042_p9 = pneg %p15041_p7 }
0x1854   : > { %p15048_p3 = por %p15047_p4, %p15046_p8 }
0x1856   : > { %p15049_p10 = pnand %p15048_p3, %p15042_p9 }
0x1858   : > { %15052 = shalt.err (!%p15049_p10)
}
0x1859   : > { %s15152_s4 = smov 128   ;;  %s15153_s28 = smov 8  }
0x185a   : > { %14028 = dma.vmem_to_hbm [thread:$0]  (%p18148_p2), %s17824_s9, 256, %s17822_s23, %s11947_s24, %s15152_s4, %s15152_s4, %s15153_s28  }
0x185b PF: > { %s11996_s14 = sand.u32 1, %s15107_s18   ;;  %p18150_p1 = scmp.ne.s32.totalorder %s18010_s25, 0 }
0x185c   : > { %p18151_p11 = scmp.ge.s32.totalorder %s15119_s21, 2  ;;  %s11997_s30 = scalar_lea.sflag [#allocation4], %s11996_s14 }
0x185e   : > { %p14068_p12 = pnand %p18151_p11, %p18150_p1 }
0x1860   : > { %15098 = dma.done.wait (!%p14068_p12), %s11997_s30, 256  }
0x1861   : > { %15100 = vsyncadd (!%p14068_p12), %s11997_s30, 4294967040  ;;  %s12006_s7 = scalar_lea.sflag [#allocation22], %s11996_s14 }
0x1862   : > { %15102 = dma.done.wait (!%p14068_p12), %s12006_s7, 1024  }
0x1863   : > { %15104 = vsyncadd (!%p14068_p12), %s12006_s7, 4294966272  ;;  %p39_p2 = scmp.ge.s32.totalorder %s15497_s26, 4   ;;  %s18152_s18 = smov %s15111_s19 }
0x1864   : > { %s18153_s19 = smov %s15115_s20  ;;  %s18154_s20 = smov %s15508_s15 }
0x1865   : > { %s18155_s21 = smov %s15497_s26  ;;  %41 = sbr.rel (!%p39_p2) target bundleno = 27 (0x1b), region = 201 }
0x186c   :  { %12011 = vsyncpa [#allocation3], 1 }
0x186d   :  { %12013 = vsyncpa [#allocation3 + $0x1], 1 }
0x186e   :  { %12014 = vsyncpa [#allocation6], 1 }
0x186f   :  { %12016 = vsyncpa [#allocation6 + $0x1], 1 }
0x1870   :  { %12017 = vsyncpa [#allocation9], 1 }
0x1871   :  { %12018 = vsyncpa [#allocation12], 1 }
0x1872   :  { %12019 = vsyncpa [#allocation15], 1 }
0x1873   :  { %12020 = vsyncpa [#allocation18], 1 }
0x1874   :  { %12021 = vsyncpa [#allocation4], 1 }
0x1875   :  { %12023 = vsyncpa [#allocation4 + $0x1], 1 }
0x1876   :  { %12024 = vsyncpa [#allocation22], 1 }
0x1877   :  { %12026 = vsyncpa [#allocation22 + $0x1], 1 }

</bundles_post_ra>
